<compile_context>
chip_gen: v7x
topology: tpu7x:2x2x1
jax: 0.10.0
libtpu: 0.0.40
codegen_flags: <defaults>
</compile_context>

<pallas_src>
import jax
import jax.numpy as jnp
from jax import lax
from jax.experimental import pallas as pl
from jax.experimental.pallas import tpu as pltpu

_VMEM = pltpu.MemorySpace.VMEM


def _vmem_specs(n):
    return [pl.BlockSpec(memory_space=_VMEM) for _ in range(n)]


# ---------------------------------------------------------------------------
# Pallas kernels
# ---------------------------------------------------------------------------

def _gemm_bias_relu_kernel(x_ref, w_ref, b_ref, o_ref):
    """Single-block GEMM + bias + ReLU (used for all three conv layers)."""
    w = w_ref[...].astype(jnp.float32)                    # bf16 weight -> f32 on-chip
    y = jnp.dot(x_ref[...], w, preferred_element_type=jnp.float32)
    o_ref[...] = jnp.maximum(y + b_ref[...], 0.0)


def _head_kernel(x_ref, w1_ref, b1_ref, wh_ref, bh_ref, o_ref):
    """Linear -> ReLU -> fused (actor|critic) head -> log_softmax / scaled_sigmoid.

    wh is (hidden, A+1): actor and critic weights concatenated so the two tiny
    head matmuls become one MXU op.  Output is lane-packed (B, 2A+1):
    [logits | log_probs | value].
    """
    a = wh_ref.shape[1] - 1

    w1 = w1_ref[...].astype(jnp.float32)
    feat = jnp.maximum(
        jnp.dot(x_ref[...], w1, preferred_element_type=jnp.float32) + b1_ref[...],
        0.0)

    wh = wh_ref[...].astype(jnp.float32)
    head = jnp.dot(feat, wh, preferred_element_type=jnp.float32) + bh_ref[...]

    logits = head[:, :a]
    v_raw = head[:, a:a + 1]

    # Categorical(logits=...) represented by normalized log-probabilities.
    m = jnp.max(logits, axis=-1, keepdims=True)
    lse = jnp.log(jnp.sum(jnp.exp(logits - m), axis=-1, keepdims=True)) + m
    logp = logits - lse

    # scaled_sigmoid(v) = (2 / (1 + exp(-signed_sqrt(v) / 9)) - 1) * 20
    sroot = jnp.sqrt(jnp.abs(v_raw))
    ssqrt = jnp.where(v_raw >= 0.0, sroot, -sroot)
    value = (2.0 / (1.0 + jnp.exp(-ssqrt / 9.0)) - 1.0) * 20.0

    o_ref[...] = jnp.concatenate([logits, logp, value], axis=-1)


# ---------------------------------------------------------------------------
# Wrappers
# ---------------------------------------------------------------------------

def _gemm_bias_relu(x, w, b):
    m = x.shape[0]
    n = w.shape[1]
    return pl.pallas_call(
        _gemm_bias_relu_kernel,
        out_shape=jax.ShapeDtypeStruct((m, n), jnp.float32),
        in_specs=_vmem_specs(3),
        out_specs=pl.BlockSpec(memory_space=_VMEM),
    )(x, w, b)


def _im2col(x, k, s):
    """x: (B, H, W, C) -> (B*OH*OW, k*k*C), feature order (kh, kw, c). Layout only."""
    b, h, w, c = x.shape
    oh = (h - k) // s + 1
    ow = (w - k) // s + 1
    cols = []
    for kh in range(k):
        for kw in range(k):
            cols.append(x[:, kh:kh + s * oh:s, kw:kw + s * ow:s, :])
    p = jnp.stack(cols, axis=3)                            # (B, OH, OW, k*k, C)
    return p.reshape(b * oh * ow, k * k * c), oh, ow


@jax.jit
def cnn_forward(x, params):
    """x: (B, 4, 84, 84) f32 NCHW -> (logits (B,A), log_probs (B,A), value (B,1))."""
    (w1c, b1c), (w2c, b2c), (w3c, b3c), (wl, bl), (wa, ba), (wc, bc) = params
    b = x.shape[0]
    xh = jnp.transpose(x, (0, 2, 3, 1))                    # NCHW -> NHWC

    # conv1: 4 -> 32, k=8, s=4
    p1, oh1, ow1 = _im2col(xh, 8, 4)
    y1 = _gemm_bias_relu(p1, w1c, b1c).reshape(b, oh1, ow1, -1)
    # conv2: 32 -> 64, k=4, s=2
    p2, oh2, ow2 = _im2col(y1, 4, 2)
    y2 = _gemm_bias_relu(p2, w2c, b2c).reshape(b, oh2, ow2, -1)
    # conv3: 64 -> 64, k=3, s=1
    p3, _, _ = _im2col(y2, 3, 1)
    flat = _gemm_bias_relu(p3, w3c, b3c).reshape(b, -1)    # nn.Flatten (h, w, c order)

    # Fused Linear -> ReLU -> actor/critic heads (heads concatenated in wrapper).
    a = wa.shape[1]
    wh = jnp.concatenate([wa, wc], axis=1)                 # (hidden, A+1), bf16
    bh = jnp.concatenate([ba, bc], axis=1)                 # (1, A+1), f32
    packed = pl.pallas_call(
        _head_kernel,
        out_shape=jax.ShapeDtypeStruct((b, 2 * a + 1), jnp.float32),
        in_specs=_vmem_specs(5),
        out_specs=pl.BlockSpec(memory_space=_VMEM),
    )(flat, wl, bl, wh, bh)

    logits = packed[:, :a]
    logp = packed[:, a:2 * a]
    value = packed[:, 2 * a:]
    return logits, logp, value
    # TODO(synk): torch.distributions.Categorical sampling is not reproduced;
    # the distribution is fully specified by the returned logits / log_probs.


# ---------------------------------------------------------------------------
# Params + pure-JAX reference
# ---------------------------------------------------------------------------

def init_params(key, hidden_dim, num_outputs):
    """Weights stored bf16 (HBM-traffic halving), biases f32.

    Shapes match the PyTorch module; conv weights are kept in im2col layout
    (k*k*Cin, Cout) == HWIO flattened.  Init scaling mimics the module's
    layer_init stds; small nonzero biases exercise the bias-add path
    (init choice does not change forward-pass semantics).
    """
    ks = jax.random.split(key, 12)

    def dense(kw, kb, fan_in, fan_out, std):
        w = jax.random.normal(kw, (fan_in, fan_out), jnp.float32) * (std / jnp.sqrt(fan_in))
        b = jax.random.uniform(kb, (1, fan_out), jnp.float32, -0.05, 0.05)
        return w.astype(jnp.bfloat16), b

    conv1 = dense(ks[0], ks[1], 8 * 8 * 4, 32, 2.0 ** 0.5)
    conv2 = dense(ks[2], ks[3], 4 * 4 * 32, 64, 2.0 ** 0.5)
    conv3 = dense(ks[4], ks[5], 3 * 3 * 64, 64, 2.0 ** 0.5)
    lin = dense(ks[6], ks[7], 64 * 7 * 7, hidden_dim, 2.0 ** 0.5)
    actor = dense(ks[8], ks[9], hidden_dim, num_outputs, 0.01)
    critic = dense(ks[10], ks[11], hidden_dim, 1, 1.0)
    return conv1, conv2, conv3, lin, actor, critic


def reference_forward(x, params):
    (w1c, b1c), (w2c, b2c), (w3c, b3c), (wl, bl), (wa, ba), (wc, bc) = params
    hi = lax.Precision.HIGHEST

    def conv(xh, wmat, bias, k, s):
        cin = xh.shape[-1]
        cout = wmat.shape[-1]
        w = wmat.astype(jnp.float32).reshape(k, k, cin, cout)
        y = lax.conv_general_dilated(
            xh, w, window_strides=(s, s), padding="VALID",
            dimension_numbers=("NHWC", "HWIO", "NHWC"), precision=hi)
        return jnp.maximum(y + bias.reshape(1, 1, 1, -1), 0.0)

    xh = jnp.transpose(x, (0, 2, 3, 1))
    y = conv(xh, w1c, b1c, 8, 4)
    y = conv(y, w2c, b2c, 4, 2)
    y = conv(y, w3c, b3c, 3, 1)
    feat = y.reshape(y.shape[0], -1)
    feat = jnp.maximum(jnp.dot(feat, wl.astype(jnp.float32), precision=hi) + bl, 0.0)
    logits = jnp.dot(feat, wa.astype(jnp.float32), precision=hi) + ba
    logp = jax.nn.log_softmax(logits, axis=-1)
    v = jnp.dot(feat, wc.astype(jnp.float32), precision=hi) + bc
    sroot = jnp.sqrt(jnp.abs(v))
    ssqrt = jnp.where(v >= 0.0, sroot, -sroot)
    value = (2.0 / (1.0 + jnp.exp(-ssqrt / 9.0)) - 1.0) * 20.0
    return logits, logp, value


if __name__ == "__main__":
    key = jax.random.PRNGKey(0)
    kx, kp = jax.random.split(key)

    B, HIDDEN, NUM_OUTPUTS = 2, 512, 6
    # 84x84 spatial is required by Linear(in_features=64*7*7) in the module.
    x = jax.random.normal(kx, (B, 4, 84, 84), dtype=jnp.float32)
    params = init_params(kp, HIDDEN, NUM_OUTPUTS)

    logits, logp, value = cnn_forward(x, params)
    jax.block_until_ready((logits, logp, value))

    ref_logits, ref_logp, ref_value = reference_forward(x, params)
    assert jnp.allclose(logits, ref_logits, atol=1e-3, rtol=1e-3)
    assert jnp.allclose(logp, ref_logp, atol=1e-3, rtol=1e-3)
    assert jnp.allclose(value, ref_value, atol=1e-3, rtol=1e-3)

    print("KERNEL_OK")
</pallas_src>

<mosaic_0001>
module attributes {stable_mosaic.version = 11 : i64} {
  func.func @_gemm_bias_relu_kernel(%arg0: memref<800x256xf32, #tpu.memory_space<vmem>>, %arg1: memref<256x32xbf16, #tpu.memory_space<vmem>>, %arg2: memref<1x32xf32, #tpu.memory_space<vmem>>, %arg3: memref<800x32xf32, #tpu.memory_space<vmem>>) attributes {dimension_semantics = [], scalar_prefetch = 0 : i64, scratch_operands = 0 : i64, tpu.core_type = #tpu.core_type<tc>} {
    %c0 = arith.constant 0 : index
    %c0_0 = arith.constant 0 : index
    %0 = vector.load %arg1[%c0, %c0_0] : memref<256x32xbf16, #tpu.memory_space<vmem>>, vector<256x32xbf16>
    %1 = arith.extf %0 : vector<256x32xbf16> to vector<256x32xf32>
    %c0_1 = arith.constant 0 : index
    %c0_2 = arith.constant 0 : index
    %2 = vector.load %arg0[%c0_1, %c0_2] : memref<800x256xf32, #tpu.memory_space<vmem>>, vector<800x256xf32>
    %cst = arith.constant dense<0.000000e+00> : vector<800x32xf32>
    %3 = tpu.matmul %2, %1, %cst {dimension_numbers = #tpu.dot_dimension_numbers<[1], [0], [0], [1], [0, 0, 1, 1], [], []>} : vector<800x256xf32>, vector<256x32xf32>, vector<800x32xf32> -> vector<800x32xf32>
    %c0_3 = arith.constant 0 : index
    %c0_4 = arith.constant 0 : index
    %4 = vector.load %arg2[%c0_3, %c0_4] : memref<1x32xf32, #tpu.memory_space<vmem>>, vector<1x32xf32>
    %5 = vector.broadcast %4 : vector<1x32xf32> to vector<800x32xf32>
    %6 = arith.addf %3, %5 : vector<800x32xf32>
    %cst_5 = arith.constant 0.000000e+00 : f32
    %7 = vector.broadcast %cst_5 : f32 to vector<800x32xf32>
    %8 = arith.maximumf %6, %7 : vector<800x32xf32>
    %c0_6 = arith.constant 0 : index
    %c0_7 = arith.constant 0 : index
    %9 = vector.load %arg3[%c0_6, %c0_7] : memref<800x32xf32, #tpu.memory_space<vmem>>, vector<800x32xf32>
    tpu.vector_store %arg3[%c0_6, %c0_7], %8 {strides = array<i32>} : memref<800x32xf32, #tpu.memory_space<vmem>>, vector<800x32xf32>,
    return
  }
}

module attributes {stable_mosaic.version = 11 : i64} {
  func.func @_gemm_bias_relu_kernel(%arg0: memref<162x512xf32, #tpu.memory_space<vmem>>, %arg1: memref<512x64xbf16, #tpu.memory_space<vmem>>, %arg2: memref<1x64xf32, #tpu.memory_space<vmem>>, %arg3: memref<162x64xf32, #tpu.memory_space<vmem>>) attributes {dimension_semantics = [], scalar_prefetch = 0 : i64, scratch_operands = 0 : i64, tpu.core_type = #tpu.core_type<tc>} {
    %c0 = arith.constant 0 : index
    %c0_0 = arith.constant 0 : index
    %0 = vector.load %arg1[%c0, %c0_0] : memref<512x64xbf16, #tpu.memory_space<vmem>>, vector<512x64xbf16>
    %1 = arith.extf %0 : vector<512x64xbf16> to vector<512x64xf32>
    %c0_1 = arith.constant 0 : index
    %c0_2 = arith.constant 0 : index
    %2 = vector.load %arg0[%c0_1, %c0_2] : memref<162x512xf32, #tpu.memory_space<vmem>>, vector<162x512xf32>
    %cst = arith.constant dense<0.000000e+00> : vector<162x64xf32>
    %3 = tpu.matmul %2, %1, %cst {dimension_numbers = #tpu.dot_dimension_numbers<[1], [0], [0], [1], [0, 0, 1, 1], [], []>} : vector<162x512xf32>, vector<512x64xf32>, vector<162x64xf32> -> vector<162x64xf32>
    %c0_3 = arith.constant 0 : index
    %c0_4 = arith.constant 0 : index
    %4 = vector.load %arg2[%c0_3, %c0_4] : memref<1x64xf32, #tpu.memory_space<vmem>>, vector<1x64xf32>
    %5 = vector.broadcast %4 : vector<1x64xf32> to vector<162x64xf32>
    %6 = arith.addf %3, %5 : vector<162x64xf32>
    %cst_5 = arith.constant 0.000000e+00 : f32
    %7 = vector.broadcast %cst_5 : f32 to vector<162x64xf32>
    %8 = arith.maximumf %6, %7 : vector<162x64xf32>
    %c0_6 = arith.constant 0 : index
    %c0_7 = arith.constant 0 : index
    %9 = vector.load %arg3[%c0_6, %c0_7] : memref<162x64xf32, #tpu.memory_space<vmem>>, vector<162x64xf32>
    tpu.vector_store %arg3[%c0_6, %c0_7], %8 {strides = array<i32>} : memref<162x64xf32, #tpu.memory_space<vmem>>, vector<162x64xf32>,
    return
  }
}

module attributes {stable_mosaic.version = 11 : i64} {
  func.func @_gemm_bias_relu_kernel(%arg0: memref<98x576xf32, #tpu.memory_space<vmem>>, %arg1: memref<576x64xbf16, #tpu.memory_space<vmem>>, %arg2: memref<1x64xf32, #tpu.memory_space<vmem>>, %arg3: memref<98x64xf32, #tpu.memory_space<vmem>>) attributes {dimension_semantics = [], scalar_prefetch = 0 : i64, scratch_operands = 0 : i64, tpu.core_type = #tpu.core_type<tc>} {
    %c0 = arith.constant 0 : index
    %c0_0 = arith.constant 0 : index
    %0 = vector.load %arg1[%c0, %c0_0] : memref<576x64xbf16, #tpu.memory_space<vmem>>, vector<576x64xbf16>
    %1 = arith.extf %0 : vector<576x64xbf16> to vector<576x64xf32>
    %c0_1 = arith.constant 0 : index
    %c0_2 = arith.constant 0 : index
    %2 = vector.load %arg0[%c0_1, %c0_2] : memref<98x576xf32, #tpu.memory_space<vmem>>, vector<98x576xf32>
    %cst = arith.constant dense<0.000000e+00> : vector<98x64xf32>
    %3 = tpu.matmul %2, %1, %cst {dimension_numbers = #tpu.dot_dimension_numbers<[1], [0], [0], [1], [0, 0, 1, 1], [], []>} : vector<98x576xf32>, vector<576x64xf32>, vector<98x64xf32> -> vector<98x64xf32>
    %c0_3 = arith.constant 0 : index
    %c0_4 = arith.constant 0 : index
    %4 = vector.load %arg2[%c0_3, %c0_4] : memref<1x64xf32, #tpu.memory_space<vmem>>, vector<1x64xf32>
    %5 = vector.broadcast %4 : vector<1x64xf32> to vector<98x64xf32>
    %6 = arith.addf %3, %5 : vector<98x64xf32>
    %cst_5 = arith.constant 0.000000e+00 : f32
    %7 = vector.broadcast %cst_5 : f32 to vector<98x64xf32>
    %8 = arith.maximumf %6, %7 : vector<98x64xf32>
    %c0_6 = arith.constant 0 : index
    %c0_7 = arith.constant 0 : index
    %9 = vector.load %arg3[%c0_6, %c0_7] : memref<98x64xf32, #tpu.memory_space<vmem>>, vector<98x64xf32>
    tpu.vector_store %arg3[%c0_6, %c0_7], %8 {strides = array<i32>} : memref<98x64xf32, #tpu.memory_space<vmem>>, vector<98x64xf32>,
    return
  }
}

module attributes {stable_mosaic.version = 11 : i64} {
  func.func @_head_kernel(%arg0: memref<2x3136xf32, #tpu.memory_space<vmem>>, %arg1: memref<3136x512xbf16, #tpu.memory_space<vmem>>, %arg2: memref<1x512xf32, #tpu.memory_space<vmem>>, %arg3: memref<512x7xbf16, #tpu.memory_space<vmem>>, %arg4: memref<1x7xf32, #tpu.memory_space<vmem>>, %arg5: memref<2x13xf32, #tpu.memory_space<vmem>>) attributes {dimension_semantics = [], scalar_prefetch = 0 : i64, scratch_operands = 0 : i64, tpu.core_type = #tpu.core_type<tc>} {
    %c0 = arith.constant 0 : index
    %c0_0 = arith.constant 0 : index
    %0 = vector.load %arg1[%c0, %c0_0] : memref<3136x512xbf16, #tpu.memory_space<vmem>>, vector<3136x512xbf16>
    %1 = arith.extf %0 : vector<3136x512xbf16> to vector<3136x512xf32>
    %c0_1 = arith.constant 0 : index
    %c0_2 = arith.constant 0 : index
    %2 = vector.load %arg0[%c0_1, %c0_2] : memref<2x3136xf32, #tpu.memory_space<vmem>>, vector<2x3136xf32>
    %cst = arith.constant dense<0.000000e+00> : vector<2x512xf32>
    %3 = tpu.matmul %2, %1, %cst {dimension_numbers = #tpu.dot_dimension_numbers<[1], [0], [0], [1], [0, 0, 1, 1], [], []>} : vector<2x3136xf32>, vector<3136x512xf32>, vector<2x512xf32> -> vector<2x512xf32>
    %c0_3 = arith.constant 0 : index
    %c0_4 = arith.constant 0 : index
    %4 = vector.load %arg2[%c0_3, %c0_4] : memref<1x512xf32, #tpu.memory_space<vmem>>, vector<1x512xf32>
    %5 = vector.broadcast %4 : vector<1x512xf32> to vector<2x512xf32>
    %6 = arith.addf %3, %5 : vector<2x512xf32>
    %cst_5 = arith.constant 0.000000e+00 : f32
    %7 = vector.broadcast %cst_5 : f32 to vector<2x512xf32>
    %8 = arith.maximumf %6, %7 : vector<2x512xf32>
    %c0_6 = arith.constant 0 : index
    %c0_7 = arith.constant 0 : index
    %9 = vector.load %arg3[%c0_6, %c0_7] : memref<512x7xbf16, #tpu.memory_space<vmem>>, vector<512x7xbf16>
    %10 = arith.extf %9 : vector<512x7xbf16> to vector<512x7xf32>
    %cst_8 = arith.constant dense<0.000000e+00> : vector<2x7xf32>
    %11 = tpu.matmul %8, %10, %cst_8 {dimension_numbers = #tpu.dot_dimension_numbers<[1], [0], [0], [1], [0, 0, 1, 1], [], []>} : vector<2x512xf32>, vector<512x7xf32>, vector<2x7xf32> -> vector<2x7xf32>
    %c0_9 = arith.constant 0 : index
    %c0_10 = arith.constant 0 : index
    %12 = vector.load %arg4[%c0_9, %c0_10] : memref<1x7xf32, #tpu.memory_space<vmem>>, vector<1x7xf32>
    %13 = vector.broadcast %12 : vector<1x7xf32> to vector<2x7xf32>
    %14 = arith.addf %11, %13 : vector<2x7xf32>
    %15 = vector.extract_strided_slice %14 {offsets = [0, 0], sizes = [2, 6], strides = [1, 1]} : vector<2x7xf32> to vector<2x6xf32>
    %16 = vector.extract_strided_slice %14 {offsets = [0, 6], sizes = [2, 1], strides = [1, 1]} : vector<2x7xf32> to vector<2x1xf32>
    %cst_11 = arith.constant dense<0xFF800000> : vector<2xf32>
    %17 = vector.multi_reduction <maximumf>, %15, %cst_11 [1] : vector<2x6xf32> to vector<2xf32>
    %18 = vector.shape_cast %17 : vector<2xf32> to vector<2x1xf32>
    %19 = vector.broadcast %18 : vector<2x1xf32> to vector<2x6xf32>
    %20 = arith.subf %15, %19 : vector<2x6xf32>
    %21 = math.exp %20 : vector<2x6xf32>
    %cst_12 = arith.constant dense<0.000000e+00> : vector<2xf32>
    %22 = vector.multi_reduction <add>, %21, %cst_12 [1] : vector<2x6xf32> to vector<2xf32>
    %23 = vector.shape_cast %22 : vector<2xf32> to vector<2x1xf32>
    %24 = math.log %23 : vector<2x1xf32>
    %25 = arith.addf %24, %18 : vector<2x1xf32>
    %26 = vector.broadcast %25 : vector<2x1xf32> to vector<2x6xf32>
    %27 = arith.subf %15, %26 : vector<2x6xf32>
    %28 = math.absf %16 : vector<2x1xf32>
    %29 = math.sqrt %28 : vector<2x1xf32>
    %cst_13 = arith.constant 0.000000e+00 : f32
    %30 = vector.broadcast %cst_13 : f32 to vector<2x1xf32>
    %31 = arith.cmpf oge, %16, %30 : vector<2x1xf32>
    %cst_14 = arith.constant 0.000000e+00 : f32
    %32 = vector.broadcast %cst_14 : f32 to vector<2x1xf32>
    %33 = arith.subf %32, %29 : vector<2x1xf32>
    %34 = arith.select %31, %29, %33 : vector<2x1xi1>, vector<2x1xf32>
    %cst_15 = arith.constant 0.000000e+00 : f32
    %35 = vector.broadcast %cst_15 : f32 to vector<2x1xf32>
    %36 = arith.subf %35, %34 : vector<2x1xf32>
    %cst_16 = arith.constant 9.000000e+00 : f32
    %37 = vector.broadcast %cst_16 : f32 to vector<2x1xf32>
    %38 = arith.divf %36, %37 : vector<2x1xf32>
    %39 = math.exp %38 : vector<2x1xf32>
    %cst_17 = arith.constant 1.000000e+00 : f32
    %40 = vector.broadcast %cst_17 : f32 to vector<2x1xf32>
    %41 = arith.addf %40, %39 : vector<2x1xf32>
    %cst_18 = arith.constant 2.000000e+00 : f32
    %42 = vector.broadcast %cst_18 : f32 to vector<2x1xf32>
    %43 = arith.divf %42, %41 : vector<2x1xf32>
    %cst_19 = arith.constant 1.000000e+00 : f32
    %44 = vector.broadcast %cst_19 : f32 to vector<2x1xf32>
    %45 = arith.subf %43, %44 : vector<2x1xf32>
    %cst_20 = arith.constant 2.000000e+01 : f32
    %46 = vector.broadcast %cst_20 : f32 to vector<2x1xf32>
    %47 = arith.mulf %45, %46 : vector<2x1xf32>
    %48 = tpu.concatenate %15, %27, %47 in 1 : vector<2x6xf32>, vector<2x6xf32>, vector<2x1xf32> -> vector<2x13xf32>
    %c0_21 = arith.constant 0 : index
    %c0_22 = arith.constant 0 : index
    %49 = vector.load %arg5[%c0_21, %c0_22] : memref<2x13xf32, #tpu.memory_space<vmem>>, vector<2x13xf32>
    tpu.vector_store %arg5[%c0_21, %c0_22], %48 {strides = array<i32>} : memref<2x13xf32, #tpu.memory_space<vmem>>, vector<2x13xf32>,
    return
  }
}

</mosaic_0001>

<bundles_post_ra>
// kernel: cnn_forward.4
= control target key start
LH: loop header
LB: loop body
LE: loop exit
PB: predicated region body
PF: predicated region fallthrough
CT: control target
= control target key end

     0   :  { %v1216_v0 = vmov 0.0|0.0   ;;  %vm950_vm0 = vcmask 261120   ;;  %s2422_s1 = inlined_call_operand.vmem [shape: bf16[256,32], index: 1, kind: input, shape index: {}]   ;;  %s2423_s0 = inlined_call_operand.vmem [shape: f32[800,256], index: 0, kind: input, shape index: {}]   ;;  %s2424_s2 = inlined_call_operand.vmem [shape: f32[1,32], index: 2, kind: input, shape index: {}]   ;;  %s2425_s3 = inlined_call_operand.vmem [shape: f32[800,32], index: 3, kind: output, shape index: {}]  }
   0x1   :  { %1135 = vmatprep.subr.bf16.mxu0 %v1216_v0  ;;  %1183 = vmatprep.subr.bf16.mxu1 %v1216_v0  ;;  %v1057_v1 = vld [vmem:[%s2422_s1] sm:$0xff]   ;;  %v1120_v2 = vld [vmem:[%s2422_s1 + $0x8] sm:$0xff]   ;;  %v1121_v5 = vld [vmem:[%s2422_s1 + $0x10] sm:$0xff]  }
   0x2   :  { %1137 = vmatpush1.bf16.msra.mxu0 %v1057_v1  ;;  %1199 = vmatpush1.bf16.msra.mxu1 %v1057_v1  ;;  %v79_v3 = vld [vmem:[%s2423_s0 + $0x8] sm:$0xff]  ;;  %v1122_v6 = vld [vmem:[%s2422_s1 + $0x18] sm:$0xff]   ;;  %v1123_v7 = vld [vmem:[%s2422_s1 + $0x20] sm:$0xff]  }
   0x3   :  { %1138 = vmatprep.subr.bf16.mxu0 %v1216_v0  ;;  %1184 = vmatprep.subr.bf16.mxu1 %v1216_v0  ;;  %v179_v4 = vld [vmem:[%s2423_s0 + $0x328] sm:$0xff]  ;;  %v1125_v9 = vld [vmem:[%s2422_s1 + $0x30] sm:$0xff]   ;;  %v1126_v10 = vld [vmem:[%s2422_s1 + $0x38] sm:$0xff]  }
   0x4   :  { %349 = vmatprep.mubr.f32.mxu0 %v79_v3  ;;  %599 = vmatprep.mubr.f32.mxu1 %v179_v4  ;;  %v1124_v8 = vld [vmem:[%s2422_s1 + $0x28] sm:$0xff]   ;;  %v1127_v11 = vld [vmem:[%s2422_s1 + $0x40] sm:$0xff]   ;;  %v1129_v13 = vld [vmem:[%s2422_s1 + $0x50] sm:$0xff]  }
   0x5   :  { %v1128_v12 = vld [vmem:[%s2422_s1 + $0x48] sm:$0xff]   ;;  %v1130_v14 = vld [vmem:[%s2422_s1 + $0x58] sm:$0xff]   ;;  %v1131_v15 = vld [vmem:[%s2422_s1 + $0x60] sm:$0xff]  }
   0x6   :  { %1140 = vmatpush1.bf16.msra.mxu0 %v1120_v2  ;;  %1200 = vmatpush1.bf16.msra.mxu1 %v1120_v2  ;;  %v1132_v16 = vld [vmem:[%s2422_s1 + $0x68] sm:$0xff]   ;;  %v1133_v17 = vld [vmem:[%s2422_s1 + $0x70] sm:$0xff]   ;;  %v1134_v18 = vld [vmem:[%s2422_s1 + $0x78] sm:$0xff]  }
   0x7   :  { %1141 = vmatprep.subr.bf16.mxu0 %v1216_v0  ;;  %1185 = vmatprep.subr.bf16.mxu1 %v1216_v0  ;;  %v78_v19 = vld [vmem:[%s2423_s0] sm:$0xff]  ;;  %v81_v21 = vld [vmem:[%s2423_s0 + $0x18] sm:$0xff]  ;;  %v80_v23 = vld [vmem:[%s2423_s0 + $0x10] sm:$0xff] }
   0x8   :  { %v178_v20 = vld [vmem:[%s2423_s0 + $0x320] sm:$0xff]  ;;  %v181_v22 = vld [vmem:[%s2423_s0 + $0x338] sm:$0xff]  ;;  %v180_v24 = vld [vmem:[%s2423_s0 + $0x330] sm:$0xff] }
   0x9   :  { %v83_v25 = vld [vmem:[%s2423_s0 + $0x28] sm:$0xff]  ;;  %v82_v27 = vld [vmem:[%s2423_s0 + $0x20] sm:$0xff]  ;;  %v85_v29 = vld [vmem:[%s2423_s0 + $0x38] sm:$0xff] }
   0xa   :  { %1143 = vmatpush1.bf16.msra.mxu0 %v1121_v5  ;;  %1201 = vmatpush1.bf16.msra.mxu1 %v1121_v5  ;;  %v183_v26 = vld [vmem:[%s2423_s0 + $0x348] sm:$0xff]  ;;  %v182_v28 = vld [vmem:[%s2423_s0 + $0x340] sm:$0xff]  ;;  %v185_v30 = vld [vmem:[%s2423_s0 + $0x358] sm:$0xff] }
   0xb   :  { %1144 = vmatprep.subr.bf16.mxu0 %v1216_v0  ;;  %1186 = vmatprep.subr.bf16.mxu1 %v1216_v0  ;;  %v84_v31 = vld [vmem:[%s2423_s0 + $0x30] sm:$0xff]  ;;  %v87_v33 = vld [vmem:[%s2423_s0 + $0x48] sm:$0xff]  ;;  %v86_v35 = vld [vmem:[%s2423_s0 + $0x40] sm:$0xff] }
   0xc   :  { %v184_v32 = vld [vmem:[%s2423_s0 + $0x350] sm:$0xff]  ;;  %v187_v34 = vld [vmem:[%s2423_s0 + $0x368] sm:$0xff]  ;;  %v186_v36 = vld [vmem:[%s2423_s0 + $0x360] sm:$0xff] }
   0xd   :  { %v89_v37 = vld [vmem:[%s2423_s0 + $0x58] sm:$0xff]  ;;  %v88_v39 = vld [vmem:[%s2423_s0 + $0x50] sm:$0xff]  ;;  %v91_v41 = vld [vmem:[%s2423_s0 + $0x68] sm:$0xff] }
   0xe   :  { %1146 = vmatpush1.bf16.msra.mxu0 %v1122_v6  ;;  %1202 = vmatpush1.bf16.msra.mxu1 %v1122_v6  ;;  %v189_v38 = vld [vmem:[%s2423_s0 + $0x378] sm:$0xff]  ;;  %v188_v40 = vld [vmem:[%s2423_s0 + $0x370] sm:$0xff]  ;;  %v191_v42 = vld [vmem:[%s2423_s0 + $0x388] sm:$0xff] }
   0xf   :  { %1147 = vmatprep.subr.bf16.mxu0 %v1216_v0  ;;  %1187 = vmatprep.subr.bf16.mxu1 %v1216_v0  ;;  %v90_v43 = vld [vmem:[%s2423_s0 + $0x60] sm:$0xff]  ;;  %v93_v45 = vld [vmem:[%s2423_s0 + $0x78] sm:$0xff]  ;;  %v92_v47 = vld [vmem:[%s2423_s0 + $0x70] sm:$0xff] }
  0x10   :  { %v190_v44 = vld [vmem:[%s2423_s0 + $0x380] sm:$0xff]  ;;  %v193_v46 = vld [vmem:[%s2423_s0 + $0x398] sm:$0xff]  ;;  %v192_v48 = vld [vmem:[%s2423_s0 + $0x390] sm:$0xff] }
  0x11   :  { %v95_v49 = vld [vmem:[%s2423_s0 + $0x88] sm:$0xff]  ;;  %v94_v51 = vld [vmem:[%s2423_s0 + $0x80] sm:$0xff]  ;;  %v97_v53 = vld [vmem:[%s2423_s0 + $0x98] sm:$0xff] }
  0x12   :  { %1149 = vmatpush1.bf16.msra.mxu0 %v1123_v7  ;;  %1203 = vmatpush1.bf16.msra.mxu1 %v1123_v7  ;;  %v195_v50 = vld [vmem:[%s2423_s0 + $0x3a8] sm:$0xff]  ;;  %v194_v52 = vld [vmem:[%s2423_s0 + $0x3a0] sm:$0xff]  ;;  %v197_v54 = vld [vmem:[%s2423_s0 + $0x3b8] sm:$0xff] }
  0x13   :  { %1150 = vmatprep.subr.bf16.mxu0 %v1216_v0  ;;  %1188 = vmatprep.subr.bf16.mxu1 %v1216_v0  ;;  %v96_v55 = vld [vmem:[%s2423_s0 + $0x90] sm:$0xff]  ;;  %v99_v57 = vld [vmem:[%s2423_s0 + $0xa8] sm:$0xff]  ;;  %v98_v59 = vld [vmem:[%s2423_s0 + $0xa0] sm:$0xff] }
  0x14   :  { %v196_v56 = vld [vmem:[%s2423_s0 + $0x3b0] sm:$0xff]  ;;  %v199_v58 = vld [vmem:[%s2423_s0 + $0x3c8] sm:$0xff]  ;;  %v198_v60 = vld [vmem:[%s2423_s0 + $0x3c0] sm:$0xff] }
  0x15   :  { %v101_v61 = vld [vmem:[%s2423_s0 + $0xb8] sm:$0xff]  ;;  %v100_v63 = vld [vmem:[%s2423_s0 + $0xb0] sm:$0xff]  ;;  %v103_v1 = vld [vmem:[%s2423_s0 + $0xc8] sm:$0xff] }
  0x16   :  { %1152 = vmatpush1.bf16.msra.mxu0 %v1124_v8  ;;  %1204 = vmatpush1.bf16.msra.mxu1 %v1124_v8  ;;  %v201_v62 = vld [vmem:[%s2423_s0 + $0x3d8] sm:$0xff]  ;;  %v203_v2 = vld [vmem:[%s2423_s0 + $0x3e8] sm:$0xff]  ;;  %v102_v3 = vld [vmem:[%s2423_s0 + $0xc0] sm:$0xff] }
  0x17   :  { %1153 = vmatprep.subr.bf16.mxu0 %v1216_v0  ;;  %1189 = vmatprep.subr.bf16.mxu1 %v1216_v0  ;;  %v202_v4 = vld [vmem:[%s2423_s0 + $0x3e0] sm:$0xff]  ;;  %v105_v5 = vld [vmem:[%s2423_s0 + $0xd8] sm:$0xff]  ;;  %v104_v7 = vld [vmem:[%s2423_s0 + $0xd0] sm:$0xff] }
  0x18   :  { %v205_v6 = vld [vmem:[%s2423_s0 + $0x3f8] sm:$0xff]  ;;  %v204_v8 = vld [vmem:[%s2423_s0 + $0x3f0] sm:$0xff] }
  0x1a   :  { %1155 = vmatpush1.bf16.msra.mxu0 %v1125_v9  ;;  %1205 = vmatpush1.bf16.msra.mxu1 %v1125_v9  ;;  %v107_v9 = vld [vmem:[%s2423_s0 + $0xe8] sm:$0xff] }
  0x1b   :  { %1156 = vmatprep.subr.bf16.mxu0 %v1216_v0  ;;  %1190 = vmatprep.subr.bf16.mxu1 %v1216_v0 }
  0x1e   :  { %1158 = vmatpush1.bf16.msra.mxu0 %v1126_v10  ;;  %1206 = vmatpush1.bf16.msra.mxu1 %v1126_v10  ;;  %v207_v10 = vld [vmem:[%s2423_s0 + $0x408] sm:$0xff] }
  0x1f   :  { %1159 = vmatprep.subr.bf16.mxu0 %v1216_v0  ;;  %1191 = vmatprep.subr.bf16.mxu1 %v1216_v0 }
  0x22   :  { %1161 = vmatpush1.bf16.msra.mxu0 %v1127_v11  ;;  %1207 = vmatpush1.bf16.msra.mxu1 %v1127_v11  ;;  %v106_v11 = vld [vmem:[%s2423_s0 + $0xe0] sm:$0xff] }
  0x23   :  { %1162 = vmatprep.subr.bf16.mxu0 %v1216_v0  ;;  %1192 = vmatprep.subr.bf16.mxu1 %v1216_v0 }
  0x26   :  { %1164 = vmatpush1.bf16.msra.mxu0 %v1128_v12  ;;  %1208 = vmatpush1.bf16.msra.mxu1 %v1128_v12  ;;  %v206_v12 = vld [vmem:[%s2423_s0 + $0x400] sm:$0xff] }
  0x27   :  { %1165 = vmatprep.subr.bf16.mxu0 %v1216_v0  ;;  %1193 = vmatprep.subr.bf16.mxu1 %v1216_v0 }
  0x2a   :  { %1167 = vmatpush1.bf16.msra.mxu0 %v1129_v13  ;;  %1209 = vmatpush1.bf16.msra.mxu1 %v1129_v13  ;;  %v109_v13 = vld [vmem:[%s2423_s0 + $0xf8] sm:$0xff] }
  0x2b   :  { %1168 = vmatprep.subr.bf16.mxu0 %v1216_v0  ;;  %1194 = vmatprep.subr.bf16.mxu1 %v1216_v0 }
  0x2e   :  { %1170 = vmatpush1.bf16.msra.mxu0 %v1130_v14  ;;  %1210 = vmatpush1.bf16.msra.mxu1 %v1130_v14  ;;  %v209_v14 = vld [vmem:[%s2423_s0 + $0x418] sm:$0xff] }
  0x2f   :  { %1171 = vmatprep.subr.bf16.mxu0 %v1216_v0  ;;  %1195 = vmatprep.subr.bf16.mxu1 %v1216_v0 }
  0x32   :  { %1173 = vmatpush1.bf16.msra.mxu0 %v1131_v15  ;;  %1211 = vmatpush1.bf16.msra.mxu1 %v1131_v15  ;;  %v108_v15 = vld [vmem:[%s2423_s0 + $0xf0] sm:$0xff] }
  0x33   :  { %1174 = vmatprep.subr.bf16.mxu0 %v1216_v0  ;;  %1196 = vmatprep.subr.bf16.mxu1 %v1216_v0 }
  0x36   :  { %1176 = vmatpush1.bf16.msra.mxu0 %v1132_v16  ;;  %1212 = vmatpush1.bf16.msra.mxu1 %v1132_v16  ;;  %v208_v16 = vld [vmem:[%s2423_s0 + $0x410] sm:$0xff] }
  0x37   :  { %1177 = vmatprep.subr.bf16.mxu0 %v1216_v0  ;;  %1197 = vmatprep.subr.bf16.mxu1 %v1216_v0 }
  0x3a   :  { %1179 = vmatpush1.bf16.msra.mxu0 %v1133_v17  ;;  %1213 = vmatpush1.bf16.msra.mxu1 %v1133_v17  ;;  %v111_v17 = vld [vmem:[%s2423_s0 + $0x108] sm:$0xff] }
  0x3b   :  { %1180 = vmatprep.subr.bf16.mxu0 %v1216_v0  ;;  %1198 = vmatprep.subr.bf16.mxu1 %v1216_v0  ;;  %v200_v0 = vld [vmem:[%s2423_s0 + $0x3d0] sm:$0xff] }
  0x3e   :  { %1182 = vmatpush1.bf16.msra.mxu0 %v1134_v18  ;;  %1214 = vmatpush1.bf16.msra.mxu1 %v1134_v18  ;;  %v211_v18 = vld [vmem:[%s2423_s0 + $0x428] sm:$0xff] }
  0x41   :  { %350 = vmatmul.mubr.f32.vlgmr.msra.gmra.mrb[0].mxu0 %v78_v19  ;;  %600 = vmatmul.mubr.f32.vlgmr.msra.gmra.mrb[0].mxu1 %v178_v20  ;;  %v110_v19 = vld [vmem:[%s2423_s0 + $0x100] sm:$0xff] }
  0x42   :  { %354 = vmatprep.mubr.f32.mxu0 %v81_v21  ;;  %604 = vmatprep.mubr.f32.mxu1 %v181_v22  ;;  %v210_v20 = vld [vmem:[%s2423_s0 + $0x420] sm:$0xff]  ;;  %v113_v21 = vld [vmem:[%s2423_s0 + $0x118] sm:$0xff] }
  0x43   :  { %v213_v22 = vld [vmem:[%s2423_s0 + $0x438] sm:$0xff] }
  0x45   :  { %355 = vmatmul.mubr.f32.gmra.mrb[2].mxu0 %v80_v23  ;;  %605 = vmatmul.mubr.f32.gmra.mrb[2].mxu1 %v180_v24  ;;  %v112_v23 = vld [vmem:[%s2423_s0 + $0x110] sm:$0xff] }
  0x46   :  { %359 = vmatprep.mubr.f32.mxu0 %v83_v25  ;;  %609 = vmatprep.mubr.f32.mxu1 %v183_v26  ;;  %v212_v24 = vld [vmem:[%s2423_s0 + $0x430] sm:$0xff]  ;;  %v115_v25 = vld [vmem:[%s2423_s0 + $0x128] sm:$0xff] }
  0x47   :  { %v215_v26 = vld [vmem:[%s2423_s0 + $0x448] sm:$0xff] }
  0x49   :  { %360 = vmatmul.mubr.f32.gmra.mrb[4].mxu0 %v82_v27  ;;  %610 = vmatmul.mubr.f32.gmra.mrb[4].mxu1 %v182_v28  ;;  %v114_v27 = vld [vmem:[%s2423_s0 + $0x120] sm:$0xff] }
  0x4a   :  { %364 = vmatprep.mubr.f32.mxu0 %v85_v29  ;;  %614 = vmatprep.mubr.f32.mxu1 %v185_v30  ;;  %v214_v28 = vld [vmem:[%s2423_s0 + $0x440] sm:$0xff]  ;;  %v117_v29 = vld [vmem:[%s2423_s0 + $0x138] sm:$0xff] }
  0x4b   :  { %v217_v30 = vld [vmem:[%s2423_s0 + $0x458] sm:$0xff] }
  0x4d   :  { %365 = vmatmul.mubr.f32.gmra.mrb[6].mxu0 %v84_v31  ;;  %615 = vmatmul.mubr.f32.gmra.mrb[6].mxu1 %v184_v32  ;;  %v116_v31 = vld [vmem:[%s2423_s0 + $0x130] sm:$0xff] }
  0x4e   :  { %369 = vmatprep.mubr.f32.mxu0 %v87_v33  ;;  %619 = vmatprep.mubr.f32.mxu1 %v187_v34  ;;  %v216_v32 = vld [vmem:[%s2423_s0 + $0x450] sm:$0xff]  ;;  %v119_v33 = vld [vmem:[%s2423_s0 + $0x148] sm:$0xff] }
  0x4f   :  { %v219_v34 = vld [vmem:[%s2423_s0 + $0x468] sm:$0xff] }
  0x51   :  { %370 = vmatmul.mubr.f32.gmra.mrb[8].mxu0 %v86_v35  ;;  %620 = vmatmul.mubr.f32.gmra.mrb[8].mxu1 %v186_v36  ;;  %v118_v35 = vld [vmem:[%s2423_s0 + $0x140] sm:$0xff] }
  0x52   :  { %374 = vmatprep.mubr.f32.mxu0 %v89_v37  ;;  %624 = vmatprep.mubr.f32.mxu1 %v189_v38  ;;  %v218_v36 = vld [vmem:[%s2423_s0 + $0x460] sm:$0xff]  ;;  %v121_v37 = vld [vmem:[%s2423_s0 + $0x158] sm:$0xff] }
  0x53   :  { %v221_v38 = vld [vmem:[%s2423_s0 + $0x478] sm:$0xff] }
  0x55   :  { %375 = vmatmul.mubr.f32.gmra.mrb[10].mxu0 %v88_v39  ;;  %625 = vmatmul.mubr.f32.gmra.mrb[10].mxu1 %v188_v40  ;;  %v120_v39 = vld [vmem:[%s2423_s0 + $0x150] sm:$0xff] }
  0x56   :  { %379 = vmatprep.mubr.f32.mxu0 %v91_v41  ;;  %629 = vmatprep.mubr.f32.mxu1 %v191_v42  ;;  %v220_v40 = vld [vmem:[%s2423_s0 + $0x470] sm:$0xff]  ;;  %v123_v41 = vld [vmem:[%s2423_s0 + $0x168] sm:$0xff] }
  0x57   :  { %v223_v42 = vld [vmem:[%s2423_s0 + $0x488] sm:$0xff] }
  0x59   :  { %380 = vmatmul.mubr.f32.gmra.mrb[12].mxu0 %v90_v43  ;;  %630 = vmatmul.mubr.f32.gmra.mrb[12].mxu1 %v190_v44  ;;  %v122_v43 = vld [vmem:[%s2423_s0 + $0x160] sm:$0xff] }
  0x5a   :  { %384 = vmatprep.mubr.f32.mxu0 %v93_v45  ;;  %634 = vmatprep.mubr.f32.mxu1 %v193_v46  ;;  %v222_v44 = vld [vmem:[%s2423_s0 + $0x480] sm:$0xff]  ;;  %v125_v45 = vld [vmem:[%s2423_s0 + $0x178] sm:$0xff] }
  0x5b   :  { %v225_v46 = vld [vmem:[%s2423_s0 + $0x498] sm:$0xff] }
  0x5d   :  { %385 = vmatmul.mubr.f32.gmra.mrb[14].mxu0 %v92_v47  ;;  %635 = vmatmul.mubr.f32.gmra.mrb[14].mxu1 %v192_v48  ;;  %v124_v47 = vld [vmem:[%s2423_s0 + $0x170] sm:$0xff] }
  0x5e   :  { %389 = vmatprep.mubr.f32.mxu0 %v95_v49  ;;  %639 = vmatprep.mubr.f32.mxu1 %v195_v50  ;;  %v224_v48 = vld [vmem:[%s2423_s0 + $0x490] sm:$0xff]  ;;  %v127_v49 = vld [vmem:[%s2423_s0 + $0x188] sm:$0xff] }
  0x5f   :  { %v227_v50 = vld [vmem:[%s2423_s0 + $0x4a8] sm:$0xff] }
  0x61   :  { %390 = vmatmul.mubr.f32.gmra.mrb[16].mxu0 %v94_v51  ;;  %640 = vmatmul.mubr.f32.gmra.mrb[16].mxu1 %v194_v52  ;;  %v126_v51 = vld [vmem:[%s2423_s0 + $0x180] sm:$0xff] }
  0x62   :  { %394 = vmatprep.mubr.f32.mxu0 %v97_v53  ;;  %644 = vmatprep.mubr.f32.mxu1 %v197_v54  ;;  %v226_v52 = vld [vmem:[%s2423_s0 + $0x4a0] sm:$0xff]  ;;  %v129_v53 = vld [vmem:[%s2423_s0 + $0x198] sm:$0xff] }
  0x63   :  { %v229_v54 = vld [vmem:[%s2423_s0 + $0x4b8] sm:$0xff] }
  0x65   :  { %395 = vmatmul.mubr.f32.gmra.mrb[18].mxu0 %v96_v55  ;;  %645 = vmatmul.mubr.f32.gmra.mrb[18].mxu1 %v196_v56  ;;  %v128_v55 = vld [vmem:[%s2423_s0 + $0x190] sm:$0xff] }
  0x66   :  { %399 = vmatprep.mubr.f32.mxu0 %v99_v57  ;;  %649 = vmatprep.mubr.f32.mxu1 %v199_v58  ;;  %v228_v56 = vld [vmem:[%s2423_s0 + $0x4b0] sm:$0xff]  ;;  %v131_v57 = vld [vmem:[%s2423_s0 + $0x1a8] sm:$0xff] }
  0x67   :  { %v231_v58 = vld [vmem:[%s2423_s0 + $0x4c8] sm:$0xff] }
  0x69   :  { %400 = vmatmul.mubr.f32.gmra.mrb[20].mxu0 %v98_v59  ;;  %650 = vmatmul.mubr.f32.gmra.mrb[20].mxu1 %v198_v60  ;;  %v130_v59 = vld [vmem:[%s2423_s0 + $0x1a0] sm:$0xff] }
  0x6a   :  { %404 = vmatprep.mubr.f32.mxu0 %v101_v61  ;;  %654 = vmatprep.mubr.f32.mxu1 %v201_v62  ;;  %v230_v60 = vld [vmem:[%s2423_s0 + $0x4c0] sm:$0xff]  ;;  %v133_v61 = vld [vmem:[%s2423_s0 + $0x1b8] sm:$0xff] }
  0x6b   :  { %v233_v62 = vld [vmem:[%s2423_s0 + $0x4d8] sm:$0xff] }
  0x6d   :  { %405 = vmatmul.mubr.f32.gmra.mrb[22].mxu0 %v100_v63  ;;  %655 = vmatmul.mubr.f32.gmra.mrb[22].mxu1 %v200_v0  ;;  %v132_v63 = vld [vmem:[%s2423_s0 + $0x1b0] sm:$0xff] }
  0x6e   :  { %409 = vmatprep.mubr.f32.mxu0 %v103_v1  ;;  %659 = vmatprep.mubr.f32.mxu1 %v203_v2  ;;  %v232_v0 = vld [vmem:[%s2423_s0 + $0x4d0] sm:$0xff]  ;;  %v135_v1 = vld [vmem:[%s2423_s0 + $0x1c8] sm:$0xff] }
  0x6f   :  { %v235_v2 = vld [vmem:[%s2423_s0 + $0x4e8] sm:$0xff] }
  0x71   :  { %410 = vmatmul.mubr.f32.gmra.mrb[24].mxu0 %v102_v3  ;;  %660 = vmatmul.mubr.f32.gmra.mrb[24].mxu1 %v202_v4  ;;  %v134_v3 = vld [vmem:[%s2423_s0 + $0x1c0] sm:$0xff] }
  0x72   :  { %414 = vmatprep.mubr.f32.mxu0 %v105_v5  ;;  %664 = vmatprep.mubr.f32.mxu1 %v205_v6  ;;  %v234_v4 = vld [vmem:[%s2423_s0 + $0x4e0] sm:$0xff]  ;;  %v137_v5 = vld [vmem:[%s2423_s0 + $0x1d8] sm:$0xff] }
  0x73   :  { %v237_v6 = vld [vmem:[%s2423_s0 + $0x4f8] sm:$0xff] }
  0x75   :  { %415 = vmatmul.mubr.f32.gmra.mrb[26].mxu0 %v104_v7  ;;  %665 = vmatmul.mubr.f32.gmra.mrb[26].mxu1 %v204_v8  ;;  %v136_v7 = vld [vmem:[%s2423_s0 + $0x1d0] sm:$0xff] }
  0x76   :  { %419 = vmatprep.mubr.f32.mxu0 %v107_v9  ;;  %669 = vmatprep.mubr.f32.mxu1 %v207_v10  ;;  %v236_v8 = vld [vmem:[%s2423_s0 + $0x4f0] sm:$0xff]  ;;  %v139_v9 = vld [vmem:[%s2423_s0 + $0x1e8] sm:$0xff] }
  0x77   :  { %v239_v10 = vld [vmem:[%s2423_s0 + $0x508] sm:$0xff] }
  0x79   :  { %420 = vmatmul.mubr.f32.gmra.mrb[28].mxu0 %v106_v11  ;;  %670 = vmatmul.mubr.f32.gmra.mrb[28].mxu1 %v206_v12  ;;  %v138_v11 = vld [vmem:[%s2423_s0 + $0x1e0] sm:$0xff] }
  0x7a   :  { %424 = vmatprep.mubr.f32.mxu0 %v109_v13  ;;  %674 = vmatprep.mubr.f32.mxu1 %v209_v14  ;;  %v238_v12 = vld [vmem:[%s2423_s0 + $0x500] sm:$0xff]  ;;  %v141_v13 = vld [vmem:[%s2423_s0 + $0x1f8] sm:$0xff] }
  0x7b   :  { %v241_v14 = vld [vmem:[%s2423_s0 + $0x518] sm:$0xff] }
  0x7d   :  { %425 = vmatmul.mubr.f32.gmra.mrb[30].mxu0 %v108_v15  ;;  %675 = vmatmul.mubr.f32.gmra.mrb[30].mxu1 %v208_v16  ;;  %v140_v15 = vld [vmem:[%s2423_s0 + $0x1f0] sm:$0xff] }
  0x7e   :  { %429 = vmatprep.mubr.f32.mxu0 %v111_v17  ;;  %679 = vmatprep.mubr.f32.mxu1 %v211_v18  ;;  %v240_v16 = vld [vmem:[%s2423_s0 + $0x510] sm:$0xff]  ;;  %v143_v17 = vld [vmem:[%s2423_s0 + $0x208] sm:$0xff] }
  0x7f   :  { %v243_v18 = vld [vmem:[%s2423_s0 + $0x528] sm:$0xff] }
  0x81   :  { %430 = vmatmul.mubr.f32.gmra.mrb[32].mxu0 %v110_v19  ;;  %680 = vmatmul.mubr.f32.gmra.mrb[32].mxu1 %v210_v20  ;;  %v142_v19 = vld [vmem:[%s2423_s0 + $0x200] sm:$0xff] }
  0x82   :  { %434 = vmatprep.mubr.f32.mxu0 %v113_v21  ;;  %684 = vmatprep.mubr.f32.mxu1 %v213_v22  ;;  %v242_v20 = vld [vmem:[%s2423_s0 + $0x520] sm:$0xff]  ;;  %v145_v21 = vld [vmem:[%s2423_s0 + $0x218] sm:$0xff] }
  0x83   :  { %v245_v22 = vld [vmem:[%s2423_s0 + $0x538] sm:$0xff] }
  0x85   :  { %435 = vmatmul.mubr.f32.gmra.mrb[34].mxu0 %v112_v23  ;;  %685 = vmatmul.mubr.f32.gmra.mrb[34].mxu1 %v212_v24  ;;  %v144_v23 = vld [vmem:[%s2423_s0 + $0x210] sm:$0xff] }
  0x86   :  { %439 = vmatprep.mubr.f32.mxu0 %v115_v25  ;;  %689 = vmatprep.mubr.f32.mxu1 %v215_v26  ;;  %v244_v24 = vld [vmem:[%s2423_s0 + $0x530] sm:$0xff]  ;;  %v147_v25 = vld [vmem:[%s2423_s0 + $0x228] sm:$0xff] }
  0x87   :  { %v247_v26 = vld [vmem:[%s2423_s0 + $0x548] sm:$0xff] }
  0x89   :  { %440 = vmatmul.mubr.f32.gmra.mrb[36].mxu0 %v114_v27  ;;  %690 = vmatmul.mubr.f32.gmra.mrb[36].mxu1 %v214_v28  ;;  %v146_v27 = vld [vmem:[%s2423_s0 + $0x220] sm:$0xff] }
  0x8a   :  { %444 = vmatprep.mubr.f32.mxu0 %v117_v29  ;;  %694 = vmatprep.mubr.f32.mxu1 %v217_v30  ;;  %v246_v28 = vld [vmem:[%s2423_s0 + $0x540] sm:$0xff]  ;;  %v149_v29 = vld [vmem:[%s2423_s0 + $0x238] sm:$0xff] }
  0x8b   :  { %v249_v30 = vld [vmem:[%s2423_s0 + $0x558] sm:$0xff] }
  0x8d   :  { %445 = vmatmul.mubr.f32.gmra.mrb[38].mxu0 %v116_v31  ;;  %695 = vmatmul.mubr.f32.gmra.mrb[38].mxu1 %v216_v32  ;;  %v148_v31 = vld [vmem:[%s2423_s0 + $0x230] sm:$0xff] }
  0x8e   :  { %449 = vmatprep.mubr.f32.mxu0 %v119_v33  ;;  %699 = vmatprep.mubr.f32.mxu1 %v219_v34  ;;  %v248_v32 = vld [vmem:[%s2423_s0 + $0x550] sm:$0xff]  ;;  %v151_v33 = vld [vmem:[%s2423_s0 + $0x248] sm:$0xff] }
  0x8f   :  { %v251_v34 = vld [vmem:[%s2423_s0 + $0x568] sm:$0xff] }
  0x91   :  { %450 = vmatmul.mubr.f32.gmra.mrb[40].mxu0 %v118_v35  ;;  %700 = vmatmul.mubr.f32.gmra.mrb[40].mxu1 %v218_v36  ;;  %v150_v35 = vld [vmem:[%s2423_s0 + $0x240] sm:$0xff] }
  0x92   :  { %454 = vmatprep.mubr.f32.mxu0 %v121_v37  ;;  %704 = vmatprep.mubr.f32.mxu1 %v221_v38  ;;  %v250_v36 = vld [vmem:[%s2423_s0 + $0x560] sm:$0xff]  ;;  %v153_v37 = vld [vmem:[%s2423_s0 + $0x258] sm:$0xff] }
  0x93   :  { %v253_v38 = vld [vmem:[%s2423_s0 + $0x578] sm:$0xff] }
  0x95   :  { %455 = vmatmul.mubr.f32.gmra.mrb[42].mxu0 %v120_v39  ;;  %705 = vmatmul.mubr.f32.gmra.mrb[42].mxu1 %v220_v40  ;;  %v152_v39 = vld [vmem:[%s2423_s0 + $0x250] sm:$0xff] }
  0x96   :  { %459 = vmatprep.mubr.f32.mxu0 %v123_v41  ;;  %709 = vmatprep.mubr.f32.mxu1 %v223_v42  ;;  %v252_v40 = vld [vmem:[%s2423_s0 + $0x570] sm:$0xff]  ;;  %v155_v41 = vld [vmem:[%s2423_s0 + $0x268] sm:$0xff] }
  0x97   :  { %v255_v42 = vld [vmem:[%s2423_s0 + $0x588] sm:$0xff] }
  0x99   :  { %460 = vmatmul.mubr.f32.gmra.mrb[44].mxu0 %v122_v43  ;;  %710 = vmatmul.mubr.f32.gmra.mrb[44].mxu1 %v222_v44  ;;  %v154_v43 = vld [vmem:[%s2423_s0 + $0x260] sm:$0xff] }
  0x9a   :  { %464 = vmatprep.mubr.f32.mxu0 %v125_v45  ;;  %714 = vmatprep.mubr.f32.mxu1 %v225_v46  ;;  %v254_v44 = vld [vmem:[%s2423_s0 + $0x580] sm:$0xff]  ;;  %v157_v45 = vld [vmem:[%s2423_s0 + $0x278] sm:$0xff] }
  0x9b   :  { %v257_v46 = vld [vmem:[%s2423_s0 + $0x598] sm:$0xff] }
  0x9d   :  { %465 = vmatmul.mubr.f32.gmra.mrb[46].mxu0 %v124_v47  ;;  %715 = vmatmul.mubr.f32.gmra.mrb[46].mxu1 %v224_v48  ;;  %v156_v47 = vld [vmem:[%s2423_s0 + $0x270] sm:$0xff] }
  0x9e   :  { %469 = vmatprep.mubr.f32.mxu0 %v127_v49  ;;  %719 = vmatprep.mubr.f32.mxu1 %v227_v50  ;;  %v256_v48 = vld [vmem:[%s2423_s0 + $0x590] sm:$0xff]  ;;  %v159_v49 = vld [vmem:[%s2423_s0 + $0x288] sm:$0xff] }
  0x9f   :  { %v259_v50 = vld [vmem:[%s2423_s0 + $0x5a8] sm:$0xff] }
  0xa1   :  { %470 = vmatmul.mubr.f32.gmra.mrb[48].mxu0 %v126_v51  ;;  %720 = vmatmul.mubr.f32.gmra.mrb[48].mxu1 %v226_v52  ;;  %v158_v51 = vld [vmem:[%s2423_s0 + $0x280] sm:$0xff] }
  0xa2   :  { %474 = vmatprep.mubr.f32.mxu0 %v129_v53  ;;  %724 = vmatprep.mubr.f32.mxu1 %v229_v54  ;;  %v258_v52 = vld [vmem:[%s2423_s0 + $0x5a0] sm:$0xff]  ;;  %v161_v53 = vld [vmem:[%s2423_s0 + $0x298] sm:$0xff] }
  0xa3   :  { %v261_v54 = vld [vmem:[%s2423_s0 + $0x5b8] sm:$0xff] }
  0xa5   :  { %475 = vmatmul.mubr.f32.gmra.mrb[50].mxu0 %v128_v55  ;;  %725 = vmatmul.mubr.f32.gmra.mrb[50].mxu1 %v228_v56  ;;  %v160_v55 = vld [vmem:[%s2423_s0 + $0x290] sm:$0xff] }
  0xa6   :  { %479 = vmatprep.mubr.f32.mxu0 %v131_v57  ;;  %729 = vmatprep.mubr.f32.mxu1 %v231_v58  ;;  %v260_v56 = vld [vmem:[%s2423_s0 + $0x5b0] sm:$0xff]  ;;  %v163_v57 = vld [vmem:[%s2423_s0 + $0x2a8] sm:$0xff] }
  0xa7   :  { %v263_v58 = vld [vmem:[%s2423_s0 + $0x5c8] sm:$0xff] }
  0xa9   :  { %480 = vmatmul.mubr.f32.gmra.mrb[52].mxu0 %v130_v59  ;;  %730 = vmatmul.mubr.f32.gmra.mrb[52].mxu1 %v230_v60  ;;  %v162_v59 = vld [vmem:[%s2423_s0 + $0x2a0] sm:$0xff] }
  0xaa   :  { %484 = vmatprep.mubr.f32.mxu0 %v133_v61  ;;  %734 = vmatprep.mubr.f32.mxu1 %v233_v62  ;;  %v262_v60 = vld [vmem:[%s2423_s0 + $0x5c0] sm:$0xff]  ;;  %v165_v61 = vld [vmem:[%s2423_s0 + $0x2b8] sm:$0xff] }
  0xab   :  { %v265_v62 = vld [vmem:[%s2423_s0 + $0x5d8] sm:$0xff] }
  0xad   :  { %485 = vmatmul.mubr.f32.gmra.mrb[54].mxu0 %v132_v63  ;;  %735 = vmatmul.mubr.f32.gmra.mrb[54].mxu1 %v232_v0  ;;  %v164_v63 = vld [vmem:[%s2423_s0 + $0x2b0] sm:$0xff] }
  0xae   :  { %489 = vmatprep.mubr.f32.mxu0 %v135_v1  ;;  %739 = vmatprep.mubr.f32.mxu1 %v235_v2  ;;  %v264_v0 = vld [vmem:[%s2423_s0 + $0x5d0] sm:$0xff]  ;;  %v167_v1 = vld [vmem:[%s2423_s0 + $0x2c8] sm:$0xff] }
  0xaf   :  { %v267_v2 = vld [vmem:[%s2423_s0 + $0x5e8] sm:$0xff] }
  0xb1   :  { %490 = vmatmul.mubr.f32.gmra.mrb[56].mxu0 %v134_v3  ;;  %740 = vmatmul.mubr.f32.gmra.mrb[56].mxu1 %v234_v4  ;;  %v166_v3 = vld [vmem:[%s2423_s0 + $0x2c0] sm:$0xff] }
  0xb2   :  { %494 = vmatprep.mubr.f32.mxu0 %v137_v5  ;;  %744 = vmatprep.mubr.f32.mxu1 %v237_v6  ;;  %v266_v4 = vld [vmem:[%s2423_s0 + $0x5e0] sm:$0xff]  ;;  %v169_v5 = vld [vmem:[%s2423_s0 + $0x2d8] sm:$0xff] }
  0xb3   :  { %v269_v6 = vld [vmem:[%s2423_s0 + $0x5f8] sm:$0xff] }
  0xb5   :  { %495 = vmatmul.mubr.f32.gmra.mrb[58].mxu0 %v136_v7  ;;  %745 = vmatmul.mubr.f32.gmra.mrb[58].mxu1 %v236_v8  ;;  %v168_v7 = vld [vmem:[%s2423_s0 + $0x2d0] sm:$0xff] }
  0xb6   :  { %499 = vmatprep.mubr.f32.mxu0 %v139_v9  ;;  %749 = vmatprep.mubr.f32.mxu1 %v239_v10  ;;  %v268_v8 = vld [vmem:[%s2423_s0 + $0x5f0] sm:$0xff]  ;;  %v171_v9 = vld [vmem:[%s2423_s0 + $0x2e8] sm:$0xff] }
  0xb7   :  { %v271_v10 = vld [vmem:[%s2423_s0 + $0x608] sm:$0xff] }
  0xb9   :  { %500 = vmatmul.mubr.f32.gmra.mrb[60].mxu0 %v138_v11  ;;  %750 = vmatmul.mubr.f32.gmra.mrb[60].mxu1 %v238_v12  ;;  %v170_v11 = vld [vmem:[%s2423_s0 + $0x2e0] sm:$0xff] }
  0xba   :  { %504 = vmatprep.mubr.f32.mxu0 %v141_v13  ;;  %754 = vmatprep.mubr.f32.mxu1 %v241_v14  ;;  %v270_v12 = vld [vmem:[%s2423_s0 + $0x600] sm:$0xff]  ;;  %v173_v13 = vld [vmem:[%s2423_s0 + $0x2f8] sm:$0xff] }
  0xbb   :  { %v273_v14 = vld [vmem:[%s2423_s0 + $0x618] sm:$0xff] }
  0xbd   :  { %505 = vmatmul.mubr.f32.gmra.mrb[62].mxu0 %v140_v15  ;;  %755 = vmatmul.mubr.f32.gmra.mrb[62].mxu1 %v240_v16  ;;  %v172_v15 = vld [vmem:[%s2423_s0 + $0x2f0] sm:$0xff] }
  0xbe   :  { %509 = vmatprep.mubr.f32.mxu0 %v143_v17  ;;  %759 = vmatprep.mubr.f32.mxu1 %v243_v18  ;;  %v272_v16 = vld [vmem:[%s2423_s0 + $0x610] sm:$0xff]  ;;  %v175_v17 = vld [vmem:[%s2423_s0 + $0x308] sm:$0xff] }
  0xbf   :  { %v275_v18 = vld [vmem:[%s2423_s0 + $0x628] sm:$0xff] }
  0xc1   :  { %510 = vmatmul.mubr.f32.gmra.mrb[64].mxu0 %v142_v19  ;;  %760 = vmatmul.mubr.f32.gmra.mrb[64].mxu1 %v242_v20  ;;  %v174_v19 = vld [vmem:[%s2423_s0 + $0x300] sm:$0xff] }
  0xc2   :  { %514 = vmatprep.mubr.f32.mxu0 %v145_v21  ;;  %764 = vmatprep.mubr.f32.mxu1 %v245_v22  ;;  %v274_v20 = vld [vmem:[%s2423_s0 + $0x620] sm:$0xff]  ;;  %v177_v21 = vld [vmem:[%s2423_s0 + $0x318] sm:$0xff] }
  0xc3   :  { %v277_v22 = vld [vmem:[%s2423_s0 + $0x638] sm:$0xff] }
  0xc5   :  { %515 = vmatmul.mubr.f32.gmra.mrb[66].mxu0 %v144_v23  ;;  %765 = vmatmul.mubr.f32.gmra.mrb[66].mxu1 %v244_v24  ;;  %v176_v23 = vld [vmem:[%s2423_s0 + $0x310] sm:$0xff] }
  0xc6   :  { %519 = vmatprep.mubr.f32.mxu0 %v147_v25  ;;  %769 = vmatprep.mubr.f32.mxu1 %v247_v26  ;;  %v276_v24 = vld [vmem:[%s2423_s0 + $0x630] sm:$0xff]  ;;  %v1920_v25 = vld [vmem:[%s2424_s2] ss:$0 sm:$0xff] }
  0xc9   :  { %520 = vmatmul.mubr.f32.gmra.mrb[68].mxu0 %v146_v27  ;;  %770 = vmatmul.mubr.f32.gmra.mrb[68].mxu1 %v246_v28 }
  0xca   :  { %524 = vmatprep.mubr.f32.mxu0 %v149_v29  ;;  %774 = vmatprep.mubr.f32.mxu1 %v249_v30 }
  0xcd   :  { %525 = vmatmul.mubr.f32.gmra.mrb[70].mxu0 %v148_v31  ;;  %775 = vmatmul.mubr.f32.gmra.mrb[70].mxu1 %v248_v32 }
  0xce   :  { %529 = vmatprep.mubr.f32.mxu0 %v151_v33  ;;  %779 = vmatprep.mubr.f32.mxu1 %v251_v34 }
  0xd1   :  { %530 = vmatmul.mubr.f32.gmra.mrb[72].mxu0 %v150_v35  ;;  %780 = vmatmul.mubr.f32.gmra.mrb[72].mxu1 %v250_v36 }
  0xd2   :  { %534 = vmatprep.mubr.f32.mxu0 %v153_v37  ;;  %784 = vmatprep.mubr.f32.mxu1 %v253_v38 }
  0xd5   :  { %535 = vmatmul.mubr.f32.gmra.mrb[74].mxu0 %v152_v39  ;;  %785 = vmatmul.mubr.f32.gmra.mrb[74].mxu1 %v252_v40 }
  0xd6   :  { %539 = vmatprep.mubr.f32.mxu0 %v155_v41  ;;  %789 = vmatprep.mubr.f32.mxu1 %v255_v42 }
  0xd9   :  { %540 = vmatmul.mubr.f32.gmra.mrb[76].mxu0 %v154_v43  ;;  %790 = vmatmul.mubr.f32.gmra.mrb[76].mxu1 %v254_v44 }
  0xda   :  { %544 = vmatprep.mubr.f32.mxu0 %v157_v45  ;;  %794 = vmatprep.mubr.f32.mxu1 %v257_v46 }
  0xdd   :  { %545 = vmatmul.mubr.f32.gmra.mrb[78].mxu0 %v156_v47  ;;  %795 = vmatmul.mubr.f32.gmra.mrb[78].mxu1 %v256_v48 }
  0xde   :  { %549 = vmatprep.mubr.f32.mxu0 %v159_v49  ;;  %799 = vmatprep.mubr.f32.mxu1 %v259_v50 }
  0xe1   :  { %550 = vmatmul.mubr.f32.gmra.mrb[80].mxu0 %v158_v51  ;;  %800 = vmatmul.mubr.f32.gmra.mrb[80].mxu1 %v258_v52 }
  0xe2   :  { %554 = vmatprep.mubr.f32.mxu0 %v161_v53  ;;  %804 = vmatprep.mubr.f32.mxu1 %v261_v54 }
  0xe5   :  { %555 = vmatmul.mubr.f32.gmra.mrb[82].mxu0 %v160_v55  ;;  %805 = vmatmul.mubr.f32.gmra.mrb[82].mxu1 %v260_v56 }
  0xe6   :  { %559 = vmatprep.mubr.f32.mxu0 %v163_v57  ;;  %809 = vmatprep.mubr.f32.mxu1 %v263_v58 }
  0xe9   :  { %560 = vmatmul.mubr.f32.gmra.mrb[84].mxu0 %v162_v59  ;;  %810 = vmatmul.mubr.f32.gmra.mrb[84].mxu1 %v262_v60 }
  0xea   :  { %564 = vmatprep.mubr.f32.mxu0 %v165_v61  ;;  %814 = vmatprep.mubr.f32.mxu1 %v265_v62 }
  0xed   :  { %565 = vmatmul.mubr.f32.gmra.mrb[86].mxu0 %v164_v63  ;;  %815 = vmatmul.mubr.f32.gmra.mrb[86].mxu1 %v264_v0 }
  0xee   :  { %569 = vmatprep.mubr.f32.mxu0 %v167_v1  ;;  %819 = vmatprep.mubr.f32.mxu1 %v267_v2 }
  0xf1   :  { %570 = vmatmul.mubr.f32.gmra.mrb[88].mxu0 %v166_v3  ;;  %820 = vmatmul.mubr.f32.gmra.mrb[88].mxu1 %v266_v4 }
  0xf2   :  { %574 = vmatprep.mubr.f32.mxu0 %v169_v5  ;;  %824 = vmatprep.mubr.f32.mxu1 %v269_v6 }
  0xf5   :  { %575 = vmatmul.mubr.f32.gmra.mrb[90].mxu0 %v168_v7  ;;  %825 = vmatmul.mubr.f32.gmra.mrb[90].mxu1 %v268_v8 }
  0xf6   :  { %579 = vmatprep.mubr.f32.mxu0 %v171_v9  ;;  %829 = vmatprep.mubr.f32.mxu1 %v271_v10 }
  0xf9   :  { %580 = vmatmul.mubr.f32.gmra.mrb[92].mxu0 %v170_v11  ;;  %830 = vmatmul.mubr.f32.gmra.mrb[92].mxu1 %v270_v12 }
  0xfa   :  { %584 = vmatprep.mubr.f32.mxu0 %v173_v13  ;;  %834 = vmatprep.mubr.f32.mxu1 %v273_v14 }
  0xfd   :  { %585 = vmatmul.mubr.f32.gmra.mrb[94].mxu0 %v172_v15  ;;  %835 = vmatmul.mubr.f32.gmra.mrb[94].mxu1 %v272_v16 }
  0xfe   :  { %589 = vmatprep.mubr.f32.mxu0 %v175_v17  ;;  %839 = vmatprep.mubr.f32.mxu1 %v275_v18 }
 0x101   :  { %590 = vmatmul.mubr.f32.gmra.mrb[96].mxu0 %v174_v19  ;;  %840 = vmatmul.mubr.f32.gmra.mrb[96].mxu1 %v274_v20 }
 0x102   :  { %594 = vmatprep.mubr.f32.mxu0 %v177_v21  ;;  %844 = vmatprep.mubr.f32.mxu1 %v277_v22 }
 0x105   :  { %595 = vmatmul.mubr.f32.gmra.mrb[98].mxu0 %v176_v23  ;;  %845 = vmatmul.mubr.f32.gmra.mrb[98].mxu1 %v276_v24 }
 0x114   :  { %v351_v26 = vpop.f32.mrb[0].mxu0  ;;  %v601_v27 = vpop.f32.mrb[0].mxu1 }
 0x115   :  { %v352_v28 = vadd.f32 %v1920_v25, %v351_v26  ;;  %v602_v29 = vadd.f32 %v1920_v25, %v601_v27  ;;  %v353_v30 = vpop.f32.mrb[1].mxu0  ;;  %v603_v31 = vpop.f32.mrb[1].mxu1 }
 0x117   :  { %v850_v32 = vmax.f32 %v352_v28, 0.0  ;;  %v900_v33 = vmax.f32 %v602_v29, 0.0 }
 0x118   :  { %v356_v34 = vpop.f32.mrb[2].mxu0  ;;  %v606_v35 = vpop.f32.mrb[2].mxu1 }
 0x119   :  { %951 = vst.msk [vmem:[%s2425_s3] sm:$0xff] %vm950_vm0, %v850_v32  ;;  %1001 = vst.msk [vmem:[%s2425_s3 + $0x190] sm:$0xff] %vm950_vm0, %v900_v33  ;;  %v357_v36 = vadd.f32 %v1920_v25, %v356_v34  ;;  %v607_v37 = vadd.f32 %v1920_v25, %v606_v35  ;;  %v358_v38 = vpop.f32.mrb[3].mxu0  ;;  %v608_v39 = vpop.f32.mrb[3].mxu1 }
 0x11b   :  { %v851_v40 = vmax.f32 %v357_v36, 0.0  ;;  %v901_v41 = vmax.f32 %v607_v37, 0.0 }
 0x11c   :  { %v361_v42 = vpop.f32.mrb[4].mxu0  ;;  %v611_v43 = vpop.f32.mrb[4].mxu1 }
 0x11d   :  { %952 = vst.msk [vmem:[%s2425_s3 + $0x8] sm:$0xff] %vm950_vm0, %v851_v40  ;;  %1002 = vst.msk [vmem:[%s2425_s3 + $0x198] sm:$0xff] %vm950_vm0, %v901_v41  ;;  %v362_v44 = vadd.f32 %v1920_v25, %v361_v42  ;;  %v612_v45 = vadd.f32 %v1920_v25, %v611_v43  ;;  %v363_v46 = vpop.f32.mrb[5].mxu0  ;;  %v613_v47 = vpop.f32.mrb[5].mxu1 }
 0x11f   :  { %v852_v48 = vmax.f32 %v362_v44, 0.0  ;;  %v902_v49 = vmax.f32 %v612_v45, 0.0 }
 0x120   :  { %v366_v50 = vpop.f32.mrb[6].mxu0  ;;  %v616_v51 = vpop.f32.mrb[6].mxu1 }
 0x121   :  { %953 = vst.msk [vmem:[%s2425_s3 + $0x10] sm:$0xff] %vm950_vm0, %v852_v48  ;;  %1003 = vst.msk [vmem:[%s2425_s3 + $0x1a0] sm:$0xff] %vm950_vm0, %v902_v49  ;;  %v367_v52 = vadd.f32 %v1920_v25, %v366_v50  ;;  %v617_v53 = vadd.f32 %v1920_v25, %v616_v51  ;;  %v368_v54 = vpop.f32.mrb[7].mxu0  ;;  %v618_v55 = vpop.f32.mrb[7].mxu1 }
 0x123   :  { %v853_v56 = vmax.f32 %v367_v52, 0.0  ;;  %v903_v57 = vmax.f32 %v617_v53, 0.0 }
 0x124   :  { %v371_v58 = vpop.f32.mrb[8].mxu0  ;;  %v621_v59 = vpop.f32.mrb[8].mxu1 }
 0x125   :  { %954 = vst.msk [vmem:[%s2425_s3 + $0x18] sm:$0xff] %vm950_vm0, %v853_v56  ;;  %1004 = vst.msk [vmem:[%s2425_s3 + $0x1a8] sm:$0xff] %vm950_vm0, %v903_v57  ;;  %v372_v60 = vadd.f32 %v1920_v25, %v371_v58  ;;  %v622_v61 = vadd.f32 %v1920_v25, %v621_v59  ;;  %v373_v62 = vpop.f32.mrb[9].mxu0  ;;  %v623_v63 = vpop.f32.mrb[9].mxu1 }
 0x127   :  { %v854_v0 = vmax.f32 %v372_v60, 0.0  ;;  %v904_v1 = vmax.f32 %v622_v61, 0.0 }
 0x128   :  { %v376_v2 = vpop.f32.mrb[10].mxu0  ;;  %v626_v3 = vpop.f32.mrb[10].mxu1 }
 0x129   :  { %955 = vst.msk [vmem:[%s2425_s3 + $0x20] sm:$0xff] %vm950_vm0, %v854_v0  ;;  %1005 = vst.msk [vmem:[%s2425_s3 + $0x1b0] sm:$0xff] %vm950_vm0, %v904_v1  ;;  %v377_v4 = vadd.f32 %v1920_v25, %v376_v2  ;;  %v627_v5 = vadd.f32 %v1920_v25, %v626_v3  ;;  %v378_v6 = vpop.f32.mrb[11].mxu0  ;;  %v628_v7 = vpop.f32.mrb[11].mxu1 }
 0x12b   :  { %v855_v8 = vmax.f32 %v377_v4, 0.0  ;;  %v905_v9 = vmax.f32 %v627_v5, 0.0 }
 0x12c   :  { %v381_v10 = vpop.f32.mrb[12].mxu0  ;;  %v631_v11 = vpop.f32.mrb[12].mxu1 }
 0x12d   :  { %956 = vst.msk [vmem:[%s2425_s3 + $0x28] sm:$0xff] %vm950_vm0, %v855_v8  ;;  %1006 = vst.msk [vmem:[%s2425_s3 + $0x1b8] sm:$0xff] %vm950_vm0, %v905_v9  ;;  %v382_v12 = vadd.f32 %v1920_v25, %v381_v10  ;;  %v632_v13 = vadd.f32 %v1920_v25, %v631_v11  ;;  %v383_v14 = vpop.f32.mrb[13].mxu0  ;;  %v633_v15 = vpop.f32.mrb[13].mxu1 }
 0x12f   :  { %v856_v16 = vmax.f32 %v382_v12, 0.0  ;;  %v906_v17 = vmax.f32 %v632_v13, 0.0 }
 0x130   :  { %v386_v18 = vpop.f32.mrb[14].mxu0  ;;  %v636_v19 = vpop.f32.mrb[14].mxu1 }
 0x131   :  { %957 = vst.msk [vmem:[%s2425_s3 + $0x30] sm:$0xff] %vm950_vm0, %v856_v16  ;;  %1007 = vst.msk [vmem:[%s2425_s3 + $0x1c0] sm:$0xff] %vm950_vm0, %v906_v17  ;;  %v387_v20 = vadd.f32 %v1920_v25, %v386_v18  ;;  %v637_v21 = vadd.f32 %v1920_v25, %v636_v19  ;;  %v388_v22 = vpop.f32.mrb[15].mxu0  ;;  %v638_v23 = vpop.f32.mrb[15].mxu1 }
 0x133   :  { %v857_v24 = vmax.f32 %v387_v20, 0.0  ;;  %v907_v26 = vmax.f32 %v637_v21, 0.0 }
 0x134   :  { %v391_v27 = vpop.f32.mrb[16].mxu0  ;;  %v641_v28 = vpop.f32.mrb[16].mxu1 }
 0x135   :  { %958 = vst.msk [vmem:[%s2425_s3 + $0x38] sm:$0xff] %vm950_vm0, %v857_v24  ;;  %1008 = vst.msk [vmem:[%s2425_s3 + $0x1c8] sm:$0xff] %vm950_vm0, %v907_v26  ;;  %v392_v29 = vadd.f32 %v1920_v25, %v391_v27  ;;  %v642_v30 = vadd.f32 %v1920_v25, %v641_v28  ;;  %v393_v31 = vpop.f32.mrb[17].mxu0  ;;  %v643_v32 = vpop.f32.mrb[17].mxu1 }
 0x137   :  { %v858_v33 = vmax.f32 %v392_v29, 0.0  ;;  %v908_v34 = vmax.f32 %v642_v30, 0.0 }
 0x138   :  { %v396_v35 = vpop.f32.mrb[18].mxu0  ;;  %v646_v36 = vpop.f32.mrb[18].mxu1 }
 0x139   :  { %959 = vst.msk [vmem:[%s2425_s3 + $0x40] sm:$0xff] %vm950_vm0, %v858_v33  ;;  %1009 = vst.msk [vmem:[%s2425_s3 + $0x1d0] sm:$0xff] %vm950_vm0, %v908_v34  ;;  %v397_v37 = vadd.f32 %v1920_v25, %v396_v35  ;;  %v647_v38 = vadd.f32 %v1920_v25, %v646_v36  ;;  %v398_v39 = vpop.f32.mrb[19].mxu0  ;;  %v648_v40 = vpop.f32.mrb[19].mxu1 }
 0x13b   :  { %v859_v41 = vmax.f32 %v397_v37, 0.0  ;;  %v909_v42 = vmax.f32 %v647_v38, 0.0 }
 0x13c   :  { %v401_v43 = vpop.f32.mrb[20].mxu0  ;;  %v651_v44 = vpop.f32.mrb[20].mxu1 }
 0x13d   :  { %960 = vst.msk [vmem:[%s2425_s3 + $0x48] sm:$0xff] %vm950_vm0, %v859_v41  ;;  %1010 = vst.msk [vmem:[%s2425_s3 + $0x1d8] sm:$0xff] %vm950_vm0, %v909_v42  ;;  %v402_v45 = vadd.f32 %v1920_v25, %v401_v43  ;;  %v652_v46 = vadd.f32 %v1920_v25, %v651_v44  ;;  %v403_v47 = vpop.f32.mrb[21].mxu0  ;;  %v653_v48 = vpop.f32.mrb[21].mxu1 }
 0x13f   :  { %v860_v49 = vmax.f32 %v402_v45, 0.0  ;;  %v910_v50 = vmax.f32 %v652_v46, 0.0 }
 0x140   :  { %v406_v51 = vpop.f32.mrb[22].mxu0  ;;  %v656_v52 = vpop.f32.mrb[22].mxu1 }
 0x141   :  { %961 = vst.msk [vmem:[%s2425_s3 + $0x50] sm:$0xff] %vm950_vm0, %v860_v49  ;;  %1011 = vst.msk [vmem:[%s2425_s3 + $0x1e0] sm:$0xff] %vm950_vm0, %v910_v50  ;;  %v407_v53 = vadd.f32 %v1920_v25, %v406_v51  ;;  %v657_v54 = vadd.f32 %v1920_v25, %v656_v52  ;;  %v408_v55 = vpop.f32.mrb[23].mxu0  ;;  %v658_v56 = vpop.f32.mrb[23].mxu1 }
 0x143   :  { %v861_v57 = vmax.f32 %v407_v53, 0.0  ;;  %v911_v58 = vmax.f32 %v657_v54, 0.0 }
 0x144   :  { %v411_v59 = vpop.f32.mrb[24].mxu0  ;;  %v661_v60 = vpop.f32.mrb[24].mxu1 }
 0x145   :  { %962 = vst.msk [vmem:[%s2425_s3 + $0x58] sm:$0xff] %vm950_vm0, %v861_v57  ;;  %1012 = vst.msk [vmem:[%s2425_s3 + $0x1e8] sm:$0xff] %vm950_vm0, %v911_v58  ;;  %v412_v61 = vadd.f32 %v1920_v25, %v411_v59  ;;  %v662_v62 = vadd.f32 %v1920_v25, %v661_v60  ;;  %v413_v63 = vpop.f32.mrb[25].mxu0  ;;  %v663_v0 = vpop.f32.mrb[25].mxu1 }
 0x147   :  { %v862_v1 = vmax.f32 %v412_v61, 0.0  ;;  %v912_v2 = vmax.f32 %v662_v62, 0.0 }
 0x148   :  { %v416_v3 = vpop.f32.mrb[26].mxu0  ;;  %v666_v4 = vpop.f32.mrb[26].mxu1 }
 0x149   :  { %963 = vst.msk [vmem:[%s2425_s3 + $0x60] sm:$0xff] %vm950_vm0, %v862_v1  ;;  %1013 = vst.msk [vmem:[%s2425_s3 + $0x1f0] sm:$0xff] %vm950_vm0, %v912_v2  ;;  %v417_v5 = vadd.f32 %v1920_v25, %v416_v3  ;;  %v667_v6 = vadd.f32 %v1920_v25, %v666_v4  ;;  %v418_v7 = vpop.f32.mrb[27].mxu0  ;;  %v668_v8 = vpop.f32.mrb[27].mxu1 }
 0x14b   :  { %v863_v9 = vmax.f32 %v417_v5, 0.0  ;;  %v913_v10 = vmax.f32 %v667_v6, 0.0 }
 0x14c   :  { %v421_v11 = vpop.f32.mrb[28].mxu0  ;;  %v671_v12 = vpop.f32.mrb[28].mxu1 }
 0x14d   :  { %964 = vst.msk [vmem:[%s2425_s3 + $0x68] sm:$0xff] %vm950_vm0, %v863_v9  ;;  %1014 = vst.msk [vmem:[%s2425_s3 + $0x1f8] sm:$0xff] %vm950_vm0, %v913_v10  ;;  %v422_v13 = vadd.f32 %v1920_v25, %v421_v11  ;;  %v672_v14 = vadd.f32 %v1920_v25, %v671_v12  ;;  %v423_v15 = vpop.f32.mrb[29].mxu0  ;;  %v673_v16 = vpop.f32.mrb[29].mxu1 }
 0x14f   :  { %v864_v17 = vmax.f32 %v422_v13, 0.0  ;;  %v914_v18 = vmax.f32 %v672_v14, 0.0 }
 0x150   :  { %v426_v19 = vpop.f32.mrb[30].mxu0  ;;  %v676_v20 = vpop.f32.mrb[30].mxu1 }
 0x151   :  { %965 = vst.msk [vmem:[%s2425_s3 + $0x70] sm:$0xff] %vm950_vm0, %v864_v17  ;;  %1015 = vst.msk [vmem:[%s2425_s3 + $0x200] sm:$0xff] %vm950_vm0, %v914_v18  ;;  %v427_v21 = vadd.f32 %v1920_v25, %v426_v19  ;;  %v677_v22 = vadd.f32 %v1920_v25, %v676_v20  ;;  %v428_v23 = vpop.f32.mrb[31].mxu0  ;;  %v678_v24 = vpop.f32.mrb[31].mxu1 }
 0x153   :  { %v865_v26 = vmax.f32 %v427_v21, 0.0  ;;  %v915_v27 = vmax.f32 %v677_v22, 0.0 }
 0x154   :  { %v431_v28 = vpop.f32.mrb[32].mxu0  ;;  %v681_v29 = vpop.f32.mrb[32].mxu1 }
 0x155   :  { %966 = vst.msk [vmem:[%s2425_s3 + $0x78] sm:$0xff] %vm950_vm0, %v865_v26  ;;  %1016 = vst.msk [vmem:[%s2425_s3 + $0x208] sm:$0xff] %vm950_vm0, %v915_v27  ;;  %v432_v30 = vadd.f32 %v1920_v25, %v431_v28  ;;  %v682_v31 = vadd.f32 %v1920_v25, %v681_v29  ;;  %v433_v32 = vpop.f32.mrb[33].mxu0  ;;  %v683_v33 = vpop.f32.mrb[33].mxu1 }
 0x157   :  { %v866_v34 = vmax.f32 %v432_v30, 0.0  ;;  %v916_v35 = vmax.f32 %v682_v31, 0.0 }
 0x158   :  { %v436_v36 = vpop.f32.mrb[34].mxu0  ;;  %v686_v37 = vpop.f32.mrb[34].mxu1 }
 0x159   :  { %967 = vst.msk [vmem:[%s2425_s3 + $0x80] sm:$0xff] %vm950_vm0, %v866_v34  ;;  %1017 = vst.msk [vmem:[%s2425_s3 + $0x210] sm:$0xff] %vm950_vm0, %v916_v35  ;;  %v437_v38 = vadd.f32 %v1920_v25, %v436_v36  ;;  %v687_v39 = vadd.f32 %v1920_v25, %v686_v37  ;;  %v438_v40 = vpop.f32.mrb[35].mxu0  ;;  %v688_v41 = vpop.f32.mrb[35].mxu1 }
 0x15b   :  { %v867_v42 = vmax.f32 %v437_v38, 0.0  ;;  %v917_v43 = vmax.f32 %v687_v39, 0.0 }
 0x15c   :  { %v441_v44 = vpop.f32.mrb[36].mxu0  ;;  %v691_v45 = vpop.f32.mrb[36].mxu1 }
 0x15d   :  { %968 = vst.msk [vmem:[%s2425_s3 + $0x88] sm:$0xff] %vm950_vm0, %v867_v42  ;;  %1018 = vst.msk [vmem:[%s2425_s3 + $0x218] sm:$0xff] %vm950_vm0, %v917_v43  ;;  %v442_v46 = vadd.f32 %v1920_v25, %v441_v44  ;;  %v692_v47 = vadd.f32 %v1920_v25, %v691_v45  ;;  %v443_v48 = vpop.f32.mrb[37].mxu0  ;;  %v693_v49 = vpop.f32.mrb[37].mxu1 }
 0x15f   :  { %v868_v50 = vmax.f32 %v442_v46, 0.0  ;;  %v918_v51 = vmax.f32 %v692_v47, 0.0 }
 0x160   :  { %v446_v52 = vpop.f32.mrb[38].mxu0  ;;  %v696_v53 = vpop.f32.mrb[38].mxu1 }
 0x161   :  { %969 = vst.msk [vmem:[%s2425_s3 + $0x90] sm:$0xff] %vm950_vm0, %v868_v50  ;;  %1019 = vst.msk [vmem:[%s2425_s3 + $0x220] sm:$0xff] %vm950_vm0, %v918_v51  ;;  %v447_v54 = vadd.f32 %v1920_v25, %v446_v52  ;;  %v697_v55 = vadd.f32 %v1920_v25, %v696_v53  ;;  %v448_v56 = vpop.f32.mrb[39].mxu0  ;;  %v698_v57 = vpop.f32.mrb[39].mxu1 }
 0x163   :  { %v869_v58 = vmax.f32 %v447_v54, 0.0  ;;  %v919_v59 = vmax.f32 %v697_v55, 0.0 }
 0x164   :  { %v451_v60 = vpop.f32.mrb[40].mxu0  ;;  %v701_v61 = vpop.f32.mrb[40].mxu1 }
 0x165   :  { %970 = vst.msk [vmem:[%s2425_s3 + $0x98] sm:$0xff] %vm950_vm0, %v869_v58  ;;  %1020 = vst.msk [vmem:[%s2425_s3 + $0x228] sm:$0xff] %vm950_vm0, %v919_v59  ;;  %v452_v62 = vadd.f32 %v1920_v25, %v451_v60  ;;  %v702_v63 = vadd.f32 %v1920_v25, %v701_v61  ;;  %v453_v0 = vpop.f32.mrb[41].mxu0  ;;  %v703_v1 = vpop.f32.mrb[41].mxu1 }
 0x167   :  { %v870_v2 = vmax.f32 %v452_v62, 0.0  ;;  %v920_v3 = vmax.f32 %v702_v63, 0.0 }
 0x168   :  { %v456_v4 = vpop.f32.mrb[42].mxu0  ;;  %v706_v5 = vpop.f32.mrb[42].mxu1 }
 0x169   :  { %971 = vst.msk [vmem:[%s2425_s3 + $0xa0] sm:$0xff] %vm950_vm0, %v870_v2  ;;  %1021 = vst.msk [vmem:[%s2425_s3 + $0x230] sm:$0xff] %vm950_vm0, %v920_v3  ;;  %v457_v6 = vadd.f32 %v1920_v25, %v456_v4  ;;  %v707_v7 = vadd.f32 %v1920_v25, %v706_v5  ;;  %v458_v8 = vpop.f32.mrb[43].mxu0  ;;  %v708_v9 = vpop.f32.mrb[43].mxu1 }
 0x16b   :  { %v871_v10 = vmax.f32 %v457_v6, 0.0  ;;  %v921_v11 = vmax.f32 %v707_v7, 0.0 }
 0x16c   :  { %v461_v12 = vpop.f32.mrb[44].mxu0  ;;  %v711_v13 = vpop.f32.mrb[44].mxu1 }
 0x16d   :  { %972 = vst.msk [vmem:[%s2425_s3 + $0xa8] sm:$0xff] %vm950_vm0, %v871_v10  ;;  %1022 = vst.msk [vmem:[%s2425_s3 + $0x238] sm:$0xff] %vm950_vm0, %v921_v11  ;;  %v462_v14 = vadd.f32 %v1920_v25, %v461_v12  ;;  %v712_v15 = vadd.f32 %v1920_v25, %v711_v13  ;;  %v463_v16 = vpop.f32.mrb[45].mxu0  ;;  %v713_v17 = vpop.f32.mrb[45].mxu1 }
 0x16f   :  { %v872_v18 = vmax.f32 %v462_v14, 0.0  ;;  %v922_v19 = vmax.f32 %v712_v15, 0.0 }
 0x170   :  { %v466_v20 = vpop.f32.mrb[46].mxu0  ;;  %v716_v21 = vpop.f32.mrb[46].mxu1 }
 0x171   :  { %973 = vst.msk [vmem:[%s2425_s3 + $0xb0] sm:$0xff] %vm950_vm0, %v872_v18  ;;  %1023 = vst.msk [vmem:[%s2425_s3 + $0x240] sm:$0xff] %vm950_vm0, %v922_v19  ;;  %v467_v22 = vadd.f32 %v1920_v25, %v466_v20  ;;  %v717_v23 = vadd.f32 %v1920_v25, %v716_v21  ;;  %v468_v24 = vpop.f32.mrb[47].mxu0  ;;  %v718_v26 = vpop.f32.mrb[47].mxu1 }
 0x173   :  { %v873_v27 = vmax.f32 %v467_v22, 0.0  ;;  %v923_v28 = vmax.f32 %v717_v23, 0.0 }
 0x174   :  { %v471_v29 = vpop.f32.mrb[48].mxu0  ;;  %v721_v30 = vpop.f32.mrb[48].mxu1 }
 0x175   :  { %974 = vst.msk [vmem:[%s2425_s3 + $0xb8] sm:$0xff] %vm950_vm0, %v873_v27  ;;  %1024 = vst.msk [vmem:[%s2425_s3 + $0x248] sm:$0xff] %vm950_vm0, %v923_v28  ;;  %v472_v31 = vadd.f32 %v1920_v25, %v471_v29  ;;  %v722_v32 = vadd.f32 %v1920_v25, %v721_v30  ;;  %v473_v33 = vpop.f32.mrb[49].mxu0  ;;  %v723_v34 = vpop.f32.mrb[49].mxu1 }
 0x177   :  { %v874_v35 = vmax.f32 %v472_v31, 0.0  ;;  %v924_v36 = vmax.f32 %v722_v32, 0.0 }
 0x178   :  { %v476_v37 = vpop.f32.mrb[50].mxu0  ;;  %v726_v38 = vpop.f32.mrb[50].mxu1 }
 0x179   :  { %975 = vst.msk [vmem:[%s2425_s3 + $0xc0] sm:$0xff] %vm950_vm0, %v874_v35  ;;  %1025 = vst.msk [vmem:[%s2425_s3 + $0x250] sm:$0xff] %vm950_vm0, %v924_v36  ;;  %v477_v39 = vadd.f32 %v1920_v25, %v476_v37  ;;  %v727_v40 = vadd.f32 %v1920_v25, %v726_v38  ;;  %v478_v41 = vpop.f32.mrb[51].mxu0  ;;  %v728_v42 = vpop.f32.mrb[51].mxu1 }
 0x17b   :  { %v875_v43 = vmax.f32 %v477_v39, 0.0  ;;  %v925_v44 = vmax.f32 %v727_v40, 0.0 }
 0x17c   :  { %v481_v45 = vpop.f32.mrb[52].mxu0  ;;  %v731_v46 = vpop.f32.mrb[52].mxu1 }
 0x17d   :  { %976 = vst.msk [vmem:[%s2425_s3 + $0xc8] sm:$0xff] %vm950_vm0, %v875_v43  ;;  %1026 = vst.msk [vmem:[%s2425_s3 + $0x258] sm:$0xff] %vm950_vm0, %v925_v44  ;;  %v482_v47 = vadd.f32 %v1920_v25, %v481_v45  ;;  %v732_v48 = vadd.f32 %v1920_v25, %v731_v46  ;;  %v483_v49 = vpop.f32.mrb[53].mxu0  ;;  %v733_v50 = vpop.f32.mrb[53].mxu1 }
 0x17f   :  { %v876_v51 = vmax.f32 %v482_v47, 0.0  ;;  %v926_v52 = vmax.f32 %v732_v48, 0.0 }
 0x180   :  { %v486_v53 = vpop.f32.mrb[54].mxu0  ;;  %v736_v54 = vpop.f32.mrb[54].mxu1 }
 0x181   :  { %977 = vst.msk [vmem:[%s2425_s3 + $0xd0] sm:$0xff] %vm950_vm0, %v876_v51  ;;  %1027 = vst.msk [vmem:[%s2425_s3 + $0x260] sm:$0xff] %vm950_vm0, %v926_v52  ;;  %v487_v55 = vadd.f32 %v1920_v25, %v486_v53  ;;  %v737_v56 = vadd.f32 %v1920_v25, %v736_v54  ;;  %v488_v57 = vpop.f32.mrb[55].mxu0  ;;  %v738_v58 = vpop.f32.mrb[55].mxu1 }
 0x183   :  { %v877_v59 = vmax.f32 %v487_v55, 0.0  ;;  %v927_v60 = vmax.f32 %v737_v56, 0.0 }
 0x184   :  { %v491_v61 = vpop.f32.mrb[56].mxu0  ;;  %v741_v62 = vpop.f32.mrb[56].mxu1 }
 0x185   :  { %978 = vst.msk [vmem:[%s2425_s3 + $0xd8] sm:$0xff] %vm950_vm0, %v877_v59  ;;  %1028 = vst.msk [vmem:[%s2425_s3 + $0x268] sm:$0xff] %vm950_vm0, %v927_v60  ;;  %v492_v63 = vadd.f32 %v1920_v25, %v491_v61  ;;  %v742_v0 = vadd.f32 %v1920_v25, %v741_v62  ;;  %v493_v1 = vpop.f32.mrb[57].mxu0  ;;  %v743_v2 = vpop.f32.mrb[57].mxu1 }
 0x187   :  { %v878_v3 = vmax.f32 %v492_v63, 0.0  ;;  %v928_v4 = vmax.f32 %v742_v0, 0.0 }
 0x188   :  { %v496_v5 = vpop.f32.mrb[58].mxu0  ;;  %v746_v6 = vpop.f32.mrb[58].mxu1 }
 0x189   :  { %979 = vst.msk [vmem:[%s2425_s3 + $0xe0] sm:$0xff] %vm950_vm0, %v878_v3  ;;  %1029 = vst.msk [vmem:[%s2425_s3 + $0x270] sm:$0xff] %vm950_vm0, %v928_v4  ;;  %v497_v7 = vadd.f32 %v1920_v25, %v496_v5  ;;  %v747_v8 = vadd.f32 %v1920_v25, %v746_v6  ;;  %v498_v9 = vpop.f32.mrb[59].mxu0  ;;  %v748_v10 = vpop.f32.mrb[59].mxu1 }
 0x18b   :  { %v879_v11 = vmax.f32 %v497_v7, 0.0  ;;  %v929_v12 = vmax.f32 %v747_v8, 0.0 }
 0x18c   :  { %v501_v13 = vpop.f32.mrb[60].mxu0  ;;  %v751_v14 = vpop.f32.mrb[60].mxu1 }
 0x18d   :  { %980 = vst.msk [vmem:[%s2425_s3 + $0xe8] sm:$0xff] %vm950_vm0, %v879_v11  ;;  %1030 = vst.msk [vmem:[%s2425_s3 + $0x278] sm:$0xff] %vm950_vm0, %v929_v12  ;;  %v502_v15 = vadd.f32 %v1920_v25, %v501_v13  ;;  %v752_v16 = vadd.f32 %v1920_v25, %v751_v14  ;;  %v503_v17 = vpop.f32.mrb[61].mxu0  ;;  %v753_v18 = vpop.f32.mrb[61].mxu1 }
 0x18f   :  { %v880_v19 = vmax.f32 %v502_v15, 0.0  ;;  %v930_v20 = vmax.f32 %v752_v16, 0.0 }
 0x190   :  { %v506_v21 = vpop.f32.mrb[62].mxu0  ;;  %v756_v22 = vpop.f32.mrb[62].mxu1 }
 0x191   :  { %981 = vst.msk [vmem:[%s2425_s3 + $0xf0] sm:$0xff] %vm950_vm0, %v880_v19  ;;  %1031 = vst.msk [vmem:[%s2425_s3 + $0x280] sm:$0xff] %vm950_vm0, %v930_v20  ;;  %v507_v23 = vadd.f32 %v1920_v25, %v506_v21  ;;  %v757_v24 = vadd.f32 %v1920_v25, %v756_v22  ;;  %v508_v26 = vpop.f32.mrb[63].mxu0  ;;  %v758_v27 = vpop.f32.mrb[63].mxu1 }
 0x193   :  { %v881_v28 = vmax.f32 %v507_v23, 0.0  ;;  %v931_v29 = vmax.f32 %v757_v24, 0.0 }
 0x194   :  { %v511_v30 = vpop.f32.mrb[64].mxu0  ;;  %v761_v31 = vpop.f32.mrb[64].mxu1 }
 0x195   :  { %982 = vst.msk [vmem:[%s2425_s3 + $0xf8] sm:$0xff] %vm950_vm0, %v881_v28  ;;  %1032 = vst.msk [vmem:[%s2425_s3 + $0x288] sm:$0xff] %vm950_vm0, %v931_v29  ;;  %v512_v32 = vadd.f32 %v1920_v25, %v511_v30  ;;  %v762_v33 = vadd.f32 %v1920_v25, %v761_v31  ;;  %v513_v34 = vpop.f32.mrb[65].mxu0  ;;  %v763_v35 = vpop.f32.mrb[65].mxu1 }
 0x197   :  { %v882_v36 = vmax.f32 %v512_v32, 0.0  ;;  %v932_v37 = vmax.f32 %v762_v33, 0.0 }
 0x198   :  { %v516_v38 = vpop.f32.mrb[66].mxu0  ;;  %v766_v39 = vpop.f32.mrb[66].mxu1 }
 0x199   :  { %983 = vst.msk [vmem:[%s2425_s3 + $0x100] sm:$0xff] %vm950_vm0, %v882_v36  ;;  %1033 = vst.msk [vmem:[%s2425_s3 + $0x290] sm:$0xff] %vm950_vm0, %v932_v37  ;;  %v517_v40 = vadd.f32 %v1920_v25, %v516_v38  ;;  %v767_v41 = vadd.f32 %v1920_v25, %v766_v39  ;;  %v518_v42 = vpop.f32.mrb[67].mxu0  ;;  %v768_v43 = vpop.f32.mrb[67].mxu1 }
 0x19b   :  { %v883_v44 = vmax.f32 %v517_v40, 0.0  ;;  %v933_v45 = vmax.f32 %v767_v41, 0.0 }
 0x19c   :  { %v521_v46 = vpop.f32.mrb[68].mxu0  ;;  %v771_v47 = vpop.f32.mrb[68].mxu1 }
 0x19d   :  { %984 = vst.msk [vmem:[%s2425_s3 + $0x108] sm:$0xff] %vm950_vm0, %v883_v44  ;;  %1034 = vst.msk [vmem:[%s2425_s3 + $0x298] sm:$0xff] %vm950_vm0, %v933_v45  ;;  %v522_v48 = vadd.f32 %v1920_v25, %v521_v46  ;;  %v772_v49 = vadd.f32 %v1920_v25, %v771_v47  ;;  %v523_v50 = vpop.f32.mrb[69].mxu0  ;;  %v773_v51 = vpop.f32.mrb[69].mxu1 }
 0x19f   :  { %v884_v52 = vmax.f32 %v522_v48, 0.0  ;;  %v934_v53 = vmax.f32 %v772_v49, 0.0 }
 0x1a0   :  { %v526_v54 = vpop.f32.mrb[70].mxu0  ;;  %v776_v55 = vpop.f32.mrb[70].mxu1 }
 0x1a1   :  { %985 = vst.msk [vmem:[%s2425_s3 + $0x110] sm:$0xff] %vm950_vm0, %v884_v52  ;;  %1035 = vst.msk [vmem:[%s2425_s3 + $0x2a0] sm:$0xff] %vm950_vm0, %v934_v53  ;;  %v527_v56 = vadd.f32 %v1920_v25, %v526_v54  ;;  %v777_v57 = vadd.f32 %v1920_v25, %v776_v55  ;;  %v528_v58 = vpop.f32.mrb[71].mxu0  ;;  %v778_v59 = vpop.f32.mrb[71].mxu1 }
 0x1a3   :  { %v885_v60 = vmax.f32 %v527_v56, 0.0  ;;  %v935_v61 = vmax.f32 %v777_v57, 0.0 }
 0x1a4   :  { %v531_v62 = vpop.f32.mrb[72].mxu0  ;;  %v781_v63 = vpop.f32.mrb[72].mxu1 }
 0x1a5   :  { %986 = vst.msk [vmem:[%s2425_s3 + $0x118] sm:$0xff] %vm950_vm0, %v885_v60  ;;  %1036 = vst.msk [vmem:[%s2425_s3 + $0x2a8] sm:$0xff] %vm950_vm0, %v935_v61  ;;  %v532_v0 = vadd.f32 %v1920_v25, %v531_v62  ;;  %v782_v1 = vadd.f32 %v1920_v25, %v781_v63  ;;  %v533_v2 = vpop.f32.mrb[73].mxu0  ;;  %v783_v3 = vpop.f32.mrb[73].mxu1 }
 0x1a7   :  { %v886_v4 = vmax.f32 %v532_v0, 0.0  ;;  %v936_v5 = vmax.f32 %v782_v1, 0.0 }
 0x1a8   :  { %v536_v6 = vpop.f32.mrb[74].mxu0  ;;  %v786_v7 = vpop.f32.mrb[74].mxu1 }
 0x1a9   :  { %987 = vst.msk [vmem:[%s2425_s3 + $0x120] sm:$0xff] %vm950_vm0, %v886_v4  ;;  %1037 = vst.msk [vmem:[%s2425_s3 + $0x2b0] sm:$0xff] %vm950_vm0, %v936_v5  ;;  %v537_v8 = vadd.f32 %v1920_v25, %v536_v6  ;;  %v787_v9 = vadd.f32 %v1920_v25, %v786_v7  ;;  %v538_v10 = vpop.f32.mrb[75].mxu0  ;;  %v788_v11 = vpop.f32.mrb[75].mxu1 }
 0x1ab   :  { %v887_v12 = vmax.f32 %v537_v8, 0.0  ;;  %v937_v13 = vmax.f32 %v787_v9, 0.0 }
 0x1ac   :  { %v541_v14 = vpop.f32.mrb[76].mxu0  ;;  %v791_v15 = vpop.f32.mrb[76].mxu1 }
 0x1ad   :  { %988 = vst.msk [vmem:[%s2425_s3 + $0x128] sm:$0xff] %vm950_vm0, %v887_v12  ;;  %1038 = vst.msk [vmem:[%s2425_s3 + $0x2b8] sm:$0xff] %vm950_vm0, %v937_v13  ;;  %v542_v16 = vadd.f32 %v1920_v25, %v541_v14  ;;  %v792_v17 = vadd.f32 %v1920_v25, %v791_v15  ;;  %v543_v18 = vpop.f32.mrb[77].mxu0  ;;  %v793_v19 = vpop.f32.mrb[77].mxu1 }
 0x1af   :  { %v888_v20 = vmax.f32 %v542_v16, 0.0  ;;  %v938_v21 = vmax.f32 %v792_v17, 0.0 }
 0x1b0   :  { %v546_v22 = vpop.f32.mrb[78].mxu0  ;;  %v796_v23 = vpop.f32.mrb[78].mxu1 }
 0x1b1   :  { %989 = vst.msk [vmem:[%s2425_s3 + $0x130] sm:$0xff] %vm950_vm0, %v888_v20  ;;  %1039 = vst.msk [vmem:[%s2425_s3 + $0x2c0] sm:$0xff] %vm950_vm0, %v938_v21  ;;  %v547_v24 = vadd.f32 %v1920_v25, %v546_v22  ;;  %v797_v26 = vadd.f32 %v1920_v25, %v796_v23  ;;  %v548_v27 = vpop.f32.mrb[79].mxu0  ;;  %v798_v28 = vpop.f32.mrb[79].mxu1 }
 0x1b3   :  { %v889_v29 = vmax.f32 %v547_v24, 0.0  ;;  %v939_v30 = vmax.f32 %v797_v26, 0.0 }
 0x1b4   :  { %v551_v31 = vpop.f32.mrb[80].mxu0  ;;  %v801_v32 = vpop.f32.mrb[80].mxu1 }
 0x1b5   :  { %990 = vst.msk [vmem:[%s2425_s3 + $0x138] sm:$0xff] %vm950_vm0, %v889_v29  ;;  %1040 = vst.msk [vmem:[%s2425_s3 + $0x2c8] sm:$0xff] %vm950_vm0, %v939_v30  ;;  %v552_v33 = vadd.f32 %v1920_v25, %v551_v31  ;;  %v802_v34 = vadd.f32 %v1920_v25, %v801_v32  ;;  %v553_v35 = vpop.f32.mrb[81].mxu0  ;;  %v803_v36 = vpop.f32.mrb[81].mxu1 }
 0x1b7   :  { %v890_v37 = vmax.f32 %v552_v33, 0.0  ;;  %v940_v38 = vmax.f32 %v802_v34, 0.0 }
 0x1b8   :  { %v556_v39 = vpop.f32.mrb[82].mxu0  ;;  %v806_v40 = vpop.f32.mrb[82].mxu1 }
 0x1b9   :  { %991 = vst.msk [vmem:[%s2425_s3 + $0x140] sm:$0xff] %vm950_vm0, %v890_v37  ;;  %1041 = vst.msk [vmem:[%s2425_s3 + $0x2d0] sm:$0xff] %vm950_vm0, %v940_v38  ;;  %v557_v41 = vadd.f32 %v1920_v25, %v556_v39  ;;  %v807_v42 = vadd.f32 %v1920_v25, %v806_v40  ;;  %v558_v43 = vpop.f32.mrb[83].mxu0  ;;  %v808_v44 = vpop.f32.mrb[83].mxu1 }
 0x1bb   :  { %v891_v45 = vmax.f32 %v557_v41, 0.0  ;;  %v941_v46 = vmax.f32 %v807_v42, 0.0 }
 0x1bc   :  { %v561_v47 = vpop.f32.mrb[84].mxu0  ;;  %v811_v48 = vpop.f32.mrb[84].mxu1 }
 0x1bd   :  { %992 = vst.msk [vmem:[%s2425_s3 + $0x148] sm:$0xff] %vm950_vm0, %v891_v45  ;;  %1042 = vst.msk [vmem:[%s2425_s3 + $0x2d8] sm:$0xff] %vm950_vm0, %v941_v46  ;;  %v562_v49 = vadd.f32 %v1920_v25, %v561_v47  ;;  %v812_v50 = vadd.f32 %v1920_v25, %v811_v48  ;;  %v563_v51 = vpop.f32.mrb[85].mxu0  ;;  %v813_v52 = vpop.f32.mrb[85].mxu1 }
 0x1bf   :  { %v892_v53 = vmax.f32 %v562_v49, 0.0  ;;  %v942_v54 = vmax.f32 %v812_v50, 0.0 }
 0x1c0   :  { %v566_v55 = vpop.f32.mrb[86].mxu0  ;;  %v816_v56 = vpop.f32.mrb[86].mxu1 }
 0x1c1   :  { %993 = vst.msk [vmem:[%s2425_s3 + $0x150] sm:$0xff] %vm950_vm0, %v892_v53  ;;  %1043 = vst.msk [vmem:[%s2425_s3 + $0x2e0] sm:$0xff] %vm950_vm0, %v942_v54  ;;  %v567_v57 = vadd.f32 %v1920_v25, %v566_v55  ;;  %v817_v58 = vadd.f32 %v1920_v25, %v816_v56  ;;  %v568_v59 = vpop.f32.mrb[87].mxu0  ;;  %v818_v60 = vpop.f32.mrb[87].mxu1 }
 0x1c3   :  { %v893_v61 = vmax.f32 %v567_v57, 0.0  ;;  %v943_v62 = vmax.f32 %v817_v58, 0.0 }
 0x1c4   :  { %v571_v63 = vpop.f32.mrb[88].mxu0  ;;  %v821_v0 = vpop.f32.mrb[88].mxu1 }
 0x1c5   :  { %994 = vst.msk [vmem:[%s2425_s3 + $0x158] sm:$0xff] %vm950_vm0, %v893_v61  ;;  %1044 = vst.msk [vmem:[%s2425_s3 + $0x2e8] sm:$0xff] %vm950_vm0, %v943_v62  ;;  %v572_v1 = vadd.f32 %v1920_v25, %v571_v63  ;;  %v822_v2 = vadd.f32 %v1920_v25, %v821_v0  ;;  %v573_v3 = vpop.f32.mrb[89].mxu0  ;;  %v823_v4 = vpop.f32.mrb[89].mxu1 }
 0x1c7   :  { %v894_v5 = vmax.f32 %v572_v1, 0.0  ;;  %v944_v6 = vmax.f32 %v822_v2, 0.0 }
 0x1c8   :  { %v576_v7 = vpop.f32.mrb[90].mxu0  ;;  %v826_v8 = vpop.f32.mrb[90].mxu1 }
 0x1c9   :  { %995 = vst.msk [vmem:[%s2425_s3 + $0x160] sm:$0xff] %vm950_vm0, %v894_v5  ;;  %1045 = vst.msk [vmem:[%s2425_s3 + $0x2f0] sm:$0xff] %vm950_vm0, %v944_v6  ;;  %v577_v9 = vadd.f32 %v1920_v25, %v576_v7  ;;  %v827_v10 = vadd.f32 %v1920_v25, %v826_v8  ;;  %v578_v11 = vpop.f32.mrb[91].mxu0  ;;  %v828_v12 = vpop.f32.mrb[91].mxu1 }
 0x1cb   :  { %v895_v13 = vmax.f32 %v577_v9, 0.0  ;;  %v945_v14 = vmax.f32 %v827_v10, 0.0 }
 0x1cc   :  { %v581_v15 = vpop.f32.mrb[92].mxu0  ;;  %v831_v16 = vpop.f32.mrb[92].mxu1 }
 0x1cd   :  { %996 = vst.msk [vmem:[%s2425_s3 + $0x168] sm:$0xff] %vm950_vm0, %v895_v13  ;;  %1046 = vst.msk [vmem:[%s2425_s3 + $0x2f8] sm:$0xff] %vm950_vm0, %v945_v14  ;;  %v582_v17 = vadd.f32 %v1920_v25, %v581_v15  ;;  %v832_v18 = vadd.f32 %v1920_v25, %v831_v16  ;;  %v583_v19 = vpop.f32.mrb[93].mxu0  ;;  %v833_v20 = vpop.f32.mrb[93].mxu1 }
 0x1cf   :  { %v896_v21 = vmax.f32 %v582_v17, 0.0  ;;  %v946_v22 = vmax.f32 %v832_v18, 0.0 }
 0x1d0   :  { %v586_v23 = vpop.f32.mrb[94].mxu0  ;;  %v836_v24 = vpop.f32.mrb[94].mxu1 }
 0x1d1   :  { %997 = vst.msk [vmem:[%s2425_s3 + $0x170] sm:$0xff] %vm950_vm0, %v896_v21  ;;  %1047 = vst.msk [vmem:[%s2425_s3 + $0x300] sm:$0xff] %vm950_vm0, %v946_v22  ;;  %v587_v26 = vadd.f32 %v1920_v25, %v586_v23  ;;  %v837_v27 = vadd.f32 %v1920_v25, %v836_v24  ;;  %v588_v28 = vpop.f32.mrb[95].mxu0  ;;  %v838_v29 = vpop.f32.mrb[95].mxu1 }
 0x1d3   :  { %v897_v30 = vmax.f32 %v587_v26, 0.0  ;;  %v947_v31 = vmax.f32 %v837_v27, 0.0 }
 0x1d4   :  { %v591_v32 = vpop.f32.mrb[96].mxu0  ;;  %v841_v33 = vpop.f32.mrb[96].mxu1 }
 0x1d5   :  { %998 = vst.msk [vmem:[%s2425_s3 + $0x178] sm:$0xff] %vm950_vm0, %v897_v30  ;;  %1048 = vst.msk [vmem:[%s2425_s3 + $0x308] sm:$0xff] %vm950_vm0, %v947_v31  ;;  %v592_v34 = vadd.f32 %v1920_v25, %v591_v32  ;;  %v842_v35 = vadd.f32 %v1920_v25, %v841_v33  ;;  %v593_v36 = vpop.f32.mrb[97].mxu0  ;;  %v843_v37 = vpop.f32.mrb[97].mxu1 }
 0x1d7   :  { %v898_v38 = vmax.f32 %v592_v34, 0.0  ;;  %v948_v39 = vmax.f32 %v842_v35, 0.0 }
 0x1d8   :  { %v596_v40 = vpop.f32.mrb[98].mxu0  ;;  %v846_v41 = vpop.f32.mrb[98].mxu1 }
 0x1d9   :  { %999 = vst.msk [vmem:[%s2425_s3 + $0x180] sm:$0xff] %vm950_vm0, %v898_v38  ;;  %1049 = vst.msk [vmem:[%s2425_s3 + $0x310] sm:$0xff] %vm950_vm0, %v948_v39  ;;  %v597_v42 = vadd.f32 %v1920_v25, %v596_v40  ;;  %v847_v43 = vadd.f32 %v1920_v25, %v846_v41  ;;  %v598_v44 = vpop.f32.mrb[99].mxu0  ;;  %v848_v45 = vpop.f32.mrb[99].mxu1 }
 0x1db   :  { %v899_v46 = vmax.f32 %v597_v42, 0.0  ;;  %v949_v47 = vmax.f32 %v847_v43, 0.0 }
 0x1dd   :  { %1000 = vst.msk [vmem:[%s2425_s3 + $0x188] sm:$0xff] %vm950_vm0, %v899_v46  ;;  %1050 = vst.msk [vmem:[%s2425_s3 + $0x318] sm:$0xff] %vm950_vm0, %v949_v47 }

// kernel: cnn_forward.5
= control target key start
LH: loop header
LB: loop body
LE: loop exit
PB: predicated region body
PF: predicated region fallthrough
CT: control target
= control target key end

     0   :  { %v920_v0 = vmov 0.0|0.0   ;;  %vm594_vm0 = vcmask 523264   ;;  %vm615_vm1 = vcmask 517120   ;;  %s1430_s1 = inlined_call_operand.vmem [shape: bf16[512,64], index: 1, kind: input, shape index: {}]   ;;  %s1431_s0 = inlined_call_operand.vmem [shape: f32[162,512], index: 0, kind: input, shape index: {}]   ;;  %s1432_s2 = inlined_call_operand.vmem [shape: f32[1,64], index: 2, kind: input, shape index: {}]   ;;  %s1433_s3 = inlined_call_operand.vmem [shape: f32[162,64], index: 3, kind: output, shape index: {}]  }
   0x1   :  { %781 = vmatprep.subr.bf16.mxu1 %v920_v0  ;;  %v623_v1 = vld [vmem:[%s1430_s1] sm:$0xff]   ;;  %829 = vmatprep.subr.bf16.mxu0 %v920_v0  ;;  %v750_v3 = vld [vmem:[%s1430_s1 + $0x8] sm:$0xff]   ;;  %v751_v5 = vld [vmem:[%s1430_s1 + $0x10] sm:$0xff]  }
   0x2   :  { %v765_v2 = vld [vmem:[%s1430_s1 + $0x80] sm:$0xff]   ;;  %783 = vmatpush1.bf16.msra.mxu1 %v623_v1  ;;  %v766_v4 = vld [vmem:[%s1430_s1 + $0x88] sm:$0xff]   ;;  %v767_v6 = vld [vmem:[%s1430_s1 + $0x90] sm:$0xff]  }
   0x3   :  { %831 = vmatpush1.bf16.msra.mxu0 %v765_v2  ;;  %784 = vmatprep.subr.bf16.mxu1 %v920_v0  ;;  %v752_v7 = vld [vmem:[%s1430_s1 + $0x18] sm:$0xff]   ;;  %v143_v9 = vld [vmem:[%s1431_s0 + $0x8] sm:$0xff]  ;;  %v753_v11 = vld [vmem:[%s1430_s1 + $0x20] sm:$0xff]  }
   0x4   :  { %832 = vmatprep.subr.bf16.mxu0 %v920_v0  ;;  %v768_v8 = vld [vmem:[%s1430_s1 + $0x98] sm:$0xff]   ;;  %297 = vmatprep.mubr.f32.mxu1 %v143_v9  ;;  %v769_v12 = vld [vmem:[%s1430_s1 + $0xa0] sm:$0xff]   ;;  %v754_v13 = vld [vmem:[%s1430_s1 + $0x28] sm:$0xff]  }
   0x5   :  { %v145_v10 = vld [vmem:[%s1431_s0 + $0x18] sm:$0xff]  ;;  %v770_v14 = vld [vmem:[%s1430_s1 + $0xa8] sm:$0xff]   ;;  %v755_v15 = vld [vmem:[%s1430_s1 + $0x30] sm:$0xff]  }
   0x6   :  { %786 = vmatpush1.bf16.msra.mxu1 %v750_v3  ;;  %467 = vmatprep.mubr.f32.mxu0 %v145_v10  ;;  %v771_v16 = vld [vmem:[%s1430_s1 + $0xb0] sm:$0xff]   ;;  %v756_v17 = vld [vmem:[%s1430_s1 + $0x38] sm:$0xff]   ;;  %v757_v19 = vld [vmem:[%s1430_s1 + $0x40] sm:$0xff]  }
   0x7   :  { %834 = vmatpush1.bf16.msra.mxu0 %v766_v4  ;;  %787 = vmatprep.subr.bf16.mxu1 %v920_v0  ;;  %v772_v18 = vld [vmem:[%s1430_s1 + $0xb8] sm:$0xff]   ;;  %v773_v20 = vld [vmem:[%s1430_s1 + $0xc0] sm:$0xff]   ;;  %v758_v21 = vld [vmem:[%s1430_s1 + $0x48] sm:$0xff]  }
   0x8   :  { %835 = vmatprep.subr.bf16.mxu0 %v920_v0  ;;  %v774_v22 = vld [vmem:[%s1430_s1 + $0xc8] sm:$0xff]   ;;  %v759_v23 = vld [vmem:[%s1430_s1 + $0x50] sm:$0xff]   ;;  %v760_v25 = vld [vmem:[%s1430_s1 + $0x58] sm:$0xff]  }
   0x9   :  { %v775_v24 = vld [vmem:[%s1430_s1 + $0xd0] sm:$0xff]   ;;  %v776_v26 = vld [vmem:[%s1430_s1 + $0xd8] sm:$0xff]   ;;  %v761_v27 = vld [vmem:[%s1430_s1 + $0x60] sm:$0xff]  }
   0xa   :  { %789 = vmatpush1.bf16.msra.mxu1 %v751_v5  ;;  %v777_v28 = vld [vmem:[%s1430_s1 + $0xe0] sm:$0xff]   ;;  %v762_v29 = vld [vmem:[%s1430_s1 + $0x68] sm:$0xff]   ;;  %v763_v31 = vld [vmem:[%s1430_s1 + $0x70] sm:$0xff]  }
   0xb   :  { %837 = vmatpush1.bf16.msra.mxu0 %v767_v6  ;;  %790 = vmatprep.subr.bf16.mxu1 %v920_v0  ;;  %v778_v30 = vld [vmem:[%s1430_s1 + $0xe8] sm:$0xff]   ;;  %v779_v32 = vld [vmem:[%s1430_s1 + $0xf0] sm:$0xff]   ;;  %v764_v33 = vld [vmem:[%s1430_s1 + $0x78] sm:$0xff]  }
   0xc   :  { %838 = vmatprep.subr.bf16.mxu0 %v920_v0  ;;  %v780_v34 = vld [vmem:[%s1430_s1 + $0xf8] sm:$0xff]   ;;  %v142_v35 = vld [vmem:[%s1431_s0] sm:$0xff]  ;;  %v144_v36 = vld [vmem:[%s1431_s0 + $0x10] sm:$0xff] }
   0xd   :  { %v147_v37 = vld [vmem:[%s1431_s0 + $0x28] sm:$0xff]  ;;  %v149_v38 = vld [vmem:[%s1431_s0 + $0x38] sm:$0xff]  ;;  %v146_v39 = vld [vmem:[%s1431_s0 + $0x20] sm:$0xff] }
   0xe   :  { %792 = vmatpush1.bf16.msra.mxu1 %v752_v7  ;;  %v148_v40 = vld [vmem:[%s1431_s0 + $0x30] sm:$0xff]  ;;  %v151_v41 = vld [vmem:[%s1431_s0 + $0x48] sm:$0xff]  ;;  %v153_v42 = vld [vmem:[%s1431_s0 + $0x58] sm:$0xff] }
   0xf   :  { %840 = vmatpush1.bf16.msra.mxu0 %v768_v8  ;;  %793 = vmatprep.subr.bf16.mxu1 %v920_v0  ;;  %v150_v43 = vld [vmem:[%s1431_s0 + $0x40] sm:$0xff]  ;;  %v152_v44 = vld [vmem:[%s1431_s0 + $0x50] sm:$0xff]  ;;  %v155_v45 = vld [vmem:[%s1431_s0 + $0x68] sm:$0xff] }
  0x10   :  { %841 = vmatprep.subr.bf16.mxu0 %v920_v0  ;;  %v157_v46 = vld [vmem:[%s1431_s0 + $0x78] sm:$0xff]  ;;  %v154_v47 = vld [vmem:[%s1431_s0 + $0x60] sm:$0xff]  ;;  %v156_v48 = vld [vmem:[%s1431_s0 + $0x70] sm:$0xff] }
  0x11   :  { %v159_v49 = vld [vmem:[%s1431_s0 + $0x88] sm:$0xff]  ;;  %v161_v50 = vld [vmem:[%s1431_s0 + $0x98] sm:$0xff]  ;;  %v158_v51 = vld [vmem:[%s1431_s0 + $0x80] sm:$0xff] }
  0x12   :  { %795 = vmatpush1.bf16.msra.mxu1 %v753_v11  ;;  %v160_v52 = vld [vmem:[%s1431_s0 + $0x90] sm:$0xff]  ;;  %v163_v53 = vld [vmem:[%s1431_s0 + $0xa8] sm:$0xff]  ;;  %v165_v54 = vld [vmem:[%s1431_s0 + $0xb8] sm:$0xff] }
  0x13   :  { %843 = vmatpush1.bf16.msra.mxu0 %v769_v12  ;;  %796 = vmatprep.subr.bf16.mxu1 %v920_v0  ;;  %v162_v55 = vld [vmem:[%s1431_s0 + $0xa0] sm:$0xff]  ;;  %v164_v56 = vld [vmem:[%s1431_s0 + $0xb0] sm:$0xff]  ;;  %v167_v57 = vld [vmem:[%s1431_s0 + $0xc8] sm:$0xff] }
  0x14   :  { %844 = vmatprep.subr.bf16.mxu0 %v920_v0  ;;  %v169_v58 = vld [vmem:[%s1431_s0 + $0xd8] sm:$0xff]  ;;  %v166_v59 = vld [vmem:[%s1431_s0 + $0xc0] sm:$0xff]  ;;  %v168_v60 = vld [vmem:[%s1431_s0 + $0xd0] sm:$0xff] }
  0x15   :  { %v171_v61 = vld [vmem:[%s1431_s0 + $0xe8] sm:$0xff]  ;;  %v173_v62 = vld [vmem:[%s1431_s0 + $0xf8] sm:$0xff]  ;;  %v170_v63 = vld [vmem:[%s1431_s0 + $0xe0] sm:$0xff] }
  0x16   :  { %798 = vmatpush1.bf16.msra.mxu1 %v754_v13  ;;  %v175_v1 = vld [vmem:[%s1431_s0 + $0x108] sm:$0xff]  ;;  %v177_v2 = vld [vmem:[%s1431_s0 + $0x118] sm:$0xff]  ;;  %v174_v3 = vld [vmem:[%s1431_s0 + $0x100] sm:$0xff] }
  0x17   :  { %846 = vmatpush1.bf16.msra.mxu0 %v770_v14  ;;  %799 = vmatprep.subr.bf16.mxu1 %v920_v0  ;;  %v176_v4 = vld [vmem:[%s1431_s0 + $0x110] sm:$0xff]  ;;  %v179_v5 = vld [vmem:[%s1431_s0 + $0x128] sm:$0xff]  ;;  %v181_v6 = vld [vmem:[%s1431_s0 + $0x138] sm:$0xff] }
  0x18   :  { %847 = vmatprep.subr.bf16.mxu0 %v920_v0  ;;  %v178_v7 = vld [vmem:[%s1431_s0 + $0x120] sm:$0xff]  ;;  %v180_v8 = vld [vmem:[%s1431_s0 + $0x130] sm:$0xff]  ;;  %v183_v9 = vld [vmem:[%s1431_s0 + $0x148] sm:$0xff] }
  0x19   :  { %v185_v10 = vld [vmem:[%s1431_s0 + $0x158] sm:$0xff]  ;;  %v182_v11 = vld [vmem:[%s1431_s0 + $0x140] sm:$0xff]  ;;  %v184_v12 = vld [vmem:[%s1431_s0 + $0x150] sm:$0xff] }
  0x1a   :  { %801 = vmatpush1.bf16.msra.mxu1 %v755_v15  ;;  %v187_v13 = vld [vmem:[%s1431_s0 + $0x168] sm:$0xff]  ;;  %v189_v14 = vld [vmem:[%s1431_s0 + $0x178] sm:$0xff]  ;;  %v186_v15 = vld [vmem:[%s1431_s0 + $0x160] sm:$0xff] }
  0x1b   :  { %849 = vmatpush1.bf16.msra.mxu0 %v771_v16  ;;  %802 = vmatprep.subr.bf16.mxu1 %v920_v0  ;;  %v188_v16 = vld [vmem:[%s1431_s0 + $0x170] sm:$0xff] }
  0x1c   :  { %850 = vmatprep.subr.bf16.mxu0 %v920_v0 }
  0x1e   :  { %804 = vmatpush1.bf16.msra.mxu1 %v756_v17  ;;  %v191_v17 = vld [vmem:[%s1431_s0 + $0x188] sm:$0xff] }
  0x1f   :  { %852 = vmatpush1.bf16.msra.mxu0 %v772_v18  ;;  %805 = vmatprep.subr.bf16.mxu1 %v920_v0  ;;  %v193_v18 = vld [vmem:[%s1431_s0 + $0x198] sm:$0xff] }
  0x20   :  { %853 = vmatprep.subr.bf16.mxu0 %v920_v0 }
  0x22   :  { %807 = vmatpush1.bf16.msra.mxu1 %v757_v19  ;;  %v190_v19 = vld [vmem:[%s1431_s0 + $0x180] sm:$0xff] }
  0x23   :  { %855 = vmatpush1.bf16.msra.mxu0 %v773_v20  ;;  %808 = vmatprep.subr.bf16.mxu1 %v920_v0  ;;  %v192_v20 = vld [vmem:[%s1431_s0 + $0x190] sm:$0xff] }
  0x24   :  { %856 = vmatprep.subr.bf16.mxu0 %v920_v0 }
  0x26   :  { %810 = vmatpush1.bf16.msra.mxu1 %v758_v21  ;;  %v195_v21 = vld [vmem:[%s1431_s0 + $0x1a8] sm:$0xff] }
  0x27   :  { %858 = vmatpush1.bf16.msra.mxu0 %v774_v22  ;;  %811 = vmatprep.subr.bf16.mxu1 %v920_v0  ;;  %v197_v22 = vld [vmem:[%s1431_s0 + $0x1b8] sm:$0xff] }
  0x28   :  { %859 = vmatprep.subr.bf16.mxu0 %v920_v0 }
  0x2a   :  { %813 = vmatpush1.bf16.msra.mxu1 %v759_v23  ;;  %v194_v23 = vld [vmem:[%s1431_s0 + $0x1a0] sm:$0xff] }
  0x2b   :  { %861 = vmatpush1.bf16.msra.mxu0 %v775_v24  ;;  %814 = vmatprep.subr.bf16.mxu1 %v920_v0  ;;  %v196_v24 = vld [vmem:[%s1431_s0 + $0x1b0] sm:$0xff] }
  0x2c   :  { %862 = vmatprep.subr.bf16.mxu0 %v920_v0 }
  0x2e   :  { %816 = vmatpush1.bf16.msra.mxu1 %v760_v25  ;;  %v199_v25 = vld [vmem:[%s1431_s0 + $0x1c8] sm:$0xff] }
  0x2f   :  { %864 = vmatpush1.bf16.msra.mxu0 %v776_v26  ;;  %817 = vmatprep.subr.bf16.mxu1 %v920_v0  ;;  %v201_v26 = vld [vmem:[%s1431_s0 + $0x1d8] sm:$0xff] }
  0x30   :  { %865 = vmatprep.subr.bf16.mxu0 %v920_v0 }
  0x32   :  { %819 = vmatpush1.bf16.msra.mxu1 %v761_v27  ;;  %v198_v27 = vld [vmem:[%s1431_s0 + $0x1c0] sm:$0xff] }
  0x33   :  { %867 = vmatpush1.bf16.msra.mxu0 %v777_v28  ;;  %820 = vmatprep.subr.bf16.mxu1 %v920_v0  ;;  %v200_v28 = vld [vmem:[%s1431_s0 + $0x1d0] sm:$0xff] }
  0x34   :  { %868 = vmatprep.subr.bf16.mxu0 %v920_v0 }
  0x36   :  { %822 = vmatpush1.bf16.msra.mxu1 %v762_v29  ;;  %v203_v29 = vld [vmem:[%s1431_s0 + $0x1e8] sm:$0xff] }
  0x37   :  { %870 = vmatpush1.bf16.msra.mxu0 %v778_v30  ;;  %823 = vmatprep.subr.bf16.mxu1 %v920_v0  ;;  %v205_v30 = vld [vmem:[%s1431_s0 + $0x1f8] sm:$0xff] }
  0x38   :  { %871 = vmatprep.subr.bf16.mxu0 %v920_v0 }
  0x3a   :  { %825 = vmatpush1.bf16.msra.mxu1 %v763_v31  ;;  %v202_v31 = vld [vmem:[%s1431_s0 + $0x1e0] sm:$0xff] }
  0x3b   :  { %873 = vmatpush1.bf16.msra.mxu0 %v779_v32  ;;  %826 = vmatprep.subr.bf16.mxu1 %v920_v0  ;;  %v204_v32 = vld [vmem:[%s1431_s0 + $0x1f0] sm:$0xff] }
  0x3c   :  { %874 = vmatprep.subr.bf16.mxu0 %v920_v0  ;;  %v172_v0 = vld [vmem:[%s1431_s0 + $0xf0] sm:$0xff] }
  0x3e   :  { %828 = vmatpush1.bf16.msra.mxu1 %v764_v33  ;;  %v207_v33 = vld [vmem:[%s1431_s0 + $0x208] sm:$0xff] }
  0x3f   :  { %876 = vmatpush1.bf16.msra.mxu0 %v780_v34  ;;  %v209_v34 = vld [vmem:[%s1431_s0 + $0x218] sm:$0xff] }
  0x41   :  { %298 = vmatmul.mubr.f32.vlgmr.msra.gmra.mrb[0].mxu1 %v142_v35  ;;  %v206_v35 = vld [vmem:[%s1431_s0 + $0x200] sm:$0xff] }
  0x42   :  { %468 = vmatmul.mubr.f32.vlgmr.msra.gmra.mrb[0].mxu0 %v144_v36  ;;  %302 = vmatprep.mubr.f32.mxu1 %v147_v37  ;;  %v208_v36 = vld [vmem:[%s1431_s0 + $0x210] sm:$0xff]  ;;  %v211_v37 = vld [vmem:[%s1431_s0 + $0x228] sm:$0xff] }
  0x43   :  { %472 = vmatprep.mubr.f32.mxu0 %v149_v38  ;;  %v213_v38 = vld [vmem:[%s1431_s0 + $0x238] sm:$0xff] }
  0x45   :  { %303 = vmatmul.mubr.f32.gmra.mrb[2].mxu1 %v146_v39  ;;  %v210_v39 = vld [vmem:[%s1431_s0 + $0x220] sm:$0xff] }
  0x46   :  { %473 = vmatmul.mubr.f32.gmra.mrb[2].mxu0 %v148_v40  ;;  %307 = vmatprep.mubr.f32.mxu1 %v151_v41  ;;  %v212_v40 = vld [vmem:[%s1431_s0 + $0x230] sm:$0xff]  ;;  %v215_v41 = vld [vmem:[%s1431_s0 + $0x248] sm:$0xff] }
  0x47   :  { %477 = vmatprep.mubr.f32.mxu0 %v153_v42  ;;  %v217_v42 = vld [vmem:[%s1431_s0 + $0x258] sm:$0xff] }
  0x49   :  { %308 = vmatmul.mubr.f32.gmra.mrb[4].mxu1 %v150_v43  ;;  %v214_v43 = vld [vmem:[%s1431_s0 + $0x240] sm:$0xff] }
  0x4a   :  { %478 = vmatmul.mubr.f32.gmra.mrb[4].mxu0 %v152_v44  ;;  %312 = vmatprep.mubr.f32.mxu1 %v155_v45  ;;  %v216_v44 = vld [vmem:[%s1431_s0 + $0x250] sm:$0xff]  ;;  %v219_v45 = vld [vmem:[%s1431_s0 + $0x268] sm:$0xff] }
  0x4b   :  { %482 = vmatprep.mubr.f32.mxu0 %v157_v46  ;;  %v221_v46 = vld [vmem:[%s1431_s0 + $0x278] sm:$0xff] }
  0x4d   :  { %313 = vmatmul.mubr.f32.gmra.mrb[6].mxu1 %v154_v47  ;;  %v218_v47 = vld [vmem:[%s1431_s0 + $0x260] sm:$0xff] }
  0x4e   :  { %483 = vmatmul.mubr.f32.gmra.mrb[6].mxu0 %v156_v48  ;;  %317 = vmatprep.mubr.f32.mxu1 %v159_v49  ;;  %v220_v48 = vld [vmem:[%s1431_s0 + $0x270] sm:$0xff]  ;;  %v223_v49 = vld [vmem:[%s1431_s0 + $0x288] sm:$0x3] }
  0x4f   :  { %487 = vmatprep.mubr.f32.mxu0 %v161_v50  ;;  %v225_v50 = vld [vmem:[%s1431_s0 + $0x298] sm:$0x3] }
  0x51   :  { %318 = vmatmul.mubr.f32.gmra.mrb[8].mxu1 %v158_v51  ;;  %v222_v51 = vld [vmem:[%s1431_s0 + $0x280] sm:$0x3] }
  0x52   :  { %488 = vmatmul.mubr.f32.gmra.mrb[8].mxu0 %v160_v52  ;;  %322 = vmatprep.mubr.f32.mxu1 %v163_v53  ;;  %v224_v52 = vld [vmem:[%s1431_s0 + $0x290] sm:$0x3]  ;;  %v1324_v53 = vld [vmem:[%s1432_s2] ss:$0 sm:$0xff] }
  0x53   :  { %492 = vmatprep.mubr.f32.mxu0 %v165_v54 }
  0x55   :  { %323 = vmatmul.mubr.f32.gmra.mrb[10].mxu1 %v162_v55 }
  0x56   :  { %493 = vmatmul.mubr.f32.gmra.mrb[10].mxu0 %v164_v56  ;;  %327 = vmatprep.mubr.f32.mxu1 %v167_v57 }
  0x57   :  { %497 = vmatprep.mubr.f32.mxu0 %v169_v58 }
  0x59   :  { %328 = vmatmul.mubr.f32.gmra.mrb[12].mxu1 %v166_v59 }
  0x5a   :  { %498 = vmatmul.mubr.f32.gmra.mrb[12].mxu0 %v168_v60  ;;  %332 = vmatprep.mubr.f32.mxu1 %v171_v61 }
  0x5b   :  { %502 = vmatprep.mubr.f32.mxu0 %v173_v62 }
  0x5d   :  { %333 = vmatmul.mubr.f32.gmra.mrb[14].mxu1 %v170_v63 }
  0x5e   :  { %503 = vmatmul.mubr.f32.gmra.mrb[14].mxu0 %v172_v0  ;;  %337 = vmatprep.mubr.f32.mxu1 %v175_v1 }
  0x5f   :  { %507 = vmatprep.mubr.f32.mxu0 %v177_v2 }
  0x61   :  { %338 = vmatmul.mubr.f32.gmra.mrb[16].mxu1 %v174_v3 }
  0x62   :  { %508 = vmatmul.mubr.f32.gmra.mrb[16].mxu0 %v176_v4  ;;  %342 = vmatprep.mubr.f32.mxu1 %v179_v5 }
  0x63   :  { %512 = vmatprep.mubr.f32.mxu0 %v181_v6 }
  0x65   :  { %343 = vmatmul.mubr.f32.gmra.mrb[18].mxu1 %v178_v7 }
  0x66   :  { %513 = vmatmul.mubr.f32.gmra.mrb[18].mxu0 %v180_v8  ;;  %347 = vmatprep.mubr.f32.mxu1 %v183_v9 }
  0x67   :  { %517 = vmatprep.mubr.f32.mxu0 %v185_v10 }
  0x69   :  { %348 = vmatmul.mubr.f32.gmra.mrb[20].mxu1 %v182_v11 }
  0x6a   :  { %518 = vmatmul.mubr.f32.gmra.mrb[20].mxu0 %v184_v12  ;;  %352 = vmatprep.mubr.f32.mxu1 %v187_v13 }
  0x6b   :  { %522 = vmatprep.mubr.f32.mxu0 %v189_v14 }
  0x6d   :  { %353 = vmatmul.mubr.f32.gmra.mrb[22].mxu1 %v186_v15 }
  0x6e   :  { %523 = vmatmul.mubr.f32.gmra.mrb[22].mxu0 %v188_v16  ;;  %357 = vmatprep.mubr.f32.mxu1 %v191_v17 }
  0x6f   :  { %527 = vmatprep.mubr.f32.mxu0 %v193_v18 }
  0x71   :  { %358 = vmatmul.mubr.f32.gmra.mrb[24].mxu1 %v190_v19 }
  0x72   :  { %528 = vmatmul.mubr.f32.gmra.mrb[24].mxu0 %v192_v20  ;;  %362 = vmatprep.mubr.f32.mxu1 %v195_v21 }
  0x73   :  { %532 = vmatprep.mubr.f32.mxu0 %v197_v22 }
  0x75   :  { %363 = vmatmul.mubr.f32.gmra.mrb[26].mxu1 %v194_v23 }
  0x76   :  { %533 = vmatmul.mubr.f32.gmra.mrb[26].mxu0 %v196_v24  ;;  %367 = vmatprep.mubr.f32.mxu1 %v199_v25 }
  0x77   :  { %537 = vmatprep.mubr.f32.mxu0 %v201_v26 }
  0x79   :  { %368 = vmatmul.mubr.f32.gmra.mrb[28].mxu1 %v198_v27 }
  0x7a   :  { %538 = vmatmul.mubr.f32.gmra.mrb[28].mxu0 %v200_v28  ;;  %372 = vmatprep.mubr.f32.mxu1 %v203_v29 }
  0x7b   :  { %542 = vmatprep.mubr.f32.mxu0 %v205_v30 }
  0x7d   :  { %373 = vmatmul.mubr.f32.gmra.mrb[30].mxu1 %v202_v31 }
  0x7e   :  { %543 = vmatmul.mubr.f32.gmra.mrb[30].mxu0 %v204_v32  ;;  %377 = vmatprep.mubr.f32.mxu1 %v207_v33 }
  0x7f   :  { %547 = vmatprep.mubr.f32.mxu0 %v209_v34 }
  0x81   :  { %378 = vmatmul.mubr.f32.gmra.mrb[32].mxu1 %v206_v35 }
  0x82   :  { %548 = vmatmul.mubr.f32.gmra.mrb[32].mxu0 %v208_v36  ;;  %382 = vmatprep.mubr.f32.mxu1 %v211_v37 }
  0x83   :  { %552 = vmatprep.mubr.f32.mxu0 %v213_v38 }
  0x85   :  { %383 = vmatmul.mubr.f32.gmra.mrb[34].mxu1 %v210_v39 }
  0x86   :  { %553 = vmatmul.mubr.f32.gmra.mrb[34].mxu0 %v212_v40  ;;  %387 = vmatprep.mubr.f32.mxu1 %v215_v41 }
  0x87   :  { %557 = vmatprep.mubr.f32.mxu0 %v217_v42 }
  0x89   :  { %388 = vmatmul.mubr.f32.gmra.mrb[36].mxu1 %v214_v43 }
  0x8a   :  { %558 = vmatmul.mubr.f32.gmra.mrb[36].mxu0 %v216_v44  ;;  %392 = vmatprep.mubr.f32.mxu1 %v219_v45 }
  0x8b   :  { %562 = vmatprep.mubr.f32.mxu0 %v221_v46 }
  0x8d   :  { %393 = vmatmul.mubr.f32.gmra.mrb[38].mxu1 %v218_v47 }
  0x8e   :  { %563 = vmatmul.mubr.f32.gmra.mrb[38].mxu0 %v220_v48  ;;  %397 = vmatprep.mubr.f32.mxu1 %v223_v49 }
  0x8f   :  { %567 = vmatprep.mubr.f32.mxu0 %v225_v50 }
  0x91   :  { %398 = vmatmul.mubr.f32.gmra.mrb[40].mxu1 %v222_v51 }
  0x92   :  { %568 = vmatmul.mubr.f32.gmra.mrb[40].mxu0 %v224_v52 }
 0x114   :  { %v299_v54 = vpop.f32.mrb[0].mxu1 }
 0x115   :  { %v469_v55 = vpop.f32.mrb[0].mxu0  ;;  %v300_v56 = vadd.f32 %v1324_v53, %v299_v54  ;;  %v301_v57 = vpop.f32.mrb[1].mxu1 }
 0x116   :  { %v471_v58 = vpop.f32.mrb[1].mxu0 }
 0x117   :  { %v470_v59 = vadd.f32 %v469_v55, %v300_v56 }
 0x118   :  { %v304_v60 = vpop.f32.mrb[2].mxu1 }
 0x119   :  { %v474_v61 = vpop.f32.mrb[2].mxu0  ;;  %v573_v62 = vmax.f32 %v470_v59, 0.0  ;;  %v305_v63 = vadd.f32 %v1324_v53, %v304_v60  ;;  %v306_v0 = vpop.f32.mrb[3].mxu1 }
 0x11a   :  { %v476_v1 = vpop.f32.mrb[3].mxu0 }
 0x11b   :  { %595 = vst.msk [vmem:[%s1433_s3] sm:$0xff] %vm594_vm0, %v573_v62  ;;  %v475_v2 = vadd.f32 %v474_v61, %v305_v63 }
 0x11c   :  { %v309_v3 = vpop.f32.mrb[4].mxu1 }
 0x11d   :  { %v479_v4 = vpop.f32.mrb[4].mxu0  ;;  %v574_v5 = vmax.f32 %v475_v2, 0.0  ;;  %v310_v6 = vadd.f32 %v1324_v53, %v309_v3  ;;  %v311_v7 = vpop.f32.mrb[5].mxu1 }
 0x11e   :  { %v481_v8 = vpop.f32.mrb[5].mxu0 }
 0x11f   :  { %596 = vst.msk [vmem:[%s1433_s3 + $0x8] sm:$0xff] %vm594_vm0, %v574_v5  ;;  %v480_v9 = vadd.f32 %v479_v4, %v310_v6 }
 0x120   :  { %v314_v10 = vpop.f32.mrb[6].mxu1 }
 0x121   :  { %v484_v11 = vpop.f32.mrb[6].mxu0  ;;  %v575_v12 = vmax.f32 %v480_v9, 0.0  ;;  %v315_v13 = vadd.f32 %v1324_v53, %v314_v10  ;;  %v316_v14 = vpop.f32.mrb[7].mxu1 }
 0x122   :  { %v486_v15 = vpop.f32.mrb[7].mxu0 }
 0x123   :  { %597 = vst.msk [vmem:[%s1433_s3 + $0x10] sm:$0xff] %vm594_vm0, %v575_v12  ;;  %v485_v16 = vadd.f32 %v484_v11, %v315_v13 }
 0x124   :  { %v319_v17 = vpop.f32.mrb[8].mxu1 }
 0x125   :  { %v489_v18 = vpop.f32.mrb[8].mxu0  ;;  %v576_v19 = vmax.f32 %v485_v16, 0.0  ;;  %v320_v20 = vadd.f32 %v1324_v53, %v319_v17  ;;  %v321_v21 = vpop.f32.mrb[9].mxu1 }
 0x126   :  { %v491_v22 = vpop.f32.mrb[9].mxu0 }
 0x127   :  { %598 = vst.msk [vmem:[%s1433_s3 + $0x18] sm:$0xff] %vm594_vm0, %v576_v19  ;;  %v490_v23 = vadd.f32 %v489_v18, %v320_v20 }
 0x128   :  { %v324_v24 = vpop.f32.mrb[10].mxu1 }
 0x129   :  { %v494_v25 = vpop.f32.mrb[10].mxu0  ;;  %v577_v26 = vmax.f32 %v490_v23, 0.0  ;;  %v325_v27 = vadd.f32 %v1324_v53, %v324_v24  ;;  %v326_v28 = vpop.f32.mrb[11].mxu1 }
 0x12a   :  { %v496_v29 = vpop.f32.mrb[11].mxu0 }
 0x12b   :  { %599 = vst.msk [vmem:[%s1433_s3 + $0x20] sm:$0xff] %vm594_vm0, %v577_v26  ;;  %v495_v30 = vadd.f32 %v494_v25, %v325_v27 }
 0x12c   :  { %v329_v31 = vpop.f32.mrb[12].mxu1 }
 0x12d   :  { %v499_v32 = vpop.f32.mrb[12].mxu0  ;;  %v578_v33 = vmax.f32 %v495_v30, 0.0  ;;  %v330_v34 = vadd.f32 %v1324_v53, %v329_v31  ;;  %v331_v35 = vpop.f32.mrb[13].mxu1 }
 0x12e   :  { %v501_v36 = vpop.f32.mrb[13].mxu0 }
 0x12f   :  { %600 = vst.msk [vmem:[%s1433_s3 + $0x28] sm:$0xff] %vm594_vm0, %v578_v33  ;;  %v500_v37 = vadd.f32 %v499_v32, %v330_v34 }
 0x130   :  { %v334_v38 = vpop.f32.mrb[14].mxu1 }
 0x131   :  { %v504_v39 = vpop.f32.mrb[14].mxu0  ;;  %v579_v40 = vmax.f32 %v500_v37, 0.0  ;;  %v335_v41 = vadd.f32 %v1324_v53, %v334_v38  ;;  %v336_v42 = vpop.f32.mrb[15].mxu1 }
 0x132   :  { %v506_v43 = vpop.f32.mrb[15].mxu0 }
 0x133   :  { %601 = vst.msk [vmem:[%s1433_s3 + $0x30] sm:$0xff] %vm594_vm0, %v579_v40  ;;  %v505_v44 = vadd.f32 %v504_v39, %v335_v41 }
 0x134   :  { %v339_v45 = vpop.f32.mrb[16].mxu1 }
 0x135   :  { %v509_v46 = vpop.f32.mrb[16].mxu0  ;;  %v580_v47 = vmax.f32 %v505_v44, 0.0  ;;  %v340_v48 = vadd.f32 %v1324_v53, %v339_v45  ;;  %v341_v49 = vpop.f32.mrb[17].mxu1 }
 0x136   :  { %v511_v50 = vpop.f32.mrb[17].mxu0 }
 0x137   :  { %602 = vst.msk [vmem:[%s1433_s3 + $0x38] sm:$0xff] %vm594_vm0, %v580_v47  ;;  %v510_v51 = vadd.f32 %v509_v46, %v340_v48 }
 0x138   :  { %v344_v52 = vpop.f32.mrb[18].mxu1 }
 0x139   :  { %v514_v54 = vpop.f32.mrb[18].mxu0  ;;  %v581_v55 = vmax.f32 %v510_v51, 0.0  ;;  %v345_v56 = vadd.f32 %v1324_v53, %v344_v52  ;;  %v346_v57 = vpop.f32.mrb[19].mxu1 }
 0x13a   :  { %v516_v58 = vpop.f32.mrb[19].mxu0 }
 0x13b   :  { %603 = vst.msk [vmem:[%s1433_s3 + $0x40] sm:$0xff] %vm594_vm0, %v581_v55  ;;  %v515_v59 = vadd.f32 %v514_v54, %v345_v56 }
 0x13c   :  { %v349_v60 = vpop.f32.mrb[20].mxu1 }
 0x13d   :  { %v519_v61 = vpop.f32.mrb[20].mxu0  ;;  %v582_v62 = vmax.f32 %v515_v59, 0.0  ;;  %v350_v63 = vadd.f32 %v1324_v53, %v349_v60  ;;  %v351_v0 = vpop.f32.mrb[21].mxu1 }
 0x13e   :  { %v521_v1 = vpop.f32.mrb[21].mxu0 }
 0x13f   :  { %604 = vst.msk [vmem:[%s1433_s3 + $0x48] sm:$0xff] %vm594_vm0, %v582_v62  ;;  %v520_v2 = vadd.f32 %v519_v61, %v350_v63 }
 0x140   :  { %v354_v3 = vpop.f32.mrb[22].mxu1 }
 0x141   :  { %v524_v4 = vpop.f32.mrb[22].mxu0  ;;  %v583_v5 = vmax.f32 %v520_v2, 0.0  ;;  %v355_v6 = vadd.f32 %v1324_v53, %v354_v3  ;;  %v356_v7 = vpop.f32.mrb[23].mxu1 }
 0x142   :  { %v526_v8 = vpop.f32.mrb[23].mxu0 }
 0x143   :  { %605 = vst.msk [vmem:[%s1433_s3 + $0x50] sm:$0xff] %vm594_vm0, %v583_v5  ;;  %v525_v9 = vadd.f32 %v524_v4, %v355_v6 }
 0x144   :  { %v359_v10 = vpop.f32.mrb[24].mxu1 }
 0x145   :  { %v529_v11 = vpop.f32.mrb[24].mxu0  ;;  %v584_v12 = vmax.f32 %v525_v9, 0.0  ;;  %v360_v13 = vadd.f32 %v1324_v53, %v359_v10  ;;  %v361_v14 = vpop.f32.mrb[25].mxu1 }
 0x146   :  { %v531_v15 = vpop.f32.mrb[25].mxu0 }
 0x147   :  { %606 = vst.msk [vmem:[%s1433_s3 + $0x58] sm:$0xff] %vm594_vm0, %v584_v12  ;;  %v530_v16 = vadd.f32 %v529_v11, %v360_v13 }
 0x148   :  { %v364_v17 = vpop.f32.mrb[26].mxu1 }
 0x149   :  { %v534_v18 = vpop.f32.mrb[26].mxu0  ;;  %v585_v19 = vmax.f32 %v530_v16, 0.0  ;;  %v365_v20 = vadd.f32 %v1324_v53, %v364_v17  ;;  %v366_v21 = vpop.f32.mrb[27].mxu1 }
 0x14a   :  { %v536_v22 = vpop.f32.mrb[27].mxu0 }
 0x14b   :  { %607 = vst.msk [vmem:[%s1433_s3 + $0x60] sm:$0xff] %vm594_vm0, %v585_v19  ;;  %v535_v23 = vadd.f32 %v534_v18, %v365_v20 }
 0x14c   :  { %v369_v24 = vpop.f32.mrb[28].mxu1 }
 0x14d   :  { %v539_v25 = vpop.f32.mrb[28].mxu0  ;;  %v586_v26 = vmax.f32 %v535_v23, 0.0  ;;  %v370_v27 = vadd.f32 %v1324_v53, %v369_v24  ;;  %v371_v28 = vpop.f32.mrb[29].mxu1 }
 0x14e   :  { %v541_v29 = vpop.f32.mrb[29].mxu0 }
 0x14f   :  { %608 = vst.msk [vmem:[%s1433_s3 + $0x68] sm:$0xff] %vm594_vm0, %v586_v26  ;;  %v540_v30 = vadd.f32 %v539_v25, %v370_v27 }
 0x150   :  { %v374_v31 = vpop.f32.mrb[30].mxu1 }
 0x151   :  { %v544_v32 = vpop.f32.mrb[30].mxu0  ;;  %v587_v33 = vmax.f32 %v540_v30, 0.0  ;;  %v375_v34 = vadd.f32 %v1324_v53, %v374_v31  ;;  %v376_v35 = vpop.f32.mrb[31].mxu1 }
 0x152   :  { %v546_v36 = vpop.f32.mrb[31].mxu0 }
 0x153   :  { %609 = vst.msk [vmem:[%s1433_s3 + $0x70] sm:$0xff] %vm594_vm0, %v587_v33  ;;  %v545_v37 = vadd.f32 %v544_v32, %v375_v34 }
 0x154   :  { %v379_v38 = vpop.f32.mrb[32].mxu1 }
 0x155   :  { %v549_v39 = vpop.f32.mrb[32].mxu0  ;;  %v588_v40 = vmax.f32 %v545_v37, 0.0  ;;  %v380_v41 = vadd.f32 %v1324_v53, %v379_v38  ;;  %v381_v42 = vpop.f32.mrb[33].mxu1 }
 0x156   :  { %v551_v43 = vpop.f32.mrb[33].mxu0 }
 0x157   :  { %610 = vst.msk [vmem:[%s1433_s3 + $0x78] sm:$0xff] %vm594_vm0, %v588_v40  ;;  %v550_v44 = vadd.f32 %v549_v39, %v380_v41 }
 0x158   :  { %v384_v45 = vpop.f32.mrb[34].mxu1 }
 0x159   :  { %v554_v46 = vpop.f32.mrb[34].mxu0  ;;  %v589_v47 = vmax.f32 %v550_v44, 0.0  ;;  %v385_v48 = vadd.f32 %v1324_v53, %v384_v45  ;;  %v386_v49 = vpop.f32.mrb[35].mxu1 }
 0x15a   :  { %v556_v50 = vpop.f32.mrb[35].mxu0 }
 0x15b   :  { %611 = vst.msk [vmem:[%s1433_s3 + $0x80] sm:$0xff] %vm594_vm0, %v589_v47  ;;  %v555_v51 = vadd.f32 %v554_v46, %v385_v48 }
 0x15c   :  { %v389_v52 = vpop.f32.mrb[36].mxu1 }
 0x15d   :  { %v559_v54 = vpop.f32.mrb[36].mxu0  ;;  %v590_v55 = vmax.f32 %v555_v51, 0.0  ;;  %v390_v56 = vadd.f32 %v1324_v53, %v389_v52  ;;  %v391_v57 = vpop.f32.mrb[37].mxu1 }
 0x15e   :  { %v561_v58 = vpop.f32.mrb[37].mxu0 }
 0x15f   :  { %612 = vst.msk [vmem:[%s1433_s3 + $0x88] sm:$0xff] %vm594_vm0, %v590_v55  ;;  %v560_v59 = vadd.f32 %v559_v54, %v390_v56 }
 0x160   :  { %v394_v60 = vpop.f32.mrb[38].mxu1 }
 0x161   :  { %v564_v61 = vpop.f32.mrb[38].mxu0  ;;  %v591_v62 = vmax.f32 %v560_v59, 0.0  ;;  %v395_v63 = vadd.f32 %v1324_v53, %v394_v60  ;;  %v396_v0 = vpop.f32.mrb[39].mxu1 }
 0x162   :  { %v566_v1 = vpop.f32.mrb[39].mxu0 }
 0x163   :  { %613 = vst.msk [vmem:[%s1433_s3 + $0x90] sm:$0xff] %vm594_vm0, %v591_v62  ;;  %v565_v2 = vadd.f32 %v564_v61, %v395_v63 }
 0x164   :  { %v399_v3 = vpop.f32.mrb[40].mxu1 }
 0x165   :  { %v569_v4 = vpop.f32.mrb[40].mxu0  ;;  %v592_v5 = vmax.f32 %v565_v2, 0.0  ;;  %v400_v6 = vadd.f32 %v1324_v53, %v399_v3  ;;  %v401_v7 = vpop.f32.mrb[41].mxu1 }
 0x166   :  { %v571_v8 = vpop.f32.mrb[41].mxu0 }
 0x167   :  { %614 = vst.msk [vmem:[%s1433_s3 + $0x98] sm:$0xff] %vm594_vm0, %v592_v5  ;;  %v570_v9 = vadd.f32 %v569_v4, %v400_v6 }
 0x169   :  { %v593_v10 = vmax.f32 %v570_v9, 0.0 }
 0x16b   :  { %616 = vst.msk [vmem:[%s1433_s3 + $0xa0] sm:$0x3] %vm615_vm1, %v593_v10 }

// kernel: cnn_forward.6
= control target key start
LH: loop header
LB: loop body
LE: loop exit
PB: predicated region body
PF: predicated region fallthrough
CT: control target
= control target key end

     0   :  { %v1189_v36 = vmov 0.0|0.0   ;;  %vm1190_vm0 = vmmov 0   ;;  %vm230_vm1 = vcmask 523264   ;;  %vm685_vm2 = vcmask 517120   ;;  %s1631_s1 = inlined_call_operand.vmem [shape: bf16[576,64], index: 1, kind: input, shape index: {}]   ;;  %s1632_s0 = inlined_call_operand.vmem [shape: f32[98,576], index: 0, kind: input, shape index: {}]   ;;  %s1633_s2 = inlined_call_operand.vmem [shape: f32[1,64], index: 2, kind: input, shape index: {}]   ;;  %s1634_s3 = inlined_call_operand.vmem [shape: f32[98,64], index: 3, kind: output, shape index: {}]  }
   0x1   :  { %v856_v0 = vld [vmem:[%s1631_s1 + $0x40] sm:$0xff]   ;;  %v857_v4 = vld [vmem:[%s1631_s1 + $0x48] sm:$0xff]   ;;  %v858_v8 = vld [vmem:[%s1631_s1 + $0x50] sm:$0xff]  }
   0x2   :  { %v872_v1 = vld [vmem:[%s1631_s1 + $0xc0] sm:$0xff]   ;;  %1103 = vmatprep.subr.bf16.mxu0 %v856_v0  ;;  %v873_v5 = vld [vmem:[%s1631_s1 + $0xc8] sm:$0xff]   ;;  %v874_v9 = vld [vmem:[%s1631_s1 + $0xd0] sm:$0xff]  }
   0x3   :  { %v706_v2 = vld [vmem:[%s1631_s1] sm:$0xff]   ;;  %1135 = vmatprep.subr.bf16.mxu1 %v872_v1  ;;  %v849_v6 = vld [vmem:[%s1631_s1 + $0x8] sm:$0xff]   ;;  %v850_v10 = vld [vmem:[%s1631_s1 + $0x10] sm:$0xff]  }
   0x4   :  { %v864_v3 = vld [vmem:[%s1631_s1 + $0x80] sm:$0xff]   ;;  %1105 = vmatpush3.bf16.msra.mxu0 %v706_v2  ;;  %v865_v7 = vld [vmem:[%s1631_s1 + $0x88] sm:$0xff]   ;;  %v866_v11 = vld [vmem:[%s1631_s1 + $0x90] sm:$0xff]  }
   0x5   :  { %1137 = vmatpush3.bf16.msra.mxu1 %v864_v3  ;;  %1107 = vmatprep.subr.bf16.mxu0 %v857_v4  ;;  %v859_v12 = vld [vmem:[%s1631_s1 + $0x58] sm:$0xff]   ;;  %v159_v14 = vld [vmem:[%s1632_s0 + $0x8] sm:$0xff]  ;;  %v860_v18 = vld [vmem:[%s1631_s1 + $0x60] sm:$0xff]  }
   0x6   :  { %1139 = vmatprep.subr.bf16.mxu1 %v873_v5  ;;  %v875_v13 = vld [vmem:[%s1631_s1 + $0xd8] sm:$0xff]   ;;  %v876_v19 = vld [vmem:[%s1631_s1 + $0xe0] sm:$0xff]   ;;  %334 = vmatprep.mubr.f32.mxu0 %v159_v14  ;;  %v861_v22 = vld [vmem:[%s1631_s1 + $0x68] sm:$0xff]  }
   0x7   :  { %v851_v15 = vld [vmem:[%s1631_s1 + $0x18] sm:$0xff]   ;;  %v852_v20 = vld [vmem:[%s1631_s1 + $0x20] sm:$0xff]   ;;  %v877_v23 = vld [vmem:[%s1631_s1 + $0xe8] sm:$0xff]  }
   0x8   :  { %1109 = vmatpush3.bf16.msra.mxu0 %v849_v6  ;;  %v867_v16 = vld [vmem:[%s1631_s1 + $0x98] sm:$0xff]   ;;  %v868_v21 = vld [vmem:[%s1631_s1 + $0xa0] sm:$0xff]   ;;  %v853_v24 = vld [vmem:[%s1631_s1 + $0x28] sm:$0xff]  }
   0x9   :  { %1141 = vmatpush3.bf16.msra.mxu1 %v865_v7  ;;  %1111 = vmatprep.subr.bf16.mxu0 %v858_v8  ;;  %v161_v17 = vld [vmem:[%s1632_s0 + $0x18] sm:$0xff]  ;;  %v869_v25 = vld [vmem:[%s1631_s1 + $0xa8] sm:$0xff]   ;;  %v862_v26 = vld [vmem:[%s1631_s1 + $0x70] sm:$0xff]  }
   0xa   :  { %1143 = vmatprep.subr.bf16.mxu1 %v874_v9  ;;  %464 = vmatprep.mubr.f32.mxu1 %v161_v17  ;;  %v878_v27 = vld [vmem:[%s1631_s1 + $0xf0] sm:$0xff]   ;;  %v863_v30 = vld [vmem:[%s1631_s1 + $0x78] sm:$0xff]   ;;  %v158_v34 = vld [vmem:[%s1632_s0] sm:$0xff] }
   0xb   :  { %v854_v28 = vld [vmem:[%s1631_s1 + $0x30] sm:$0xff]   ;;  %v879_v31 = vld [vmem:[%s1631_s1 + $0xf8] sm:$0xff]   ;;  %v880_v37 = vld [vmem:[%s1631_s1 + $0x100] sm:$0xff]  }
   0xc   :  { %1113 = vmatpush3.bf16.msra.mxu0 %v850_v10  ;;  %v870_v29 = vld [vmem:[%s1631_s1 + $0xb0] sm:$0xff]   ;;  %v855_v32 = vld [vmem:[%s1631_s1 + $0x38] sm:$0xff]   ;;  %v166_v39 = vld [vmem:[%s1632_s0 + $0x40] sm:$0xff] }
   0xd   :  { %1145 = vmatpush3.bf16.msra.mxu1 %v866_v11  ;;  %1115 = vmatprep.subr.bf16.mxu0 %v859_v12  ;;  %v871_v33 = vld [vmem:[%s1631_s1 + $0xb8] sm:$0xff]   ;;  %v160_v35 = vld [vmem:[%s1632_s0 + $0x10] sm:$0xff]  ;;  %v163_v40 = vld [vmem:[%s1632_s0 + $0x28] sm:$0xff] }
   0xe   :  { %1147 = vmatprep.subr.bf16.mxu1 %v875_v13  ;;  %v164_v38 = vld [vmem:[%s1632_s0 + $0x30] sm:$0xff]  ;;  %v165_v41 = vld [vmem:[%s1632_s0 + $0x38] sm:$0xff]  ;;  %v171_v43 = vld [vmem:[%s1632_s0 + $0x68] sm:$0xff] }
   0xf   :  { %v169_v42 = vld [vmem:[%s1632_s0 + $0x58] sm:$0xff]  ;;  %v881_v44 = vld [vmem:[%s1631_s1 + $0x108] sm:$0xff]   ;;  %v168_v45 = vld [vmem:[%s1632_s0 + $0x50] sm:$0xff] }
  0x10   :  { %1117 = vmatpush3.bf16.msra.mxu0 %v851_v15  ;;  %v170_v46 = vld [vmem:[%s1632_s0 + $0x60] sm:$0xff]  ;;  %v176_v48 = vld [vmem:[%s1632_s0 + $0x90] sm:$0xff]  ;;  %v173_v50 = vld [vmem:[%s1632_s0 + $0x78] sm:$0xff] }
  0x11   :  { %1149 = vmatpush3.bf16.msra.mxu1 %v867_v16  ;;  %1119 = vmatprep.subr.bf16.mxu0 %v860_v18  ;;  %v174_v47 = vld [vmem:[%s1632_s0 + $0x80] sm:$0xff]  ;;  %v882_v49 = vld [vmem:[%s1631_s1 + $0x110] sm:$0xff]   ;;  %v175_v51 = vld [vmem:[%s1632_s0 + $0x88] sm:$0xff] }
  0x12   :  { %1151 = vmatprep.subr.bf16.mxu1 %v876_v19  ;;  %v179_v52 = vld [vmem:[%s1632_s0 + $0xa8] sm:$0xff]  ;;  %v181_v53 = vld [vmem:[%s1632_s0 + $0xb8] sm:$0xff]  ;;  %v178_v55 = vld [vmem:[%s1632_s0 + $0xa0] sm:$0xff] }
  0x13   :  { %v883_v54 = vld [vmem:[%s1631_s1 + $0x118] sm:$0xff]   ;;  %v180_v56 = vld [vmem:[%s1632_s0 + $0xb0] sm:$0xff]  ;;  %v186_v58 = vld [vmem:[%s1632_s0 + $0xe0] sm:$0xff] }
  0x14   :  { %1121 = vmatpush3.bf16.msra.mxu0 %v852_v20  ;;  %v184_v57 = vld [vmem:[%s1632_s0 + $0xd0] sm:$0xff]  ;;  %v183_v59 = vld [vmem:[%s1632_s0 + $0xc8] sm:$0xff]  ;;  %v185_v60 = vld [vmem:[%s1632_s0 + $0xd8] sm:$0xff] }
  0x15   :  { %1153 = vmatpush3.bf16.msra.mxu1 %v868_v21  ;;  %1123 = vmatprep.subr.bf16.mxu0 %v861_v22  ;;  %v189_v61 = vld [vmem:[%s1632_s0 + $0xf8] sm:$0xff]  ;;  %v191_v62 = vld [vmem:[%s1632_s0 + $0x108] sm:$0xff]  ;;  %v188_v63 = vld [vmem:[%s1632_s0 + $0xf0] sm:$0xff] }
  0x16   :  { %1155 = vmatprep.subr.bf16.mxu1 %v877_v23  ;;  %v190_v0 = vld [vmem:[%s1632_s0 + $0x100] sm:$0xff]  ;;  %v196_v2 = vld [vmem:[%s1632_s0 + $0x130] sm:$0xff]  ;;  %v193_v3 = vld [vmem:[%s1632_s0 + $0x118] sm:$0xff] }
  0x17   :  { %v194_v1 = vld [vmem:[%s1632_s0 + $0x120] sm:$0xff]  ;;  %v195_v4 = vld [vmem:[%s1632_s0 + $0x128] sm:$0xff]  ;;  %v201_v6 = vld [vmem:[%s1632_s0 + $0x158] sm:$0xff] }
  0x18   :  { %1125 = vmatpush3.bf16.msra.mxu0 %v853_v24  ;;  %v199_v5 = vld [vmem:[%s1632_s0 + $0x148] sm:$0xff]  ;;  %v198_v7 = vld [vmem:[%s1632_s0 + $0x140] sm:$0xff]  ;;  %v200_v8 = vld [vmem:[%s1632_s0 + $0x150] sm:$0xff] }
  0x19   :  { %1157 = vmatpush3.bf16.msra.mxu1 %v869_v25  ;;  %1127 = vmatprep.subr.bf16.mxu0 %v862_v26  ;;  %v204_v9 = vld [vmem:[%s1632_s0 + $0x170] sm:$0xff]  ;;  %v206_v10 = vld [vmem:[%s1632_s0 + $0x180] sm:$0xff]  ;;  %v203_v11 = vld [vmem:[%s1632_s0 + $0x168] sm:$0xff]  ;;  %v1191_v25 = vmov 0.0  }
  0x1a   :  { %1159 = vmatprep.subr.bf16.mxu1 %v878_v27  ;;  %v205_v12 = vld [vmem:[%s1632_s0 + $0x178] sm:$0xff]  ;;  %v211_v14 = vld [vmem:[%s1632_s0 + $0x1a8] sm:$0xff]  ;;  %v208_v15 = vld [vmem:[%s1632_s0 + $0x190] sm:$0xff] }
  0x1b   :  { %v209_v13 = vld [vmem:[%s1632_s0 + $0x198] sm:$0xff]  ;;  %v210_v16 = vld [vmem:[%s1632_s0 + $0x1a0] sm:$0xff]  ;;  %v216_v18 = vld [vmem:[%s1632_s0 + $0x1d0] sm:$0xff] }
  0x1c   :  { %1129 = vmatpush3.bf16.msra.mxu0 %v854_v28  ;;  %v214_v17 = vld [vmem:[%s1632_s0 + $0x1c0] sm:$0xff]  ;;  %v213_v19 = vld [vmem:[%s1632_s0 + $0x1b8] sm:$0xff]  ;;  %v215_v20 = vld [vmem:[%s1632_s0 + $0x1c8] sm:$0xff] }
  0x1d   :  { %1161 = vmatpush3.bf16.msra.mxu1 %v870_v29  ;;  %1131 = vmatprep.subr.bf16.mxu0 %v863_v30  ;;  %v219_v21 = vld [vmem:[%s1632_s0 + $0x1e8] sm:$0x3]  ;;  %v221_v22 = vld [vmem:[%s1632_s0 + $0x1f8] sm:$0x3]  ;;  %v218_v23 = vld [vmem:[%s1632_s0 + $0x1e0] sm:$0x3] }
  0x1e   :  { %1163 = vmatprep.subr.bf16.mxu1 %v879_v31  ;;  %v220_v24 = vld [vmem:[%s1632_s0 + $0x1f0] sm:$0x3]  ;;  %v162_v26 = vld [vmem:[%s1632_s0 + $0x20] sm:$0xff]  ;;  %v197_v27 = vld [vmem:[%s1632_s0 + $0x138] sm:$0xff] }
  0x1f   :  { %v167_v28 = vld [vmem:[%s1632_s0 + $0x48] sm:$0xff]  ;;  %v202_v29 = vld [vmem:[%s1632_s0 + $0x160] sm:$0xff]  ;;  %v172_v30 = vld [vmem:[%s1632_s0 + $0x70] sm:$0xff] }
  0x20   :  { %1133 = vmatpush3.bf16.msra.mxu0 %v855_v32  ;;  %v207_v31 = vld [vmem:[%s1632_s0 + $0x188] sm:$0xff]  ;;  %v177_v32 = vld [vmem:[%s1632_s0 + $0x98] sm:$0xff] }
  0x21   :  { %1165 = vmatpush3.bf16.msra.mxu1 %v871_v33  ;;  %1166 = vmatprep.subr.bf16.mxu0 %v1189_v36  ;;  %v212_v33 = vld [vmem:[%s1632_s0 + $0x1b0] sm:$0xff] }
  0x22   :  { %1178 = vmatprep.subr.bf16.mxu1 %v1189_v36 }
  0x23   :  { %335 = vmatmul.mubr.f32.vlgmr.msra.gmra.mrb[0].mxu0 %v158_v34  ;;  %v182_v34 = vld [vmem:[%s1632_s0 + $0xc0] sm:$0xff] }
  0x24   :  { %465 = vmatmul.mubr.f32.vlgmr.msra.gmra.mrb[0].mxu1 %v160_v35  ;;  %1168 = vmatpush3.bf16.msra.mxu0 %v880_v37  ;;  %v217_v35 = vld [vmem:[%s1632_s0 + $0x1d8] sm:$0xff] }
  0x25   :  { %339 = vmatprep.mubr.f32.mxu0 %v164_v38  ;;  %469 = vmatprep.mubr.f32.mxu1 %v166_v39  ;;  %v192_v38 = vld [vmem:[%s1632_s0 + $0x110] sm:$0xff] }
  0x26   :  { %1182 = vmatpush3.bf16.msra.mxu1 %v880_v37  ;;  %1169 = vmatprep.subr.bf16.mxu0 %v1189_v36  ;;  %v222_v37 = vld [vmem:[%s1632_s0 + $0x200] sm:$0x3] }
  0x27   :  { %1179 = vmatprep.subr.bf16.mxu1 %v1189_v36  ;;  %340 = vmatmul.mubr.f32.gmra.mrb[2].mxu0 %v163_v40 }
  0x28   :  { %470 = vmatmul.mubr.f32.gmra.mrb[2].mxu1 %v165_v41  ;;  %344 = vmatprep.mubr.f32.mxu0 %v169_v42  ;;  %v1544_v41 = vld [vmem:[%s1633_s2] ss:$0 sm:$0xff] }
  0x29   :  { %474 = vmatprep.mubr.f32.mxu1 %v171_v43  ;;  %1171 = vmatpush3.bf16.msra.mxu0 %v881_v44 }
  0x2a   :  { %1183 = vmatpush3.bf16.msra.mxu1 %v881_v44  ;;  %1172 = vmatprep.subr.bf16.mxu0 %v1189_v36 }
  0x2b   :  { %1180 = vmatprep.subr.bf16.mxu1 %v1189_v36  ;;  %345 = vmatmul.mubr.f32.gmra.mrb[4].mxu0 %v168_v45 }
  0x2c   :  { %475 = vmatmul.mubr.f32.gmra.mrb[4].mxu1 %v170_v46  ;;  %349 = vmatprep.mubr.f32.mxu0 %v174_v47 }
  0x2d   :  { %479 = vmatprep.mubr.f32.mxu1 %v176_v48  ;;  %1174 = vmatpush3.bf16.msra.mxu0 %v882_v49 }
  0x2e   :  { %1184 = vmatpush3.bf16.msra.mxu1 %v882_v49  ;;  %1175 = vmatprep.subr.bf16.mxu0 %v1189_v36 }
  0x2f   :  { %1181 = vmatprep.subr.bf16.mxu1 %v1189_v36  ;;  %350 = vmatmul.mubr.f32.gmra.mrb[6].mxu0 %v173_v50  ;;  %v187_v36 = vld [vmem:[%s1632_s0 + $0xe8] sm:$0xff] }
  0x30   :  { %480 = vmatmul.mubr.f32.gmra.mrb[6].mxu1 %v175_v51  ;;  %354 = vmatprep.mubr.f32.mxu0 %v179_v52 }
  0x31   :  { %484 = vmatprep.mubr.f32.mxu1 %v181_v53  ;;  %1177 = vmatpush3.bf16.msra.mxu0 %v883_v54 }
  0x32   :  { %1185 = vmatpush3.bf16.msra.mxu1 %v883_v54 }
  0x33   :  { %355 = vmatmul.mubr.f32.gmra.mrb[8].mxu0 %v178_v55 }
  0x34   :  { %485 = vmatmul.mubr.f32.gmra.mrb[8].mxu1 %v180_v56  ;;  %359 = vmatprep.mubr.f32.mxu0 %v184_v57 }
  0x35   :  { %489 = vmatprep.mubr.f32.mxu1 %v186_v58 }
  0x37   :  { %360 = vmatmul.mubr.f32.gmra.mrb[10].mxu0 %v183_v59 }
  0x38   :  { %490 = vmatmul.mubr.f32.gmra.mrb[10].mxu1 %v185_v60  ;;  %364 = vmatprep.mubr.f32.mxu0 %v189_v61 }
  0x39   :  { %494 = vmatprep.mubr.f32.mxu1 %v191_v62 }
  0x3b   :  { %365 = vmatmul.mubr.f32.gmra.mrb[12].mxu0 %v188_v63 }
  0x3c   :  { %495 = vmatmul.mubr.f32.gmra.mrb[12].mxu1 %v190_v0  ;;  %369 = vmatprep.mubr.f32.mxu0 %v194_v1 }
  0x3d   :  { %499 = vmatprep.mubr.f32.mxu1 %v196_v2 }
  0x3f   :  { %370 = vmatmul.mubr.f32.gmra.mrb[14].mxu0 %v193_v3 }
  0x40   :  { %500 = vmatmul.mubr.f32.gmra.mrb[14].mxu1 %v195_v4  ;;  %374 = vmatprep.mubr.f32.mxu0 %v199_v5 }
  0x41   :  { %504 = vmatprep.mubr.f32.mxu1 %v201_v6 }
  0x43   :  { %375 = vmatmul.mubr.f32.gmra.mrb[16].mxu0 %v198_v7 }
  0x44   :  { %505 = vmatmul.mubr.f32.gmra.mrb[16].mxu1 %v200_v8  ;;  %379 = vmatprep.mubr.f32.mxu0 %v204_v9 }
  0x45   :  { %509 = vmatprep.mubr.f32.mxu1 %v206_v10 }
  0x47   :  { %380 = vmatmul.mubr.f32.gmra.mrb[18].mxu0 %v203_v11 }
  0x48   :  { %510 = vmatmul.mubr.f32.gmra.mrb[18].mxu1 %v205_v12  ;;  %384 = vmatprep.mubr.f32.mxu0 %v209_v13 }
  0x49   :  { %514 = vmatprep.mubr.f32.mxu1 %v211_v14 }
  0x4b   :  { %385 = vmatmul.mubr.f32.gmra.mrb[20].mxu0 %v208_v15 }
  0x4c   :  { %515 = vmatmul.mubr.f32.gmra.mrb[20].mxu1 %v210_v16  ;;  %389 = vmatprep.mubr.f32.mxu0 %v214_v17 }
  0x4d   :  { %519 = vmatprep.mubr.f32.mxu1 %v216_v18 }
  0x4f   :  { %390 = vmatmul.mubr.f32.gmra.mrb[22].mxu0 %v213_v19 }
  0x50   :  { %520 = vmatmul.mubr.f32.gmra.mrb[22].mxu1 %v215_v20  ;;  %394 = vmatprep.mubr.f32.mxu0 %v219_v21 }
  0x51   :  { %524 = vmatprep.mubr.f32.mxu1 %v221_v22 }
  0x53   :  { %395 = vmatmul.mubr.f32.gmra.mrb[24].mxu0 %v218_v23 }
  0x54   :  { %525 = vmatmul.mubr.f32.gmra.mrb[24].mxu1 %v220_v24  ;;  %1063 = vmatprep.mubr.msk.f32.mxu0 %vm1190_vm0, %v1191_v25 }
  0x55   :  { %1084 = vmatprep.mubr.msk.f32.mxu1 %vm1190_vm0, %v1191_v25 }
  0x57   :  { %1064 = vmatmul.mubr.msk.f32.vlgmr.msra.gmra.mrb[26].mxu0 %vm230_vm1, %v162_v26 }
  0x58   :  { %1085 = vmatmul.mubr.msk.f32.vlgmr.msra.gmra.mrb[26].mxu1 %vm230_vm1, %v197_v27  ;;  %1066 = vmatprep.mubr.msk.f32.mxu0 %vm1190_vm0, %v1191_v25 }
  0x59   :  { %1087 = vmatprep.mubr.msk.f32.mxu1 %vm1190_vm0, %v1191_v25 }
  0x5b   :  { %1067 = vmatmul.mubr.msk.f32.gmra.mrb[28].mxu0 %vm230_vm1, %v167_v28 }
  0x5c   :  { %1088 = vmatmul.mubr.msk.f32.gmra.mrb[28].mxu1 %vm230_vm1, %v202_v29  ;;  %1069 = vmatprep.mubr.msk.f32.mxu0 %vm1190_vm0, %v1191_v25 }
  0x5d   :  { %1090 = vmatprep.mubr.msk.f32.mxu1 %vm1190_vm0, %v1191_v25 }
  0x5f   :  { %1070 = vmatmul.mubr.msk.f32.gmra.mrb[30].mxu0 %vm230_vm1, %v172_v30 }
  0x60   :  { %1091 = vmatmul.mubr.msk.f32.gmra.mrb[30].mxu1 %vm230_vm1, %v207_v31  ;;  %1072 = vmatprep.mubr.msk.f32.mxu0 %vm1190_vm0, %v1191_v25 }
  0x61   :  { %1093 = vmatprep.mubr.msk.f32.mxu1 %vm1190_vm0, %v1191_v25 }
  0x63   :  { %1073 = vmatmul.mubr.msk.f32.gmra.mrb[32].mxu0 %vm230_vm1, %v177_v32 }
  0x64   :  { %1094 = vmatmul.mubr.msk.f32.gmra.mrb[32].mxu1 %vm230_vm1, %v212_v33  ;;  %1075 = vmatprep.mubr.msk.f32.mxu0 %vm1190_vm0, %v1191_v25 }
  0x65   :  { %1096 = vmatprep.mubr.msk.f32.mxu1 %vm1190_vm0, %v1191_v25 }
  0x67   :  { %1076 = vmatmul.mubr.msk.f32.gmra.mrb[34].mxu0 %vm230_vm1, %v182_v34 }
  0x68   :  { %1097 = vmatmul.mubr.msk.f32.gmra.mrb[34].mxu1 %vm230_vm1, %v217_v35  ;;  %1078 = vmatprep.mubr.msk.f32.mxu0 %vm1190_vm0, %v1191_v25 }
  0x69   :  { %1099 = vmatprep.mubr.msk.f32.mxu1 %vm1190_vm0, %v1191_v25 }
  0x6b   :  { %1079 = vmatmul.mubr.msk.f32.gmra.mrb[36].mxu0 %vm230_vm1, %v187_v36 }
  0x6c   :  { %1100 = vmatmul.mubr.msk.f32.gmra.mrb[36].mxu1 %vm230_vm1, %v222_v37  ;;  %1081 = vmatprep.mubr.msk.f32.mxu0 %vm1190_vm0, %v1191_v25 }
  0x6f   :  { %1082 = vmatmul.mubr.msk.f32.gmra.mrb[38].mxu0 %vm230_vm1, %v192_v38 }
  0xf6   :  { %v916_v39 = vpop.f32.mrb[0].mxu0 }
  0xf7   :  { %v987_v40 = vpop.f32.mrb[0].mxu1  ;;  %v917_v42 = vpop.f32.mrb[1].mxu0 }
  0xf8   :  { %v988_v43 = vpop.f32.mrb[1].mxu1  ;;  %v918_v44 = vadd.f32 %v917_v42, %v916_v39 }
  0xf9   :  { %v989_v45 = vadd.f32 %v988_v43, %v987_v40 }
  0xfa   :  { %v337_v46 = vadd.f32 %v918_v44, %v1544_v41  ;;  %v919_v47 = vpop.f32.mrb[2].mxu0 }
  0xfb   :  { %v990_v48 = vpop.f32.mrb[2].mxu1  ;;  %v920_v49 = vpop.f32.mrb[3].mxu0 }
  0xfc   :  { %v991_v50 = vpop.f32.mrb[3].mxu1  ;;  %v921_v51 = vadd.f32 %v920_v49, %v919_v47  ;;  %v1547_v53 = vadd.f32 %v989_v45, %v337_v46 }
  0xfd   :  { %v992_v52 = vadd.f32 %v991_v50, %v990_v48 }
  0xfe   :  { %v342_v54 = vadd.f32 %v921_v51, %v1544_v41  ;;  %v922_v55 = vpop.f32.mrb[4].mxu0 }
  0xff   :  { %v993_v56 = vpop.f32.mrb[4].mxu1  ;;  %v923_v57 = vpop.f32.mrb[5].mxu0 }
 0x100   :  { %v994_v58 = vpop.f32.mrb[5].mxu1  ;;  %v924_v59 = vadd.f32 %v923_v57, %v922_v55  ;;  %v1550_v61 = vadd.f32 %v992_v52, %v342_v54 }
 0x101   :  { %v995_v60 = vadd.f32 %v994_v58, %v993_v56 }
 0x102   :  { %v347_v62 = vadd.f32 %v924_v59, %v1544_v41  ;;  %v925_v63 = vpop.f32.mrb[6].mxu0 }
 0x103   :  { %v996_v0 = vpop.f32.mrb[6].mxu1  ;;  %v926_v1 = vpop.f32.mrb[7].mxu0 }
 0x104   :  { %v997_v2 = vpop.f32.mrb[7].mxu1  ;;  %v927_v3 = vadd.f32 %v926_v1, %v925_v63  ;;  %v1553_v5 = vadd.f32 %v995_v60, %v347_v62 }
 0x105   :  { %v998_v4 = vadd.f32 %v997_v2, %v996_v0 }
 0x106   :  { %v352_v6 = vadd.f32 %v927_v3, %v1544_v41  ;;  %v928_v7 = vpop.f32.mrb[8].mxu0 }
 0x107   :  { %v999_v8 = vpop.f32.mrb[8].mxu1  ;;  %v929_v9 = vpop.f32.mrb[9].mxu0 }
 0x108   :  { %v1000_v10 = vpop.f32.mrb[9].mxu1  ;;  %v930_v11 = vadd.f32 %v929_v9, %v928_v7  ;;  %v1556_v13 = vadd.f32 %v998_v4, %v352_v6 }
 0x109   :  { %v1001_v12 = vadd.f32 %v1000_v10, %v999_v8 }
 0x10a   :  { %v357_v14 = vadd.f32 %v930_v11, %v1544_v41  ;;  %v931_v15 = vpop.f32.mrb[10].mxu0 }
 0x10b   :  { %v1002_v16 = vpop.f32.mrb[10].mxu1  ;;  %v932_v17 = vpop.f32.mrb[11].mxu0 }
 0x10c   :  { %v1003_v18 = vpop.f32.mrb[11].mxu1  ;;  %v933_v19 = vadd.f32 %v932_v17, %v931_v15  ;;  %v1559_v21 = vadd.f32 %v1001_v12, %v357_v14 }
 0x10d   :  { %v1004_v20 = vadd.f32 %v1003_v18, %v1002_v16 }
 0x10e   :  { %v362_v22 = vadd.f32 %v933_v19, %v1544_v41  ;;  %v934_v23 = vpop.f32.mrb[12].mxu0 }
 0x10f   :  { %v1005_v24 = vpop.f32.mrb[12].mxu1  ;;  %v935_v25 = vpop.f32.mrb[13].mxu0 }
 0x110   :  { %v1006_v26 = vpop.f32.mrb[13].mxu1  ;;  %v936_v27 = vadd.f32 %v935_v25, %v934_v23  ;;  %v1562_v29 = vadd.f32 %v1004_v20, %v362_v22 }
 0x111   :  { %v1007_v28 = vadd.f32 %v1006_v26, %v1005_v24 }
 0x112   :  { %v367_v30 = vadd.f32 %v936_v27, %v1544_v41  ;;  %v937_v31 = vpop.f32.mrb[14].mxu0 }
 0x113   :  { %v1008_v32 = vpop.f32.mrb[14].mxu1  ;;  %v938_v33 = vpop.f32.mrb[15].mxu0 }
 0x114   :  { %v1009_v34 = vpop.f32.mrb[15].mxu1  ;;  %v939_v35 = vadd.f32 %v938_v33, %v937_v31  ;;  %v1565_v37 = vadd.f32 %v1007_v28, %v367_v30 }
 0x115   :  { %v1010_v36 = vadd.f32 %v1009_v34, %v1008_v32 }
 0x116   :  { %v372_v38 = vadd.f32 %v939_v35, %v1544_v41  ;;  %v940_v39 = vpop.f32.mrb[16].mxu0 }
 0x117   :  { %v1011_v40 = vpop.f32.mrb[16].mxu1  ;;  %v941_v42 = vpop.f32.mrb[17].mxu0 }
 0x118   :  { %v1012_v43 = vpop.f32.mrb[17].mxu1  ;;  %v942_v44 = vadd.f32 %v941_v42, %v940_v39  ;;  %v502_v46 = vadd.f32 %v1010_v36, %v372_v38 }
 0x119   :  { %v1013_v45 = vadd.f32 %v1012_v43, %v1011_v40 }
 0x11a   :  { %v377_v47 = vadd.f32 %v942_v44, %v1544_v41  ;;  %v943_v48 = vpop.f32.mrb[18].mxu0 }
 0x11b   :  { %v1014_v49 = vpop.f32.mrb[18].mxu1  ;;  %v944_v50 = vpop.f32.mrb[19].mxu0 }
 0x11c   :  { %v1015_v51 = vpop.f32.mrb[19].mxu1  ;;  %v945_v52 = vadd.f32 %v944_v50, %v943_v48  ;;  %v507_v55 = vadd.f32 %v1013_v45, %v377_v47 }
 0x11d   :  { %v1016_v54 = vadd.f32 %v1015_v51, %v1014_v49 }
 0x11e   :  { %v382_v56 = vadd.f32 %v945_v52, %v1544_v41  ;;  %v946_v57 = vpop.f32.mrb[20].mxu0 }
 0x11f   :  { %v1017_v58 = vpop.f32.mrb[20].mxu1  ;;  %v947_v59 = vpop.f32.mrb[21].mxu0 }
 0x120   :  { %v1018_v60 = vpop.f32.mrb[21].mxu1  ;;  %v948_v62 = vadd.f32 %v947_v59, %v946_v57  ;;  %v512_v0 = vadd.f32 %v1016_v54, %v382_v56 }
 0x121   :  { %v1019_v63 = vadd.f32 %v1018_v60, %v1017_v58 }
 0x122   :  { %v387_v1 = vadd.f32 %v948_v62, %v1544_v41  ;;  %v949_v2 = vpop.f32.mrb[22].mxu0 }
 0x123   :  { %v1020_v3 = vpop.f32.mrb[22].mxu1  ;;  %v950_v4 = vpop.f32.mrb[23].mxu0 }
 0x124   :  { %v1021_v6 = vpop.f32.mrb[23].mxu1  ;;  %v951_v7 = vadd.f32 %v950_v4, %v949_v2  ;;  %v517_v9 = vadd.f32 %v1019_v63, %v387_v1 }
 0x125   :  { %v1022_v8 = vadd.f32 %v1021_v6, %v1020_v3 }
 0x126   :  { %v392_v10 = vadd.f32 %v951_v7, %v1544_v41  ;;  %v952_v11 = vpop.f32.mrb[24].mxu0 }
 0x127   :  { %v1023_v12 = vpop.f32.mrb[24].mxu1  ;;  %v953_v14 = vpop.f32.mrb[25].mxu0 }
 0x128   :  { %v1024_v15 = vpop.f32.mrb[25].mxu1  ;;  %v954_v16 = vadd.f32 %v953_v14, %v952_v11  ;;  %v522_v18 = vadd.f32 %v1022_v8, %v392_v10 }
 0x129   :  { %v1025_v17 = vadd.f32 %v1024_v15, %v1023_v12 }
 0x12a   :  { %v397_v19 = vadd.f32 %v954_v16, %v1544_v41  ;;  %v596_v20 = vpop.f32.mrb[26].mxu0 }
 0x12b   :  { %v631_v22 = vpop.f32.mrb[26].mxu1  ;;  %v597_v23 = vadd.f32 %v596_v20, %v1547_v53  ;;  %v1065_v25 = vpop.f32.mrb[27].mxu0 }
 0x12c   :  { %v632_v24 = vadd.f32 %v631_v22, %v502_v46  ;;  %v1086_v26 = vpop.f32.mrb[27].mxu1  ;;  %v527_v27 = vadd.f32 %v1025_v17, %v397_v19 }
 0x12d   :  { %v660_v28 = vmax.f32 %v597_v23, 0.0 }
 0x12e   :  { %v667_v30 = vmax.f32 %v632_v24, 0.0  ;;  %v601_v31 = vpop.f32.mrb[28].mxu0 }
 0x12f   :  { %v636_v32 = vpop.f32.mrb[28].mxu1  ;;  %673 = vst.msk [vmem:[%s1634_s3] sm:$0xff] %vm230_vm1, %v660_v28  ;;  %v602_v41 = vadd.f32 %v601_v31, %v1550_v61  ;;  %v1068_v33 = vpop.f32.mrb[29].mxu0 }
 0x130   :  { %680 = vst.msk [vmem:[%s1634_s3 + $0x38] sm:$0xff] %vm230_vm1, %v667_v30  ;;  %v637_v53 = vadd.f32 %v636_v32, %v507_v55  ;;  %v1089_v34 = vpop.f32.mrb[29].mxu1 }
 0x131   :  { %v661_v35 = vmax.f32 %v602_v41, 0.0 }
 0x132   :  { %v668_v36 = vmax.f32 %v637_v53, 0.0  ;;  %v606_v38 = vpop.f32.mrb[30].mxu0 }
 0x133   :  { %v641_v39 = vpop.f32.mrb[30].mxu1  ;;  %674 = vst.msk [vmem:[%s1634_s3 + $0x8] sm:$0xff] %vm230_vm1, %v661_v35  ;;  %v607_v40 = vadd.f32 %v606_v38, %v1553_v5  ;;  %v1071_v42 = vpop.f32.mrb[31].mxu0 }
 0x134   :  { %681 = vst.msk [vmem:[%s1634_s3 + $0x40] sm:$0xff] %vm230_vm1, %v668_v36  ;;  %v642_v61 = vadd.f32 %v641_v39, %v512_v0  ;;  %v1092_v43 = vpop.f32.mrb[31].mxu1 }
 0x135   :  { %v662_v44 = vmax.f32 %v607_v40, 0.0 }
 0x136   :  { %v669_v45 = vmax.f32 %v642_v61, 0.0  ;;  %v611_v46 = vpop.f32.mrb[32].mxu0 }
 0x137   :  { %v646_v47 = vpop.f32.mrb[32].mxu1  ;;  %675 = vst.msk [vmem:[%s1634_s3 + $0x10] sm:$0xff] %vm230_vm1, %v662_v44  ;;  %v612_v48 = vadd.f32 %v611_v46, %v1556_v13  ;;  %v1074_v49 = vpop.f32.mrb[33].mxu0 }
 0x138   :  { %682 = vst.msk [vmem:[%s1634_s3 + $0x48] sm:$0xff] %vm230_vm1, %v669_v45  ;;  %v647_v5 = vadd.f32 %v646_v47, %v517_v9  ;;  %v1095_v50 = vpop.f32.mrb[33].mxu1 }
 0x139   :  { %v663_v51 = vmax.f32 %v612_v48, 0.0 }
 0x13a   :  { %v670_v52 = vmax.f32 %v647_v5, 0.0  ;;  %v616_v54 = vpop.f32.mrb[34].mxu0 }
 0x13b   :  { %v651_v55 = vpop.f32.mrb[34].mxu1  ;;  %676 = vst.msk [vmem:[%s1634_s3 + $0x18] sm:$0xff] %vm230_vm1, %v663_v51  ;;  %v617_v56 = vadd.f32 %v616_v54, %v1559_v21  ;;  %v1077_v57 = vpop.f32.mrb[35].mxu0 }
 0x13c   :  { %683 = vst.msk [vmem:[%s1634_s3 + $0x50] sm:$0xff] %vm230_vm1, %v670_v52  ;;  %v652_v13 = vadd.f32 %v651_v55, %v522_v18  ;;  %v1098_v58 = vpop.f32.mrb[35].mxu1 }
 0x13d   :  { %v664_v59 = vmax.f32 %v617_v56, 0.0 }
 0x13e   :  { %v671_v60 = vmax.f32 %v652_v13, 0.0  ;;  %v621_v62 = vpop.f32.mrb[36].mxu0 }
 0x13f   :  { %v656_v63 = vpop.f32.mrb[36].mxu1  ;;  %677 = vst.msk [vmem:[%s1634_s3 + $0x20] sm:$0xff] %vm230_vm1, %v664_v59  ;;  %v622_v0 = vadd.f32 %v621_v62, %v1562_v29  ;;  %v1080_v1 = vpop.f32.mrb[37].mxu0 }
 0x140   :  { %684 = vst.msk [vmem:[%s1634_s3 + $0x58] sm:$0xff] %vm230_vm1, %v671_v60  ;;  %v657_v21 = vadd.f32 %v656_v63, %v527_v27  ;;  %v1101_v2 = vpop.f32.mrb[37].mxu1 }
 0x141   :  { %v665_v3 = vmax.f32 %v622_v0, 0.0 }
 0x142   :  { %v672_v4 = vmax.f32 %v657_v21, 0.0  ;;  %v626_v6 = vpop.f32.mrb[38].mxu0 }
 0x143   :  { %678 = vst.msk [vmem:[%s1634_s3 + $0x28] sm:$0xff] %vm230_vm1, %v665_v3  ;;  %v627_v7 = vadd.f32 %v626_v6, %v1565_v37  ;;  %v1083_v8 = vpop.f32.mrb[39].mxu0 }
 0x144   :  { %686 = vst.msk [vmem:[%s1634_s3 + $0x60] sm:$0x3] %vm685_vm2, %v672_v4 }
 0x145   :  { %v666_v29 = vmax.f32 %v627_v7, 0.0 }
 0x147   :  { %679 = vst.msk [vmem:[%s1634_s3 + $0x30] sm:$0xff] %vm230_vm1, %v666_v29 }

// kernel: cnn_forward.7
= control target key start
LH: loop header
LB: loop body
LE: loop exit
PB: predicated region body
PF: predicated region fallthrough
CT: control target
= control target key end

     0   :  { %v2381_v36 = vlaneseq  ;;  %v8619_v37 = vmov 1983009808   ;;  %vm2541_vm0 = vcmask 523264   ;;  %vm4669_vm1 = vcmask 41984   ;;  %s11242_s1 = inlined_call_operand.vmem [shape: bf16[3136,512], index: 1, kind: input, shape index: {}]   ;;  %s11243_s0 = inlined_call_operand.vmem [shape: f32[2,3136], index: 0, kind: input, shape index: {}]   ;;  %s11244_s3 = inlined_call_operand.vmem [shape: bf16[512,7], index: 3, kind: input, shape index: {}]   ;;  %s11245_s2 = inlined_call_operand.vmem [shape: f32[1,512], index: 2, kind: input, shape index: {}]   ;;  %s11246_s4 = inlined_call_operand.vmem [shape: f32[1,7], index: 4, kind: input, shape index: {}]   ;;  %s11247_s5 = inlined_call_operand.vmem [shape: f32[2,13], index: 5, kind: output, shape index: {}]  }
   0x1   :  { %v7427_v0 = vld [vmem:[%s11242_s1 + $0x4] ss:$16 sps:$4 sm:$0xff]   ;;  %v7429_v1 = vld [vmem:[%s11242_s1 + $0xc] ss:$16 sps:$4 sm:$0xff]   ;;  %v7431_v2 = vld [vmem:[%s11242_s1] ss:$16 sps:$4 sm:$0xff]   ;;  %v2410_v38 = vunpack.c.l.s4 %v8619_v37 }
   0x2   :  { %4957 = vmatprep.subr.bf16.mxu0 %v7427_v0  ;;  %v7432_v3 = vld [vmem:[%s11242_s1 + $0x8] ss:$16 sps:$4 sm:$0xff]   ;;  %5741 = vmatprep.subr.bf16.mxu1 %v7429_v1  ;;  %v7433_v4 = vld [vmem:[%s11242_s1 + $0x24] ss:$16 sps:$4 sm:$0xff]   ;;  %v7435_v5 = vld [vmem:[%s11242_s1 + $0x2c] ss:$16 sps:$4 sm:$0xff]  }
   0x3   :  { %4959 = vmatpush1.bf16.msra.mxu0 %v7431_v2  ;;  %5743 = vmatpush1.bf16.msra.mxu1 %v7432_v3  ;;  %v7437_v6 = vld [vmem:[%s11242_s1 + $0x20] ss:$16 sps:$4 sm:$0xff]   ;;  %v7438_v7 = vld [vmem:[%s11242_s1 + $0x28] ss:$16 sps:$4 sm:$0xff]   ;;  %v7439_v8 = vld [vmem:[%s11242_s1 + $0x44] ss:$16 sps:$4 sm:$0xff]   ;;  %v2411_v43 = vunpack.c.0.s8 %v2410_v38 }
   0x4   :  { %4961 = vmatprep.subr.bf16.mxu0 %v7433_v4  ;;  %5745 = vmatprep.subr.bf16.mxu1 %v7435_v5  ;;  %v7441_v9 = vld [vmem:[%s11242_s1 + $0x4c] ss:$16 sps:$4 sm:$0xff]   ;;  %v7443_v10 = vld [vmem:[%s11242_s1 + $0x40] ss:$16 sps:$4 sm:$0xff]   ;;  %v7444_v11 = vld [vmem:[%s11242_s1 + $0x48] ss:$16 sps:$4 sm:$0xff]  }
   0x5   :  { %v7445_v12 = vld [vmem:[%s11242_s1 + $0x64] ss:$16 sps:$4 sm:$0xff]   ;;  %v7447_v13 = vld [vmem:[%s11242_s1 + $0x6c] ss:$16 sps:$4 sm:$0xff]   ;;  %v7449_v14 = vld [vmem:[%s11242_s1 + $0x60] ss:$16 sps:$4 sm:$0xff]  }
   0x6   :  { %v7450_v15 = vld [vmem:[%s11242_s1 + $0x68] ss:$16 sps:$4 sm:$0xff]   ;;  %v7451_v16 = vld [vmem:[%s11242_s1 + $0x84] ss:$16 sps:$4 sm:$0xff]   ;;  %v7453_v17 = vld [vmem:[%s11242_s1 + $0x8c] ss:$16 sps:$4 sm:$0xff]  }
   0x7   :  { %4963 = vmatpush1.bf16.msra.mxu0 %v7437_v6  ;;  %5747 = vmatpush1.bf16.msra.mxu1 %v7438_v7  ;;  %v7455_v18 = vld [vmem:[%s11242_s1 + $0x80] ss:$16 sps:$4 sm:$0xff]   ;;  %v7456_v19 = vld [vmem:[%s11242_s1 + $0x88] ss:$16 sps:$4 sm:$0xff]   ;;  %v7457_v20 = vld [vmem:[%s11242_s1 + $0xa4] ss:$16 sps:$4 sm:$0xff]  }
   0x8   :  { %4965 = vmatprep.subr.bf16.mxu0 %v7439_v8  ;;  %5749 = vmatprep.subr.bf16.mxu1 %v7441_v9  ;;  %v7459_v21 = vld [vmem:[%s11242_s1 + $0xac] ss:$16 sps:$4 sm:$0xff]   ;;  %v7461_v22 = vld [vmem:[%s11242_s1 + $0xa0] ss:$16 sps:$4 sm:$0xff]   ;;  %v7462_v23 = vld [vmem:[%s11242_s1 + $0xa8] ss:$16 sps:$4 sm:$0xff]  }
   0x9   :  { %v7463_v24 = vld [vmem:[%s11242_s1 + $0xc4] ss:$16 sps:$4 sm:$0xff]   ;;  %v7465_v25 = vld [vmem:[%s11242_s1 + $0xcc] ss:$16 sps:$4 sm:$0xff]   ;;  %v7467_v26 = vld [vmem:[%s11242_s1 + $0xc0] ss:$16 sps:$4 sm:$0xff]  }
   0xa   :  { %v7468_v27 = vld [vmem:[%s11242_s1 + $0xc8] ss:$16 sps:$4 sm:$0xff]   ;;  %v7469_v28 = vld [vmem:[%s11242_s1 + $0xe4] ss:$16 sps:$4 sm:$0xff]   ;;  %v7471_v29 = vld [vmem:[%s11242_s1 + $0xec] ss:$16 sps:$4 sm:$0xff]  }
   0xb   :  { %4967 = vmatpush1.bf16.msra.mxu0 %v7443_v10  ;;  %5751 = vmatpush1.bf16.msra.mxu1 %v7444_v11  ;;  %v7473_v30 = vld [vmem:[%s11242_s1 + $0xe0] ss:$16 sps:$4 sm:$0xff]   ;;  %v7474_v31 = vld [vmem:[%s11242_s1 + $0xe8] ss:$16 sps:$4 sm:$0xff]   ;;  %v7475_v32 = vld [vmem:[%s11242_s1 + $0x104] ss:$16 sps:$4 sm:$0xff]  }
   0xc   :  { %4969 = vmatprep.subr.bf16.mxu0 %v7445_v12  ;;  %5753 = vmatprep.subr.bf16.mxu1 %v7447_v13  ;;  %v7477_v33 = vld [vmem:[%s11242_s1 + $0x10c] ss:$16 sps:$4 sm:$0xff]   ;;  %v7479_v34 = vld [vmem:[%s11242_s1 + $0x100] ss:$16 sps:$4 sm:$0xff]   ;;  %v7480_v35 = vld [vmem:[%s11242_s1 + $0x108] ss:$16 sps:$4 sm:$0xff]  }
   0xd   :  { %v7481_v39 = vld [vmem:[%s11242_s1 + $0x124] ss:$16 sps:$4 sm:$0xff]   ;;  %v7483_v40 = vld [vmem:[%s11242_s1 + $0x12c] ss:$16 sps:$4 sm:$0xff]   ;;  %v7485_v41 = vld [vmem:[%s11242_s1 + $0x120] ss:$16 sps:$4 sm:$0xff]  }
   0xe   :  { %v8769_v42 = vshrl.u32 %v2381_v36, 7  ;;  %v7486_v44 = vld [vmem:[%s11242_s1 + $0x128] ss:$16 sps:$4 sm:$0xff]   ;;  %v7487_v45 = vld [vmem:[%s11242_s1 + $0x144] ss:$16 sps:$4 sm:$0xff]   ;;  %vm4712_vm5 = vcmask 48128  }
   0xf   :  { %4971 = vmatpush1.bf16.msra.mxu0 %v7449_v14  ;;  %5755 = vmatpush1.bf16.msra.mxu1 %v7450_v15  ;;  %v7489_v46 = vld [vmem:[%s11242_s1 + $0x14c] ss:$16 sps:$4 sm:$0xff]   ;;  %v7491_v47 = vld [vmem:[%s11242_s1 + $0x140] ss:$16 sps:$4 sm:$0xff]   ;;  %v7492_v48 = vld [vmem:[%s11242_s1 + $0x148] ss:$16 sps:$4 sm:$0xff]  }
  0x10   :  { %4973 = vmatprep.subr.bf16.mxu0 %v7451_v16  ;;  %5757 = vmatprep.subr.bf16.mxu1 %v7453_v17  ;;  %v8787_v49 = vsub.s32 %v2411_v43, %v8769_v42  ;;  %v7493_v50 = vld [vmem:[%s11242_s1 + $0x164] ss:$16 sps:$4 sm:$0xff]   ;;  %v7495_v51 = vld [vmem:[%s11242_s1 + $0x16c] ss:$16 sps:$4 sm:$0xff]   ;;  %v7497_v53 = vld [vmem:[%s11242_s1 + $0x160] ss:$16 sps:$4 sm:$0xff]  }
  0x11   :  { %v2372_v52 = vld [vmem:[%s11243_s0] sm:$0xff]  ;;  %v7498_v55 = vld [vmem:[%s11242_s1 + $0x168] ss:$16 sps:$4 sm:$0xff]   ;;  %v7501_v57 = vld [vmem:[%s11242_s1 + $0x18c] ss:$16 sps:$4 sm:$0xff]   ;;  %vm4714_vm6 = vcmask 97280  }
  0x12   :  { %v2415_v54 = vrot.slane %v2372_v52, %v8787_v49  ;;  %v7499_v56 = vld [vmem:[%s11242_s1 + $0x184] ss:$16 sps:$4 sm:$0xff]   ;;  %v7503_v59 = vld [vmem:[%s11242_s1 + $0x180] ss:$16 sps:$4 sm:$0xff]   ;;  %v7504_v60 = vld [vmem:[%s11242_s1 + $0x188] ss:$16 sps:$4 sm:$0xff]   ;;  %v2408_v7 = vcombine.high %v2372_v52, %v2372_v52 }
  0x13   :  { %4975 = vmatpush1.bf16.msra.mxu0 %v7455_v18  ;;  %5759 = vmatpush1.bf16.msra.mxu1 %v7456_v19  ;;  %v7505_v61 = vld [vmem:[%s11242_s1 + $0x1a4] ss:$16 sps:$4 sm:$0xff]   ;;  %v7507_v62 = vld [vmem:[%s11242_s1 + $0x1ac] ss:$16 sps:$4 sm:$0xff]   ;;  %v7509_v63 = vld [vmem:[%s11242_s1 + $0x1a0] ss:$16 sps:$4 sm:$0xff]  }
  0x14   :  { %4977 = vmatprep.subr.bf16.mxu0 %v7457_v20  ;;  %5761 = vmatprep.subr.bf16.mxu1 %v7459_v21  ;;  %v2423_v58 = vcombine.high %v2415_v54, %v2415_v54  ;;  %v7510_v0 = vld [vmem:[%s11242_s1 + $0x1a8] ss:$16 sps:$4 sm:$0xff]   ;;  %v7511_v1 = vld [vmem:[%s11242_s1 + $0x1c4] ss:$16 sps:$4 sm:$0xff]   ;;  %v7513_v2 = vld [vmem:[%s11242_s1 + $0x1cc] ss:$16 sps:$4 sm:$0xff]   ;;  %v8860_v12 = vrot.slane %v2408_v7, %v8787_v49 }
  0x15   :  { %v7515_v3 = vld [vmem:[%s11242_s1 + $0x1c0] ss:$16 sps:$4 sm:$0xff]   ;;  %v7516_v4 = vld [vmem:[%s11242_s1 + $0x1c8] ss:$16 sps:$4 sm:$0xff]   ;;  %v7517_v5 = vld [vmem:[%s11242_s1 + $0x1e4] ss:$16 sps:$4 sm:$0xff]  }
  0x16   :  { %2608 = vmatprep.mubr.f32.mxu0 %v2423_v58  ;;  %3531 = vmatprep.mubr.f32.mxu1 %v2423_v58  ;;  %v7519_v6 = vld [vmem:[%s11242_s1 + $0x1ec] ss:$16 sps:$4 sm:$0xff]   ;;  %v7521_v8 = vld [vmem:[%s11242_s1 + $0x1e0] ss:$16 sps:$4 sm:$0xff]   ;;  %v7522_v9 = vld [vmem:[%s11242_s1 + $0x1e8] ss:$16 sps:$4 sm:$0xff]   ;;  %v2424_v17 = vcombine.high %v8860_v12, %v8860_v12 }
  0x17   :  { %4979 = vmatpush1.bf16.msra.mxu0 %v7461_v22  ;;  %5763 = vmatpush1.bf16.msra.mxu1 %v7462_v23  ;;  %v7524_v10 = vld [vmem:[%s11242_s1 + $0x204] ss:$16 sps:$4 sm:$0xff]   ;;  %v7527_v11 = vld [vmem:[%s11242_s1 + $0x20c] ss:$16 sps:$4 sm:$0xff]   ;;  %v7526_v13 = vld [vmem:[%s11242_s1 + $0x200] ss:$16 sps:$4 sm:$0xff]  }
  0x18   :  { %4981 = vmatprep.subr.bf16.mxu0 %v7463_v24  ;;  %5765 = vmatprep.subr.bf16.mxu1 %v7465_v25  ;;  %v7529_v14 = vld [vmem:[%s11242_s1 + $0x208] ss:$16 sps:$4 sm:$0xff]   ;;  %v7530_v15 = vld [vmem:[%s11242_s1 + $0x224] ss:$16 sps:$4 sm:$0xff]   ;;  %v7533_v16 = vld [vmem:[%s11242_s1 + $0x22c] ss:$16 sps:$4 sm:$0xff]  }
  0x19   :  { %v7532_v18 = vld [vmem:[%s11242_s1 + $0x220] ss:$16 sps:$4 sm:$0xff]   ;;  %v7535_v19 = vld [vmem:[%s11242_s1 + $0x228] ss:$16 sps:$4 sm:$0xff]   ;;  %v7536_v20 = vld [vmem:[%s11242_s1 + $0x244] ss:$16 sps:$4 sm:$0xff]  }
  0x1a   :  { %v7539_v21 = vld [vmem:[%s11242_s1 + $0x24c] ss:$16 sps:$4 sm:$0xff]   ;;  %v7538_v22 = vld [vmem:[%s11242_s1 + $0x240] ss:$16 sps:$4 sm:$0xff]   ;;  %v7541_v23 = vld [vmem:[%s11242_s1 + $0x248] ss:$16 sps:$4 sm:$0xff]  }
  0x1b   :  { %4983 = vmatpush1.bf16.msra.mxu0 %v7467_v26  ;;  %5767 = vmatpush1.bf16.msra.mxu1 %v7468_v27  ;;  %v7542_v24 = vld [vmem:[%s11242_s1 + $0x264] ss:$16 sps:$4 sm:$0xff]   ;;  %v7545_v25 = vld [vmem:[%s11242_s1 + $0x26c] ss:$16 sps:$4 sm:$0xff]   ;;  %v7544_v26 = vld [vmem:[%s11242_s1 + $0x260] ss:$16 sps:$4 sm:$0xff]  }
  0x1c   :  { %4985 = vmatprep.subr.bf16.mxu0 %v7469_v28  ;;  %5769 = vmatprep.subr.bf16.mxu1 %v7471_v29  ;;  %v7547_v27 = vld [vmem:[%s11242_s1 + $0x268] ss:$16 sps:$4 sm:$0xff]   ;;  %v7548_v28 = vld [vmem:[%s11242_s1 + $0x284] ss:$16 sps:$4 sm:$0xff]   ;;  %v7551_v29 = vld [vmem:[%s11242_s1 + $0x28c] ss:$16 sps:$4 sm:$0xff]  }
  0x1d   :  { %v7560_v36 = vld [vmem:[%s11242_s1 + $0x2c4] ss:$16 sps:$4 sm:$0xff]   ;;  %v7563_v37 = vld [vmem:[%s11242_s1 + $0x2cc] ss:$16 sps:$4 sm:$0xff]   ;;  %v7562_v38 = vld [vmem:[%s11242_s1 + $0x2c0] ss:$16 sps:$4 sm:$0xff]  }
  0x1e   :  { %v7568_v43 = vld [vmem:[%s11242_s1 + $0x2e0] ss:$16 sps:$4 sm:$0xff]   ;;  %v7590_v58 = vld [vmem:[%s11242_s1 + $0x364] ss:$16 sps:$4 sm:$0xff]   ;;  %v7611_v7 = vld [vmem:[%s11242_s1 + $0x3cc] ss:$16 sps:$4 sm:$0xff]  }
  0x1f   :  { %4987 = vmatpush1.bf16.msra.mxu0 %v7473_v30  ;;  %5771 = vmatpush1.bf16.msra.mxu1 %v7474_v31  ;;  %v7550_v30 = vld [vmem:[%s11242_s1 + $0x280] ss:$16 sps:$4 sm:$0xff]   ;;  %v7553_v31 = vld [vmem:[%s11242_s1 + $0x288] ss:$16 sps:$4 sm:$0xff]   ;;  %vm4716_vm7 = vcmask 99328  }
  0x20   :  { %4989 = vmatprep.subr.bf16.mxu0 %v7475_v32  ;;  %5773 = vmatprep.subr.bf16.mxu1 %v7477_v33  ;;  %v7554_v32 = vld [vmem:[%s11242_s1 + $0x2a4] ss:$16 sps:$4 sm:$0xff]   ;;  %v7557_v33 = vld [vmem:[%s11242_s1 + $0x2ac] ss:$16 sps:$4 sm:$0xff]   ;;  %v7580_v52 = vld [vmem:[%s11242_s1 + $0x320] ss:$16 sps:$4 sm:$0xff]  }
  0x23   :  { %4991 = vmatpush1.bf16.msra.mxu0 %v7479_v34  ;;  %5775 = vmatpush1.bf16.msra.mxu1 %v7480_v35  ;;  %v7556_v34 = vld [vmem:[%s11242_s1 + $0x2a0] ss:$16 sps:$4 sm:$0xff]   ;;  %v7559_v35 = vld [vmem:[%s11242_s1 + $0x2a8] ss:$16 sps:$4 sm:$0xff]  }
  0x24   :  { %4993 = vmatprep.subr.bf16.mxu0 %v7481_v39  ;;  %5777 = vmatprep.subr.bf16.mxu1 %v7483_v40  ;;  %v7565_v39 = vld [vmem:[%s11242_s1 + $0x2c8] ss:$16 sps:$4 sm:$0xff]   ;;  %v7566_v40 = vld [vmem:[%s11242_s1 + $0x2e4] ss:$16 sps:$4 sm:$0xff]  }
  0x27   :  { %4995 = vmatpush1.bf16.msra.mxu0 %v7485_v41  ;;  %5779 = vmatpush1.bf16.msra.mxu1 %v7486_v44  ;;  %v7569_v41 = vld [vmem:[%s11242_s1 + $0x2ec] ss:$16 sps:$4 sm:$0xff]   ;;  %v7571_v44 = vld [vmem:[%s11242_s1 + $0x2e8] ss:$16 sps:$4 sm:$0xff]  }
  0x28   :  { %4997 = vmatprep.subr.bf16.mxu0 %v7487_v45  ;;  %5781 = vmatprep.subr.bf16.mxu1 %v7489_v46  ;;  %v7572_v45 = vld [vmem:[%s11242_s1 + $0x304] ss:$16 sps:$4 sm:$0xff]   ;;  %v7575_v46 = vld [vmem:[%s11242_s1 + $0x30c] ss:$16 sps:$4 sm:$0xff]  }
  0x2b   :  { %4999 = vmatpush1.bf16.msra.mxu0 %v7491_v47  ;;  %5783 = vmatpush1.bf16.msra.mxu1 %v7492_v48  ;;  %v7574_v47 = vld [vmem:[%s11242_s1 + $0x300] ss:$16 sps:$4 sm:$0xff]   ;;  %v7577_v48 = vld [vmem:[%s11242_s1 + $0x308] ss:$16 sps:$4 sm:$0xff]  }
  0x2c   :  { %5001 = vmatprep.subr.bf16.mxu0 %v7493_v50  ;;  %5785 = vmatprep.subr.bf16.mxu1 %v7495_v51  ;;  %v7578_v50 = vld [vmem:[%s11242_s1 + $0x324] ss:$16 sps:$4 sm:$0xff]   ;;  %v7581_v51 = vld [vmem:[%s11242_s1 + $0x32c] ss:$16 sps:$4 sm:$0xff]  }
  0x2f   :  { %5003 = vmatpush1.bf16.msra.mxu0 %v7497_v53  ;;  %5787 = vmatpush1.bf16.msra.mxu1 %v7498_v55  ;;  %v7583_v53 = vld [vmem:[%s11242_s1 + $0x328] ss:$16 sps:$4 sm:$0xff]   ;;  %v7587_v55 = vld [vmem:[%s11242_s1 + $0x34c] ss:$16 sps:$4 sm:$0xff]  }
  0x30   :  { %5005 = vmatprep.subr.bf16.mxu0 %v7499_v56  ;;  %5789 = vmatprep.subr.bf16.mxu1 %v7501_v57  ;;  %v7586_v56 = vld [vmem:[%s11242_s1 + $0x340] ss:$16 sps:$4 sm:$0xff]   ;;  %v7589_v57 = vld [vmem:[%s11242_s1 + $0x348] ss:$16 sps:$4 sm:$0xff]  }
  0x33   :  { %5007 = vmatpush1.bf16.msra.mxu0 %v7503_v59  ;;  %5791 = vmatpush1.bf16.msra.mxu1 %v7504_v60  ;;  %v7593_v59 = vld [vmem:[%s11242_s1 + $0x36c] ss:$16 sps:$4 sm:$0xff]   ;;  %v7592_v60 = vld [vmem:[%s11242_s1 + $0x360] ss:$16 sps:$4 sm:$0xff]  }
  0x34   :  { %5009 = vmatprep.subr.bf16.mxu0 %v7505_v61  ;;  %5793 = vmatprep.subr.bf16.mxu1 %v7507_v62  ;;  %v7595_v61 = vld [vmem:[%s11242_s1 + $0x368] ss:$16 sps:$4 sm:$0xff]   ;;  %v7596_v62 = vld [vmem:[%s11242_s1 + $0x384] ss:$16 sps:$4 sm:$0xff]  }
  0x37   :  { %5011 = vmatpush1.bf16.msra.mxu0 %v7509_v63  ;;  %5795 = vmatpush1.bf16.msra.mxu1 %v7510_v0  ;;  %v7599_v63 = vld [vmem:[%s11242_s1 + $0x38c] ss:$16 sps:$4 sm:$0xff]   ;;  %v7598_v0 = vld [vmem:[%s11242_s1 + $0x380] ss:$16 sps:$4 sm:$0xff]  }
  0x38   :  { %5013 = vmatprep.subr.bf16.mxu0 %v7511_v1  ;;  %5797 = vmatprep.subr.bf16.mxu1 %v7513_v2  ;;  %v7601_v1 = vld [vmem:[%s11242_s1 + $0x388] ss:$16 sps:$4 sm:$0xff]   ;;  %v7602_v2 = vld [vmem:[%s11242_s1 + $0x3a4] ss:$16 sps:$4 sm:$0xff]  }
  0x3b   :  { %5015 = vmatpush1.bf16.msra.mxu0 %v7515_v3  ;;  %5799 = vmatpush1.bf16.msra.mxu1 %v7516_v4  ;;  %v7605_v3 = vld [vmem:[%s11242_s1 + $0x3ac] ss:$16 sps:$4 sm:$0xff]   ;;  %v7604_v4 = vld [vmem:[%s11242_s1 + $0x3a0] ss:$16 sps:$4 sm:$0xff]  }
  0x3c   :  { %5017 = vmatprep.subr.bf16.mxu0 %v7517_v5  ;;  %5801 = vmatprep.subr.bf16.mxu1 %v7519_v6  ;;  %v7607_v5 = vld [vmem:[%s11242_s1 + $0x3a8] ss:$16 sps:$4 sm:$0xff]   ;;  %v7608_v6 = vld [vmem:[%s11242_s1 + $0x3c4] ss:$16 sps:$4 sm:$0xff]  }
  0x3f   :  { %5019 = vmatpush1.bf16.msra.mxu0 %v7521_v8  ;;  %5803 = vmatpush1.bf16.msra.mxu1 %v7522_v9  ;;  %v7610_v8 = vld [vmem:[%s11242_s1 + $0x3c0] ss:$16 sps:$4 sm:$0xff]   ;;  %v7613_v9 = vld [vmem:[%s11242_s1 + $0x3c8] ss:$16 sps:$4 sm:$0xff]  }
  0x40   :  { %5021 = vmatprep.subr.bf16.mxu0 %v7524_v10  ;;  %5805 = vmatprep.subr.bf16.mxu1 %v7527_v11  ;;  %v7614_v10 = vld [vmem:[%s11242_s1 + $0x3e4] ss:$16 sps:$4 sm:$0xff]   ;;  %v7617_v11 = vld [vmem:[%s11242_s1 + $0x3ec] ss:$16 sps:$4 sm:$0xff]  }
  0x42   :  { %2609 = vmatmul.mubr.f32.vlgmr.msra.gmra.mrb[0].mxu0 %v2415_v54  ;;  %3532 = vmatmul.mubr.f32.vlgmr.msra.gmra.mrb[0].mxu1 %v2415_v54  ;;  %v7584_v54 = vld [vmem:[%s11242_s1 + $0x344] ss:$16 sps:$4 sm:$0xff]  }
  0x43   :  { %5023 = vmatpush1.bf16.msra.mxu0 %v7526_v13  ;;  %5807 = vmatpush1.bf16.msra.mxu1 %v7529_v14  ;;  %v7616_v13 = vld [vmem:[%s11242_s1 + $0x3e0] ss:$16 sps:$4 sm:$0xff]   ;;  %v7619_v14 = vld [vmem:[%s11242_s1 + $0x3e8] ss:$16 sps:$4 sm:$0xff]  }
  0x44   :  { %5025 = vmatprep.subr.bf16.mxu0 %v7530_v15  ;;  %5809 = vmatprep.subr.bf16.mxu1 %v7533_v16  ;;  %v7620_v15 = vld [vmem:[%s11242_s1 + $0x404] ss:$16 sps:$4 sm:$0xff]   ;;  %v7623_v16 = vld [vmem:[%s11242_s1 + $0x40c] ss:$16 sps:$4 sm:$0xff]  }
  0x45   :  { %2679 = vmatprep.mubr.f32.mxu0 %v2424_v17  ;;  %3602 = vmatprep.mubr.f32.mxu1 %v2424_v17  ;;  %v7622_v17 = vld [vmem:[%s11242_s1 + $0x400] ss:$16 sps:$4 sm:$0xff]  }
  0x47   :  { %5027 = vmatpush1.bf16.msra.mxu0 %v7532_v18  ;;  %5811 = vmatpush1.bf16.msra.mxu1 %v7535_v19  ;;  %v7625_v18 = vld [vmem:[%s11242_s1 + $0x408] ss:$16 sps:$4 sm:$0xff]  }
  0x48   :  { %5029 = vmatprep.subr.bf16.mxu0 %v7536_v20  ;;  %5813 = vmatprep.subr.bf16.mxu1 %v7539_v21  ;;  %v9065_v19 = vld [vmem:[%s11243_s0 + $0x8] sm:$0xff]  ;;  %v7626_v20 = vld [vmem:[%s11242_s1 + $0x424] ss:$16 sps:$4 sm:$0xff]  }
  0x49   :  { %v7629_v21 = vld [vmem:[%s11242_s1 + $0x42c] ss:$16 sps:$4 sm:$0xff]  }
  0x4b   :  { %5031 = vmatpush1.bf16.msra.mxu0 %v7538_v22  ;;  %5815 = vmatpush1.bf16.msra.mxu1 %v7541_v23  ;;  %v9075_v22 = vrot.slane %v9065_v19, %v8787_v49 }
  0x4c   :  { %5033 = vmatprep.subr.bf16.mxu0 %v7542_v24  ;;  %5817 = vmatprep.subr.bf16.mxu1 %v7545_v25  ;;  %v7628_v24 = vld [vmem:[%s11242_s1 + $0x420] ss:$16 sps:$4 sm:$0xff]   ;;  %v7631_v25 = vld [vmem:[%s11242_s1 + $0x428] ss:$16 sps:$4 sm:$0xff]  }
  0x4d   :  { %v2440_v23 = vcombine.high %v9075_v22, %v9075_v22 }
  0x4f   :  { %5035 = vmatpush1.bf16.msra.mxu0 %v7544_v26  ;;  %5819 = vmatpush1.bf16.msra.mxu1 %v7547_v27  ;;  %v7632_v26 = vld [vmem:[%s11242_s1 + $0x444] ss:$16 sps:$4 sm:$0xff]   ;;  %v7634_v27 = vld [vmem:[%s11242_s1 + $0x440] ss:$16 sps:$4 sm:$0xff]  }
  0x50   :  { %5037 = vmatprep.subr.bf16.mxu0 %v7548_v28  ;;  %5821 = vmatprep.subr.bf16.mxu1 %v7551_v29  ;;  %v7637_v28 = vld [vmem:[%s11242_s1 + $0x448] ss:$16 sps:$4 sm:$0xff]   ;;  %v7638_v29 = vld [vmem:[%s11242_s1 + $0x464] ss:$16 sps:$4 sm:$0xff]  }
  0x53   :  { %5039 = vmatpush1.bf16.msra.mxu0 %v7550_v30  ;;  %5823 = vmatpush1.bf16.msra.mxu1 %v7553_v31  ;;  %v7641_v30 = vld [vmem:[%s11242_s1 + $0x46c] ss:$16 sps:$4 sm:$0xff]   ;;  %v7640_v31 = vld [vmem:[%s11242_s1 + $0x460] ss:$16 sps:$4 sm:$0xff]  }
  0x54   :  { %5041 = vmatprep.subr.bf16.mxu0 %v7554_v32  ;;  %5825 = vmatprep.subr.bf16.mxu1 %v7557_v33  ;;  %v7643_v32 = vld [vmem:[%s11242_s1 + $0x468] ss:$16 sps:$4 sm:$0xff]   ;;  %v7644_v33 = vld [vmem:[%s11242_s1 + $0x484] ss:$16 sps:$4 sm:$0xff]  }
  0x57   :  { %5043 = vmatpush1.bf16.msra.mxu0 %v7556_v34  ;;  %5827 = vmatpush1.bf16.msra.mxu1 %v7559_v35  ;;  %v7647_v34 = vld [vmem:[%s11242_s1 + $0x48c] ss:$16 sps:$4 sm:$0xff]   ;;  %v7646_v35 = vld [vmem:[%s11242_s1 + $0x480] ss:$16 sps:$4 sm:$0xff]  }
  0x58   :  { %5045 = vmatprep.subr.bf16.mxu0 %v7560_v36  ;;  %5829 = vmatprep.subr.bf16.mxu1 %v7563_v37  ;;  %v7649_v36 = vld [vmem:[%s11242_s1 + $0x488] ss:$16 sps:$4 sm:$0xff]   ;;  %v7650_v37 = vld [vmem:[%s11242_s1 + $0x4a4] ss:$16 sps:$4 sm:$0xff]  }
  0x5b   :  { %5047 = vmatpush1.bf16.msra.mxu0 %v7562_v38  ;;  %5831 = vmatpush1.bf16.msra.mxu1 %v7565_v39  ;;  %v7653_v38 = vld [vmem:[%s11242_s1 + $0x4ac] ss:$16 sps:$4 sm:$0xff]   ;;  %v7652_v39 = vld [vmem:[%s11242_s1 + $0x4a0] ss:$16 sps:$4 sm:$0xff]  }
  0x5c   :  { %5049 = vmatprep.subr.bf16.mxu0 %v7566_v40  ;;  %5833 = vmatprep.subr.bf16.mxu1 %v7569_v41  ;;  %v7655_v40 = vld [vmem:[%s11242_s1 + $0x4a8] ss:$16 sps:$4 sm:$0xff]   ;;  %v7656_v41 = vld [vmem:[%s11242_s1 + $0x4c4] ss:$16 sps:$4 sm:$0xff]  }
  0x5f   :  { %5051 = vmatpush1.bf16.msra.mxu0 %v7568_v43  ;;  %5835 = vmatpush1.bf16.msra.mxu1 %v7571_v44  ;;  %v7659_v43 = vld [vmem:[%s11242_s1 + $0x4cc] ss:$16 sps:$4 sm:$0xff]   ;;  %v7658_v44 = vld [vmem:[%s11242_s1 + $0x4c0] ss:$16 sps:$4 sm:$0xff]  }
  0x60   :  { %5053 = vmatprep.subr.bf16.mxu0 %v7572_v45  ;;  %5837 = vmatprep.subr.bf16.mxu1 %v7575_v46  ;;  %v7661_v45 = vld [vmem:[%s11242_s1 + $0x4c8] ss:$16 sps:$4 sm:$0xff]   ;;  %v7662_v46 = vld [vmem:[%s11242_s1 + $0x4e4] ss:$16 sps:$4 sm:$0xff]  }
  0x63   :  { %5055 = vmatpush1.bf16.msra.mxu0 %v7574_v47  ;;  %5839 = vmatpush1.bf16.msra.mxu1 %v7577_v48  ;;  %v7665_v47 = vld [vmem:[%s11242_s1 + $0x4ec] ss:$16 sps:$4 sm:$0xff]   ;;  %v7664_v48 = vld [vmem:[%s11242_s1 + $0x4e0] ss:$16 sps:$4 sm:$0xff]  }
  0x64   :  { %5057 = vmatprep.subr.bf16.mxu0 %v7578_v50  ;;  %5841 = vmatprep.subr.bf16.mxu1 %v7581_v51  ;;  %v7667_v50 = vld [vmem:[%s11242_s1 + $0x4e8] ss:$16 sps:$4 sm:$0xff]   ;;  %v7668_v51 = vld [vmem:[%s11242_s1 + $0x504] ss:$16 sps:$4 sm:$0xff]  }
  0x67   :  { %5059 = vmatpush1.bf16.msra.mxu0 %v7580_v52  ;;  %5843 = vmatpush1.bf16.msra.mxu1 %v7583_v53  ;;  %v7671_v52 = vld [vmem:[%s11242_s1 + $0x50c] ss:$16 sps:$4 sm:$0xff]   ;;  %v7670_v53 = vld [vmem:[%s11242_s1 + $0x500] ss:$16 sps:$4 sm:$0xff]  }
  0x68   :  { %5061 = vmatprep.subr.bf16.mxu0 %v7584_v54  ;;  %5845 = vmatprep.subr.bf16.mxu1 %v7587_v55  ;;  %v7673_v54 = vld [vmem:[%s11242_s1 + $0x508] ss:$16 sps:$4 sm:$0xff]   ;;  %v7674_v55 = vld [vmem:[%s11242_s1 + $0x524] ss:$16 sps:$4 sm:$0xff]  }
  0x6b   :  { %5063 = vmatpush1.bf16.msra.mxu0 %v7586_v56  ;;  %5847 = vmatpush1.bf16.msra.mxu1 %v7589_v57  ;;  %v7677_v56 = vld [vmem:[%s11242_s1 + $0x52c] ss:$16 sps:$4 sm:$0xff]   ;;  %v7676_v57 = vld [vmem:[%s11242_s1 + $0x520] ss:$16 sps:$4 sm:$0xff]  }
  0x6c   :  { %5065 = vmatprep.subr.bf16.mxu0 %v7590_v58  ;;  %5849 = vmatprep.subr.bf16.mxu1 %v7593_v59  ;;  %v7679_v58 = vld [vmem:[%s11242_s1 + $0x528] ss:$16 sps:$4 sm:$0xff]   ;;  %v7680_v59 = vld [vmem:[%s11242_s1 + $0x544] ss:$16 sps:$4 sm:$0xff]  }
  0x6f   :  { %5067 = vmatpush1.bf16.msra.mxu0 %v7592_v60  ;;  %5851 = vmatpush1.bf16.msra.mxu1 %v7595_v61  ;;  %v7683_v60 = vld [vmem:[%s11242_s1 + $0x54c] ss:$16 sps:$4 sm:$0xff]   ;;  %v7682_v61 = vld [vmem:[%s11242_s1 + $0x540] ss:$16 sps:$4 sm:$0xff]  }
  0x70   :  { %5069 = vmatprep.subr.bf16.mxu0 %v7596_v62  ;;  %5853 = vmatprep.subr.bf16.mxu1 %v7599_v63  ;;  %v7685_v62 = vld [vmem:[%s11242_s1 + $0x548] ss:$16 sps:$4 sm:$0xff]   ;;  %v7686_v63 = vld [vmem:[%s11242_s1 + $0x564] ss:$16 sps:$4 sm:$0xff]  }
  0x73   :  { %5071 = vmatpush1.bf16.msra.mxu0 %v7598_v0  ;;  %5855 = vmatpush1.bf16.msra.mxu1 %v7601_v1  ;;  %v7689_v0 = vld [vmem:[%s11242_s1 + $0x56c] ss:$16 sps:$4 sm:$0xff]   ;;  %v7688_v1 = vld [vmem:[%s11242_s1 + $0x560] ss:$16 sps:$4 sm:$0xff]  }
  0x74   :  { %5073 = vmatprep.subr.bf16.mxu0 %v7602_v2  ;;  %5857 = vmatprep.subr.bf16.mxu1 %v7605_v3  ;;  %v7691_v2 = vld [vmem:[%s11242_s1 + $0x568] ss:$16 sps:$4 sm:$0xff]   ;;  %v7692_v3 = vld [vmem:[%s11242_s1 + $0x584] ss:$16 sps:$4 sm:$0xff]  }
  0x77   :  { %5075 = vmatpush1.bf16.msra.mxu0 %v7604_v4  ;;  %5859 = vmatpush1.bf16.msra.mxu1 %v7607_v5  ;;  %v7695_v4 = vld [vmem:[%s11242_s1 + $0x58c] ss:$16 sps:$4 sm:$0xff]   ;;  %v7694_v5 = vld [vmem:[%s11242_s1 + $0x580] ss:$16 sps:$4 sm:$0xff]  }
  0x78   :  { %5077 = vmatprep.subr.bf16.mxu0 %v7608_v6  ;;  %5861 = vmatprep.subr.bf16.mxu1 %v7611_v7  ;;  %v7697_v6 = vld [vmem:[%s11242_s1 + $0x588] ss:$16 sps:$4 sm:$0xff]   ;;  %v7698_v7 = vld [vmem:[%s11242_s1 + $0x5a4] ss:$16 sps:$4 sm:$0xff]  }
  0x7b   :  { %5079 = vmatpush1.bf16.msra.mxu0 %v7610_v8  ;;  %5863 = vmatpush1.bf16.msra.mxu1 %v7613_v9  ;;  %v7701_v8 = vld [vmem:[%s11242_s1 + $0x5ac] ss:$16 sps:$4 sm:$0xff]   ;;  %v7700_v9 = vld [vmem:[%s11242_s1 + $0x5a0] ss:$16 sps:$4 sm:$0xff]  }
  0x7c   :  { %5081 = vmatprep.subr.bf16.mxu0 %v7614_v10  ;;  %5865 = vmatprep.subr.bf16.mxu1 %v7617_v11  ;;  %v7703_v10 = vld [vmem:[%s11242_s1 + $0x5a8] ss:$16 sps:$4 sm:$0xff]   ;;  %v7704_v11 = vld [vmem:[%s11242_s1 + $0x5c4] ss:$16 sps:$4 sm:$0xff]  }
  0x7f   :  { %5083 = vmatpush1.bf16.msra.mxu0 %v7616_v13  ;;  %5867 = vmatpush1.bf16.msra.mxu1 %v7619_v14  ;;  %v7707_v13 = vld [vmem:[%s11242_s1 + $0x5cc] ss:$16 sps:$4 sm:$0xff]   ;;  %v7706_v14 = vld [vmem:[%s11242_s1 + $0x5c0] ss:$16 sps:$4 sm:$0xff]  }
  0x80   :  { %5085 = vmatprep.subr.bf16.mxu0 %v7620_v15  ;;  %5869 = vmatprep.subr.bf16.mxu1 %v7623_v16  ;;  %v7709_v15 = vld [vmem:[%s11242_s1 + $0x5c8] ss:$16 sps:$4 sm:$0xff]   ;;  %v7710_v16 = vld [vmem:[%s11242_s1 + $0x5e4] ss:$16 sps:$4 sm:$0xff]  }
  0x82   :  { %2680 = vmatmul.mubr.f32.vlgmr.msra.gmra.mrb[0].mxu0 %v8860_v12  ;;  %3603 = vmatmul.mubr.f32.vlgmr.msra.gmra.mrb[0].mxu1 %v8860_v12  ;;  %v7635_v12 = vld [vmem:[%s11242_s1 + $0x44c] ss:$16 sps:$4 sm:$0xff]  }
  0x83   :  { %5087 = vmatpush1.bf16.msra.mxu0 %v7622_v17  ;;  %5871 = vmatpush1.bf16.msra.mxu1 %v7625_v18  ;;  %v7713_v17 = vld [vmem:[%s11242_s1 + $0x5ec] ss:$16 sps:$4 sm:$0xff]   ;;  %v2425_v18 = vcombine.high %v9065_v19, %v9065_v19 }
  0x84   :  { %5089 = vmatprep.subr.bf16.mxu0 %v7626_v20  ;;  %5873 = vmatprep.subr.bf16.mxu1 %v7629_v21  ;;  %v7712_v20 = vld [vmem:[%s11242_s1 + $0x5e0] ss:$16 sps:$4 sm:$0xff]   ;;  %v7715_v21 = vld [vmem:[%s11242_s1 + $0x5e8] ss:$16 sps:$4 sm:$0xff]   ;;  %v7719_v19 = vld [vmem:[%s11242_s1 + $0x60c] ss:$16 sps:$4 sm:$0xff]  }
  0x85   :  { %2750 = vmatprep.mubr.f32.mxu0 %v2440_v23  ;;  %3673 = vmatprep.mubr.f32.mxu1 %v2440_v23  ;;  %v7716_v23 = vld [vmem:[%s11242_s1 + $0x604] ss:$16 sps:$4 sm:$0xff]  }
  0x87   :  { %5091 = vmatpush1.bf16.msra.mxu0 %v7628_v24  ;;  %5875 = vmatpush1.bf16.msra.mxu1 %v7631_v25  ;;  %v9264_v24 = vrot.slane %v2425_v18, %v8787_v49  ;;  %v7718_v25 = vld [vmem:[%s11242_s1 + $0x600] ss:$16 sps:$4 sm:$0xff]   ;;  %v7803_v18 = vld [vmem:[%s11242_s1 + $0x7cc] ss:$16 sps:$4 sm:$0xff]  }
  0x88   :  { %5093 = vmatprep.subr.bf16.mxu0 %v7632_v26  ;;  %5877 = vmatprep.subr.bf16.mxu1 %v7635_v12  ;;  %v7721_v26 = vld [vmem:[%s11242_s1 + $0x608] ss:$16 sps:$4 sm:$0xff]   ;;  %v7722_v12 = vld [vmem:[%s11242_s1 + $0x624] ss:$16 sps:$4 sm:$0xff]  }
  0x8b   :  { %5095 = vmatpush1.bf16.msra.mxu0 %v7634_v27  ;;  %5879 = vmatpush1.bf16.msra.mxu1 %v7637_v28  ;;  %v7725_v27 = vld [vmem:[%s11242_s1 + $0x62c] ss:$16 sps:$4 sm:$0xff]   ;;  %v2441_v28 = vcombine.high %v9264_v24, %v9264_v24 }
  0x8c   :  { %5097 = vmatprep.subr.bf16.mxu0 %v7638_v29  ;;  %5881 = vmatprep.subr.bf16.mxu1 %v7641_v30  ;;  %v7724_v29 = vld [vmem:[%s11242_s1 + $0x620] ss:$16 sps:$4 sm:$0xff]   ;;  %v7727_v30 = vld [vmem:[%s11242_s1 + $0x628] ss:$16 sps:$4 sm:$0xff]  }
  0x8f   :  { %5099 = vmatpush1.bf16.msra.mxu0 %v7640_v31  ;;  %5883 = vmatpush1.bf16.msra.mxu1 %v7643_v32  ;;  %v7728_v31 = vld [vmem:[%s11242_s1 + $0x644] ss:$16 sps:$4 sm:$0xff]   ;;  %v7730_v32 = vld [vmem:[%s11242_s1 + $0x640] ss:$16 sps:$4 sm:$0xff]  }
  0x90   :  { %5101 = vmatprep.subr.bf16.mxu0 %v7644_v33  ;;  %5885 = vmatprep.subr.bf16.mxu1 %v7647_v34  ;;  %v7733_v33 = vld [vmem:[%s11242_s1 + $0x648] ss:$16 sps:$4 sm:$0xff]   ;;  %v7734_v34 = vld [vmem:[%s11242_s1 + $0x664] ss:$16 sps:$4 sm:$0xff]  }
  0x93   :  { %5103 = vmatpush1.bf16.msra.mxu0 %v7646_v35  ;;  %5887 = vmatpush1.bf16.msra.mxu1 %v7649_v36  ;;  %v7737_v35 = vld [vmem:[%s11242_s1 + $0x66c] ss:$16 sps:$4 sm:$0xff]   ;;  %v7736_v36 = vld [vmem:[%s11242_s1 + $0x660] ss:$16 sps:$4 sm:$0xff]  }
  0x94   :  { %5105 = vmatprep.subr.bf16.mxu0 %v7650_v37  ;;  %5889 = vmatprep.subr.bf16.mxu1 %v7653_v38  ;;  %v7739_v37 = vld [vmem:[%s11242_s1 + $0x668] ss:$16 sps:$4 sm:$0xff]   ;;  %v7740_v38 = vld [vmem:[%s11242_s1 + $0x684] ss:$16 sps:$4 sm:$0xff]  }
  0x97   :  { %5107 = vmatpush1.bf16.msra.mxu0 %v7652_v39  ;;  %5891 = vmatpush1.bf16.msra.mxu1 %v7655_v40  ;;  %v7743_v39 = vld [vmem:[%s11242_s1 + $0x68c] ss:$16 sps:$4 sm:$0xff]   ;;  %v7742_v40 = vld [vmem:[%s11242_s1 + $0x680] ss:$16 sps:$4 sm:$0xff]  }
  0x98   :  { %5109 = vmatprep.subr.bf16.mxu0 %v7656_v41  ;;  %5893 = vmatprep.subr.bf16.mxu1 %v7659_v43  ;;  %v7745_v41 = vld [vmem:[%s11242_s1 + $0x688] ss:$16 sps:$4 sm:$0xff]   ;;  %v7746_v43 = vld [vmem:[%s11242_s1 + $0x6a4] ss:$16 sps:$4 sm:$0xff]  }
  0x9b   :  { %5111 = vmatpush1.bf16.msra.mxu0 %v7658_v44  ;;  %5895 = vmatpush1.bf16.msra.mxu1 %v7661_v45  ;;  %v7749_v44 = vld [vmem:[%s11242_s1 + $0x6ac] ss:$16 sps:$4 sm:$0xff]   ;;  %v7748_v45 = vld [vmem:[%s11242_s1 + $0x6a0] ss:$16 sps:$4 sm:$0xff]  }
  0x9c   :  { %5113 = vmatprep.subr.bf16.mxu0 %v7662_v46  ;;  %5897 = vmatprep.subr.bf16.mxu1 %v7665_v47  ;;  %v7751_v46 = vld [vmem:[%s11242_s1 + $0x6a8] ss:$16 sps:$4 sm:$0xff]   ;;  %v7752_v47 = vld [vmem:[%s11242_s1 + $0x6c4] ss:$16 sps:$4 sm:$0xff]  }
  0x9f   :  { %5115 = vmatpush1.bf16.msra.mxu0 %v7664_v48  ;;  %5899 = vmatpush1.bf16.msra.mxu1 %v7667_v50  ;;  %v7755_v48 = vld [vmem:[%s11242_s1 + $0x6cc] ss:$16 sps:$4 sm:$0xff]   ;;  %v7754_v50 = vld [vmem:[%s11242_s1 + $0x6c0] ss:$16 sps:$4 sm:$0xff]  }
  0xa0   :  { %5117 = vmatprep.subr.bf16.mxu0 %v7668_v51  ;;  %5901 = vmatprep.subr.bf16.mxu1 %v7671_v52  ;;  %v7757_v51 = vld [vmem:[%s11242_s1 + $0x6c8] ss:$16 sps:$4 sm:$0xff]   ;;  %v7758_v52 = vld [vmem:[%s11242_s1 + $0x6e4] ss:$16 sps:$4 sm:$0xff]  }
  0xa3   :  { %5119 = vmatpush1.bf16.msra.mxu0 %v7670_v53  ;;  %5903 = vmatpush1.bf16.msra.mxu1 %v7673_v54  ;;  %v7761_v53 = vld [vmem:[%s11242_s1 + $0x6ec] ss:$16 sps:$4 sm:$0xff]   ;;  %v7760_v54 = vld [vmem:[%s11242_s1 + $0x6e0] ss:$16 sps:$4 sm:$0xff]  }
  0xa4   :  { %5121 = vmatprep.subr.bf16.mxu0 %v7674_v55  ;;  %5905 = vmatprep.subr.bf16.mxu1 %v7677_v56  ;;  %v7763_v55 = vld [vmem:[%s11242_s1 + $0x6e8] ss:$16 sps:$4 sm:$0xff]   ;;  %v7764_v56 = vld [vmem:[%s11242_s1 + $0x704] ss:$16 sps:$4 sm:$0xff]  }
  0xa7   :  { %5123 = vmatpush1.bf16.msra.mxu0 %v7676_v57  ;;  %5907 = vmatpush1.bf16.msra.mxu1 %v7679_v58  ;;  %v7767_v57 = vld [vmem:[%s11242_s1 + $0x70c] ss:$16 sps:$4 sm:$0xff]   ;;  %v7766_v58 = vld [vmem:[%s11242_s1 + $0x700] ss:$16 sps:$4 sm:$0xff]  }
  0xa8   :  { %5125 = vmatprep.subr.bf16.mxu0 %v7680_v59  ;;  %5909 = vmatprep.subr.bf16.mxu1 %v7683_v60  ;;  %v7769_v59 = vld [vmem:[%s11242_s1 + $0x708] ss:$16 sps:$4 sm:$0xff]   ;;  %v7770_v60 = vld [vmem:[%s11242_s1 + $0x724] ss:$16 sps:$4 sm:$0xff]  }
  0xab   :  { %5127 = vmatpush1.bf16.msra.mxu0 %v7682_v61  ;;  %5911 = vmatpush1.bf16.msra.mxu1 %v7685_v62  ;;  %v7773_v61 = vld [vmem:[%s11242_s1 + $0x72c] ss:$16 sps:$4 sm:$0xff]   ;;  %v7772_v62 = vld [vmem:[%s11242_s1 + $0x720] ss:$16 sps:$4 sm:$0xff]  }
  0xac   :  { %5129 = vmatprep.subr.bf16.mxu0 %v7686_v63  ;;  %5913 = vmatprep.subr.bf16.mxu1 %v7689_v0  ;;  %v7775_v63 = vld [vmem:[%s11242_s1 + $0x728] ss:$16 sps:$4 sm:$0xff]   ;;  %v7776_v0 = vld [vmem:[%s11242_s1 + $0x744] ss:$16 sps:$4 sm:$0xff]  }
  0xaf   :  { %5131 = vmatpush1.bf16.msra.mxu0 %v7688_v1  ;;  %5915 = vmatpush1.bf16.msra.mxu1 %v7691_v2  ;;  %v7779_v1 = vld [vmem:[%s11242_s1 + $0x74c] ss:$16 sps:$4 sm:$0xff]   ;;  %v7778_v2 = vld [vmem:[%s11242_s1 + $0x740] ss:$16 sps:$4 sm:$0xff]  }
  0xb0   :  { %5133 = vmatprep.subr.bf16.mxu0 %v7692_v3  ;;  %5917 = vmatprep.subr.bf16.mxu1 %v7695_v4  ;;  %v7781_v3 = vld [vmem:[%s11242_s1 + $0x748] ss:$16 sps:$4 sm:$0xff]   ;;  %v7782_v4 = vld [vmem:[%s11242_s1 + $0x764] ss:$16 sps:$4 sm:$0xff]  }
  0xb3   :  { %5135 = vmatpush1.bf16.msra.mxu0 %v7694_v5  ;;  %5919 = vmatpush1.bf16.msra.mxu1 %v7697_v6  ;;  %v7785_v5 = vld [vmem:[%s11242_s1 + $0x76c] ss:$16 sps:$4 sm:$0xff]   ;;  %v7784_v6 = vld [vmem:[%s11242_s1 + $0x760] ss:$16 sps:$4 sm:$0xff]  }
  0xb4   :  { %5137 = vmatprep.subr.bf16.mxu0 %v7698_v7  ;;  %5921 = vmatprep.subr.bf16.mxu1 %v7701_v8  ;;  %v7787_v7 = vld [vmem:[%s11242_s1 + $0x768] ss:$16 sps:$4 sm:$0xff]   ;;  %v7788_v8 = vld [vmem:[%s11242_s1 + $0x784] ss:$16 sps:$4 sm:$0xff]  }
  0xb7   :  { %5139 = vmatpush1.bf16.msra.mxu0 %v7700_v9  ;;  %5923 = vmatpush1.bf16.msra.mxu1 %v7703_v10  ;;  %v7791_v9 = vld [vmem:[%s11242_s1 + $0x78c] ss:$16 sps:$4 sm:$0xff]   ;;  %v7790_v10 = vld [vmem:[%s11242_s1 + $0x780] ss:$16 sps:$4 sm:$0xff]  }
  0xb8   :  { %5141 = vmatprep.subr.bf16.mxu0 %v7704_v11  ;;  %5925 = vmatprep.subr.bf16.mxu1 %v7707_v13  ;;  %v7793_v11 = vld [vmem:[%s11242_s1 + $0x788] ss:$16 sps:$4 sm:$0xff]   ;;  %v7794_v13 = vld [vmem:[%s11242_s1 + $0x7a4] ss:$16 sps:$4 sm:$0xff]  }
  0xbb   :  { %5143 = vmatpush1.bf16.msra.mxu0 %v7706_v14  ;;  %5927 = vmatpush1.bf16.msra.mxu1 %v7709_v15  ;;  %v7797_v14 = vld [vmem:[%s11242_s1 + $0x7ac] ss:$16 sps:$4 sm:$0xff]   ;;  %v7796_v15 = vld [vmem:[%s11242_s1 + $0x7a0] ss:$16 sps:$4 sm:$0xff]  }
  0xbc   :  { %5145 = vmatprep.subr.bf16.mxu0 %v7710_v16  ;;  %5929 = vmatprep.subr.bf16.mxu1 %v7713_v17  ;;  %v7799_v16 = vld [vmem:[%s11242_s1 + $0x7a8] ss:$16 sps:$4 sm:$0xff]   ;;  %v7800_v17 = vld [vmem:[%s11242_s1 + $0x7c4] ss:$16 sps:$4 sm:$0xff]  }
  0xbf   :  { %5147 = vmatpush1.bf16.msra.mxu0 %v7712_v20  ;;  %5931 = vmatpush1.bf16.msra.mxu1 %v7715_v21  ;;  %v7802_v20 = vld [vmem:[%s11242_s1 + $0x7c0] ss:$16 sps:$4 sm:$0xff]   ;;  %v7805_v21 = vld [vmem:[%s11242_s1 + $0x7c8] ss:$16 sps:$4 sm:$0xff]  }
  0xc0   :  { %5149 = vmatprep.subr.bf16.mxu0 %v7716_v23  ;;  %5933 = vmatprep.subr.bf16.mxu1 %v7719_v19  ;;  %v7806_v23 = vld [vmem:[%s11242_s1 + $0x7e4] ss:$16 sps:$4 sm:$0xff]   ;;  %v7809_v19 = vld [vmem:[%s11242_s1 + $0x7ec] ss:$16 sps:$4 sm:$0xff]  }
  0xc2   :  { %2751 = vmatmul.mubr.f32.vlgmr.msra.gmra.mrb[0].mxu0 %v9075_v22  ;;  %3674 = vmatmul.mubr.f32.vlgmr.msra.gmra.mrb[0].mxu1 %v9075_v22  ;;  %v7731_v22 = vld [vmem:[%s11242_s1 + $0x64c] ss:$16 sps:$4 sm:$0xff]  }
  0xc3   :  { %5151 = vmatpush1.bf16.msra.mxu0 %v7718_v25  ;;  %5935 = vmatpush1.bf16.msra.mxu1 %v7721_v26  ;;  %v7808_v25 = vld [vmem:[%s11242_s1 + $0x7e0] ss:$16 sps:$4 sm:$0xff]  }
  0xc4   :  { %5153 = vmatprep.subr.bf16.mxu0 %v7722_v12  ;;  %5937 = vmatprep.subr.bf16.mxu1 %v7725_v27  ;;  %v9456_v26 = vld [vmem:[%s11243_s0 + $0x10] sm:$0xff]  ;;  %v7811_v12 = vld [vmem:[%s11242_s1 + $0x7e8] ss:$16 sps:$4 sm:$0xff]  }
  0xc5   :  { %2821 = vmatprep.mubr.f32.mxu0 %v2441_v28  ;;  %3744 = vmatprep.mubr.f32.mxu1 %v2441_v28  ;;  %v7813_v27 = vld [vmem:[%s11242_s1 + $0x804] ss:$16 sps:$4 sm:$0xff]   ;;  %v7816_v28 = vld [vmem:[%s11242_s1 + $0x80c] ss:$16 sps:$4 sm:$0xff]  }
  0xc7   :  { %5155 = vmatpush1.bf16.msra.mxu0 %v7724_v29  ;;  %5939 = vmatpush1.bf16.msra.mxu1 %v7727_v30  ;;  %v9469_v29 = vrot.slane %v9456_v26, %v8787_v49  ;;  %v7815_v30 = vld [vmem:[%s11242_s1 + $0x800] ss:$16 sps:$4 sm:$0xff]  }
  0xc8   :  { %5157 = vmatprep.subr.bf16.mxu0 %v7728_v31  ;;  %5941 = vmatprep.subr.bf16.mxu1 %v7731_v22  ;;  %v7818_v31 = vld [vmem:[%s11242_s1 + $0x808] ss:$16 sps:$4 sm:$0xff]   ;;  %v7819_v22 = vld [vmem:[%s11242_s1 + $0x824] ss:$16 sps:$4 sm:$0xff]  }
  0xcb   :  { %5159 = vmatpush1.bf16.msra.mxu0 %v7730_v32  ;;  %5943 = vmatpush1.bf16.msra.mxu1 %v7733_v33  ;;  %v7822_v32 = vld [vmem:[%s11242_s1 + $0x82c] ss:$16 sps:$4 sm:$0xff]   ;;  %v2457_v33 = vcombine.high %v9469_v29, %v9469_v29 }
  0xcc   :  { %5161 = vmatprep.subr.bf16.mxu0 %v7734_v34  ;;  %5945 = vmatprep.subr.bf16.mxu1 %v7737_v35  ;;  %v7821_v34 = vld [vmem:[%s11242_s1 + $0x820] ss:$16 sps:$4 sm:$0xff]   ;;  %v7824_v35 = vld [vmem:[%s11242_s1 + $0x828] ss:$16 sps:$4 sm:$0xff]  }
  0xcf   :  { %5163 = vmatpush1.bf16.msra.mxu0 %v7736_v36  ;;  %5947 = vmatpush1.bf16.msra.mxu1 %v7739_v37  ;;  %v7825_v36 = vld [vmem:[%s11242_s1 + $0x844] ss:$16 sps:$4 sm:$0xff]   ;;  %v7827_v37 = vld [vmem:[%s11242_s1 + $0x840] ss:$16 sps:$4 sm:$0xff]  }
  0xd0   :  { %5165 = vmatprep.subr.bf16.mxu0 %v7740_v38  ;;  %5949 = vmatprep.subr.bf16.mxu1 %v7743_v39  ;;  %v7830_v38 = vld [vmem:[%s11242_s1 + $0x848] ss:$16 sps:$4 sm:$0xff]   ;;  %v7831_v39 = vld [vmem:[%s11242_s1 + $0x864] ss:$16 sps:$4 sm:$0xff]  }
  0xd3   :  { %5167 = vmatpush1.bf16.msra.mxu0 %v7742_v40  ;;  %5951 = vmatpush1.bf16.msra.mxu1 %v7745_v41  ;;  %v7834_v40 = vld [vmem:[%s11242_s1 + $0x86c] ss:$16 sps:$4 sm:$0xff]   ;;  %v7833_v41 = vld [vmem:[%s11242_s1 + $0x860] ss:$16 sps:$4 sm:$0xff]  }
  0xd4   :  { %5169 = vmatprep.subr.bf16.mxu0 %v7746_v43  ;;  %5953 = vmatprep.subr.bf16.mxu1 %v7749_v44  ;;  %v7836_v43 = vld [vmem:[%s11242_s1 + $0x868] ss:$16 sps:$4 sm:$0xff]   ;;  %v7837_v44 = vld [vmem:[%s11242_s1 + $0x884] ss:$16 sps:$4 sm:$0xff]  }
  0xd7   :  { %5171 = vmatpush1.bf16.msra.mxu0 %v7748_v45  ;;  %5955 = vmatpush1.bf16.msra.mxu1 %v7751_v46  ;;  %v7840_v45 = vld [vmem:[%s11242_s1 + $0x88c] ss:$16 sps:$4 sm:$0xff]   ;;  %v7839_v46 = vld [vmem:[%s11242_s1 + $0x880] ss:$16 sps:$4 sm:$0xff]  }
  0xd8   :  { %5173 = vmatprep.subr.bf16.mxu0 %v7752_v47  ;;  %5957 = vmatprep.subr.bf16.mxu1 %v7755_v48  ;;  %v7842_v47 = vld [vmem:[%s11242_s1 + $0x888] ss:$16 sps:$4 sm:$0xff]   ;;  %v7843_v48 = vld [vmem:[%s11242_s1 + $0x8a4] ss:$16 sps:$4 sm:$0xff]  }
  0xdb   :  { %5175 = vmatpush1.bf16.msra.mxu0 %v7754_v50  ;;  %5959 = vmatpush1.bf16.msra.mxu1 %v7757_v51  ;;  %v7846_v50 = vld [vmem:[%s11242_s1 + $0x8ac] ss:$16 sps:$4 sm:$0xff]   ;;  %v7845_v51 = vld [vmem:[%s11242_s1 + $0x8a0] ss:$16 sps:$4 sm:$0xff]  }
  0xdc   :  { %5177 = vmatprep.subr.bf16.mxu0 %v7758_v52  ;;  %5961 = vmatprep.subr.bf16.mxu1 %v7761_v53  ;;  %v7848_v52 = vld [vmem:[%s11242_s1 + $0x8a8] ss:$16 sps:$4 sm:$0xff]   ;;  %v7849_v53 = vld [vmem:[%s11242_s1 + $0x8c4] ss:$16 sps:$4 sm:$0xff]  }
  0xdf   :  { %5179 = vmatpush1.bf16.msra.mxu0 %v7760_v54  ;;  %5963 = vmatpush1.bf16.msra.mxu1 %v7763_v55  ;;  %v7852_v54 = vld [vmem:[%s11242_s1 + $0x8cc] ss:$16 sps:$4 sm:$0xff]   ;;  %v7851_v55 = vld [vmem:[%s11242_s1 + $0x8c0] ss:$16 sps:$4 sm:$0xff]  }
  0xe0   :  { %5181 = vmatprep.subr.bf16.mxu0 %v7764_v56  ;;  %5965 = vmatprep.subr.bf16.mxu1 %v7767_v57  ;;  %v7854_v56 = vld [vmem:[%s11242_s1 + $0x8c8] ss:$16 sps:$4 sm:$0xff]   ;;  %v7855_v57 = vld [vmem:[%s11242_s1 + $0x8e4] ss:$16 sps:$4 sm:$0xff]  }
  0xe3   :  { %5183 = vmatpush1.bf16.msra.mxu0 %v7766_v58  ;;  %5967 = vmatpush1.bf16.msra.mxu1 %v7769_v59  ;;  %v7858_v58 = vld [vmem:[%s11242_s1 + $0x8ec] ss:$16 sps:$4 sm:$0xff]   ;;  %v7857_v59 = vld [vmem:[%s11242_s1 + $0x8e0] ss:$16 sps:$4 sm:$0xff]  }
  0xe4   :  { %5185 = vmatprep.subr.bf16.mxu0 %v7770_v60  ;;  %5969 = vmatprep.subr.bf16.mxu1 %v7773_v61  ;;  %v7860_v60 = vld [vmem:[%s11242_s1 + $0x8e8] ss:$16 sps:$4 sm:$0xff]   ;;  %v7861_v61 = vld [vmem:[%s11242_s1 + $0x904] ss:$16 sps:$4 sm:$0xff]  }
  0xe7   :  { %5187 = vmatpush1.bf16.msra.mxu0 %v7772_v62  ;;  %5971 = vmatpush1.bf16.msra.mxu1 %v7775_v63  ;;  %v7864_v62 = vld [vmem:[%s11242_s1 + $0x90c] ss:$16 sps:$4 sm:$0xff]   ;;  %v7863_v63 = vld [vmem:[%s11242_s1 + $0x900] ss:$16 sps:$4 sm:$0xff]  }
  0xe8   :  { %5189 = vmatprep.subr.bf16.mxu0 %v7776_v0  ;;  %5973 = vmatprep.subr.bf16.mxu1 %v7779_v1  ;;  %v7866_v0 = vld [vmem:[%s11242_s1 + $0x908] ss:$16 sps:$4 sm:$0xff]   ;;  %v7867_v1 = vld [vmem:[%s11242_s1 + $0x924] ss:$16 sps:$4 sm:$0xff]  }
  0xeb   :  { %5191 = vmatpush1.bf16.msra.mxu0 %v7778_v2  ;;  %5975 = vmatpush1.bf16.msra.mxu1 %v7781_v3  ;;  %v7870_v2 = vld [vmem:[%s11242_s1 + $0x92c] ss:$16 sps:$4 sm:$0xff]   ;;  %v7869_v3 = vld [vmem:[%s11242_s1 + $0x920] ss:$16 sps:$4 sm:$0xff]  }
  0xec   :  { %5193 = vmatprep.subr.bf16.mxu0 %v7782_v4  ;;  %5977 = vmatprep.subr.bf16.mxu1 %v7785_v5  ;;  %v7872_v4 = vld [vmem:[%s11242_s1 + $0x928] ss:$16 sps:$4 sm:$0xff]   ;;  %v7873_v5 = vld [vmem:[%s11242_s1 + $0x944] ss:$16 sps:$4 sm:$0xff]  }
  0xef   :  { %5195 = vmatpush1.bf16.msra.mxu0 %v7784_v6  ;;  %5979 = vmatpush1.bf16.msra.mxu1 %v7787_v7  ;;  %v7876_v6 = vld [vmem:[%s11242_s1 + $0x94c] ss:$16 sps:$4 sm:$0xff]   ;;  %v7875_v7 = vld [vmem:[%s11242_s1 + $0x940] ss:$16 sps:$4 sm:$0xff]  }
  0xf0   :  { %5197 = vmatprep.subr.bf16.mxu0 %v7788_v8  ;;  %5981 = vmatprep.subr.bf16.mxu1 %v7791_v9  ;;  %v7878_v8 = vld [vmem:[%s11242_s1 + $0x948] ss:$16 sps:$4 sm:$0xff]   ;;  %v7879_v9 = vld [vmem:[%s11242_s1 + $0x964] ss:$16 sps:$4 sm:$0xff]  }
  0xf3   :  { %5199 = vmatpush1.bf16.msra.mxu0 %v7790_v10  ;;  %5983 = vmatpush1.bf16.msra.mxu1 %v7793_v11  ;;  %v7882_v10 = vld [vmem:[%s11242_s1 + $0x96c] ss:$16 sps:$4 sm:$0xff]   ;;  %v7881_v11 = vld [vmem:[%s11242_s1 + $0x960] ss:$16 sps:$4 sm:$0xff]  }
  0xf4   :  { %5201 = vmatprep.subr.bf16.mxu0 %v7794_v13  ;;  %5985 = vmatprep.subr.bf16.mxu1 %v7797_v14  ;;  %v7884_v13 = vld [vmem:[%s11242_s1 + $0x968] ss:$16 sps:$4 sm:$0xff]   ;;  %v7885_v14 = vld [vmem:[%s11242_s1 + $0x984] ss:$16 sps:$4 sm:$0xff]  }
  0xf7   :  { %5203 = vmatpush1.bf16.msra.mxu0 %v7796_v15  ;;  %5987 = vmatpush1.bf16.msra.mxu1 %v7799_v16  ;;  %v7888_v15 = vld [vmem:[%s11242_s1 + $0x98c] ss:$16 sps:$4 sm:$0xff]   ;;  %v7887_v16 = vld [vmem:[%s11242_s1 + $0x980] ss:$16 sps:$4 sm:$0xff]  }
  0xf8   :  { %5205 = vmatprep.subr.bf16.mxu0 %v7800_v17  ;;  %5989 = vmatprep.subr.bf16.mxu1 %v7803_v18  ;;  %v7890_v17 = vld [vmem:[%s11242_s1 + $0x988] ss:$16 sps:$4 sm:$0xff]   ;;  %v7891_v18 = vld [vmem:[%s11242_s1 + $0x9a4] ss:$16 sps:$4 sm:$0xff]  }
  0xfb   :  { %5207 = vmatpush1.bf16.msra.mxu0 %v7802_v20  ;;  %5991 = vmatpush1.bf16.msra.mxu1 %v7805_v21  ;;  %v7894_v20 = vld [vmem:[%s11242_s1 + $0x9ac] ss:$16 sps:$4 sm:$0xff]   ;;  %v7893_v21 = vld [vmem:[%s11242_s1 + $0x9a0] ss:$16 sps:$4 sm:$0xff]  }
  0xfc   :  { %5209 = vmatprep.subr.bf16.mxu0 %v7806_v23  ;;  %5993 = vmatprep.subr.bf16.mxu1 %v7809_v19  ;;  %v7896_v23 = vld [vmem:[%s11242_s1 + $0x9a8] ss:$16 sps:$4 sm:$0xff]   ;;  %v7897_v19 = vld [vmem:[%s11242_s1 + $0x9c4] ss:$16 sps:$4 sm:$0xff]  }
  0xff   :  { %5211 = vmatpush1.bf16.msra.mxu0 %v7808_v25  ;;  %5995 = vmatpush1.bf16.msra.mxu1 %v7811_v12  ;;  %v7900_v25 = vld [vmem:[%s11242_s1 + $0x9cc] ss:$16 sps:$4 sm:$0xff]   ;;  %v7899_v12 = vld [vmem:[%s11242_s1 + $0x9c0] ss:$16 sps:$4 sm:$0xff]  }
 0x100   :  { %5213 = vmatprep.subr.bf16.mxu0 %v7813_v27  ;;  %5997 = vmatprep.subr.bf16.mxu1 %v7816_v28  ;;  %v7902_v27 = vld [vmem:[%s11242_s1 + $0x9c8] ss:$16 sps:$4 sm:$0xff]   ;;  %v7903_v28 = vld [vmem:[%s11242_s1 + $0x9e4] ss:$16 sps:$4 sm:$0xff]  }
 0x102   :  { %2822 = vmatmul.mubr.f32.vlgmr.msra.gmra.mrb[0].mxu0 %v9264_v24  ;;  %3745 = vmatmul.mubr.f32.vlgmr.msra.gmra.mrb[0].mxu1 %v9264_v24  ;;  %v7828_v24 = vld [vmem:[%s11242_s1 + $0x84c] ss:$16 sps:$4 sm:$0xff]  }
 0x103   :  { %5215 = vmatpush1.bf16.msra.mxu0 %v7815_v30  ;;  %5999 = vmatpush1.bf16.msra.mxu1 %v7818_v31  ;;  %v7906_v30 = vld [vmem:[%s11242_s1 + $0x9ec] ss:$16 sps:$4 sm:$0xff]   ;;  %v7905_v31 = vld [vmem:[%s11242_s1 + $0x9e0] ss:$16 sps:$4 sm:$0xff]  }
 0x104   :  { %5217 = vmatprep.subr.bf16.mxu0 %v7819_v22  ;;  %6001 = vmatprep.subr.bf16.mxu1 %v7822_v32  ;;  %v2442_v22 = vcombine.high %v9456_v26, %v9456_v26  ;;  %v7908_v32 = vld [vmem:[%s11242_s1 + $0x9e8] ss:$16 sps:$4 sm:$0xff]   ;;  %v7911_v26 = vld [vmem:[%s11242_s1 + $0xa00] ss:$16 sps:$4 sm:$0xff]  }
 0x105   :  { %2892 = vmatprep.mubr.f32.mxu0 %v2457_v33  ;;  %3815 = vmatprep.mubr.f32.mxu1 %v2457_v33  ;;  %v7909_v33 = vld [vmem:[%s11242_s1 + $0xa04] ss:$16 sps:$4 sm:$0xff]  }
 0x107   :  { %5219 = vmatpush1.bf16.msra.mxu0 %v7821_v34  ;;  %6003 = vmatpush1.bf16.msra.mxu1 %v7824_v35  ;;  %v7912_v34 = vld [vmem:[%s11242_s1 + $0xa0c] ss:$16 sps:$4 sm:$0xff]   ;;  %v9673_v35 = vrot.slane %v2442_v22, %v8787_v49  ;;  %v7995_v22 = vld [vmem:[%s11242_s1 + $0xbc0] ss:$16 sps:$4 sm:$0xff]  }
 0x108   :  { %5221 = vmatprep.subr.bf16.mxu0 %v7825_v36  ;;  %6005 = vmatprep.subr.bf16.mxu1 %v7828_v24  ;;  %v7914_v36 = vld [vmem:[%s11242_s1 + $0xa08] ss:$16 sps:$4 sm:$0xff]   ;;  %v7915_v24 = vld [vmem:[%s11242_s1 + $0xa24] ss:$16 sps:$4 sm:$0xff]  }
 0x10b   :  { %5223 = vmatpush1.bf16.msra.mxu0 %v7827_v37  ;;  %6007 = vmatpush1.bf16.msra.mxu1 %v7830_v38  ;;  %v7918_v37 = vld [vmem:[%s11242_s1 + $0xa2c] ss:$16 sps:$4 sm:$0xff]   ;;  %v7917_v38 = vld [vmem:[%s11242_s1 + $0xa20] ss:$16 sps:$4 sm:$0xff]  }
 0x10c   :  { %5225 = vmatprep.subr.bf16.mxu0 %v7831_v39  ;;  %6009 = vmatprep.subr.bf16.mxu1 %v7834_v40  ;;  %v2458_v39 = vcombine.high %v9673_v35, %v9673_v35  ;;  %v7920_v40 = vld [vmem:[%s11242_s1 + $0xa28] ss:$16 sps:$4 sm:$0xff]  }
 0x10f   :  { %5227 = vmatpush1.bf16.msra.mxu0 %v7833_v41  ;;  %6011 = vmatpush1.bf16.msra.mxu1 %v7836_v43  ;;  %v7921_v41 = vld [vmem:[%s11242_s1 + $0xa44] ss:$16 sps:$4 sm:$0xff]   ;;  %v7924_v43 = vld [vmem:[%s11242_s1 + $0xa4c] ss:$16 sps:$4 sm:$0xff]  }
 0x110   :  { %5229 = vmatprep.subr.bf16.mxu0 %v7837_v44  ;;  %6013 = vmatprep.subr.bf16.mxu1 %v7840_v45  ;;  %v7926_v44 = vld [vmem:[%s11242_s1 + $0xa48] ss:$16 sps:$4 sm:$0xff]   ;;  %v7927_v45 = vld [vmem:[%s11242_s1 + $0xa64] ss:$16 sps:$4 sm:$0xff]  }
 0x113   :  { %5231 = vmatpush1.bf16.msra.mxu0 %v7839_v46  ;;  %6015 = vmatpush1.bf16.msra.mxu1 %v7842_v47  ;;  %v7930_v46 = vld [vmem:[%s11242_s1 + $0xa6c] ss:$16 sps:$4 sm:$0xff]   ;;  %v7929_v47 = vld [vmem:[%s11242_s1 + $0xa60] ss:$16 sps:$4 sm:$0xff]  }
 0x114   :  { %5233 = vmatprep.subr.bf16.mxu0 %v7843_v48  ;;  %6017 = vmatprep.subr.bf16.mxu1 %v7846_v50  ;;  %v7932_v48 = vld [vmem:[%s11242_s1 + $0xa68] ss:$16 sps:$4 sm:$0xff]   ;;  %v7933_v50 = vld [vmem:[%s11242_s1 + $0xa84] ss:$16 sps:$4 sm:$0xff]  }
 0x117   :  { %5235 = vmatpush1.bf16.msra.mxu0 %v7845_v51  ;;  %6019 = vmatpush1.bf16.msra.mxu1 %v7848_v52  ;;  %v7936_v51 = vld [vmem:[%s11242_s1 + $0xa8c] ss:$16 sps:$4 sm:$0xff]   ;;  %v7935_v52 = vld [vmem:[%s11242_s1 + $0xa80] ss:$16 sps:$4 sm:$0xff]  }
 0x118   :  { %5237 = vmatprep.subr.bf16.mxu0 %v7849_v53  ;;  %6021 = vmatprep.subr.bf16.mxu1 %v7852_v54  ;;  %v7938_v53 = vld [vmem:[%s11242_s1 + $0xa88] ss:$16 sps:$4 sm:$0xff]   ;;  %v7939_v54 = vld [vmem:[%s11242_s1 + $0xaa4] ss:$16 sps:$4 sm:$0xff]  }
 0x11b   :  { %5239 = vmatpush1.bf16.msra.mxu0 %v7851_v55  ;;  %6023 = vmatpush1.bf16.msra.mxu1 %v7854_v56  ;;  %v7942_v55 = vld [vmem:[%s11242_s1 + $0xaac] ss:$16 sps:$4 sm:$0xff]   ;;  %v7941_v56 = vld [vmem:[%s11242_s1 + $0xaa0] ss:$16 sps:$4 sm:$0xff]  }
 0x11c   :  { %5241 = vmatprep.subr.bf16.mxu0 %v7855_v57  ;;  %6025 = vmatprep.subr.bf16.mxu1 %v7858_v58  ;;  %v7944_v57 = vld [vmem:[%s11242_s1 + $0xaa8] ss:$16 sps:$4 sm:$0xff]   ;;  %v7945_v58 = vld [vmem:[%s11242_s1 + $0xac4] ss:$16 sps:$4 sm:$0xff]  }
 0x11f   :  { %5243 = vmatpush1.bf16.msra.mxu0 %v7857_v59  ;;  %6027 = vmatpush1.bf16.msra.mxu1 %v7860_v60  ;;  %v7948_v59 = vld [vmem:[%s11242_s1 + $0xacc] ss:$16 sps:$4 sm:$0xff]   ;;  %v7947_v60 = vld [vmem:[%s11242_s1 + $0xac0] ss:$16 sps:$4 sm:$0xff]  }
 0x120   :  { %5245 = vmatprep.subr.bf16.mxu0 %v7861_v61  ;;  %6029 = vmatprep.subr.bf16.mxu1 %v7864_v62  ;;  %v7950_v61 = vld [vmem:[%s11242_s1 + $0xac8] ss:$16 sps:$4 sm:$0xff]   ;;  %v7951_v62 = vld [vmem:[%s11242_s1 + $0xae4] ss:$16 sps:$4 sm:$0xff]  }
 0x123   :  { %5247 = vmatpush1.bf16.msra.mxu0 %v7863_v63  ;;  %6031 = vmatpush1.bf16.msra.mxu1 %v7866_v0  ;;  %v7954_v63 = vld [vmem:[%s11242_s1 + $0xaec] ss:$16 sps:$4 sm:$0xff]   ;;  %v7953_v0 = vld [vmem:[%s11242_s1 + $0xae0] ss:$16 sps:$4 sm:$0xff]  }
 0x124   :  { %5249 = vmatprep.subr.bf16.mxu0 %v7867_v1  ;;  %6033 = vmatprep.subr.bf16.mxu1 %v7870_v2  ;;  %v7956_v1 = vld [vmem:[%s11242_s1 + $0xae8] ss:$16 sps:$4 sm:$0xff]   ;;  %v7957_v2 = vld [vmem:[%s11242_s1 + $0xb04] ss:$16 sps:$4 sm:$0xff]  }
 0x127   :  { %5251 = vmatpush1.bf16.msra.mxu0 %v7869_v3  ;;  %6035 = vmatpush1.bf16.msra.mxu1 %v7872_v4  ;;  %v7960_v3 = vld [vmem:[%s11242_s1 + $0xb0c] ss:$16 sps:$4 sm:$0xff]   ;;  %v7959_v4 = vld [vmem:[%s11242_s1 + $0xb00] ss:$16 sps:$4 sm:$0xff]  }
 0x128   :  { %5253 = vmatprep.subr.bf16.mxu0 %v7873_v5  ;;  %6037 = vmatprep.subr.bf16.mxu1 %v7876_v6  ;;  %v7962_v5 = vld [vmem:[%s11242_s1 + $0xb08] ss:$16 sps:$4 sm:$0xff]   ;;  %v7963_v6 = vld [vmem:[%s11242_s1 + $0xb24] ss:$16 sps:$4 sm:$0xff]  }
 0x12b   :  { %5255 = vmatpush1.bf16.msra.mxu0 %v7875_v7  ;;  %6039 = vmatpush1.bf16.msra.mxu1 %v7878_v8  ;;  %v7966_v7 = vld [vmem:[%s11242_s1 + $0xb2c] ss:$16 sps:$4 sm:$0xff]   ;;  %v7965_v8 = vld [vmem:[%s11242_s1 + $0xb20] ss:$16 sps:$4 sm:$0xff]  }
 0x12c   :  { %5257 = vmatprep.subr.bf16.mxu0 %v7879_v9  ;;  %6041 = vmatprep.subr.bf16.mxu1 %v7882_v10  ;;  %v7968_v9 = vld [vmem:[%s11242_s1 + $0xb28] ss:$16 sps:$4 sm:$0xff]   ;;  %v7969_v10 = vld [vmem:[%s11242_s1 + $0xb44] ss:$16 sps:$4 sm:$0xff]  }
 0x12f   :  { %5259 = vmatpush1.bf16.msra.mxu0 %v7881_v11  ;;  %6043 = vmatpush1.bf16.msra.mxu1 %v7884_v13  ;;  %v7972_v11 = vld [vmem:[%s11242_s1 + $0xb4c] ss:$16 sps:$4 sm:$0xff]   ;;  %v7971_v13 = vld [vmem:[%s11242_s1 + $0xb40] ss:$16 sps:$4 sm:$0xff]  }
 0x130   :  { %5261 = vmatprep.subr.bf16.mxu0 %v7885_v14  ;;  %6045 = vmatprep.subr.bf16.mxu1 %v7888_v15  ;;  %v7974_v14 = vld [vmem:[%s11242_s1 + $0xb48] ss:$16 sps:$4 sm:$0xff]   ;;  %v7975_v15 = vld [vmem:[%s11242_s1 + $0xb64] ss:$16 sps:$4 sm:$0xff]  }
 0x133   :  { %5263 = vmatpush1.bf16.msra.mxu0 %v7887_v16  ;;  %6047 = vmatpush1.bf16.msra.mxu1 %v7890_v17  ;;  %v7978_v16 = vld [vmem:[%s11242_s1 + $0xb6c] ss:$16 sps:$4 sm:$0xff]   ;;  %v7977_v17 = vld [vmem:[%s11242_s1 + $0xb60] ss:$16 sps:$4 sm:$0xff]  }
 0x134   :  { %5265 = vmatprep.subr.bf16.mxu0 %v7891_v18  ;;  %6049 = vmatprep.subr.bf16.mxu1 %v7894_v20  ;;  %v7980_v18 = vld [vmem:[%s11242_s1 + $0xb68] ss:$16 sps:$4 sm:$0xff]   ;;  %v7981_v20 = vld [vmem:[%s11242_s1 + $0xb84] ss:$16 sps:$4 sm:$0xff]  }
 0x137   :  { %5267 = vmatpush1.bf16.msra.mxu0 %v7893_v21  ;;  %6051 = vmatpush1.bf16.msra.mxu1 %v7896_v23  ;;  %v7984_v21 = vld [vmem:[%s11242_s1 + $0xb8c] ss:$16 sps:$4 sm:$0xff]   ;;  %v7983_v23 = vld [vmem:[%s11242_s1 + $0xb80] ss:$16 sps:$4 sm:$0xff]  }
 0x138   :  { %5269 = vmatprep.subr.bf16.mxu0 %v7897_v19  ;;  %6053 = vmatprep.subr.bf16.mxu1 %v7900_v25  ;;  %v7986_v19 = vld [vmem:[%s11242_s1 + $0xb88] ss:$16 sps:$4 sm:$0xff]   ;;  %v7987_v25 = vld [vmem:[%s11242_s1 + $0xba4] ss:$16 sps:$4 sm:$0xff]  }
 0x13b   :  { %5271 = vmatpush1.bf16.msra.mxu0 %v7899_v12  ;;  %6055 = vmatpush1.bf16.msra.mxu1 %v7902_v27  ;;  %v7990_v12 = vld [vmem:[%s11242_s1 + $0xbac] ss:$16 sps:$4 sm:$0xff]   ;;  %v7989_v27 = vld [vmem:[%s11242_s1 + $0xba0] ss:$16 sps:$4 sm:$0xff]  }
 0x13c   :  { %5273 = vmatprep.subr.bf16.mxu0 %v7903_v28  ;;  %6057 = vmatprep.subr.bf16.mxu1 %v7906_v30  ;;  %v7992_v28 = vld [vmem:[%s11242_s1 + $0xba8] ss:$16 sps:$4 sm:$0xff]   ;;  %v7993_v30 = vld [vmem:[%s11242_s1 + $0xbc4] ss:$16 sps:$4 sm:$0xff]  }
 0x13f   :  { %5275 = vmatpush1.bf16.msra.mxu0 %v7905_v31  ;;  %6059 = vmatpush1.bf16.msra.mxu1 %v7908_v32  ;;  %v7996_v31 = vld [vmem:[%s11242_s1 + $0xbcc] ss:$16 sps:$4 sm:$0xff]   ;;  %v7998_v32 = vld [vmem:[%s11242_s1 + $0xbc8] ss:$16 sps:$4 sm:$0xff]  }
 0x140   :  { %5277 = vmatprep.subr.bf16.mxu0 %v7909_v33  ;;  %6061 = vmatprep.subr.bf16.mxu1 %v7912_v34  ;;  %v7999_v33 = vld [vmem:[%s11242_s1 + $0xbe4] ss:$16 sps:$4 sm:$0xff]   ;;  %v8002_v34 = vld [vmem:[%s11242_s1 + $0xbec] ss:$16 sps:$4 sm:$0xff]  }
 0x142   :  { %2893 = vmatmul.mubr.f32.vlgmr.msra.gmra.mrb[0].mxu0 %v9469_v29  ;;  %3816 = vmatmul.mubr.f32.vlgmr.msra.gmra.mrb[0].mxu1 %v9469_v29  ;;  %v7923_v29 = vld [vmem:[%s11242_s1 + $0xa40] ss:$16 sps:$4 sm:$0xff]  }
 0x143   :  { %5279 = vmatpush1.bf16.msra.mxu0 %v7911_v26  ;;  %6063 = vmatpush1.bf16.msra.mxu1 %v7914_v36  ;;  %v9859_v26 = vld [vmem:[%s11243_s0 + $0x18] sm:$0xff]  ;;  %v8001_v36 = vld [vmem:[%s11242_s1 + $0xbe0] ss:$16 sps:$4 sm:$0xff]  }
 0x144   :  { %5281 = vmatprep.subr.bf16.mxu0 %v7915_v24  ;;  %6065 = vmatprep.subr.bf16.mxu1 %v7918_v37  ;;  %v8004_v24 = vld [vmem:[%s11242_s1 + $0xbe8] ss:$16 sps:$4 sm:$0xff]   ;;  %v8006_v37 = vld [vmem:[%s11242_s1 + $0xc04] ss:$16 sps:$4 sm:$0xff]  }
 0x145   :  { %2963 = vmatprep.mubr.f32.mxu0 %v2458_v39  ;;  %3886 = vmatprep.mubr.f32.mxu1 %v2458_v39  ;;  %v8008_v39 = vld [vmem:[%s11242_s1 + $0xc00] ss:$16 sps:$4 sm:$0xff]  }
 0x147   :  { %5283 = vmatpush1.bf16.msra.mxu0 %v7917_v38  ;;  %6067 = vmatpush1.bf16.msra.mxu1 %v7920_v40  ;;  %v8009_v38 = vld [vmem:[%s11242_s1 + $0xc0c] ss:$16 sps:$4 sm:$0xff]   ;;  %v9878_v40 = vrot.slane %v9859_v26, %v8787_v49 }
 0x148   :  { %5285 = vmatprep.subr.bf16.mxu0 %v7921_v41  ;;  %6069 = vmatprep.subr.bf16.mxu1 %v7924_v43  ;;  %v8011_v41 = vld [vmem:[%s11242_s1 + $0xc08] ss:$16 sps:$4 sm:$0xff]   ;;  %v8012_v43 = vld [vmem:[%s11242_s1 + $0xc24] ss:$16 sps:$4 sm:$0xff]  }
 0x14b   :  { %5287 = vmatpush1.bf16.msra.mxu0 %v7923_v29  ;;  %6071 = vmatpush1.bf16.msra.mxu1 %v7926_v44  ;;  %v8015_v29 = vld [vmem:[%s11242_s1 + $0xc2c] ss:$16 sps:$4 sm:$0xff]   ;;  %v8014_v44 = vld [vmem:[%s11242_s1 + $0xc20] ss:$16 sps:$4 sm:$0xff]  }
 0x14c   :  { %5289 = vmatprep.subr.bf16.mxu0 %v7927_v45  ;;  %6073 = vmatprep.subr.bf16.mxu1 %v7930_v46  ;;  %v2474_v45 = vcombine.high %v9878_v40, %v9878_v40  ;;  %v8017_v46 = vld [vmem:[%s11242_s1 + $0xc28] ss:$16 sps:$4 sm:$0xff]  }
 0x14f   :  { %5291 = vmatpush1.bf16.msra.mxu0 %v7929_v47  ;;  %6075 = vmatpush1.bf16.msra.mxu1 %v7932_v48  ;;  %v8018_v47 = vld [vmem:[%s11242_s1 + $0xc44] ss:$16 sps:$4 sm:$0xff]   ;;  %v8021_v48 = vld [vmem:[%s11242_s1 + $0xc4c] ss:$16 sps:$4 sm:$0xff]  }
 0x150   :  { %5293 = vmatprep.subr.bf16.mxu0 %v7933_v50  ;;  %6077 = vmatprep.subr.bf16.mxu1 %v7936_v51  ;;  %v8023_v50 = vld [vmem:[%s11242_s1 + $0xc48] ss:$16 sps:$4 sm:$0xff]   ;;  %v8024_v51 = vld [vmem:[%s11242_s1 + $0xc64] ss:$16 sps:$4 sm:$0xff]  }
 0x153   :  { %5295 = vmatpush1.bf16.msra.mxu0 %v7935_v52  ;;  %6079 = vmatpush1.bf16.msra.mxu1 %v7938_v53  ;;  %v8027_v52 = vld [vmem:[%s11242_s1 + $0xc6c] ss:$16 sps:$4 sm:$0xff]   ;;  %v8026_v53 = vld [vmem:[%s11242_s1 + $0xc60] ss:$16 sps:$4 sm:$0xff]  }
 0x154   :  { %5297 = vmatprep.subr.bf16.mxu0 %v7939_v54  ;;  %6081 = vmatprep.subr.bf16.mxu1 %v7942_v55  ;;  %v8029_v54 = vld [vmem:[%s11242_s1 + $0xc68] ss:$16 sps:$4 sm:$0xff]   ;;  %v8030_v55 = vld [vmem:[%s11242_s1 + $0xc84] ss:$16 sps:$4 sm:$0xff]  }
 0x157   :  { %5299 = vmatpush1.bf16.msra.mxu0 %v7941_v56  ;;  %6083 = vmatpush1.bf16.msra.mxu1 %v7944_v57  ;;  %v8033_v56 = vld [vmem:[%s11242_s1 + $0xc8c] ss:$16 sps:$4 sm:$0xff]   ;;  %v8032_v57 = vld [vmem:[%s11242_s1 + $0xc80] ss:$16 sps:$4 sm:$0xff]  }
 0x158   :  { %5301 = vmatprep.subr.bf16.mxu0 %v7945_v58  ;;  %6085 = vmatprep.subr.bf16.mxu1 %v7948_v59  ;;  %v8035_v58 = vld [vmem:[%s11242_s1 + $0xc88] ss:$16 sps:$4 sm:$0xff]   ;;  %v8036_v59 = vld [vmem:[%s11242_s1 + $0xca4] ss:$16 sps:$4 sm:$0xff]  }
 0x15b   :  { %5303 = vmatpush1.bf16.msra.mxu0 %v7947_v60  ;;  %6087 = vmatpush1.bf16.msra.mxu1 %v7950_v61  ;;  %v8039_v60 = vld [vmem:[%s11242_s1 + $0xcac] ss:$16 sps:$4 sm:$0xff]   ;;  %v8038_v61 = vld [vmem:[%s11242_s1 + $0xca0] ss:$16 sps:$4 sm:$0xff]  }
 0x15c   :  { %5305 = vmatprep.subr.bf16.mxu0 %v7951_v62  ;;  %6089 = vmatprep.subr.bf16.mxu1 %v7954_v63  ;;  %v8041_v62 = vld [vmem:[%s11242_s1 + $0xca8] ss:$16 sps:$4 sm:$0xff]   ;;  %v8042_v63 = vld [vmem:[%s11242_s1 + $0xcc4] ss:$16 sps:$4 sm:$0xff]  }
 0x15f   :  { %5307 = vmatpush1.bf16.msra.mxu0 %v7953_v0  ;;  %6091 = vmatpush1.bf16.msra.mxu1 %v7956_v1  ;;  %v8045_v0 = vld [vmem:[%s11242_s1 + $0xccc] ss:$16 sps:$4 sm:$0xff]   ;;  %v8044_v1 = vld [vmem:[%s11242_s1 + $0xcc0] ss:$16 sps:$4 sm:$0xff]  }
 0x160   :  { %5309 = vmatprep.subr.bf16.mxu0 %v7957_v2  ;;  %6093 = vmatprep.subr.bf16.mxu1 %v7960_v3  ;;  %v8047_v2 = vld [vmem:[%s11242_s1 + $0xcc8] ss:$16 sps:$4 sm:$0xff]   ;;  %v8048_v3 = vld [vmem:[%s11242_s1 + $0xce4] ss:$16 sps:$4 sm:$0xff]  }
 0x163   :  { %5311 = vmatpush1.bf16.msra.mxu0 %v7959_v4  ;;  %6095 = vmatpush1.bf16.msra.mxu1 %v7962_v5  ;;  %v8051_v4 = vld [vmem:[%s11242_s1 + $0xcec] ss:$16 sps:$4 sm:$0xff]   ;;  %v8050_v5 = vld [vmem:[%s11242_s1 + $0xce0] ss:$16 sps:$4 sm:$0xff]  }
 0x164   :  { %5313 = vmatprep.subr.bf16.mxu0 %v7963_v6  ;;  %6097 = vmatprep.subr.bf16.mxu1 %v7966_v7  ;;  %v8053_v6 = vld [vmem:[%s11242_s1 + $0xce8] ss:$16 sps:$4 sm:$0xff]   ;;  %v8054_v7 = vld [vmem:[%s11242_s1 + $0xd04] ss:$16 sps:$4 sm:$0xff]  }
 0x167   :  { %5315 = vmatpush1.bf16.msra.mxu0 %v7965_v8  ;;  %6099 = vmatpush1.bf16.msra.mxu1 %v7968_v9  ;;  %v8057_v8 = vld [vmem:[%s11242_s1 + $0xd0c] ss:$16 sps:$4 sm:$0xff]   ;;  %v8056_v9 = vld [vmem:[%s11242_s1 + $0xd00] ss:$16 sps:$4 sm:$0xff]  }
 0x168   :  { %5317 = vmatprep.subr.bf16.mxu0 %v7969_v10  ;;  %6101 = vmatprep.subr.bf16.mxu1 %v7972_v11  ;;  %v8059_v10 = vld [vmem:[%s11242_s1 + $0xd08] ss:$16 sps:$4 sm:$0xff]   ;;  %v8060_v11 = vld [vmem:[%s11242_s1 + $0xd24] ss:$16 sps:$4 sm:$0xff]  }
 0x16b   :  { %5319 = vmatpush1.bf16.msra.mxu0 %v7971_v13  ;;  %6103 = vmatpush1.bf16.msra.mxu1 %v7974_v14  ;;  %v8063_v13 = vld [vmem:[%s11242_s1 + $0xd2c] ss:$16 sps:$4 sm:$0xff]   ;;  %v8062_v14 = vld [vmem:[%s11242_s1 + $0xd20] ss:$16 sps:$4 sm:$0xff]  }
 0x16c   :  { %5321 = vmatprep.subr.bf16.mxu0 %v7975_v15  ;;  %6105 = vmatprep.subr.bf16.mxu1 %v7978_v16  ;;  %v8065_v15 = vld [vmem:[%s11242_s1 + $0xd28] ss:$16 sps:$4 sm:$0xff]   ;;  %v8066_v16 = vld [vmem:[%s11242_s1 + $0xd44] ss:$16 sps:$4 sm:$0xff]  }
 0x16f   :  { %5323 = vmatpush1.bf16.msra.mxu0 %v7977_v17  ;;  %6107 = vmatpush1.bf16.msra.mxu1 %v7980_v18  ;;  %v8069_v17 = vld [vmem:[%s11242_s1 + $0xd4c] ss:$16 sps:$4 sm:$0xff]   ;;  %v8068_v18 = vld [vmem:[%s11242_s1 + $0xd40] ss:$16 sps:$4 sm:$0xff]  }
 0x170   :  { %5325 = vmatprep.subr.bf16.mxu0 %v7981_v20  ;;  %6109 = vmatprep.subr.bf16.mxu1 %v7984_v21  ;;  %v8071_v20 = vld [vmem:[%s11242_s1 + $0xd48] ss:$16 sps:$4 sm:$0xff]   ;;  %v8072_v21 = vld [vmem:[%s11242_s1 + $0xd64] ss:$16 sps:$4 sm:$0xff]  }
 0x173   :  { %5327 = vmatpush1.bf16.msra.mxu0 %v7983_v23  ;;  %6111 = vmatpush1.bf16.msra.mxu1 %v7986_v19  ;;  %v8075_v23 = vld [vmem:[%s11242_s1 + $0xd6c] ss:$16 sps:$4 sm:$0xff]   ;;  %v8074_v19 = vld [vmem:[%s11242_s1 + $0xd60] ss:$16 sps:$4 sm:$0xff]  }
 0x174   :  { %5329 = vmatprep.subr.bf16.mxu0 %v7987_v25  ;;  %6113 = vmatprep.subr.bf16.mxu1 %v7990_v12  ;;  %v8077_v25 = vld [vmem:[%s11242_s1 + $0xd68] ss:$16 sps:$4 sm:$0xff]   ;;  %v8078_v12 = vld [vmem:[%s11242_s1 + $0xd84] ss:$16 sps:$4 sm:$0xff]  }
 0x177   :  { %5331 = vmatpush1.bf16.msra.mxu0 %v7989_v27  ;;  %6115 = vmatpush1.bf16.msra.mxu1 %v7992_v28  ;;  %v8081_v27 = vld [vmem:[%s11242_s1 + $0xd8c] ss:$16 sps:$4 sm:$0xff]   ;;  %v8080_v28 = vld [vmem:[%s11242_s1 + $0xd80] ss:$16 sps:$4 sm:$0xff]  }
 0x178   :  { %5333 = vmatprep.subr.bf16.mxu0 %v7993_v30  ;;  %6117 = vmatprep.subr.bf16.mxu1 %v7996_v31  ;;  %v8083_v30 = vld [vmem:[%s11242_s1 + $0xd88] ss:$16 sps:$4 sm:$0xff]   ;;  %v8084_v31 = vld [vmem:[%s11242_s1 + $0xda4] ss:$16 sps:$4 sm:$0xff]  }
 0x17b   :  { %5335 = vmatpush1.bf16.msra.mxu0 %v7995_v22  ;;  %6119 = vmatpush1.bf16.msra.mxu1 %v7998_v32  ;;  %v8087_v22 = vld [vmem:[%s11242_s1 + $0xdac] ss:$16 sps:$4 sm:$0xff]   ;;  %v8086_v32 = vld [vmem:[%s11242_s1 + $0xda0] ss:$16 sps:$4 sm:$0xff]  }
 0x17c   :  { %5337 = vmatprep.subr.bf16.mxu0 %v7999_v33  ;;  %6121 = vmatprep.subr.bf16.mxu1 %v8002_v34  ;;  %v8089_v33 = vld [vmem:[%s11242_s1 + $0xda8] ss:$16 sps:$4 sm:$0xff]   ;;  %v8090_v34 = vld [vmem:[%s11242_s1 + $0xdc4] ss:$16 sps:$4 sm:$0xff]  }
 0x17f   :  { %5339 = vmatpush1.bf16.msra.mxu0 %v8001_v36  ;;  %6123 = vmatpush1.bf16.msra.mxu1 %v8004_v24  ;;  %v8093_v36 = vld [vmem:[%s11242_s1 + $0xdcc] ss:$16 sps:$4 sm:$0xff]   ;;  %v8092_v24 = vld [vmem:[%s11242_s1 + $0xdc0] ss:$16 sps:$4 sm:$0xff]  }
 0x180   :  { %5341 = vmatprep.subr.bf16.mxu0 %v8006_v37  ;;  %6125 = vmatprep.subr.bf16.mxu1 %v8009_v38  ;;  %v8095_v37 = vld [vmem:[%s11242_s1 + $0xdc8] ss:$16 sps:$4 sm:$0xff]   ;;  %v8096_v38 = vld [vmem:[%s11242_s1 + $0xde4] ss:$16 sps:$4 sm:$0xff]  }
 0x182   :  { %2964 = vmatmul.mubr.f32.vlgmr.msra.gmra.mrb[0].mxu0 %v9673_v35  ;;  %3887 = vmatmul.mubr.f32.vlgmr.msra.gmra.mrb[0].mxu1 %v9673_v35  ;;  %v8020_v35 = vld [vmem:[%s11242_s1 + $0xc40] ss:$16 sps:$4 sm:$0xff]  }
 0x183   :  { %5343 = vmatpush1.bf16.msra.mxu0 %v8008_v39  ;;  %6127 = vmatpush1.bf16.msra.mxu1 %v8011_v41  ;;  %v8099_v39 = vld [vmem:[%s11242_s1 + $0xdec] ss:$16 sps:$4 sm:$0xff]   ;;  %v8098_v41 = vld [vmem:[%s11242_s1 + $0xde0] ss:$16 sps:$4 sm:$0xff]  }
 0x184   :  { %5345 = vmatprep.subr.bf16.mxu0 %v8012_v43  ;;  %6129 = vmatprep.subr.bf16.mxu1 %v8015_v29  ;;  %v2459_v43 = vcombine.high %v9859_v26, %v9859_v26  ;;  %v8101_v29 = vld [vmem:[%s11242_s1 + $0xde8] ss:$16 sps:$4 sm:$0xff]   ;;  %v8104_v26 = vld [vmem:[%s11242_s1 + $0xe00] ss:$16 sps:$4 sm:$0xff]  }
 0x185   :  { %3034 = vmatprep.mubr.f32.mxu0 %v2474_v45  ;;  %3957 = vmatprep.mubr.f32.mxu1 %v2474_v45  ;;  %v8105_v45 = vld [vmem:[%s11242_s1 + $0xe0c] ss:$16 sps:$4 sm:$0xff]  }
 0x187   :  { %5347 = vmatpush1.bf16.msra.mxu0 %v8014_v44  ;;  %6131 = vmatpush1.bf16.msra.mxu1 %v8017_v46  ;;  %v8102_v44 = vld [vmem:[%s11242_s1 + $0xe04] ss:$16 sps:$4 sm:$0xff]   ;;  %v10079_v46 = vrot.slane %v2459_v43, %v8787_v49  ;;  %v8188_v43 = vld [vmem:[%s11242_s1 + $0xfc0] ss:$16 sps:$4 sm:$0xff]  }
 0x188   :  { %5349 = vmatprep.subr.bf16.mxu0 %v8018_v47  ;;  %6133 = vmatprep.subr.bf16.mxu1 %v8021_v48  ;;  %v8107_v47 = vld [vmem:[%s11242_s1 + $0xe08] ss:$16 sps:$4 sm:$0xff]   ;;  %v8108_v48 = vld [vmem:[%s11242_s1 + $0xe24] ss:$16 sps:$4 sm:$0xff]  }
 0x18b   :  { %5351 = vmatpush1.bf16.msra.mxu0 %v8020_v35  ;;  %6135 = vmatpush1.bf16.msra.mxu1 %v8023_v50  ;;  %v8111_v35 = vld [vmem:[%s11242_s1 + $0xe2c] ss:$16 sps:$4 sm:$0xff]   ;;  %v8110_v50 = vld [vmem:[%s11242_s1 + $0xe20] ss:$16 sps:$4 sm:$0xff]  }
 0x18c   :  { %5353 = vmatprep.subr.bf16.mxu0 %v8024_v51  ;;  %6137 = vmatprep.subr.bf16.mxu1 %v8027_v52  ;;  %v2475_v51 = vcombine.high %v10079_v46, %v10079_v46  ;;  %v8113_v52 = vld [vmem:[%s11242_s1 + $0xe28] ss:$16 sps:$4 sm:$0xff]  }
 0x18f   :  { %5355 = vmatpush1.bf16.msra.mxu0 %v8026_v53  ;;  %6139 = vmatpush1.bf16.msra.mxu1 %v8029_v54  ;;  %v8114_v53 = vld [vmem:[%s11242_s1 + $0xe44] ss:$16 sps:$4 sm:$0xff]   ;;  %v8117_v54 = vld [vmem:[%s11242_s1 + $0xe4c] ss:$16 sps:$4 sm:$0xff]  }
 0x190   :  { %5357 = vmatprep.subr.bf16.mxu0 %v8030_v55  ;;  %6141 = vmatprep.subr.bf16.mxu1 %v8033_v56  ;;  %v8119_v55 = vld [vmem:[%s11242_s1 + $0xe48] ss:$16 sps:$4 sm:$0xff]   ;;  %v8120_v56 = vld [vmem:[%s11242_s1 + $0xe64] ss:$16 sps:$4 sm:$0xff]  }
 0x193   :  { %5359 = vmatpush1.bf16.msra.mxu0 %v8032_v57  ;;  %6143 = vmatpush1.bf16.msra.mxu1 %v8035_v58  ;;  %v8123_v57 = vld [vmem:[%s11242_s1 + $0xe6c] ss:$16 sps:$4 sm:$0xff]   ;;  %v8122_v58 = vld [vmem:[%s11242_s1 + $0xe60] ss:$16 sps:$4 sm:$0xff]  }
 0x194   :  { %5361 = vmatprep.subr.bf16.mxu0 %v8036_v59  ;;  %6145 = vmatprep.subr.bf16.mxu1 %v8039_v60  ;;  %v8125_v59 = vld [vmem:[%s11242_s1 + $0xe68] ss:$16 sps:$4 sm:$0xff]   ;;  %v8126_v60 = vld [vmem:[%s11242_s1 + $0xe84] ss:$16 sps:$4 sm:$0xff]  }
 0x197   :  { %5363 = vmatpush1.bf16.msra.mxu0 %v8038_v61  ;;  %6147 = vmatpush1.bf16.msra.mxu1 %v8041_v62  ;;  %v8129_v61 = vld [vmem:[%s11242_s1 + $0xe8c] ss:$16 sps:$4 sm:$0xff]   ;;  %v8128_v62 = vld [vmem:[%s11242_s1 + $0xe80] ss:$16 sps:$4 sm:$0xff]  }
 0x198   :  { %5365 = vmatprep.subr.bf16.mxu0 %v8042_v63  ;;  %6149 = vmatprep.subr.bf16.mxu1 %v8045_v0  ;;  %v8131_v63 = vld [vmem:[%s11242_s1 + $0xe88] ss:$16 sps:$4 sm:$0xff]   ;;  %v8132_v0 = vld [vmem:[%s11242_s1 + $0xea4] ss:$16 sps:$4 sm:$0xff]  }
 0x19b   :  { %5367 = vmatpush1.bf16.msra.mxu0 %v8044_v1  ;;  %6151 = vmatpush1.bf16.msra.mxu1 %v8047_v2  ;;  %v8135_v1 = vld [vmem:[%s11242_s1 + $0xeac] ss:$16 sps:$4 sm:$0xff]   ;;  %v8134_v2 = vld [vmem:[%s11242_s1 + $0xea0] ss:$16 sps:$4 sm:$0xff]  }
 0x19c   :  { %5369 = vmatprep.subr.bf16.mxu0 %v8048_v3  ;;  %6153 = vmatprep.subr.bf16.mxu1 %v8051_v4  ;;  %v8137_v3 = vld [vmem:[%s11242_s1 + $0xea8] ss:$16 sps:$4 sm:$0xff]   ;;  %v8138_v4 = vld [vmem:[%s11242_s1 + $0xec4] ss:$16 sps:$4 sm:$0xff]  }
 0x19f   :  { %5371 = vmatpush1.bf16.msra.mxu0 %v8050_v5  ;;  %6155 = vmatpush1.bf16.msra.mxu1 %v8053_v6  ;;  %v8141_v5 = vld [vmem:[%s11242_s1 + $0xecc] ss:$16 sps:$4 sm:$0xff]   ;;  %v8140_v6 = vld [vmem:[%s11242_s1 + $0xec0] ss:$16 sps:$4 sm:$0xff]  }
 0x1a0   :  { %5373 = vmatprep.subr.bf16.mxu0 %v8054_v7  ;;  %6157 = vmatprep.subr.bf16.mxu1 %v8057_v8  ;;  %v8143_v7 = vld [vmem:[%s11242_s1 + $0xec8] ss:$16 sps:$4 sm:$0xff]   ;;  %v8144_v8 = vld [vmem:[%s11242_s1 + $0xee4] ss:$16 sps:$4 sm:$0xff]  }
 0x1a3   :  { %5375 = vmatpush1.bf16.msra.mxu0 %v8056_v9  ;;  %6159 = vmatpush1.bf16.msra.mxu1 %v8059_v10  ;;  %v8147_v9 = vld [vmem:[%s11242_s1 + $0xeec] ss:$16 sps:$4 sm:$0xff]   ;;  %v8146_v10 = vld [vmem:[%s11242_s1 + $0xee0] ss:$16 sps:$4 sm:$0xff]  }
 0x1a4   :  { %5377 = vmatprep.subr.bf16.mxu0 %v8060_v11  ;;  %6161 = vmatprep.subr.bf16.mxu1 %v8063_v13  ;;  %v8149_v11 = vld [vmem:[%s11242_s1 + $0xee8] ss:$16 sps:$4 sm:$0xff]   ;;  %v8150_v13 = vld [vmem:[%s11242_s1 + $0xf04] ss:$16 sps:$4 sm:$0xff]  }
 0x1a7   :  { %5379 = vmatpush1.bf16.msra.mxu0 %v8062_v14  ;;  %6163 = vmatpush1.bf16.msra.mxu1 %v8065_v15  ;;  %v8153_v14 = vld [vmem:[%s11242_s1 + $0xf0c] ss:$16 sps:$4 sm:$0xff]   ;;  %v8152_v15 = vld [vmem:[%s11242_s1 + $0xf00] ss:$16 sps:$4 sm:$0xff]  }
 0x1a8   :  { %5381 = vmatprep.subr.bf16.mxu0 %v8066_v16  ;;  %6165 = vmatprep.subr.bf16.mxu1 %v8069_v17  ;;  %v8155_v16 = vld [vmem:[%s11242_s1 + $0xf08] ss:$16 sps:$4 sm:$0xff]   ;;  %v8156_v17 = vld [vmem:[%s11242_s1 + $0xf24] ss:$16 sps:$4 sm:$0xff]  }
 0x1ab   :  { %5383 = vmatpush1.bf16.msra.mxu0 %v8068_v18  ;;  %6167 = vmatpush1.bf16.msra.mxu1 %v8071_v20  ;;  %v8159_v18 = vld [vmem:[%s11242_s1 + $0xf2c] ss:$16 sps:$4 sm:$0xff]   ;;  %v8158_v20 = vld [vmem:[%s11242_s1 + $0xf20] ss:$16 sps:$4 sm:$0xff]  }
 0x1ac   :  { %5385 = vmatprep.subr.bf16.mxu0 %v8072_v21  ;;  %6169 = vmatprep.subr.bf16.mxu1 %v8075_v23  ;;  %v8161_v21 = vld [vmem:[%s11242_s1 + $0xf28] ss:$16 sps:$4 sm:$0xff]   ;;  %v8162_v23 = vld [vmem:[%s11242_s1 + $0xf44] ss:$16 sps:$4 sm:$0xff]  }
 0x1af   :  { %5387 = vmatpush1.bf16.msra.mxu0 %v8074_v19  ;;  %6171 = vmatpush1.bf16.msra.mxu1 %v8077_v25  ;;  %v8165_v19 = vld [vmem:[%s11242_s1 + $0xf4c] ss:$16 sps:$4 sm:$0xff]   ;;  %v8164_v25 = vld [vmem:[%s11242_s1 + $0xf40] ss:$16 sps:$4 sm:$0xff]  }
 0x1b0   :  { %5389 = vmatprep.subr.bf16.mxu0 %v8078_v12  ;;  %6173 = vmatprep.subr.bf16.mxu1 %v8081_v27  ;;  %v8167_v12 = vld [vmem:[%s11242_s1 + $0xf48] ss:$16 sps:$4 sm:$0xff]   ;;  %v8168_v27 = vld [vmem:[%s11242_s1 + $0xf64] ss:$16 sps:$4 sm:$0xff]  }
 0x1b3   :  { %5391 = vmatpush1.bf16.msra.mxu0 %v8080_v28  ;;  %6175 = vmatpush1.bf16.msra.mxu1 %v8083_v30  ;;  %v8171_v28 = vld [vmem:[%s11242_s1 + $0xf6c] ss:$16 sps:$4 sm:$0xff]   ;;  %v8170_v30 = vld [vmem:[%s11242_s1 + $0xf60] ss:$16 sps:$4 sm:$0xff]  }
 0x1b4   :  { %5393 = vmatprep.subr.bf16.mxu0 %v8084_v31  ;;  %6177 = vmatprep.subr.bf16.mxu1 %v8087_v22  ;;  %v8173_v31 = vld [vmem:[%s11242_s1 + $0xf68] ss:$16 sps:$4 sm:$0xff]   ;;  %v8174_v22 = vld [vmem:[%s11242_s1 + $0xf84] ss:$16 sps:$4 sm:$0xff]  }
 0x1b7   :  { %5395 = vmatpush1.bf16.msra.mxu0 %v8086_v32  ;;  %6179 = vmatpush1.bf16.msra.mxu1 %v8089_v33  ;;  %v8177_v32 = vld [vmem:[%s11242_s1 + $0xf8c] ss:$16 sps:$4 sm:$0xff]   ;;  %v8176_v33 = vld [vmem:[%s11242_s1 + $0xf80] ss:$16 sps:$4 sm:$0xff]  }
 0x1b8   :  { %5397 = vmatprep.subr.bf16.mxu0 %v8090_v34  ;;  %6181 = vmatprep.subr.bf16.mxu1 %v8093_v36  ;;  %v8179_v34 = vld [vmem:[%s11242_s1 + $0xf88] ss:$16 sps:$4 sm:$0xff]   ;;  %v8180_v36 = vld [vmem:[%s11242_s1 + $0xfa4] ss:$16 sps:$4 sm:$0xff]  }
 0x1bb   :  { %5399 = vmatpush1.bf16.msra.mxu0 %v8092_v24  ;;  %6183 = vmatpush1.bf16.msra.mxu1 %v8095_v37  ;;  %v8183_v24 = vld [vmem:[%s11242_s1 + $0xfac] ss:$16 sps:$4 sm:$0xff]   ;;  %v8182_v37 = vld [vmem:[%s11242_s1 + $0xfa0] ss:$16 sps:$4 sm:$0xff]  }
 0x1bc   :  { %5401 = vmatprep.subr.bf16.mxu0 %v8096_v38  ;;  %6185 = vmatprep.subr.bf16.mxu1 %v8099_v39  ;;  %v8185_v38 = vld [vmem:[%s11242_s1 + $0xfa8] ss:$16 sps:$4 sm:$0xff]   ;;  %v8186_v39 = vld [vmem:[%s11242_s1 + $0xfc4] ss:$16 sps:$4 sm:$0xff]  }
 0x1bf   :  { %5403 = vmatpush1.bf16.msra.mxu0 %v8098_v41  ;;  %6187 = vmatpush1.bf16.msra.mxu1 %v8101_v29  ;;  %v8189_v41 = vld [vmem:[%s11242_s1 + $0xfcc] ss:$16 sps:$4 sm:$0xff]   ;;  %v8191_v29 = vld [vmem:[%s11242_s1 + $0xfc8] ss:$16 sps:$4 sm:$0xff]  }
 0x1c0   :  { %5405 = vmatprep.subr.bf16.mxu0 %v8102_v44  ;;  %6189 = vmatprep.subr.bf16.mxu1 %v8105_v45  ;;  %v8192_v44 = vld [vmem:[%s11242_s1 + $0xfe4] ss:$16 sps:$4 sm:$0xff]   ;;  %v8195_v45 = vld [vmem:[%s11242_s1 + $0xfec] ss:$16 sps:$4 sm:$0xff]  }
 0x1c2   :  { %3035 = vmatmul.mubr.f32.vlgmr.msra.gmra.mrb[0].mxu0 %v9878_v40  ;;  %3958 = vmatmul.mubr.f32.vlgmr.msra.gmra.mrb[0].mxu1 %v9878_v40  ;;  %v8116_v40 = vld [vmem:[%s11242_s1 + $0xe40] ss:$16 sps:$4 sm:$0xff]  }
 0x1c3   :  { %5407 = vmatpush1.bf16.msra.mxu0 %v8104_v26  ;;  %6191 = vmatpush1.bf16.msra.mxu1 %v8107_v47  ;;  %v10265_v26 = vld [vmem:[%s11243_s0 + $0x20] sm:$0xff] }
 0x1c4   :  { %5409 = vmatprep.subr.bf16.mxu0 %v8108_v48  ;;  %6193 = vmatprep.subr.bf16.mxu1 %v8111_v35  ;;  %v8194_v47 = vld [vmem:[%s11242_s1 + $0xfe0] ss:$16 sps:$4 sm:$0xff]   ;;  %v8197_v48 = vld [vmem:[%s11242_s1 + $0xfe8] ss:$16 sps:$4 sm:$0xff]   ;;  %v8199_v35 = vld [vmem:[%s11242_s1 + $0x1004] ss:$16 sps:$4 sm:$0xff]  }
 0x1c5   :  { %3105 = vmatprep.mubr.f32.mxu0 %v2475_v51  ;;  %4028 = vmatprep.mubr.f32.mxu1 %v2475_v51  ;;  %v10281_v51 = vrot.slane %v10265_v26, %v8787_v49 }
 0x1c7   :  { %5411 = vmatpush1.bf16.msra.mxu0 %v8110_v50  ;;  %6195 = vmatpush1.bf16.msra.mxu1 %v8113_v52  ;;  %v8202_v50 = vld [vmem:[%s11242_s1 + $0x100c] ss:$16 sps:$4 sm:$0xff]   ;;  %v8201_v52 = vld [vmem:[%s11242_s1 + $0x1000] ss:$16 sps:$4 sm:$0xff]  }
 0x1c8   :  { %5413 = vmatprep.subr.bf16.mxu0 %v8114_v53  ;;  %6197 = vmatprep.subr.bf16.mxu1 %v8117_v54  ;;  %v8204_v53 = vld [vmem:[%s11242_s1 + $0x1008] ss:$16 sps:$4 sm:$0xff]   ;;  %v8205_v54 = vld [vmem:[%s11242_s1 + $0x1024] ss:$16 sps:$4 sm:$0xff]  }
 0x1cb   :  { %5415 = vmatpush1.bf16.msra.mxu0 %v8116_v40  ;;  %6199 = vmatpush1.bf16.msra.mxu1 %v8119_v55  ;;  %v8208_v40 = vld [vmem:[%s11242_s1 + $0x102c] ss:$16 sps:$4 sm:$0xff]   ;;  %v2491_v55 = vcombine.high %v10281_v51, %v10281_v51 }
 0x1cc   :  { %5417 = vmatprep.subr.bf16.mxu0 %v8120_v56  ;;  %6201 = vmatprep.subr.bf16.mxu1 %v8123_v57  ;;  %v8207_v56 = vld [vmem:[%s11242_s1 + $0x1020] ss:$16 sps:$4 sm:$0xff]   ;;  %v8210_v57 = vld [vmem:[%s11242_s1 + $0x1028] ss:$16 sps:$4 sm:$0xff]  }
 0x1cf   :  { %5419 = vmatpush1.bf16.msra.mxu0 %v8122_v58  ;;  %6203 = vmatpush1.bf16.msra.mxu1 %v8125_v59  ;;  %v8211_v58 = vld [vmem:[%s11242_s1 + $0x1044] ss:$16 sps:$4 sm:$0xff]   ;;  %v8213_v59 = vld [vmem:[%s11242_s1 + $0x1040] ss:$16 sps:$4 sm:$0xff]  }
 0x1d0   :  { %5421 = vmatprep.subr.bf16.mxu0 %v8126_v60  ;;  %6205 = vmatprep.subr.bf16.mxu1 %v8129_v61  ;;  %v8216_v60 = vld [vmem:[%s11242_s1 + $0x1048] ss:$16 sps:$4 sm:$0xff]   ;;  %v8217_v61 = vld [vmem:[%s11242_s1 + $0x1064] ss:$16 sps:$4 sm:$0xff]  }
 0x1d3   :  { %5423 = vmatpush1.bf16.msra.mxu0 %v8128_v62  ;;  %6207 = vmatpush1.bf16.msra.mxu1 %v8131_v63  ;;  %v8220_v62 = vld [vmem:[%s11242_s1 + $0x106c] ss:$16 sps:$4 sm:$0xff]   ;;  %v8219_v63 = vld [vmem:[%s11242_s1 + $0x1060] ss:$16 sps:$4 sm:$0xff]  }
 0x1d4   :  { %5425 = vmatprep.subr.bf16.mxu0 %v8132_v0  ;;  %6209 = vmatprep.subr.bf16.mxu1 %v8135_v1  ;;  %v8222_v0 = vld [vmem:[%s11242_s1 + $0x1068] ss:$16 sps:$4 sm:$0xff]   ;;  %v8223_v1 = vld [vmem:[%s11242_s1 + $0x1084] ss:$16 sps:$4 sm:$0xff]  }
 0x1d7   :  { %5427 = vmatpush1.bf16.msra.mxu0 %v8134_v2  ;;  %6211 = vmatpush1.bf16.msra.mxu1 %v8137_v3  ;;  %v8226_v2 = vld [vmem:[%s11242_s1 + $0x108c] ss:$16 sps:$4 sm:$0xff]   ;;  %v8225_v3 = vld [vmem:[%s11242_s1 + $0x1080] ss:$16 sps:$4 sm:$0xff]  }
 0x1d8   :  { %5429 = vmatprep.subr.bf16.mxu0 %v8138_v4  ;;  %6213 = vmatprep.subr.bf16.mxu1 %v8141_v5  ;;  %v8228_v4 = vld [vmem:[%s11242_s1 + $0x1088] ss:$16 sps:$4 sm:$0xff]   ;;  %v8229_v5 = vld [vmem:[%s11242_s1 + $0x10a4] ss:$16 sps:$4 sm:$0xff]  }
 0x1db   :  { %5431 = vmatpush1.bf16.msra.mxu0 %v8140_v6  ;;  %6215 = vmatpush1.bf16.msra.mxu1 %v8143_v7  ;;  %v8232_v6 = vld [vmem:[%s11242_s1 + $0x10ac] ss:$16 sps:$4 sm:$0xff]   ;;  %v8231_v7 = vld [vmem:[%s11242_s1 + $0x10a0] ss:$16 sps:$4 sm:$0xff]  }
 0x1dc   :  { %5433 = vmatprep.subr.bf16.mxu0 %v8144_v8  ;;  %6217 = vmatprep.subr.bf16.mxu1 %v8147_v9  ;;  %v8234_v8 = vld [vmem:[%s11242_s1 + $0x10a8] ss:$16 sps:$4 sm:$0xff]   ;;  %v8235_v9 = vld [vmem:[%s11242_s1 + $0x10c4] ss:$16 sps:$4 sm:$0xff]  }
 0x1df   :  { %5435 = vmatpush1.bf16.msra.mxu0 %v8146_v10  ;;  %6219 = vmatpush1.bf16.msra.mxu1 %v8149_v11  ;;  %v8238_v10 = vld [vmem:[%s11242_s1 + $0x10cc] ss:$16 sps:$4 sm:$0xff]   ;;  %v8237_v11 = vld [vmem:[%s11242_s1 + $0x10c0] ss:$16 sps:$4 sm:$0xff]  }
 0x1e0   :  { %5437 = vmatprep.subr.bf16.mxu0 %v8150_v13  ;;  %6221 = vmatprep.subr.bf16.mxu1 %v8153_v14  ;;  %v8240_v13 = vld [vmem:[%s11242_s1 + $0x10c8] ss:$16 sps:$4 sm:$0xff]   ;;  %v8241_v14 = vld [vmem:[%s11242_s1 + $0x10e4] ss:$16 sps:$4 sm:$0xff]  }
 0x1e3   :  { %5439 = vmatpush1.bf16.msra.mxu0 %v8152_v15  ;;  %6223 = vmatpush1.bf16.msra.mxu1 %v8155_v16  ;;  %v8244_v15 = vld [vmem:[%s11242_s1 + $0x10ec] ss:$16 sps:$4 sm:$0xff]   ;;  %v8243_v16 = vld [vmem:[%s11242_s1 + $0x10e0] ss:$16 sps:$4 sm:$0xff]  }
 0x1e4   :  { %5441 = vmatprep.subr.bf16.mxu0 %v8156_v17  ;;  %6225 = vmatprep.subr.bf16.mxu1 %v8159_v18  ;;  %v8246_v17 = vld [vmem:[%s11242_s1 + $0x10e8] ss:$16 sps:$4 sm:$0xff]   ;;  %v8247_v18 = vld [vmem:[%s11242_s1 + $0x1104] ss:$16 sps:$4 sm:$0xff]  }
 0x1e7   :  { %5443 = vmatpush1.bf16.msra.mxu0 %v8158_v20  ;;  %6227 = vmatpush1.bf16.msra.mxu1 %v8161_v21  ;;  %v8250_v20 = vld [vmem:[%s11242_s1 + $0x110c] ss:$16 sps:$4 sm:$0xff]   ;;  %v8249_v21 = vld [vmem:[%s11242_s1 + $0x1100] ss:$16 sps:$4 sm:$0xff]  }
 0x1e8   :  { %5445 = vmatprep.subr.bf16.mxu0 %v8162_v23  ;;  %6229 = vmatprep.subr.bf16.mxu1 %v8165_v19  ;;  %v8252_v23 = vld [vmem:[%s11242_s1 + $0x1108] ss:$16 sps:$4 sm:$0xff]   ;;  %v8253_v19 = vld [vmem:[%s11242_s1 + $0x1124] ss:$16 sps:$4 sm:$0xff]  }
 0x1eb   :  { %5447 = vmatpush1.bf16.msra.mxu0 %v8164_v25  ;;  %6231 = vmatpush1.bf16.msra.mxu1 %v8167_v12  ;;  %v8256_v25 = vld [vmem:[%s11242_s1 + $0x112c] ss:$16 sps:$4 sm:$0xff]   ;;  %v8255_v12 = vld [vmem:[%s11242_s1 + $0x1120] ss:$16 sps:$4 sm:$0xff]  }
 0x1ec   :  { %5449 = vmatprep.subr.bf16.mxu0 %v8168_v27  ;;  %6233 = vmatprep.subr.bf16.mxu1 %v8171_v28  ;;  %v8258_v27 = vld [vmem:[%s11242_s1 + $0x1128] ss:$16 sps:$4 sm:$0xff]   ;;  %v8259_v28 = vld [vmem:[%s11242_s1 + $0x1144] ss:$16 sps:$4 sm:$0xff]  }
 0x1ef   :  { %5451 = vmatpush1.bf16.msra.mxu0 %v8170_v30  ;;  %6235 = vmatpush1.bf16.msra.mxu1 %v8173_v31  ;;  %v8262_v30 = vld [vmem:[%s11242_s1 + $0x114c] ss:$16 sps:$4 sm:$0xff]   ;;  %v8261_v31 = vld [vmem:[%s11242_s1 + $0x1140] ss:$16 sps:$4 sm:$0xff]  }
 0x1f0   :  { %5453 = vmatprep.subr.bf16.mxu0 %v8174_v22  ;;  %6237 = vmatprep.subr.bf16.mxu1 %v8177_v32  ;;  %v8264_v22 = vld [vmem:[%s11242_s1 + $0x1148] ss:$16 sps:$4 sm:$0xff]   ;;  %v8265_v32 = vld [vmem:[%s11242_s1 + $0x1164] ss:$16 sps:$4 sm:$0xff]  }
 0x1f3   :  { %5455 = vmatpush1.bf16.msra.mxu0 %v8176_v33  ;;  %6239 = vmatpush1.bf16.msra.mxu1 %v8179_v34  ;;  %v8268_v33 = vld [vmem:[%s11242_s1 + $0x116c] ss:$16 sps:$4 sm:$0xff]   ;;  %v8267_v34 = vld [vmem:[%s11242_s1 + $0x1160] ss:$16 sps:$4 sm:$0xff]  }
 0x1f4   :  { %5457 = vmatprep.subr.bf16.mxu0 %v8180_v36  ;;  %6241 = vmatprep.subr.bf16.mxu1 %v8183_v24  ;;  %v8270_v36 = vld [vmem:[%s11242_s1 + $0x1168] ss:$16 sps:$4 sm:$0xff]   ;;  %v8271_v24 = vld [vmem:[%s11242_s1 + $0x1184] ss:$16 sps:$4 sm:$0xff]  }
 0x1f7   :  { %5459 = vmatpush1.bf16.msra.mxu0 %v8182_v37  ;;  %6243 = vmatpush1.bf16.msra.mxu1 %v8185_v38  ;;  %v8274_v37 = vld [vmem:[%s11242_s1 + $0x118c] ss:$16 sps:$4 sm:$0xff]   ;;  %v8273_v38 = vld [vmem:[%s11242_s1 + $0x1180] ss:$16 sps:$4 sm:$0xff]  }
 0x1f8   :  { %5461 = vmatprep.subr.bf16.mxu0 %v8186_v39  ;;  %6245 = vmatprep.subr.bf16.mxu1 %v8189_v41  ;;  %v8276_v39 = vld [vmem:[%s11242_s1 + $0x1188] ss:$16 sps:$4 sm:$0xff]   ;;  %v8277_v41 = vld [vmem:[%s11242_s1 + $0x11a4] ss:$16 sps:$4 sm:$0xff]  }
 0x1fb   :  { %5463 = vmatpush1.bf16.msra.mxu0 %v8188_v43  ;;  %6247 = vmatpush1.bf16.msra.mxu1 %v8191_v29  ;;  %v8280_v43 = vld [vmem:[%s11242_s1 + $0x11ac] ss:$16 sps:$4 sm:$0xff]   ;;  %v8279_v29 = vld [vmem:[%s11242_s1 + $0x11a0] ss:$16 sps:$4 sm:$0xff]  }
 0x1fc   :  { %5465 = vmatprep.subr.bf16.mxu0 %v8192_v44  ;;  %6249 = vmatprep.subr.bf16.mxu1 %v8195_v45  ;;  %v8282_v44 = vld [vmem:[%s11242_s1 + $0x11a8] ss:$16 sps:$4 sm:$0xff]   ;;  %v8283_v45 = vld [vmem:[%s11242_s1 + $0x11c4] ss:$16 sps:$4 sm:$0xff]  }
 0x1ff   :  { %5467 = vmatpush1.bf16.msra.mxu0 %v8194_v47  ;;  %6251 = vmatpush1.bf16.msra.mxu1 %v8197_v48  ;;  %v8286_v47 = vld [vmem:[%s11242_s1 + $0x11cc] ss:$16 sps:$4 sm:$0xff]   ;;  %v8285_v48 = vld [vmem:[%s11242_s1 + $0x11c0] ss:$16 sps:$4 sm:$0xff]  }
 0x200   :  { %5469 = vmatprep.subr.bf16.mxu0 %v8199_v35  ;;  %6253 = vmatprep.subr.bf16.mxu1 %v8202_v50  ;;  %v8288_v35 = vld [vmem:[%s11242_s1 + $0x11c8] ss:$16 sps:$4 sm:$0xff]   ;;  %v8289_v50 = vld [vmem:[%s11242_s1 + $0x11e4] ss:$16 sps:$4 sm:$0xff]  }
 0x202   :  { %3106 = vmatmul.mubr.f32.vlgmr.msra.gmra.mrb[0].mxu0 %v10079_v46  ;;  %4029 = vmatmul.mubr.f32.vlgmr.msra.gmra.mrb[0].mxu1 %v10079_v46  ;;  %v8214_v46 = vld [vmem:[%s11242_s1 + $0x104c] ss:$16 sps:$4 sm:$0xff]  }
 0x203   :  { %5471 = vmatpush1.bf16.msra.mxu0 %v8201_v52  ;;  %6255 = vmatpush1.bf16.msra.mxu1 %v8204_v53  ;;  %v8292_v52 = vld [vmem:[%s11242_s1 + $0x11ec] ss:$16 sps:$4 sm:$0xff]   ;;  %v2476_v53 = vcombine.high %v10265_v26, %v10265_v26 }
 0x204   :  { %5473 = vmatprep.subr.bf16.mxu0 %v8205_v54  ;;  %6257 = vmatprep.subr.bf16.mxu1 %v8208_v40  ;;  %v8291_v54 = vld [vmem:[%s11242_s1 + $0x11e0] ss:$16 sps:$4 sm:$0xff]   ;;  %v8294_v40 = vld [vmem:[%s11242_s1 + $0x11e8] ss:$16 sps:$4 sm:$0xff]   ;;  %v8298_v26 = vld [vmem:[%s11242_s1 + $0x120c] ss:$16 sps:$4 sm:$0xff]  }
 0x205   :  { %3176 = vmatprep.mubr.f32.mxu0 %v2491_v55  ;;  %4099 = vmatprep.mubr.f32.mxu1 %v2491_v55  ;;  %v8295_v55 = vld [vmem:[%s11242_s1 + $0x1204] ss:$16 sps:$4 sm:$0xff]  }
 0x207   :  { %5475 = vmatpush1.bf16.msra.mxu0 %v8207_v56  ;;  %6259 = vmatpush1.bf16.msra.mxu1 %v8210_v57  ;;  %v10482_v56 = vrot.slane %v2476_v53, %v8787_v49  ;;  %v8297_v57 = vld [vmem:[%s11242_s1 + $0x1200] ss:$16 sps:$4 sm:$0xff]   ;;  %v8382_v53 = vld [vmem:[%s11242_s1 + $0x13cc] ss:$16 sps:$4 sm:$0xff]  }
 0x208   :  { %5477 = vmatprep.subr.bf16.mxu0 %v8211_v58  ;;  %6261 = vmatprep.subr.bf16.mxu1 %v8214_v46  ;;  %v8300_v58 = vld [vmem:[%s11242_s1 + $0x1208] ss:$16 sps:$4 sm:$0xff]   ;;  %v8301_v46 = vld [vmem:[%s11242_s1 + $0x1224] ss:$16 sps:$4 sm:$0xff]  }
 0x20b   :  { %5479 = vmatpush1.bf16.msra.mxu0 %v8213_v59  ;;  %6263 = vmatpush1.bf16.msra.mxu1 %v8216_v60  ;;  %v8304_v59 = vld [vmem:[%s11242_s1 + $0x122c] ss:$16 sps:$4 sm:$0xff]   ;;  %v2492_v60 = vcombine.high %v10482_v56, %v10482_v56 }
 0x20c   :  { %5481 = vmatprep.subr.bf16.mxu0 %v8217_v61  ;;  %6265 = vmatprep.subr.bf16.mxu1 %v8220_v62  ;;  %v8303_v61 = vld [vmem:[%s11242_s1 + $0x1220] ss:$16 sps:$4 sm:$0xff]   ;;  %v8306_v62 = vld [vmem:[%s11242_s1 + $0x1228] ss:$16 sps:$4 sm:$0xff]  }
 0x20f   :  { %5483 = vmatpush1.bf16.msra.mxu0 %v8219_v63  ;;  %6267 = vmatpush1.bf16.msra.mxu1 %v8222_v0  ;;  %v8307_v63 = vld [vmem:[%s11242_s1 + $0x1244] ss:$16 sps:$4 sm:$0xff]   ;;  %v8309_v0 = vld [vmem:[%s11242_s1 + $0x1240] ss:$16 sps:$4 sm:$0xff]  }
 0x210   :  { %5485 = vmatprep.subr.bf16.mxu0 %v8223_v1  ;;  %6269 = vmatprep.subr.bf16.mxu1 %v8226_v2  ;;  %v8312_v1 = vld [vmem:[%s11242_s1 + $0x1248] ss:$16 sps:$4 sm:$0xff]   ;;  %v8313_v2 = vld [vmem:[%s11242_s1 + $0x1264] ss:$16 sps:$4 sm:$0xff]  }
 0x213   :  { %5487 = vmatpush1.bf16.msra.mxu0 %v8225_v3  ;;  %6271 = vmatpush1.bf16.msra.mxu1 %v8228_v4  ;;  %v8316_v3 = vld [vmem:[%s11242_s1 + $0x126c] ss:$16 sps:$4 sm:$0xff]   ;;  %v8315_v4 = vld [vmem:[%s11242_s1 + $0x1260] ss:$16 sps:$4 sm:$0xff]  }
 0x214   :  { %5489 = vmatprep.subr.bf16.mxu0 %v8229_v5  ;;  %6273 = vmatprep.subr.bf16.mxu1 %v8232_v6  ;;  %v8318_v5 = vld [vmem:[%s11242_s1 + $0x1268] ss:$16 sps:$4 sm:$0xff]   ;;  %v8319_v6 = vld [vmem:[%s11242_s1 + $0x1284] ss:$16 sps:$4 sm:$0xff]  }
 0x217   :  { %5491 = vmatpush1.bf16.msra.mxu0 %v8231_v7  ;;  %6275 = vmatpush1.bf16.msra.mxu1 %v8234_v8  ;;  %v8322_v7 = vld [vmem:[%s11242_s1 + $0x128c] ss:$16 sps:$4 sm:$0xff]   ;;  %v8321_v8 = vld [vmem:[%s11242_s1 + $0x1280] ss:$16 sps:$4 sm:$0xff]  }
 0x218   :  { %5493 = vmatprep.subr.bf16.mxu0 %v8235_v9  ;;  %6277 = vmatprep.subr.bf16.mxu1 %v8238_v10  ;;  %v8324_v9 = vld [vmem:[%s11242_s1 + $0x1288] ss:$16 sps:$4 sm:$0xff]   ;;  %v8325_v10 = vld [vmem:[%s11242_s1 + $0x12a4] ss:$16 sps:$4 sm:$0xff]  }
 0x21b   :  { %5495 = vmatpush1.bf16.msra.mxu0 %v8237_v11  ;;  %6279 = vmatpush1.bf16.msra.mxu1 %v8240_v13  ;;  %v8328_v11 = vld [vmem:[%s11242_s1 + $0x12ac] ss:$16 sps:$4 sm:$0xff]   ;;  %v8327_v13 = vld [vmem:[%s11242_s1 + $0x12a0] ss:$16 sps:$4 sm:$0xff]  }
 0x21c   :  { %5497 = vmatprep.subr.bf16.mxu0 %v8241_v14  ;;  %6281 = vmatprep.subr.bf16.mxu1 %v8244_v15  ;;  %v8330_v14 = vld [vmem:[%s11242_s1 + $0x12a8] ss:$16 sps:$4 sm:$0xff]   ;;  %v8331_v15 = vld [vmem:[%s11242_s1 + $0x12c4] ss:$16 sps:$4 sm:$0xff]  }
 0x21f   :  { %5499 = vmatpush1.bf16.msra.mxu0 %v8243_v16  ;;  %6283 = vmatpush1.bf16.msra.mxu1 %v8246_v17  ;;  %v8334_v16 = vld [vmem:[%s11242_s1 + $0x12cc] ss:$16 sps:$4 sm:$0xff]   ;;  %v8333_v17 = vld [vmem:[%s11242_s1 + $0x12c0] ss:$16 sps:$4 sm:$0xff]  }
 0x220   :  { %5501 = vmatprep.subr.bf16.mxu0 %v8247_v18  ;;  %6285 = vmatprep.subr.bf16.mxu1 %v8250_v20  ;;  %v8336_v18 = vld [vmem:[%s11242_s1 + $0x12c8] ss:$16 sps:$4 sm:$0xff]   ;;  %v8337_v20 = vld [vmem:[%s11242_s1 + $0x12e4] ss:$16 sps:$4 sm:$0xff]  }
 0x223   :  { %5503 = vmatpush1.bf16.msra.mxu0 %v8249_v21  ;;  %6287 = vmatpush1.bf16.msra.mxu1 %v8252_v23  ;;  %v8340_v21 = vld [vmem:[%s11242_s1 + $0x12ec] ss:$16 sps:$4 sm:$0xff]   ;;  %v8339_v23 = vld [vmem:[%s11242_s1 + $0x12e0] ss:$16 sps:$4 sm:$0xff]  }
 0x224   :  { %5505 = vmatprep.subr.bf16.mxu0 %v8253_v19  ;;  %6289 = vmatprep.subr.bf16.mxu1 %v8256_v25  ;;  %v8342_v19 = vld [vmem:[%s11242_s1 + $0x12e8] ss:$16 sps:$4 sm:$0xff]   ;;  %v8343_v25 = vld [vmem:[%s11242_s1 + $0x1304] ss:$16 sps:$4 sm:$0xff]  }
 0x227   :  { %5507 = vmatpush1.bf16.msra.mxu0 %v8255_v12  ;;  %6291 = vmatpush1.bf16.msra.mxu1 %v8258_v27  ;;  %v8346_v12 = vld [vmem:[%s11242_s1 + $0x130c] ss:$16 sps:$4 sm:$0xff]   ;;  %v8345_v27 = vld [vmem:[%s11242_s1 + $0x1300] ss:$16 sps:$4 sm:$0xff]  }
 0x228   :  { %5509 = vmatprep.subr.bf16.mxu0 %v8259_v28  ;;  %6293 = vmatprep.subr.bf16.mxu1 %v8262_v30  ;;  %v8348_v28 = vld [vmem:[%s11242_s1 + $0x1308] ss:$16 sps:$4 sm:$0xff]   ;;  %v8349_v30 = vld [vmem:[%s11242_s1 + $0x1324] ss:$16 sps:$4 sm:$0xff]  }
 0x22b   :  { %5511 = vmatpush1.bf16.msra.mxu0 %v8261_v31  ;;  %6295 = vmatpush1.bf16.msra.mxu1 %v8264_v22  ;;  %v8352_v31 = vld [vmem:[%s11242_s1 + $0x132c] ss:$16 sps:$4 sm:$0xff]   ;;  %v8351_v22 = vld [vmem:[%s11242_s1 + $0x1320] ss:$16 sps:$4 sm:$0xff]  }
 0x22c   :  { %5513 = vmatprep.subr.bf16.mxu0 %v8265_v32  ;;  %6297 = vmatprep.subr.bf16.mxu1 %v8268_v33  ;;  %v8354_v32 = vld [vmem:[%s11242_s1 + $0x1328] ss:$16 sps:$4 sm:$0xff]   ;;  %v8355_v33 = vld [vmem:[%s11242_s1 + $0x1344] ss:$16 sps:$4 sm:$0xff]  }
 0x22f   :  { %5515 = vmatpush1.bf16.msra.mxu0 %v8267_v34  ;;  %6299 = vmatpush1.bf16.msra.mxu1 %v8270_v36  ;;  %v8358_v34 = vld [vmem:[%s11242_s1 + $0x134c] ss:$16 sps:$4 sm:$0xff]   ;;  %v8357_v36 = vld [vmem:[%s11242_s1 + $0x1340] ss:$16 sps:$4 sm:$0xff]  }
 0x230   :  { %5517 = vmatprep.subr.bf16.mxu0 %v8271_v24  ;;  %6301 = vmatprep.subr.bf16.mxu1 %v8274_v37  ;;  %v8360_v24 = vld [vmem:[%s11242_s1 + $0x1348] ss:$16 sps:$4 sm:$0xff]   ;;  %v8361_v37 = vld [vmem:[%s11242_s1 + $0x1364] ss:$16 sps:$4 sm:$0xff]  }
 0x233   :  { %5519 = vmatpush1.bf16.msra.mxu0 %v8273_v38  ;;  %6303 = vmatpush1.bf16.msra.mxu1 %v8276_v39  ;;  %v8364_v38 = vld [vmem:[%s11242_s1 + $0x136c] ss:$16 sps:$4 sm:$0xff]   ;;  %v8363_v39 = vld [vmem:[%s11242_s1 + $0x1360] ss:$16 sps:$4 sm:$0xff]  }
 0x234   :  { %5521 = vmatprep.subr.bf16.mxu0 %v8277_v41  ;;  %6305 = vmatprep.subr.bf16.mxu1 %v8280_v43  ;;  %v8366_v41 = vld [vmem:[%s11242_s1 + $0x1368] ss:$16 sps:$4 sm:$0xff]   ;;  %v8367_v43 = vld [vmem:[%s11242_s1 + $0x1384] ss:$16 sps:$4 sm:$0xff]  }
 0x237   :  { %5523 = vmatpush1.bf16.msra.mxu0 %v8279_v29  ;;  %6307 = vmatpush1.bf16.msra.mxu1 %v8282_v44  ;;  %v8370_v29 = vld [vmem:[%s11242_s1 + $0x138c] ss:$16 sps:$4 sm:$0xff]   ;;  %v8369_v44 = vld [vmem:[%s11242_s1 + $0x1380] ss:$16 sps:$4 sm:$0xff]  }
 0x238   :  { %5525 = vmatprep.subr.bf16.mxu0 %v8283_v45  ;;  %6309 = vmatprep.subr.bf16.mxu1 %v8286_v47  ;;  %v8372_v45 = vld [vmem:[%s11242_s1 + $0x1388] ss:$16 sps:$4 sm:$0xff]   ;;  %v8373_v47 = vld [vmem:[%s11242_s1 + $0x13a4] ss:$16 sps:$4 sm:$0xff]  }
 0x23b   :  { %5527 = vmatpush1.bf16.msra.mxu0 %v8285_v48  ;;  %6311 = vmatpush1.bf16.msra.mxu1 %v8288_v35  ;;  %v8376_v48 = vld [vmem:[%s11242_s1 + $0x13ac] ss:$16 sps:$4 sm:$0xff]   ;;  %v8375_v35 = vld [vmem:[%s11242_s1 + $0x13a0] ss:$16 sps:$4 sm:$0xff]  }
 0x23c   :  { %5529 = vmatprep.subr.bf16.mxu0 %v8289_v50  ;;  %6313 = vmatprep.subr.bf16.mxu1 %v8292_v52  ;;  %v8378_v50 = vld [vmem:[%s11242_s1 + $0x13a8] ss:$16 sps:$4 sm:$0xff]   ;;  %v8379_v52 = vld [vmem:[%s11242_s1 + $0x13c4] ss:$16 sps:$4 sm:$0xff]  }
 0x23f   :  { %5531 = vmatpush1.bf16.msra.mxu0 %v8291_v54  ;;  %6315 = vmatpush1.bf16.msra.mxu1 %v8294_v40  ;;  %v8381_v54 = vld [vmem:[%s11242_s1 + $0x13c0] ss:$16 sps:$4 sm:$0xff]   ;;  %v8384_v40 = vld [vmem:[%s11242_s1 + $0x13c8] ss:$16 sps:$4 sm:$0xff]  }
 0x240   :  { %5533 = vmatprep.subr.bf16.mxu0 %v8295_v55  ;;  %6317 = vmatprep.subr.bf16.mxu1 %v8298_v26  ;;  %v8385_v55 = vld [vmem:[%s11242_s1 + $0x13e4] ss:$16 sps:$4 sm:$0xff]   ;;  %v8388_v26 = vld [vmem:[%s11242_s1 + $0x13ec] ss:$16 sps:$4 sm:$0xff]  }
 0x242   :  { %3177 = vmatmul.mubr.f32.vlgmr.msra.gmra.mrb[0].mxu0 %v10281_v51  ;;  %4100 = vmatmul.mubr.f32.vlgmr.msra.gmra.mrb[0].mxu1 %v10281_v51  ;;  %v8310_v51 = vld [vmem:[%s11242_s1 + $0x124c] ss:$16 sps:$4 sm:$0xff]  }
 0x243   :  { %5535 = vmatpush1.bf16.msra.mxu0 %v8297_v57  ;;  %6319 = vmatpush1.bf16.msra.mxu1 %v8300_v58  ;;  %v10671_v57 = vld [vmem:[%s11243_s0 + $0x28] sm:$0xff]  ;;  %v8387_v58 = vld [vmem:[%s11242_s1 + $0x13e0] ss:$16 sps:$4 sm:$0xff]  }
 0x244   :  { %5537 = vmatprep.subr.bf16.mxu0 %v8301_v46  ;;  %6321 = vmatprep.subr.bf16.mxu1 %v8304_v59  ;;  %v8390_v46 = vld [vmem:[%s11242_s1 + $0x13e8] ss:$16 sps:$4 sm:$0xff]   ;;  %v8392_v59 = vld [vmem:[%s11242_s1 + $0x1404] ss:$16 sps:$4 sm:$0xff]  }
 0x245   :  { %3247 = vmatprep.mubr.f32.mxu0 %v2492_v60  ;;  %4170 = vmatprep.mubr.f32.mxu1 %v2492_v60  ;;  %v8395_v60 = vld [vmem:[%s11242_s1 + $0x140c] ss:$16 sps:$4 sm:$0xff]  }
 0x247   :  { %5539 = vmatpush1.bf16.msra.mxu0 %v8303_v61  ;;  %6323 = vmatpush1.bf16.msra.mxu1 %v8306_v62  ;;  %v10687_v61 = vrot.slane %v10671_v57, %v8787_v49  ;;  %v8394_v62 = vld [vmem:[%s11242_s1 + $0x1400] ss:$16 sps:$4 sm:$0xff]  }
 0x248   :  { %5541 = vmatprep.subr.bf16.mxu0 %v8307_v63  ;;  %6325 = vmatprep.subr.bf16.mxu1 %v8310_v51  ;;  %v8397_v63 = vld [vmem:[%s11242_s1 + $0x1408] ss:$16 sps:$4 sm:$0xff]   ;;  %v8398_v51 = vld [vmem:[%s11242_s1 + $0x1424] ss:$16 sps:$4 sm:$0xff]  }
 0x24b   :  { %5543 = vmatpush1.bf16.msra.mxu0 %v8309_v0  ;;  %6327 = vmatpush1.bf16.msra.mxu1 %v8312_v1  ;;  %v8401_v0 = vld [vmem:[%s11242_s1 + $0x142c] ss:$16 sps:$4 sm:$0xff]   ;;  %v2508_v1 = vcombine.high %v10687_v61, %v10687_v61 }
 0x24c   :  { %5545 = vmatprep.subr.bf16.mxu0 %v8313_v2  ;;  %6329 = vmatprep.subr.bf16.mxu1 %v8316_v3  ;;  %v8400_v2 = vld [vmem:[%s11242_s1 + $0x1420] ss:$16 sps:$4 sm:$0xff]   ;;  %v8403_v3 = vld [vmem:[%s11242_s1 + $0x1428] ss:$16 sps:$4 sm:$0xff]  }
 0x24f   :  { %5547 = vmatpush1.bf16.msra.mxu0 %v8315_v4  ;;  %6331 = vmatpush1.bf16.msra.mxu1 %v8318_v5  ;;  %v8404_v4 = vld [vmem:[%s11242_s1 + $0x1444] ss:$16 sps:$4 sm:$0xff]   ;;  %v8406_v5 = vld [vmem:[%s11242_s1 + $0x1440] ss:$16 sps:$4 sm:$0xff]  }
 0x250   :  { %5549 = vmatprep.subr.bf16.mxu0 %v8319_v6  ;;  %6333 = vmatprep.subr.bf16.mxu1 %v8322_v7  ;;  %v8409_v6 = vld [vmem:[%s11242_s1 + $0x1448] ss:$16 sps:$4 sm:$0xff]   ;;  %v8410_v7 = vld [vmem:[%s11242_s1 + $0x1464] ss:$16 sps:$4 sm:$0xff]  }
 0x253   :  { %5551 = vmatpush1.bf16.msra.mxu0 %v8321_v8  ;;  %6335 = vmatpush1.bf16.msra.mxu1 %v8324_v9  ;;  %v8413_v8 = vld [vmem:[%s11242_s1 + $0x146c] ss:$16 sps:$4 sm:$0xff]   ;;  %v8412_v9 = vld [vmem:[%s11242_s1 + $0x1460] ss:$16 sps:$4 sm:$0xff]  }
 0x254   :  { %5553 = vmatprep.subr.bf16.mxu0 %v8325_v10  ;;  %6337 = vmatprep.subr.bf16.mxu1 %v8328_v11  ;;  %v8415_v10 = vld [vmem:[%s11242_s1 + $0x1468] ss:$16 sps:$4 sm:$0xff]   ;;  %v8416_v11 = vld [vmem:[%s11242_s1 + $0x1484] ss:$16 sps:$4 sm:$0xff]  }
 0x257   :  { %5555 = vmatpush1.bf16.msra.mxu0 %v8327_v13  ;;  %6339 = vmatpush1.bf16.msra.mxu1 %v8330_v14  ;;  %v8419_v13 = vld [vmem:[%s11242_s1 + $0x148c] ss:$16 sps:$4 sm:$0xff]   ;;  %v8418_v14 = vld [vmem:[%s11242_s1 + $0x1480] ss:$16 sps:$4 sm:$0xff]  }
 0x258   :  { %5557 = vmatprep.subr.bf16.mxu0 %v8331_v15  ;;  %6341 = vmatprep.subr.bf16.mxu1 %v8334_v16  ;;  %v8421_v15 = vld [vmem:[%s11242_s1 + $0x1488] ss:$16 sps:$4 sm:$0xff]   ;;  %v8422_v16 = vld [vmem:[%s11242_s1 + $0x14a4] ss:$16 sps:$4 sm:$0xff]  }
 0x25b   :  { %5559 = vmatpush1.bf16.msra.mxu0 %v8333_v17  ;;  %6343 = vmatpush1.bf16.msra.mxu1 %v8336_v18  ;;  %v8425_v17 = vld [vmem:[%s11242_s1 + $0x14ac] ss:$16 sps:$4 sm:$0xff]   ;;  %v8424_v18 = vld [vmem:[%s11242_s1 + $0x14a0] ss:$16 sps:$4 sm:$0xff]  }
 0x25c   :  { %5561 = vmatprep.subr.bf16.mxu0 %v8337_v20  ;;  %6345 = vmatprep.subr.bf16.mxu1 %v8340_v21  ;;  %v8427_v20 = vld [vmem:[%s11242_s1 + $0x14a8] ss:$16 sps:$4 sm:$0xff]   ;;  %v8428_v21 = vld [vmem:[%s11242_s1 + $0x14c4] ss:$16 sps:$4 sm:$0xff]  }
 0x25f   :  { %5563 = vmatpush1.bf16.msra.mxu0 %v8339_v23  ;;  %6347 = vmatpush1.bf16.msra.mxu1 %v8342_v19  ;;  %v8431_v23 = vld [vmem:[%s11242_s1 + $0x14cc] ss:$16 sps:$4 sm:$0xff]   ;;  %v8430_v19 = vld [vmem:[%s11242_s1 + $0x14c0] ss:$16 sps:$4 sm:$0xff]  }
 0x260   :  { %5565 = vmatprep.subr.bf16.mxu0 %v8343_v25  ;;  %6349 = vmatprep.subr.bf16.mxu1 %v8346_v12  ;;  %v8433_v25 = vld [vmem:[%s11242_s1 + $0x14c8] ss:$16 sps:$4 sm:$0xff]   ;;  %v8434_v12 = vld [vmem:[%s11242_s1 + $0x14e4] ss:$16 sps:$4 sm:$0xff]  }
 0x263   :  { %5567 = vmatpush1.bf16.msra.mxu0 %v8345_v27  ;;  %6351 = vmatpush1.bf16.msra.mxu1 %v8348_v28  ;;  %v8437_v27 = vld [vmem:[%s11242_s1 + $0x14ec] ss:$16 sps:$4 sm:$0xff]   ;;  %v8436_v28 = vld [vmem:[%s11242_s1 + $0x14e0] ss:$16 sps:$4 sm:$0xff]  }
 0x264   :  { %5569 = vmatprep.subr.bf16.mxu0 %v8349_v30  ;;  %6353 = vmatprep.subr.bf16.mxu1 %v8352_v31  ;;  %v8439_v30 = vld [vmem:[%s11242_s1 + $0x14e8] ss:$16 sps:$4 sm:$0xff]   ;;  %v8440_v31 = vld [vmem:[%s11242_s1 + $0x1504] ss:$16 sps:$4 sm:$0xff]  }
 0x267   :  { %5571 = vmatpush1.bf16.msra.mxu0 %v8351_v22  ;;  %6355 = vmatpush1.bf16.msra.mxu1 %v8354_v32  ;;  %v8443_v22 = vld [vmem:[%s11242_s1 + $0x150c] ss:$16 sps:$4 sm:$0xff]   ;;  %v8442_v32 = vld [vmem:[%s11242_s1 + $0x1500] ss:$16 sps:$4 sm:$0xff]  }
 0x268   :  { %5573 = vmatprep.subr.bf16.mxu0 %v8355_v33  ;;  %6357 = vmatprep.subr.bf16.mxu1 %v8358_v34  ;;  %v8445_v33 = vld [vmem:[%s11242_s1 + $0x1508] ss:$16 sps:$4 sm:$0xff]   ;;  %v8446_v34 = vld [vmem:[%s11242_s1 + $0x1524] ss:$16 sps:$4 sm:$0xff]  }
 0x26b   :  { %5575 = vmatpush1.bf16.msra.mxu0 %v8357_v36  ;;  %6359 = vmatpush1.bf16.msra.mxu1 %v8360_v24  ;;  %v8449_v36 = vld [vmem:[%s11242_s1 + $0x152c] ss:$16 sps:$4 sm:$0xff]   ;;  %v8448_v24 = vld [vmem:[%s11242_s1 + $0x1520] ss:$16 sps:$4 sm:$0xff]  }
 0x26c   :  { %5577 = vmatprep.subr.bf16.mxu0 %v8361_v37  ;;  %6361 = vmatprep.subr.bf16.mxu1 %v8364_v38  ;;  %v8451_v37 = vld [vmem:[%s11242_s1 + $0x1528] ss:$16 sps:$4 sm:$0xff]   ;;  %v8452_v38 = vld [vmem:[%s11242_s1 + $0x1544] ss:$16 sps:$4 sm:$0xff]  }
 0x26f   :  { %5579 = vmatpush1.bf16.msra.mxu0 %v8363_v39  ;;  %6363 = vmatpush1.bf16.msra.mxu1 %v8366_v41  ;;  %v8455_v39 = vld [vmem:[%s11242_s1 + $0x154c] ss:$16 sps:$4 sm:$0xff]   ;;  %v8454_v41 = vld [vmem:[%s11242_s1 + $0x1540] ss:$16 sps:$4 sm:$0xff]  }
 0x270   :  { %5581 = vmatprep.subr.bf16.mxu0 %v8367_v43  ;;  %6365 = vmatprep.subr.bf16.mxu1 %v8370_v29  ;;  %v8457_v43 = vld [vmem:[%s11242_s1 + $0x1548] ss:$16 sps:$4 sm:$0xff]   ;;  %v8458_v29 = vld [vmem:[%s11242_s1 + $0x1564] ss:$16 sps:$4 sm:$0xff]  }
 0x273   :  { %5583 = vmatpush1.bf16.msra.mxu0 %v8369_v44  ;;  %6367 = vmatpush1.bf16.msra.mxu1 %v8372_v45  ;;  %v8461_v44 = vld [vmem:[%s11242_s1 + $0x156c] ss:$16 sps:$4 sm:$0xff]   ;;  %v8460_v45 = vld [vmem:[%s11242_s1 + $0x1560] ss:$16 sps:$4 sm:$0xff]  }
 0x274   :  { %5585 = vmatprep.subr.bf16.mxu0 %v8373_v47  ;;  %6369 = vmatprep.subr.bf16.mxu1 %v8376_v48  ;;  %v8463_v47 = vld [vmem:[%s11242_s1 + $0x1568] ss:$16 sps:$4 sm:$0xff]   ;;  %v8464_v48 = vld [vmem:[%s11242_s1 + $0x1584] ss:$16 sps:$4 sm:$0xff]  }
 0x277   :  { %5587 = vmatpush1.bf16.msra.mxu0 %v8375_v35  ;;  %6371 = vmatpush1.bf16.msra.mxu1 %v8378_v50  ;;  %v8467_v35 = vld [vmem:[%s11242_s1 + $0x158c] ss:$16 sps:$4 sm:$0xff]   ;;  %v8466_v50 = vld [vmem:[%s11242_s1 + $0x1580] ss:$16 sps:$4 sm:$0xff]  }
 0x278   :  { %5589 = vmatprep.subr.bf16.mxu0 %v8379_v52  ;;  %6373 = vmatprep.subr.bf16.mxu1 %v8382_v53  ;;  %v8469_v52 = vld [vmem:[%s11242_s1 + $0x1588] ss:$16 sps:$4 sm:$0xff]   ;;  %v8470_v53 = vld [vmem:[%s11242_s1 + $0x15a4] ss:$16 sps:$4 sm:$0xff]  }
 0x27b   :  { %5591 = vmatpush1.bf16.msra.mxu0 %v8381_v54  ;;  %6375 = vmatpush1.bf16.msra.mxu1 %v8384_v40  ;;  %v8473_v54 = vld [vmem:[%s11242_s1 + $0x15ac] ss:$16 sps:$4 sm:$0xff]   ;;  %v8472_v40 = vld [vmem:[%s11242_s1 + $0x15a0] ss:$16 sps:$4 sm:$0xff]  }
 0x27c   :  { %5593 = vmatprep.subr.bf16.mxu0 %v8385_v55  ;;  %6377 = vmatprep.subr.bf16.mxu1 %v8388_v26  ;;  %v8475_v55 = vld [vmem:[%s11242_s1 + $0x15a8] ss:$16 sps:$4 sm:$0xff]   ;;  %v8476_v26 = vld [vmem:[%s11242_s1 + $0x15c4] ss:$16 sps:$4 sm:$0xff]  }
 0x27f   :  { %5595 = vmatpush1.bf16.msra.mxu0 %v8387_v58  ;;  %6379 = vmatpush1.bf16.msra.mxu1 %v8390_v46  ;;  %v8479_v58 = vld [vmem:[%s11242_s1 + $0x15cc] ss:$16 sps:$4 sm:$0xff]   ;;  %v8478_v46 = vld [vmem:[%s11242_s1 + $0x15c0] ss:$16 sps:$4 sm:$0xff]  }
 0x280   :  { %5597 = vmatprep.subr.bf16.mxu0 %v8392_v59  ;;  %6381 = vmatprep.subr.bf16.mxu1 %v8395_v60  ;;  %v8481_v59 = vld [vmem:[%s11242_s1 + $0x15c8] ss:$16 sps:$4 sm:$0xff]   ;;  %v8482_v60 = vld [vmem:[%s11242_s1 + $0x15e4] ss:$16 sps:$4 sm:$0xff]  }
 0x282   :  { %3248 = vmatmul.mubr.f32.vlgmr.msra.gmra.mrb[0].mxu0 %v10482_v56  ;;  %4171 = vmatmul.mubr.f32.vlgmr.msra.gmra.mrb[0].mxu1 %v10482_v56  ;;  %v8407_v56 = vld [vmem:[%s11242_s1 + $0x144c] ss:$16 sps:$4 sm:$0xff]  }
 0x283   :  { %5599 = vmatpush1.bf16.msra.mxu0 %v8394_v62  ;;  %6383 = vmatpush1.bf16.msra.mxu1 %v8397_v63  ;;  %v8485_v62 = vld [vmem:[%s11242_s1 + $0x15ec] ss:$16 sps:$4 sm:$0xff]   ;;  %v2493_v63 = vcombine.high %v10671_v57, %v10671_v57 }
 0x284   :  { %5601 = vmatprep.subr.bf16.mxu0 %v8398_v51  ;;  %6385 = vmatprep.subr.bf16.mxu1 %v8401_v0  ;;  %v8484_v51 = vld [vmem:[%s11242_s1 + $0x15e0] ss:$16 sps:$4 sm:$0xff]   ;;  %v8487_v0 = vld [vmem:[%s11242_s1 + $0x15e8] ss:$16 sps:$4 sm:$0xff]   ;;  %v8491_v57 = vld [vmem:[%s11242_s1 + $0x160c] ss:$16 sps:$4 sm:$0xff]  }
 0x285   :  { %3318 = vmatprep.mubr.f32.mxu0 %v2508_v1  ;;  %4241 = vmatprep.mubr.f32.mxu1 %v2508_v1  ;;  %v8488_v1 = vld [vmem:[%s11242_s1 + $0x1604] ss:$16 sps:$4 sm:$0xff]  }
 0x287   :  { %5603 = vmatpush1.bf16.msra.mxu0 %v8400_v2  ;;  %6387 = vmatpush1.bf16.msra.mxu1 %v8403_v3  ;;  %v10888_v2 = vrot.slane %v2493_v63, %v8787_v49  ;;  %v8490_v3 = vld [vmem:[%s11242_s1 + $0x1600] ss:$16 sps:$4 sm:$0xff]   ;;  %v8497_v49 = vld [vmem:[%s11242_s1 + $0x162c] ss:$16 sps:$4 sm:$0xff]  }
 0x288   :  { %5605 = vmatprep.subr.bf16.mxu0 %v8404_v4  ;;  %6389 = vmatprep.subr.bf16.mxu1 %v8407_v56  ;;  %v8493_v4 = vld [vmem:[%s11242_s1 + $0x1608] ss:$16 sps:$4 sm:$0xff]   ;;  %v8494_v56 = vld [vmem:[%s11242_s1 + $0x1624] ss:$16 sps:$4 sm:$0xff]   ;;  %v8574_v63 = vld [vmem:[%s11242_s1 + $0x17c0] ss:$16 sps:$4 sm:$0xff]  }
 0x28b   :  { %5607 = vmatpush1.bf16.msra.mxu0 %v8406_v5  ;;  %6391 = vmatpush1.bf16.msra.mxu1 %v8409_v6  ;;  %v2509_v5 = vcombine.high %v10888_v2, %v10888_v2  ;;  %v8496_v6 = vld [vmem:[%s11242_s1 + $0x1620] ss:$16 sps:$4 sm:$0xff]  }
 0x28c   :  { %5609 = vmatprep.subr.bf16.mxu0 %v8410_v7  ;;  %6393 = vmatprep.subr.bf16.mxu1 %v8413_v8  ;;  %v8499_v7 = vld [vmem:[%s11242_s1 + $0x1628] ss:$16 sps:$4 sm:$0xff]   ;;  %v8500_v8 = vld [vmem:[%s11242_s1 + $0x1644] ss:$16 sps:$4 sm:$0xff]  }
 0x28f   :  { %5611 = vmatpush1.bf16.msra.mxu0 %v8412_v9  ;;  %6395 = vmatpush1.bf16.msra.mxu1 %v8415_v10  ;;  %v8502_v9 = vld [vmem:[%s11242_s1 + $0x1640] ss:$16 sps:$4 sm:$0xff]   ;;  %v8505_v10 = vld [vmem:[%s11242_s1 + $0x1648] ss:$16 sps:$4 sm:$0xff]  }
 0x290   :  { %5613 = vmatprep.subr.bf16.mxu0 %v8416_v11  ;;  %6397 = vmatprep.subr.bf16.mxu1 %v8419_v13  ;;  %v8506_v11 = vld [vmem:[%s11242_s1 + $0x1664] ss:$16 sps:$4 sm:$0xff]   ;;  %v8509_v13 = vld [vmem:[%s11242_s1 + $0x166c] ss:$16 sps:$4 sm:$0xff]  }
 0x293   :  { %5615 = vmatpush1.bf16.msra.mxu0 %v8418_v14  ;;  %6399 = vmatpush1.bf16.msra.mxu1 %v8421_v15  ;;  %v8508_v14 = vld [vmem:[%s11242_s1 + $0x1660] ss:$16 sps:$4 sm:$0xff]   ;;  %v8511_v15 = vld [vmem:[%s11242_s1 + $0x1668] ss:$16 sps:$4 sm:$0xff]  }
 0x294   :  { %5617 = vmatprep.subr.bf16.mxu0 %v8422_v16  ;;  %6401 = vmatprep.subr.bf16.mxu1 %v8425_v17  ;;  %v8512_v16 = vld [vmem:[%s11242_s1 + $0x1684] ss:$16 sps:$4 sm:$0xff]   ;;  %v8515_v17 = vld [vmem:[%s11242_s1 + $0x168c] ss:$16 sps:$4 sm:$0xff]  }
 0x297   :  { %5619 = vmatpush1.bf16.msra.mxu0 %v8424_v18  ;;  %6403 = vmatpush1.bf16.msra.mxu1 %v8427_v20  ;;  %v8514_v18 = vld [vmem:[%s11242_s1 + $0x1680] ss:$16 sps:$4 sm:$0xff]   ;;  %v8517_v20 = vld [vmem:[%s11242_s1 + $0x1688] ss:$16 sps:$4 sm:$0xff]  }
 0x298   :  { %5621 = vmatprep.subr.bf16.mxu0 %v8428_v21  ;;  %6405 = vmatprep.subr.bf16.mxu1 %v8431_v23  ;;  %v8518_v21 = vld [vmem:[%s11242_s1 + $0x16a4] ss:$16 sps:$4 sm:$0xff]   ;;  %v8521_v23 = vld [vmem:[%s11242_s1 + $0x16ac] ss:$16 sps:$4 sm:$0xff]  }
 0x29b   :  { %5623 = vmatpush1.bf16.msra.mxu0 %v8430_v19  ;;  %6407 = vmatpush1.bf16.msra.mxu1 %v8433_v25  ;;  %v8520_v19 = vld [vmem:[%s11242_s1 + $0x16a0] ss:$16 sps:$4 sm:$0xff]   ;;  %v8523_v25 = vld [vmem:[%s11242_s1 + $0x16a8] ss:$16 sps:$4 sm:$0xff]  }
 0x29c   :  { %5625 = vmatprep.subr.bf16.mxu0 %v8434_v12  ;;  %6409 = vmatprep.subr.bf16.mxu1 %v8437_v27  ;;  %v8524_v12 = vld [vmem:[%s11242_s1 + $0x16c4] ss:$16 sps:$4 sm:$0xff]   ;;  %v8527_v27 = vld [vmem:[%s11242_s1 + $0x16cc] ss:$16 sps:$4 sm:$0xff]  }
 0x29f   :  { %5627 = vmatpush1.bf16.msra.mxu0 %v8436_v28  ;;  %6411 = vmatpush1.bf16.msra.mxu1 %v8439_v30  ;;  %v8526_v28 = vld [vmem:[%s11242_s1 + $0x16c0] ss:$16 sps:$4 sm:$0xff]   ;;  %v8529_v30 = vld [vmem:[%s11242_s1 + $0x16c8] ss:$16 sps:$4 sm:$0xff]  }
 0x2a0   :  { %5629 = vmatprep.subr.bf16.mxu0 %v8440_v31  ;;  %6413 = vmatprep.subr.bf16.mxu1 %v8443_v22  ;;  %v8530_v31 = vld [vmem:[%s11242_s1 + $0x16e4] ss:$16 sps:$4 sm:$0xff]   ;;  %v8533_v22 = vld [vmem:[%s11242_s1 + $0x16ec] ss:$16 sps:$4 sm:$0xff]  }
 0x2a3   :  { %5631 = vmatpush1.bf16.msra.mxu0 %v8442_v32  ;;  %6415 = vmatpush1.bf16.msra.mxu1 %v8445_v33  ;;  %v8532_v32 = vld [vmem:[%s11242_s1 + $0x16e0] ss:$16 sps:$4 sm:$0xff]   ;;  %v8535_v33 = vld [vmem:[%s11242_s1 + $0x16e8] ss:$16 sps:$4 sm:$0xff]  }
 0x2a4   :  { %5633 = vmatprep.subr.bf16.mxu0 %v8446_v34  ;;  %6417 = vmatprep.subr.bf16.mxu1 %v8449_v36  ;;  %v8536_v34 = vld [vmem:[%s11242_s1 + $0x1704] ss:$16 sps:$4 sm:$0xff]   ;;  %v8539_v36 = vld [vmem:[%s11242_s1 + $0x170c] ss:$16 sps:$4 sm:$0xff]  }
 0x2a7   :  { %5635 = vmatpush1.bf16.msra.mxu0 %v8448_v24  ;;  %6419 = vmatpush1.bf16.msra.mxu1 %v8451_v37  ;;  %v8538_v24 = vld [vmem:[%s11242_s1 + $0x1700] ss:$16 sps:$4 sm:$0xff]   ;;  %v8541_v37 = vld [vmem:[%s11242_s1 + $0x1708] ss:$16 sps:$4 sm:$0xff]  }
 0x2a8   :  { %5637 = vmatprep.subr.bf16.mxu0 %v8452_v38  ;;  %6421 = vmatprep.subr.bf16.mxu1 %v8455_v39  ;;  %v8542_v38 = vld [vmem:[%s11242_s1 + $0x1724] ss:$16 sps:$4 sm:$0xff]   ;;  %v8545_v39 = vld [vmem:[%s11242_s1 + $0x172c] ss:$16 sps:$4 sm:$0xff]  }
 0x2ab   :  { %5639 = vmatpush1.bf16.msra.mxu0 %v8454_v41  ;;  %6423 = vmatpush1.bf16.msra.mxu1 %v8457_v43  ;;  %v8544_v41 = vld [vmem:[%s11242_s1 + $0x1720] ss:$16 sps:$4 sm:$0xff]   ;;  %v8547_v43 = vld [vmem:[%s11242_s1 + $0x1728] ss:$16 sps:$4 sm:$0xff]  }
 0x2ac   :  { %5641 = vmatprep.subr.bf16.mxu0 %v8458_v29  ;;  %6425 = vmatprep.subr.bf16.mxu1 %v8461_v44  ;;  %v8548_v29 = vld [vmem:[%s11242_s1 + $0x1744] ss:$16 sps:$4 sm:$0xff]   ;;  %v8551_v44 = vld [vmem:[%s11242_s1 + $0x174c] ss:$16 sps:$4 sm:$0xff]  }
 0x2af   :  { %5643 = vmatpush1.bf16.msra.mxu0 %v8460_v45  ;;  %6427 = vmatpush1.bf16.msra.mxu1 %v8463_v47  ;;  %v8550_v45 = vld [vmem:[%s11242_s1 + $0x1740] ss:$16 sps:$4 sm:$0xff]   ;;  %v8553_v47 = vld [vmem:[%s11242_s1 + $0x1748] ss:$16 sps:$4 sm:$0xff]  }
 0x2b0   :  { %5645 = vmatprep.subr.bf16.mxu0 %v8464_v48  ;;  %6429 = vmatprep.subr.bf16.mxu1 %v8467_v35  ;;  %v8554_v48 = vld [vmem:[%s11242_s1 + $0x1764] ss:$16 sps:$4 sm:$0xff]   ;;  %v8557_v35 = vld [vmem:[%s11242_s1 + $0x176c] ss:$16 sps:$4 sm:$0xff]  }
 0x2b3   :  { %5647 = vmatpush1.bf16.msra.mxu0 %v8466_v50  ;;  %6431 = vmatpush1.bf16.msra.mxu1 %v8469_v52  ;;  %v8556_v50 = vld [vmem:[%s11242_s1 + $0x1760] ss:$16 sps:$4 sm:$0xff]   ;;  %v8559_v52 = vld [vmem:[%s11242_s1 + $0x1768] ss:$16 sps:$4 sm:$0xff]  }
 0x2b4   :  { %5649 = vmatprep.subr.bf16.mxu0 %v8470_v53  ;;  %6433 = vmatprep.subr.bf16.mxu1 %v8473_v54  ;;  %v8560_v53 = vld [vmem:[%s11242_s1 + $0x1784] ss:$16 sps:$4 sm:$0xff]   ;;  %v8563_v54 = vld [vmem:[%s11242_s1 + $0x178c] ss:$16 sps:$4 sm:$0xff]  }
 0x2b7   :  { %5651 = vmatpush1.bf16.msra.mxu0 %v8472_v40  ;;  %6435 = vmatpush1.bf16.msra.mxu1 %v8475_v55  ;;  %v8562_v40 = vld [vmem:[%s11242_s1 + $0x1780] ss:$16 sps:$4 sm:$0xff]   ;;  %v8565_v55 = vld [vmem:[%s11242_s1 + $0x1788] ss:$16 sps:$4 sm:$0xff]  }
 0x2b8   :  { %5653 = vmatprep.subr.bf16.mxu0 %v8476_v26  ;;  %6437 = vmatprep.subr.bf16.mxu1 %v8479_v58  ;;  %v8566_v26 = vld [vmem:[%s11242_s1 + $0x17a4] ss:$16 sps:$4 sm:$0xff]   ;;  %v8569_v58 = vld [vmem:[%s11242_s1 + $0x17ac] ss:$16 sps:$4 sm:$0xff]  }
 0x2bb   :  { %5655 = vmatpush1.bf16.msra.mxu0 %v8478_v46  ;;  %6439 = vmatpush1.bf16.msra.mxu1 %v8481_v59  ;;  %v8568_v46 = vld [vmem:[%s11242_s1 + $0x17a0] ss:$16 sps:$4 sm:$0xff]   ;;  %v8571_v59 = vld [vmem:[%s11242_s1 + $0x17a8] ss:$16 sps:$4 sm:$0xff]  }
 0x2bc   :  { %5657 = vmatprep.subr.bf16.mxu0 %v8482_v60  ;;  %6441 = vmatprep.subr.bf16.mxu1 %v8485_v62  ;;  %v8572_v60 = vld [vmem:[%s11242_s1 + $0x17c4] ss:$16 sps:$4 sm:$0xff]   ;;  %v8575_v62 = vld [vmem:[%s11242_s1 + $0x17cc] ss:$16 sps:$4 sm:$0xff]  }
 0x2bf   :  { %5659 = vmatpush1.bf16.msra.mxu0 %v8484_v51  ;;  %6443 = vmatpush1.bf16.msra.mxu1 %v8487_v0  ;;  %v8577_v51 = vld [vmem:[%s11242_s1 + $0x17c8] ss:$16 sps:$4 sm:$0xff]   ;;  %v8578_v0 = vld [vmem:[%s11242_s1 + $0x17e4] ss:$16 sps:$4 sm:$0xff]  }
 0x2c0   :  { %5661 = vmatprep.subr.bf16.mxu0 %v8488_v1  ;;  %6445 = vmatprep.subr.bf16.mxu1 %v8491_v57  ;;  %v8581_v1 = vld [vmem:[%s11242_s1 + $0x17ec] ss:$16 sps:$4 sm:$0xff]   ;;  %v8580_v57 = vld [vmem:[%s11242_s1 + $0x17e0] ss:$16 sps:$4 sm:$0xff]  }
 0x2c2   :  { %3319 = vmatmul.mubr.f32.vlgmr.msra.gmra.mrb[0].mxu0 %v10687_v61  ;;  %4242 = vmatmul.mubr.f32.vlgmr.msra.gmra.mrb[0].mxu1 %v10687_v61  ;;  %v8503_v61 = vld [vmem:[%s11242_s1 + $0x164c] ss:$16 sps:$4 sm:$0xff]  }
 0x2c3   :  { %5663 = vmatpush1.bf16.msra.mxu0 %v8490_v3  ;;  %6447 = vmatpush1.bf16.msra.mxu1 %v8493_v4  ;;  %v8583_v3 = vld [vmem:[%s11242_s1 + $0x17e8] ss:$16 sps:$4 sm:$0xff]   ;;  %v8585_v4 = vld [vmem:[%s11242_s1 + $0x1804] ss:$16 sps:$4 sm:$0xff]  }
 0x2c4   :  { %5665 = vmatprep.subr.bf16.mxu0 %v8494_v56  ;;  %6449 = vmatprep.subr.bf16.mxu1 %v8497_v49  ;;  %v8588_v56 = vld [vmem:[%s11242_s1 + $0x180c] ss:$16 sps:$4 sm:$0xff]   ;;  %v8587_v49 = vld [vmem:[%s11242_s1 + $0x1800] ss:$16 sps:$4 sm:$0xff]  }
 0x2c5   :  { %3389 = vmatprep.mubr.f32.mxu0 %v2509_v5  ;;  %4312 = vmatprep.mubr.f32.mxu1 %v2509_v5  ;;  %v8590_v5 = vld [vmem:[%s11242_s1 + $0x1808] ss:$16 sps:$4 sm:$0xff]  }
 0x2c7   :  { %5667 = vmatpush1.bf16.msra.mxu0 %v8496_v6  ;;  %6451 = vmatpush1.bf16.msra.mxu1 %v8499_v7  ;;  %v8591_v6 = vld [vmem:[%s11242_s1 + $0x1824] ss:$16 sps:$4 sm:$0xff]   ;;  %v8594_v7 = vld [vmem:[%s11242_s1 + $0x182c] ss:$16 sps:$4 sm:$0xff]  }
 0x2c8   :  { %5669 = vmatprep.subr.bf16.mxu0 %v8500_v8  ;;  %6453 = vmatprep.subr.bf16.mxu1 %v8503_v61  ;;  %v8593_v8 = vld [vmem:[%s11242_s1 + $0x1820] ss:$16 sps:$4 sm:$0xff]   ;;  %v8596_v61 = vld [vmem:[%s11242_s1 + $0x1828] ss:$16 sps:$4 sm:$0xff]  }
 0x2cb   :  { %5671 = vmatpush1.bf16.msra.mxu0 %v8502_v9  ;;  %6455 = vmatpush1.bf16.msra.mxu1 %v8505_v10  ;;  %v8597_v9 = vld [vmem:[%s11242_s1 + $0x1844] ss:$16 sps:$4 sm:$0xff]   ;;  %v8620_v10 = vmov 0.0  }
 0x2cc   :  { %5673 = vmatprep.subr.bf16.mxu0 %v8506_v11  ;;  %6457 = vmatprep.subr.bf16.mxu1 %v8509_v13  ;;  %v8599_v11 = vld [vmem:[%s11242_s1 + $0x1840] ss:$16 sps:$4 sm:$0xff]   ;;  %v8602_v13 = vld [vmem:[%s11242_s1 + $0x1848] ss:$16 sps:$4 sm:$0xff]  }
 0x2cf   :  { %5675 = vmatpush1.bf16.msra.mxu0 %v8508_v14  ;;  %6459 = vmatpush1.bf16.msra.mxu1 %v8511_v15  ;;  %v8603_v14 = vld [vmem:[%s11242_s1 + $0x1864] ss:$16 sps:$4 sm:$0xff]   ;;  %v8606_v15 = vld [vmem:[%s11242_s1 + $0x186c] ss:$16 sps:$4 sm:$0xff]  }
 0x2d0   :  { %5677 = vmatprep.subr.bf16.mxu0 %v8512_v16  ;;  %6461 = vmatprep.subr.bf16.mxu1 %v8515_v17  ;;  %v8605_v16 = vld [vmem:[%s11242_s1 + $0x1860] ss:$16 sps:$4 sm:$0xff]   ;;  %v8608_v17 = vld [vmem:[%s11242_s1 + $0x1868] ss:$16 sps:$4 sm:$0xff]  }
 0x2d3   :  { %5679 = vmatpush1.bf16.msra.mxu0 %v8514_v18  ;;  %6463 = vmatpush1.bf16.msra.mxu1 %v8517_v20  ;;  %v4862_v18 = vld [vmem:[%s11244_s3 + $0x40] sm:$0xff]  }
 0x2d4   :  { %5681 = vmatprep.subr.bf16.mxu0 %v8518_v21  ;;  %6465 = vmatprep.subr.bf16.mxu1 %v8521_v23  ;;  %v4878_v20 = vld [vmem:[%s11244_s3 + $0xc0] sm:$0xff]   ;;  %v4722_v21 = vld.sshfl [vmem:[%s11243_s0 + $0x30] sm:$0x3 pattern:$0x76325410] }
 0x2d5   :  { %v4728_v23 = vld [vmem:[%s11244_s3] sm:$0xff]  }
 0x2d7   :  { %5683 = vmatpush1.bf16.msra.mxu0 %v8520_v19  ;;  %6467 = vmatpush1.bf16.msra.mxu1 %v8523_v25  ;;  %v4870_v19 = vld [vmem:[%s11244_s3 + $0x80] sm:$0xff]   ;;  %v4863_v25 = vld [vmem:[%s11244_s3 + $0x48] sm:$0xff]  }
 0x2d8   :  { %5685 = vmatprep.subr.bf16.mxu0 %v8524_v12  ;;  %6469 = vmatprep.subr.bf16.mxu1 %v8527_v27  ;;  %v4879_v12 = vld [vmem:[%s11244_s3 + $0xc8] sm:$0xff]  }
 0x2d9   :  { %v4855_v27 = vld [vmem:[%s11244_s3 + $0x8] sm:$0xff]  }
 0x2db   :  { %5687 = vmatpush1.bf16.msra.mxu0 %v8526_v28  ;;  %6471 = vmatpush1.bf16.msra.mxu1 %v8529_v30  ;;  %v4871_v28 = vld [vmem:[%s11244_s3 + $0x88] sm:$0xff]   ;;  %v4864_v30 = vld [vmem:[%s11244_s3 + $0x50] sm:$0xff]  }
 0x2dc   :  { %5689 = vmatprep.subr.bf16.mxu0 %v8530_v31  ;;  %6473 = vmatprep.subr.bf16.mxu1 %v8533_v22  ;;  %v4880_v31 = vld [vmem:[%s11244_s3 + $0xd0] sm:$0xff]  }
 0x2dd   :  { %v4856_v22 = vld [vmem:[%s11244_s3 + $0x10] sm:$0xff]  }
 0x2df   :  { %5691 = vmatpush1.bf16.msra.mxu0 %v8532_v32  ;;  %6475 = vmatpush1.bf16.msra.mxu1 %v8535_v33  ;;  %v4872_v32 = vld [vmem:[%s11244_s3 + $0x90] sm:$0xff]   ;;  %v4865_v33 = vld [vmem:[%s11244_s3 + $0x58] sm:$0xff]  }
 0x2e0   :  { %5693 = vmatprep.subr.bf16.mxu0 %v8536_v34  ;;  %6477 = vmatprep.subr.bf16.mxu1 %v8539_v36  ;;  %v4881_v34 = vld [vmem:[%s11244_s3 + $0xd8] sm:$0xff]  }
 0x2e1   :  { %v4857_v36 = vld [vmem:[%s11244_s3 + $0x18] sm:$0xff]  }
 0x2e3   :  { %5695 = vmatpush1.bf16.msra.mxu0 %v8538_v24  ;;  %6479 = vmatpush1.bf16.msra.mxu1 %v8541_v37  ;;  %v4873_v24 = vld [vmem:[%s11244_s3 + $0x98] sm:$0xff]   ;;  %v4866_v37 = vld [vmem:[%s11244_s3 + $0x60] sm:$0xff]  }
 0x2e4   :  { %5697 = vmatprep.subr.bf16.mxu0 %v8542_v38  ;;  %6481 = vmatprep.subr.bf16.mxu1 %v8545_v39  ;;  %v4882_v38 = vld [vmem:[%s11244_s3 + $0xe0] sm:$0xff]  }
 0x2e5   :  { %v4858_v39 = vld [vmem:[%s11244_s3 + $0x20] sm:$0xff]  }
 0x2e7   :  { %5699 = vmatpush1.bf16.msra.mxu0 %v8544_v41  ;;  %6483 = vmatpush1.bf16.msra.mxu1 %v8547_v43  ;;  %v4874_v41 = vld [vmem:[%s11244_s3 + $0xa0] sm:$0xff]   ;;  %v4867_v43 = vld [vmem:[%s11244_s3 + $0x68] sm:$0xff]  }
 0x2e8   :  { %5701 = vmatprep.subr.bf16.mxu0 %v8548_v29  ;;  %6485 = vmatprep.subr.bf16.mxu1 %v8551_v44  ;;  %v4883_v29 = vld [vmem:[%s11244_s3 + $0xe8] sm:$0xff]  }
 0x2e9   :  { %v4859_v44 = vld [vmem:[%s11244_s3 + $0x28] sm:$0xff]  }
 0x2eb   :  { %5703 = vmatpush1.bf16.msra.mxu0 %v8550_v45  ;;  %6487 = vmatpush1.bf16.msra.mxu1 %v8553_v47  ;;  %v4875_v45 = vld [vmem:[%s11244_s3 + $0xa8] sm:$0xff]   ;;  %v4868_v47 = vld [vmem:[%s11244_s3 + $0x70] sm:$0xff]  }
 0x2ec   :  { %5705 = vmatprep.subr.bf16.mxu0 %v8554_v48  ;;  %6489 = vmatprep.subr.bf16.mxu1 %v8557_v35  ;;  %v4884_v48 = vld [vmem:[%s11244_s3 + $0xf0] sm:$0xff]  }
 0x2ed   :  { %v4860_v35 = vld [vmem:[%s11244_s3 + $0x30] sm:$0xff]  }
 0x2ef   :  { %5707 = vmatpush1.bf16.msra.mxu0 %v8556_v50  ;;  %6491 = vmatpush1.bf16.msra.mxu1 %v8559_v52  ;;  %v4876_v50 = vld [vmem:[%s11244_s3 + $0xb0] sm:$0xff]   ;;  %v4869_v52 = vld [vmem:[%s11244_s3 + $0x78] sm:$0xff]  }
 0x2f0   :  { %5709 = vmatprep.subr.bf16.mxu0 %v8560_v53  ;;  %6493 = vmatprep.subr.bf16.mxu1 %v8563_v54  ;;  %v4885_v53 = vld [vmem:[%s11244_s3 + $0xf8] sm:$0xff]  }
 0x2f1   :  { %v4861_v54 = vld [vmem:[%s11244_s3 + $0x38] sm:$0xff]  }
 0x2f3   :  { %5711 = vmatpush1.bf16.msra.mxu0 %v8562_v40  ;;  %6495 = vmatpush1.bf16.msra.mxu1 %v8565_v55  ;;  %v4877_v40 = vld [vmem:[%s11244_s3 + $0xb8] sm:$0xff]   ;;  %v2383_v55 = vsub.s32 0, %v8769_v42 }
 0x2f4   :  { %5713 = vmatprep.subr.bf16.mxu0 %v8566_v26  ;;  %6497 = vmatprep.subr.bf16.mxu1 %v8569_v58  ;;  %v2391_v26 = vsub.s32 2, %v8769_v42  ;;  %v2379_v58 = vld [vmem:[%s11245_s2] sm:$0xf] }
 0x2f7   :  { %5715 = vmatpush1.bf16.msra.mxu0 %v8568_v46  ;;  %6499 = vmatpush1.bf16.msra.mxu1 %v8571_v59  ;;  %v2387_v46 = vsub.s32 1, %v8769_v42  ;;  %v2395_v59 = vsub.s32 3, %v8769_v42 }
 0x2f8   :  { %5717 = vmatprep.subr.bf16.mxu0 %v8572_v60  ;;  %6501 = vmatprep.subr.bf16.mxu1 %v8575_v62  ;;  %v2384_v60 = vrot.slane %v2379_v58, %v2383_v55  ;;  %v2392_v62 = vrot.slane %v2379_v58, %v2391_v26 }
 0x2fb   :  { %5719 = vmatpush1.bf16.msra.mxu0 %v8574_v63  ;;  %6503 = vmatpush1.bf16.msra.mxu1 %v8577_v51  ;;  %v2388_v63 = vrot.slane %v2379_v58, %v2387_v46  ;;  %v2396_v51 = vrot.slane %v2379_v58, %v2395_v59 }
 0x2fc   :  { %5721 = vmatprep.subr.bf16.mxu0 %v8578_v0  ;;  %6505 = vmatprep.subr.bf16.mxu1 %v8581_v1 }
 0x2ff   :  { %5723 = vmatpush1.bf16.msra.mxu0 %v8580_v57  ;;  %6507 = vmatpush1.bf16.msra.mxu1 %v8583_v3 }
 0x300   :  { %5725 = vmatprep.subr.bf16.mxu0 %v8585_v4  ;;  %6509 = vmatprep.subr.bf16.mxu1 %v8588_v56 }
 0x302   :  { %3390 = vmatmul.mubr.f32.vlgmr.msra.gmra.mrb[0].mxu0 %v10888_v2  ;;  %4313 = vmatmul.mubr.f32.vlgmr.msra.gmra.mrb[0].mxu1 %v10888_v2  ;;  %v8600_v2 = vld [vmem:[%s11242_s1 + $0x184c] ss:$16 sps:$4 sm:$0xff]  }
 0x303   :  { %5727 = vmatpush1.bf16.msra.mxu0 %v8587_v49  ;;  %6511 = vmatpush1.bf16.msra.mxu1 %v8590_v5 }
 0x304   :  { %5729 = vmatprep.subr.bf16.mxu0 %v8591_v6  ;;  %6513 = vmatprep.subr.bf16.mxu1 %v8594_v7 }
 0x305   :  { %3460 = vmatprep.mubr.f32.mxu0 %v8620_v10  ;;  %4383 = vmatprep.mubr.f32.mxu1 %v8620_v10 }
 0x307   :  { %5731 = vmatpush1.bf16.msra.mxu0 %v8593_v8  ;;  %6515 = vmatpush1.bf16.msra.mxu1 %v8596_v61 }
 0x308   :  { %5733 = vmatprep.subr.bf16.mxu0 %v8597_v9  ;;  %6517 = vmatprep.subr.bf16.mxu1 %v8600_v2  ;;  %v4725_v2 = vld [vmem:[%s11246_s4] ss:$0 sm:$0xff]  ;;  %s8621_s4 = smov 6  }
 0x30b   :  { %5735 = vmatpush1.bf16.msra.mxu0 %v8599_v11  ;;  %6519 = vmatpush1.bf16.msra.mxu1 %v8602_v13 }
 0x30c   :  { %5737 = vmatprep.subr.bf16.mxu0 %v8603_v14  ;;  %6521 = vmatprep.subr.bf16.mxu1 %v8606_v15 }
 0x30f   :  { %5739 = vmatpush1.bf16.msra.mxu0 %v8605_v16  ;;  %6523 = vmatpush1.bf16.msra.mxu1 %v8608_v17 }
 0x310   :  { %6525 = vmatprep.subr.bf16.mxu0 %v4862_v18  ;;  %6557 = vmatprep.subr.bf16.mxu1 %v4878_v20 }
 0x312   :  { %4723 = vmatmul.mubr.msk.f32.vlgmr.msra.gmra.mrb[0].mxu0 %vm2541_vm0, %v4722_v21  ;;  %4724 = vmatmul.mubr.msk.f32.vlgmr.msra.gmra.mrb[0].mxu1 %vm2541_vm0, %v4722_v21 }
 0x313   :  { %6527 = vmatpush3.bf16.msra.mxu0 %v4728_v23  ;;  %6559 = vmatpush3.bf16.msra.mxu1 %v4870_v19 }
 0x314   :  { %6529 = vmatprep.subr.bf16.mxu0 %v4863_v25  ;;  %6561 = vmatprep.subr.bf16.mxu1 %v4879_v12 }
 0x317   :  { %6531 = vmatpush3.bf16.msra.mxu0 %v4855_v27  ;;  %6563 = vmatpush3.bf16.msra.mxu1 %v4871_v28 }
 0x318   :  { %6533 = vmatprep.subr.bf16.mxu0 %v4864_v30  ;;  %6565 = vmatprep.subr.bf16.mxu1 %v4880_v31 }
 0x31b   :  { %6535 = vmatpush3.bf16.msra.mxu0 %v4856_v22  ;;  %6567 = vmatpush3.bf16.msra.mxu1 %v4872_v32 }
 0x31c   :  { %6537 = vmatprep.subr.bf16.mxu0 %v4865_v33  ;;  %6569 = vmatprep.subr.bf16.mxu1 %v4881_v34 }
 0x31f   :  { %6539 = vmatpush3.bf16.msra.mxu0 %v4857_v36  ;;  %6571 = vmatpush3.bf16.msra.mxu1 %v4873_v24 }
 0x320   :  { %6541 = vmatprep.subr.bf16.mxu0 %v4866_v37  ;;  %6573 = vmatprep.subr.bf16.mxu1 %v4882_v38 }
 0x323   :  { %6543 = vmatpush3.bf16.msra.mxu0 %v4858_v39  ;;  %6575 = vmatpush3.bf16.msra.mxu1 %v4874_v41 }
 0x324   :  { %6545 = vmatprep.subr.bf16.mxu0 %v4867_v43  ;;  %6577 = vmatprep.subr.bf16.mxu1 %v4883_v29 }
 0x327   :  { %6547 = vmatpush3.bf16.msra.mxu0 %v4859_v44  ;;  %6579 = vmatpush3.bf16.msra.mxu1 %v4875_v45 }
 0x328   :  { %6549 = vmatprep.subr.bf16.mxu0 %v4868_v47  ;;  %6581 = vmatprep.subr.bf16.mxu1 %v4884_v48 }
 0x32b   :  { %6551 = vmatpush3.bf16.msra.mxu0 %v4860_v35  ;;  %6583 = vmatpush3.bf16.msra.mxu1 %v4876_v50 }
 0x32c   :  { %6553 = vmatprep.subr.bf16.mxu0 %v4869_v52  ;;  %6585 = vmatprep.subr.bf16.mxu1 %v4885_v53 }
 0x32f   :  { %6555 = vmatpush3.bf16.msra.mxu0 %v4861_v54  ;;  %6587 = vmatpush3.bf16.msra.mxu1 %v4877_v40 }
 0x3e5   :  { %v3462_v0 = vpop.f32.mrb[0].mxu0  ;;  %v4385_v1 = vpop.f32.mrb[0].mxu1 }
 0x3e6   :  { %v6588_v57 = vadd.f32 %v3462_v0, %v2384_v60  ;;  %v6590_v3 = vadd.f32 %v4385_v1, %v2392_v62  ;;  %v3464_v4 = vpop.f32.mrb[1].mxu0  ;;  %v4387_v56 = vpop.f32.mrb[1].mxu1 }
 0x3e7   :  { %v6589_v49 = vadd.f32 %v3464_v4, %v2388_v63  ;;  %v6591_v5 = vadd.f32 %v4387_v56, %v2396_v51 }
 0x3e8   :  { %v4390_v8 = vmax.f32 %v6588_v57, 0.0  ;;  %v4392_v61 = vmax.f32 %v6590_v3, 0.0 }
 0x3e9   :  { %v4391_v6 = vmax.f32 %v6589_v49, 0.0  ;;  %v4393_v7 = vmax.f32 %v6591_v5, 0.0 }
 0x3eb   :  { %4593 = vmatprep.mubr.f32.mxu0 %v4391_v6  ;;  %4663 = vmatprep.mubr.f32.mxu1 %v4393_v7 }
 0x3ec   :  { %4594 = vmatmul.mubr.f32.vlgmr.msra.gmra.mrb[2].mxu0 %v4390_v8  ;;  %4664 = vmatmul.mubr.f32.vlgmr.msra.gmra.mrb[2].mxu1 %v4392_v61 }
 0x4bf   :  { %v4918_v42 = vpop.f32.mrb[2].mxu0  ;;  %v4953_v9 = vpop.f32.mrb[2].mxu1 }
 0x4c0   :  { %v4919_v10 = vpop.f32.mrb[3].mxu0  ;;  %v4954_v11 = vpop.f32.mrb[3].mxu1 }
 0x4c1   :  { %v4920_v13 = vadd.f32 %v4919_v10, %v4918_v42  ;;  %v4955_v14 = vadd.f32 %v4954_v11, %v4953_v9 }
 0x4c3   :  { %v4596_v15 = vadd.f32 %v4920_v13, %v4725_v2 }
 0x4c5   :  { %v4666_v16 = vadd.f32 %v4955_v14, %v4596_v15 }
 0x4c7   :  { %v4670_v17 = vsel %vm4669_vm1, %v4666_v16, -inf  ;;  %v4683_v25 = vand.u32 2147483647, %v4666_v16  ;;  %vm4691_vm4 = vcmp.ge.f32.partialorder %v4666_v16, 0.0 }
 0x4c8   :  { %4671 = vmax.xlane.f32.xlu0 %v4670_v17 }
 0x4c9   :  { %vm4686_vm2 = vcmp.eq.f32.partialorder %v4683_v25, inf  ;;  %v4689_v30 = vand.u32 2147483648, %v4683_v25  ;;  %vm4688_vm3 = vcmp.eq.f32.partialorder %v4683_v25, 0.0 }
 0x555   :  { %v4672_v18 = vpop.xlane.xlu0 %4671 }
 0x556   :  { %v4673_v20 = vsub.f32 %v4666_v16, %v4672_v18 }
 0x558   :  { %v4674_v21 = vmul.f32 1.442695, %v4673_v20 }
 0x55a   :  { %8609 = vpow2.f32 %v4674_v21 }
 0x55b   :  { %8611 = vrsqrt.f32 %v4683_v25 }
 0x564   :  { %v8610_v23 = vpop.eup %8609 }
 0x565   :  { %v4676_v19 = vsel %vm4669_vm1, %v8610_v23, 0.0  ;;  %v8612_v12 = vpop.eup %8611 }
 0x566   :  { %4677 = vadd.xlane.f32.xlu0 %v4676_v19  ;;  %v4685_v27 = vmul.f32 %v8612_v12, %v4683_v25 }
 0x568   :  { %v4687_v28 = vsel %vm4686_vm2, %v4683_v25, %v4685_v27 }
 0x569   :  { %v4690_v31 = vsel %vm4688_vm3, %v4689_v30, %v4687_v28 }
 0x56a   :  { %v4692_v22 = vsub.f32 0.0, %v4690_v31 }
 0x56c   :  { %v4693_v32 = vsel %vm4691_vm4, %v4690_v31, %v4692_v22 }
 0x56d   :  { %v4694_v33 = vsub.f32 0.0, %v4693_v32 }
 0x56f   :  { %v4696_v34 = vmul.f32 0.11111111, %v4694_v33 }
 0x571   :  { %v4697_v36 = vmul.f32 1.442695, %v4696_v34 }
 0x573   :  { %8613 = vpow2.f32 %v4697_v36 }
 0x57d   :  { %v8614_v24 = vpop.eup %8613 }
 0x57e   :  { %v4699_v37 = vadd.f32 1.0, %v8614_v24 }
 0x580   :  { %8615 = vrcp.f32 %v4699_v37 }
 0x58a   :  { %v8616_v39 = vpop.eup %8615 }
 0x58b   :  { %v4701_v29 = vmul.f32 2.0, %v8616_v39 }
 0x58d   :  { %v4726_v47 = vadd.f32 -1.0, %v4701_v29 }
 0x58f   :  { %v4703_v48 = vmul.f32 20.0, %v4726_v47 }
 0x5f3   :  { %v4678_v38 = vpop.xlane.xlu0 %4677 }
 0x5f4   :  { %8617 = vlog2.f32 %v4678_v38 }
 0x5fe   :  { %v8618_v41 = vpop.eup %8617 }
 0x5ff   :  { %v4680_v43 = vmul.f32 0.6931472, %v8618_v41 }
 0x601   :  { %v4681_v44 = vadd.f32 %v4680_v43, %v4672_v18 }
 0x603   :  { %v4682_v45 = vsub.f32 %v4666_v16, %v4681_v44 }
 0x605   :  { %4705 = vrot.lane.b32.xlu1 %v4682_v45, %s8621_s4 }
 0x609   :  { %4709 = vrot.lane.b32.xlu1 %v4703_v48, %s8621_s4 }
 0x677   :  { %v4706_v35 = vpop.permute.xlu1 %4705 }
 0x678   :  { %v4713_v50 = vsel %vm4712_vm5, %v4666_v16, %v4706_v35 }
 0x67b   :  { %v4710_v52 = vpop.permute.xlu1 %4709 }
 0x67c   :  { %v4715_v53 = vsel %vm4714_vm6, %v4713_v50, %v4710_v52 }
 0x67d   :  { %4717 = vst.msk [vmem:[%s11247_s5] sm:$0x3] %vm4716_vm7, %v4715_v53 }

</bundles_post_ra>
